<compile_context>
chip_gen: v6e
topology: v6e:2x2x1
jax: 0.10.0
libtpu: 0.0.40
codegen_flags: <defaults>
</compile_context>

<pallas_src>
import jax
import jax.numpy as jnp
from jax.experimental import pallas as pl
from jax.experimental.pallas import tpu as pltpu

EPS = 1e-6


def ln_linear_kernel(x_ref, w_ref, bias_ref, o_ref):
    # x_ref:    (TM, K)  input tokens (f32)
    # w_ref:    (K, TN)  gamma-folded weight tile (bf16, already K x N layout)
    # bias_ref: (1, TN)  beta-folded bias tile (f32)
    # o_ref:    (TM, TN) output tile (f32)
    x = x_ref[...].astype(jnp.float32)

    # LayerNorm statistics over the feature dim (affine folded into w/bias).
    mean = jnp.mean(x, axis=-1, keepdims=True)
    xc = x - mean
    var = jnp.mean(xc * xc, axis=-1, keepdims=True)
    inv = jax.lax.rsqrt(var + EPS)
    normed = (xc * inv).astype(jnp.bfloat16)

    # Linear on the MXU: bf16 x bf16 -> f32 accumulate.
    acc = jnp.dot(normed, w_ref[...], preferred_element_type=jnp.float32)
    o_ref[...] = (acc + bias_ref[...]).astype(o_ref.dtype)


def layernorm_linear(x_tokens, w_folded_bf16, bias_folded, *, tm=256, tn=None):
    """x_tokens: (M, K) f32; w_folded_bf16: (K, N) bf16; bias_folded: (N,) f32.

    Returns (M, N) f32.
    """
    M, K = x_tokens.shape
    K2, N = w_folded_bf16.shape
    assert K == K2
    if tn is None:
        tn = N                      # one lane-dense N tile (2 MiB bf16 weight fits VMEM)
    assert N % tn == 0

    # M tiling:
    #  - Small M: single full block, padded up to a multiple of 8 so sublanes are
    #    dense (no masked partial stores).
    #  - Large M: pad to a multiple of TM and tile so the input/output streams
    #    pipeline and both TensorCores (v7x) get work.
    if M <= max(tm, 512):
        tm_eff = ((M + 7) // 8) * 8
        m_pad = tm_eff
    else:
        tm_eff = tm
        m_pad = pl.cdiv(M, tm_eff) * tm_eff

    if m_pad != M:
        x_in = jnp.pad(x_tokens, ((0, m_pad - M), (0, 0)))
        # padded rows: x == 0 -> xc == 0 -> normed == 0 -> output rows are just the
        # folded bias; they are sliced off below, no NaNs possible.
    else:
        x_in = x_tokens

    bias2 = bias_folded.reshape(1, N).astype(jnp.float32)

    grid = (m_pad // tm_eff, N // tn)

    cost = pl.CostEstimate(
        flops=2 * m_pad * K * N,
        transcendentals=m_pad,  # one rsqrt per token row
        bytes_accessed=m_pad * K * 4 + K * N * 2 + N * 4 + m_pad * N * 4,
    )

    out = pl.pallas_call(
        ln_linear_kernel,
        out_shape=jax.ShapeDtypeStruct((m_pad, N), x_tokens.dtype),
        grid_spec=pltpu.PrefetchScalarGridSpec(
            num_scalar_prefetch=0,
            grid=grid,
            in_specs=[
                pl.BlockSpec((tm_eff, K), lambda i, j: (i, 0)),
                pl.BlockSpec((K, tn), lambda i, j: (0, j)),
                pl.BlockSpec((1, tn), lambda i, j: (0, j)),
            ],
            out_specs=pl.BlockSpec((tm_eff, tn), lambda i, j: (i, j)),
        ),
        compiler_params=pltpu.CompilerParams(
            dimension_semantics=("parallel", "parallel"),
            vmem_limit_bytes=32 * 1024 * 1024,
        ),
        cost_estimate=cost,
    )(x_in, w_folded_bf16, bias2)

    if m_pad != M:
        out = out[:M]
    return out


def fold_params(params):
    """Fold the LayerNorm affine into the linear weight/bias (done once, outside the kernel)."""
    gamma = params["ln_gamma"].astype(jnp.float32)
    beta = params["ln_beta"].astype(jnp.float32)
    w_t = params["w_t"].astype(jnp.float32)        # (K, N)
    bias = params["bias"].astype(jnp.float32)      # (N,)
    w_folded = (gamma[:, None] * w_t).astype(jnp.bfloat16)
    bias_folded = beta @ w_t + bias
    return w_folded, bias_folded


def model_forward(x_nhwc, params):
    """x_nhwc: (N, H, W, 512) -> (N, H, W, 2048)"""
    N, H, W, C = x_nhwc.shape
    w_folded, bias_folded = fold_params(params)
    x_tok = x_nhwc.reshape(N * H * W, C)
    out = layernorm_linear(x_tok, w_folded, bias_folded)
    return out.reshape(N, H, W, out.shape[-1])


def init_params(key, in_features=512, out_features=2048):
    k_w, k_b = jax.random.split(key)
    # PyTorch Linear stores weight as (out, in); we pre-transpose to (in, out).
    bound = 1.0 / (in_features ** 0.5)
    w = jax.random.uniform(k_w, (out_features, in_features),
                           minval=-bound, maxval=bound, dtype=jnp.float32)
    b = jax.random.uniform(k_b, (out_features,),
                           minval=-bound, maxval=bound, dtype=jnp.float32)
    return {
        "ln_gamma": jnp.ones((in_features,), jnp.float32),   # elementwise_affine default init
        "ln_beta": jnp.zeros((in_features,), jnp.float32),
        "w_t": w.T,                                          # (512, 2048)
        "bias": b,                                           # (2048,)
    }


def reference_forward(x_nhwc, params):
    x = x_nhwc.astype(jnp.float32)
    mean = jnp.mean(x, axis=-1, keepdims=True)
    var = jnp.mean((x - mean) ** 2, axis=-1, keepdims=True)
    normed = (x - mean) * jax.lax.rsqrt(var + EPS) * params["ln_gamma"] + params["ln_beta"]
    return jnp.einsum("nhwc,cd->nhwd", normed, params["w_t"]) + params["bias"]


if __name__ == "__main__":
    key = jax.random.PRNGKey(0)
    k_x, k_p = jax.random.split(key)

    # Same shape as the module's example input: (1, 14, 14, 512)
    x = jax.random.normal(k_x, (1, 14, 14, 512), dtype=jnp.float32)
    params = init_params(k_p)

    out = model_forward(x, params)
    out = jax.block_until_ready(out)

    ref = reference_forward(x, params)
    assert out.shape == (1, 14, 14, 2048), out.shape
    # bf16 matmul operands (f32 accumulate) -> slightly looser tolerance than pure f32.
    max_err = float(jnp.max(jnp.abs(out - ref)))
    assert jnp.allclose(out, ref, atol=3e-2, rtol=3e-2), max_err

    print("KERNEL_OK")
</pallas_src>

<mosaic_0001>
module attributes {stable_mosaic.version = 11 : i64} {
  func.func @ln_linear_kernel(%arg0: i32, %arg1: i32, %arg2: memref<200x512xf32, #tpu.memory_space<vmem>>, %arg3: memref<512x2048xbf16, #tpu.memory_space<vmem>>, %arg4: memref<1x2048xf32, #tpu.memory_space<vmem>>, %arg5: memref<200x2048xf32, #tpu.memory_space<vmem>>) attributes {dimension_semantics = [#tpu.dimension_semantics<parallel>, #tpu.dimension_semantics<parallel>], iteration_bounds = array<i64: 1, 1>, scalar_prefetch = 0 : i64, scratch_operands = 0 : i64, tpu.core_type = #tpu.core_type<tc>, window_params = [{transform_indices = @transform_0, window_bounds = array<i64: 200, 512>}, {transform_indices = @transform_1, window_bounds = array<i64: 512, 2048>}, {transform_indices = @transform_2, window_bounds = array<i64: 1, 2048>}, {transform_indices = @transform_3, window_bounds = array<i64: 200, 2048>}]} {
    %c0 = arith.constant 0 : index
    %c0_0 = arith.constant 0 : index
    %0 = vector.load %arg2[%c0, %c0_0] : memref<200x512xf32, #tpu.memory_space<vmem>>, vector<200x512xf32>
    %cst = arith.constant dense<0.000000e+00> : vector<200xf32>
    %1 = vector.multi_reduction <add>, %0, %cst [1] : vector<200x512xf32> to vector<200xf32>
    %2 = vector.shape_cast %1 : vector<200xf32> to vector<200x1xf32>
    %cst_1 = arith.constant 5.120000e+02 : f32
    %3 = vector.broadcast %cst_1 : f32 to vector<200x1xf32>
    %4 = arith.divf %2, %3 : vector<200x1xf32>
    %5 = vector.broadcast %4 : vector<200x1xf32> to vector<200x512xf32>
    %6 = arith.subf %0, %5 : vector<200x512xf32>
    %7 = arith.mulf %6, %6 : vector<200x512xf32>
    %cst_2 = arith.constant dense<0.000000e+00> : vector<200xf32>
    %8 = vector.multi_reduction <add>, %7, %cst_2 [1] : vector<200x512xf32> to vector<200xf32>
    %9 = vector.shape_cast %8 : vector<200xf32> to vector<200x1xf32>
    %cst_3 = arith.constant 5.120000e+02 : f32
    %10 = vector.broadcast %cst_3 : f32 to vector<200x1xf32>
    %11 = arith.divf %9, %10 : vector<200x1xf32>
    %cst_4 = arith.constant 9.99999997E-7 : f32
    %12 = vector.broadcast %cst_4 : f32 to vector<200x1xf32>
    %13 = arith.addf %11, %12 : vector<200x1xf32>
    %14 = math.rsqrt %13 : vector<200x1xf32>
    %15 = vector.broadcast %14 : vector<200x1xf32> to vector<200x512xf32>
    %16 = arith.mulf %6, %15 : vector<200x512xf32>
    %17 = arith.truncf %16 : vector<200x512xf32> to vector<200x512xbf16>
    %c0_5 = arith.constant 0 : index
    %c0_6 = arith.constant 0 : index
    %18 = vector.load %arg3[%c0_5, %c0_6] : memref<512x2048xbf16, #tpu.memory_space<vmem>>, vector<512x2048xbf16>
    %cst_7 = arith.constant dense<0.000000e+00> : vector<200x2048xf32>
    %19 = tpu.matmul %17, %18, %cst_7 {dimension_numbers = #tpu.dot_dimension_numbers<[1], [0], [0], [1], [0, 0, 1, 1], [], []>} : vector<200x512xbf16>, vector<512x2048xbf16>, vector<200x2048xf32> -> vector<200x2048xf32>
    %c0_8 = arith.constant 0 : index
    %c0_9 = arith.constant 0 : index
    %20 = vector.load %arg4[%c0_8, %c0_9] : memref<1x2048xf32, #tpu.memory_space<vmem>>, vector<1x2048xf32>
    %21 = vector.broadcast %20 : vector<1x2048xf32> to vector<200x2048xf32>
    %22 = arith.addf %19, %21 : vector<200x2048xf32>
    %c0_10 = arith.constant 0 : index
    %c0_11 = arith.constant 0 : index
    %23 = vector.load %arg5[%c0_10, %c0_11] : memref<200x2048xf32, #tpu.memory_space<vmem>>, vector<200x2048xf32>
    tpu.vector_store %arg5[%c0_10, %c0_11], %22 {strides = array<i32>} : memref<200x2048xf32, #tpu.memory_space<vmem>>, vector<200x2048xf32>,
    return
  }
  func.func @transform_0(%arg0: i32, %arg1: i32) -> (i32, i32) {
    %c0_i32 = arith.constant 0 : i32
    %c0_i32_0 = arith.constant 0 : i32
    return %arg0, %c0_i32 : i32, i32
  }
  func.func @transform_1(%arg0: i32, %arg1: i32) -> (i32, i32) {
    %c0_i32 = arith.constant 0 : i32
    %c0_i32_0 = arith.constant 0 : i32
    return %c0_i32, %arg1 : i32, i32
  }
  func.func @transform_2(%arg0: i32, %arg1: i32) -> (i32, i32) {
    %c0_i32 = arith.constant 0 : i32
    %c0_i32_0 = arith.constant 0 : i32
    return %c0_i32, %arg1 : i32, i32
  }
  func.func @transform_3(%arg0: i32, %arg1: i32) -> (i32, i32) {
    %c0_i32 = arith.constant 0 : i32
    return %arg0, %arg1 : i32, i32
  }
}

</mosaic_0001>

<bundles_post_ra>
// kernel: tpu_custom_call.1
= control target key start
LH: loop header
LB: loop body
LE: loop exit
PB: predicated region body
PF: predicated region fallthrough
CT: control target
= control target key end

     0   :  { %8 = vsyncpa [#allocation3], 0  ;;  %s10150_s0 = inlined_call_operand.hbm [shape: f32[200,512], index: 0, kind: input, shape index: {}]   ;;  %s10151_s1 = inlined_call_operand.hbm [shape: bf16[512,2048], index: 1, kind: input, shape index: {}]   ;;  %s10152_s2 = inlined_call_operand.hbm [shape: f32[1,2048], index: 2, kind: input, shape index: {}]   ;;  %s10153_s3 = inlined_call_operand.hbm [shape: f32[200,2048], index: 3, kind: output, shape index: {}]  }
   0x1   :  { %9 = vsyncpa [#allocation6], 0 }
   0x2   :  { %10 = vsyncpa [#allocation4], 0  ;;  %s7668_s12 = smov [#allocation5]  }
   0x3   :  { %s28_s13 = sshll.u32 %s7668_s12, 4  ;;  %s29_s13 = int_to_ptr.vmem [resolvable:$true] %s28_s13 }
   0x4   :  { %s7590_s14 = scalar_lea.vmem %s29_s13, 65536  ;;  %p7595_p1 = scmp.lt.s32.totalorder %s29_s13, %s29_s13 }
   0x5   :  { %p7591_p0 = scmp.ne.s32.totalorder %s29_s13, %s7590_s14  ;;  %p7596_p2 = scmp.lt.s32.totalorder %s7590_s14, %s7590_s14 }
   0x7   :  { %p7597_p3 = por %p7596_p2, %p7595_p1 }
   0x9   :  { %p7598_p4 = pnand %p7597_p3, %p7591_p0 }
   0xb   :  { %7601 = shalt.err (!%p7598_p4)
}
   0xc   :  { %s7669_s15 = smov 1024   ;;  %s7670_s16 = smov 64  }
   0xd   :  { %34 = dma.hbm_to_vmem [thread:$0]  %s10151_s1, 65536, %s29_s13, [#allocation6], %s7669_s15, %s7669_s15, %s7670_s16  }
   0xe   :  { %s7671_s19 = smov [#allocation2]  }
   0xf   :  { %s16_s20 = sshll.u32 %s7671_s19, 4  ;;  %s17_s20 = int_to_ptr.vmem [resolvable:$true] %s16_s20 }
  0x10   :  { %s7610_s21 = scalar_lea.vmem %s17_s20, 12800  ;;  %p7615_p6 = scmp.lt.s32.totalorder %s17_s20, %s17_s20 }
  0x11   :  { %p7611_p5 = scmp.ne.s32.totalorder %s17_s20, %s7610_s21  ;;  %p7616_p7 = scmp.lt.s32.totalorder %s7610_s21, %s7610_s21 }
  0x13   :  { %p7617_p8 = por %p7616_p7, %p7615_p6 }
  0x15   :  { %p7618_p9 = pnand %p7617_p8, %p7611_p5 }
  0x17   :  { %7621 = shalt.err (!%p7618_p9)
}
  0x18   :  { %s7672_s22 = smov 512   ;;  %s7673_s23 = smov 32  }
  0x19   :  { %22 = dma.hbm_to_vmem [thread:$0]  %s10150_s0, 12800, %s17_s20, [#allocation3], %s7672_s22, %s7672_s22, %s7673_s23  }
  0x1a   :  { %s7674_s26 = smov [#allocation7]  }
  0x1b   :  { %s41_s27 = sshll.u32 %s7674_s26, 4  ;;  %s42_s27 = int_to_ptr.vmem [resolvable:$true] %s41_s27 }
  0x1c   :  { %s7630_s1 = scalar_lea.vmem %s42_s27, 256  ;;  %p7635_p11 = scmp.lt.s32.totalorder %s42_s27, %s42_s27 }
  0x1d   :  { %p7631_p10 = scmp.ne.s32.totalorder %s42_s27, %s7630_s1  ;;  %p7636_p12 = scmp.lt.s32.totalorder %s7630_s1, %s7630_s1 }
  0x1f   :  { %p7637_p13 = por %p7636_p12, %p7635_p11 }
  0x21   :  { %p7638_p0 = pnand %p7637_p13, %p7631_p10 }
  0x23   :  { %7641 = shalt.err (!%p7638_p0)
}
  0x24   :  { %44 = dma.hbm_to_vmem [thread:$0]  %s10152_s2, 256, %s42_s27, [#allocation6]  }
  0x25   :  { %7662 = dma.done.wait [#allocation3], 12800  }
  0x26   :  { %7663 = vsyncadd [#allocation3], 4294954496 }
  0x27   :  { %7664 = dma.done.wait [#allocation6], 65792  }
  0x28   :  { %7665 = vsyncadd [#allocation6], 4294901504  ;;  %v7707_v0 = vld [vmem:[#allocation2] sm:$0xff]  ;;  %v7709_v1 = vld [vmem:[#allocation2 + $0x8] sm:$0xff]  ;;  %s7675_s0 = smov [#allocation8]  }
  0x29   :  { %v7711_v2 = vld [vmem:[#allocation2 + $0x10] sm:$0xff]  ;;  %v154_v3 = vadd.f32 %v7709_v1, %v7707_v0  ;;  %v7715_v4 = vld [vmem:[#allocation2 + $0x20] sm:$0xff]  ;;  %v7717_v5 = vld [vmem:[#allocation2 + $0x28] sm:$0xff]  ;;  %s6994_s2 = sshll.u32 %s7675_s0, 4  ;;  %s6995_s2 = int_to_ptr.vmem [resolvable:$true] %s6994_s2 }
  0x2a   :  { %v7719_v6 = vld [vmem:[#allocation2 + $0x18] sm:$0xff]  ;;  %v7721_v7 = vld [vmem:[#allocation2 + $0x30] sm:$0xff]  ;;  %v159_v8 = vadd.f32 %v7717_v5, %v7715_v4  ;;  %v7725_v9 = vld [vmem:[#allocation2 + $0x40] sm:$0xff]  ;;  %s7642_s30 = scalar_lea.vmem %s6995_s2, 51200  ;;  %p7647_p2 = scmp.lt.s32.totalorder %s6995_s2, %s6995_s2 }
  0x2b   :  { %v155_v10 = vadd.f32 %v154_v3, %v7711_v2  ;;  %v7728_v11 = vld [vmem:[#allocation2 + $0x38] sm:$0xff]  ;;  %v7730_v12 = vld [vmem:[#allocation2 + $0x48] sm:$0xff]  ;;  %v7732_v13 = vld [vmem:[#allocation2 + $0x50] sm:$0xff]  ;;  %p7643_p1 = scmp.ne.s32.totalorder %s6995_s2, %s7642_s30  ;;  %p7648_p3 = scmp.lt.s32.totalorder %s7642_s30, %s7642_s30 }
  0x2c   :  { %v160_v14 = vadd.f32 %v159_v8, %v7721_v7  ;;  %v164_v15 = vadd.f32 %v7730_v12, %v7725_v9  ;;  %v7737_v16 = vld [vmem:[#allocation2 + $0x60] sm:$0xff]  ;;  %v7739_v17 = vld [vmem:[#allocation2 + $0x68] sm:$0xff]  ;;  %v7741_v18 = vld [vmem:[#allocation2 + $0x70] sm:$0xff] }
  0x2d   :  { %v156_v19 = vadd.f32 %v155_v10, %v7719_v6  ;;  %v7744_v20 = vld [vmem:[#allocation2 + $0x58] sm:$0xff]  ;;  %v169_v21 = vadd.f32 %v7739_v17, %v7737_v16  ;;  %v7748_v22 = vld [vmem:[#allocation2 + $0xa0] sm:$0xff]  ;;  %v7750_v23 = vld [vmem:[#allocation2 + $0xa8] sm:$0xff]  ;;  %p7649_p4 = por %p7648_p3, %p7647_p2 }
  0x2e   :  { %v165_v24 = vadd.f32 %v164_v15, %v7732_v13  ;;  %v7753_v25 = vld [vmem:[#allocation2 + $0xb0] sm:$0xff]  ;;  %v179_v26 = vadd.f32 %v7750_v23, %v7748_v22  ;;  %v7757_v27 = vld [vmem:[#allocation2 + $0x80] sm:$0xff]  ;;  %v161_v28 = vadd.f32 %v160_v14, %v7728_v11  ;;  %v7760_v29 = vld [vmem:[#allocation2 + $0x78] sm:$0xff] }
  0x2f   :  { %157 = vadd.xlane.f32.xlu0 %v156_v19  ;;  %v170_v30 = vadd.f32 %v169_v21, %v7741_v18  ;;  %v7763_v31 = vld [vmem:[#allocation2 + $0x88] sm:$0xff]  ;;  %v7765_v32 = vld [vmem:[#allocation2 + $0x90] sm:$0xff]  ;;  %v7770_v35 = vld [vmem:[#allocation2 + $0xe0] sm:$0xff]  ;;  %p7650_p5 = pnand %p7649_p4, %p7643_p1 }
  0x30   :  { %v166_v33 = vadd.f32 %v165_v24, %v7744_v20  ;;  %v174_v34 = vadd.f32 %v7763_v31, %v7757_v27  ;;  %v7772_v36 = vld [vmem:[#allocation2 + $0xe8] sm:$0xff]  ;;  %v180_v37 = vadd.f32 %v179_v26, %v7753_v25  ;;  %v7775_v38 = vld [vmem:[#allocation2 + $0x98] sm:$0xff]  ;;  %v7777_v39 = vld [vmem:[#allocation2 + $0xc0] sm:$0xff] }
  0x31   :  { %v7779_v40 = vld [vmem:[#allocation2 + $0xc8] sm:$0xff]  ;;  %v171_v41 = vadd.f32 %v170_v30, %v7760_v29  ;;  %v7782_v42 = vld [vmem:[#allocation2 + $0xb8] sm:$0xff]  ;;  %v7785_v44 = vld [vmem:[#allocation2 + $0xf0] sm:$0xff]  ;;  %v189_v45 = vadd.f32 %v7772_v36, %v7770_v35 }
  0x32   :  { %167 = vadd.xlane.f32.xlu1 %v166_v33  ;;  %v175_v43 = vadd.f32 %v174_v34, %v7765_v32  ;;  %v7789_v46 = vld [vmem:[#allocation2 + $0xd0] sm:$0xff]  ;;  %v184_v47 = vadd.f32 %v7779_v40, %v7777_v39  ;;  %v7793_v48 = vld [vmem:[#allocation2 + $0xd8] sm:$0xff]  ;;  %v7795_v49 = vld [vmem:[#allocation2 + $0x120] sm:$0xff]  ;;  %v181_v57 = vadd.f32 %v180_v37, %v7782_v42 }
  0x33   :  { %10339 = vst [vmem:[#allocation12_spill] sm:$0xff] %v7789_v46  ;;  %162 = vadd.xlane.f32.xlu0 %v161_v28  ;;  %10340 = vst [vmem:[#allocation13_spill] sm:$0xff] %v7793_v48  ;;  %v7797_v50 = vld [vmem:[#allocation2 + $0x128] sm:$0xff]  ;;  %v7801_v53 = vld [vmem:[#allocation2 + $0x100] sm:$0xff]  ;;  %v190_v59 = vadd.f32 %v189_v45, %v7785_v44 }
  0x34   :  { %v176_v51 = vadd.f32 %v175_v43, %v7775_v38  ;;  %v185_v52 = vadd.f32 %v184_v47, %v7789_v46  ;;  %v7803_v54 = vld [vmem:[#allocation2 + $0x108] sm:$0xff]  ;;  %v7805_v55 = vld [vmem:[#allocation2 + $0x110] sm:$0xff]  ;;  %v7810_v58 = vld [vmem:[#allocation2 + $0xf8] sm:$0xff]  ;;  %v199_v61 = vadd.f32 %v7797_v50, %v7795_v49 }
  0x35   :  { %10341 = vst [vmem:[#allocation14_spill] sm:$0xff] %v7805_v55  ;;  %v194_v56 = vadd.f32 %v7803_v54, %v7801_v53  ;;  %v7813_v60 = vld [vmem:[#allocation2 + $0x130] sm:$0xff]  ;;  %v7817_v62 = vld [vmem:[#allocation2 + $0x140] sm:$0xff]  ;;  %v7823_v10 = vld [vmem:[#allocation2 + $0x168] sm:$0xff]  ;;  %v191_v28 = vadd.f32 %v190_v59, %v7810_v58 }
  0x36   :  { %172 = vadd.xlane.f32.xlu1 %v171_v41  ;;  %10342 = vst [vmem:[#allocation15_spill] sm:$0xff] %v7813_v60  ;;  %v186_v63 = vadd.f32 %v185_v52, %v7793_v48  ;;  %v7821_v8 = vld [vmem:[#allocation2 + $0x160] sm:$0xff]  ;;  %v7825_v14 = vld [vmem:[#allocation2 + $0x148] sm:$0xff]  ;;  %v7827_v15 = vld [vmem:[#allocation2 + $0x118] sm:$0xff]  ;;  %v200_v33 = vadd.f32 %v199_v61, %v7813_v60 }
  0x37   :  { %177 = vadd.xlane.f32.xlu0 %v176_v51  ;;  %v195_v3 = vadd.f32 %v194_v56, %v7805_v55  ;;  %10343 = vst [vmem:[#allocation16_spill] sm:$0xff] %v7827_v15  ;;  %v7829_v19 = vld [vmem:[#allocation2 + $0x150] sm:$0xff]  ;;  %v204_v21 = vadd.f32 %v7825_v14, %v7817_v62  ;;  %v7833_v24 = vld [vmem:[#allocation2 + $0x180] sm:$0xff]  ;;  %v7835_v26 = vld [vmem:[#allocation2 + $0x188] sm:$0xff]  ;;  %v209_v37 = vadd.f32 %v7823_v10, %v7821_v8 }
  0x38   :  { %10344 = vst [vmem:[#allocation17_spill] sm:$0xff] %v7829_v19  ;;  %v7838_v30 = vld [vmem:[#allocation2 + $0x138] sm:$0xff]  ;;  %v7841_v34 = vld [vmem:[#allocation2 + $0x170] sm:$0xff]  ;;  %v7849_v47 = vld [vmem:[#allocation2 + $0x1a0] sm:$0xff]  ;;  %v214_v52 = vadd.f32 %v7835_v26, %v7833_v24 }
  0x39   :  { %10345 = vst [vmem:[#allocation18_spill] sm:$0xff] %v7838_v30  ;;  %10346 = vst [vmem:[#allocation19_spill] sm:$0xff] %v7841_v34  ;;  %v196_v41 = vadd.f32 %v195_v3, %v7827_v15  ;;  %v7846_v43 = vld [vmem:[#allocation2 + $0x158] sm:$0xff]  ;;  %v205_v45 = vadd.f32 %v204_v21, %v7829_v19  ;;  %v7851_v51 = vld [vmem:[#allocation2 + $0x1a8] sm:$0xff]  ;;  %v201_v61 = vadd.f32 %v200_v33, %v7838_v30 }
  0x3a   :  { %182 = vadd.xlane.f32.xlu1 %v181_v57  ;;  %10347 = vst [vmem:[#allocation20_spill] sm:$0xff] %v7846_v43  ;;  %10348 = vst [vmem:[#allocation21_spill] sm:$0xff] %v7849_v47  ;;  %v7855_v56 = vld [vmem:[#allocation2 + $0x190] sm:$0xff]  ;;  %v7857_v57 = vld [vmem:[#allocation2 + $0x1c0] sm:$0xff]  ;;  %v210_v3 = vadd.f32 %v209_v37, %v7841_v34  ;;  %v219_v19 = vadd.f32 %v7851_v51, %v7849_v47 }
  0x3b   :  { %187 = vadd.xlane.f32.xlu0 %v186_v63  ;;  %10349 = vst [vmem:[#allocation22_spill] sm:$0xff] %v7851_v51  ;;  %10350 = vst [vmem:[#allocation23_spill] sm:$0xff] %v7855_v56  ;;  %v7859_v59 = vld [vmem:[#allocation2 + $0x1c8] sm:$0xff]  ;;  %v7862_v63 = vld [vmem:[#allocation2 + $0x178] sm:$0xff]  ;;  %v206_v15 = vadd.f32 %v205_v45, %v7846_v43  ;;  %v215_v60 = vadd.f32 %v214_v52, %v7855_v56 }
  0x3c   :  { %10351 = vst [vmem:[#allocation24_spill] sm:$0xff] %v7857_v57  ;;  %10352 = vst [vmem:[#allocation25_spill] sm:$0xff] %v7859_v59  ;;  %v7865_v21 = vld [vmem:[#allocation2 + $0x1b0] sm:$0xff]  ;;  %v7870_v55 = vld [vmem:[#allocation2 + $0x198] sm:$0xff]  ;;  %v224_v33 = vadd.f32 %v7859_v59, %v7857_v57 }
  0x3d   :  { %10353 = vst [vmem:[#allocation26_spill] sm:$0xff] %v7862_v63  ;;  %10354 = vst [vmem:[#allocation27_spill] sm:$0xff] %v7865_v21  ;;  %v7873_v48 = vld [vmem:[#allocation2 + $0x1e0] sm:$0xff]  ;;  %v7879_v37 = vld [vmem:[#allocation2 + $0x1d0] sm:$0xff]  ;;  %v220_v52 = vadd.f32 %v219_v19, %v7865_v21  ;;  %v216_v59 = vadd.f32 %v215_v60, %v7870_v55 }
  0x3e   :  { %192 = vadd.xlane.f32.xlu1 %v191_v28  ;;  %10355 = vst [vmem:[#allocation28_spill] sm:$0xff] %v7870_v55  ;;  %10356 = vst [vmem:[#allocation29_spill] sm:$0xff] %v7873_v48  ;;  %v7875_v28 = vld [vmem:[#allocation2 + $0x1e8] sm:$0xff]  ;;  %v7881_v34 = vld [vmem:[#allocation2 + $0x200] sm:$0xff]  ;;  %v225_v51 = vadd.f32 %v224_v33, %v7879_v37 }
  0x3f   :  { %197 = vadd.xlane.f32.xlu0 %v196_v41  ;;  %10357 = vst [vmem:[#allocation30_spill] sm:$0xff] %v7875_v28  ;;  %10358 = vst [vmem:[#allocation31_spill] sm:$0xff] %v7879_v37  ;;  %v7883_v30 = vld [vmem:[#allocation2 + $0x208] sm:$0xff]  ;;  %v211_v41 = vadd.f32 %v210_v3, %v7862_v63  ;;  %v7886_v45 = vld [vmem:[#allocation2 + $0x1b8] sm:$0xff]  ;;  %v229_v43 = vadd.f32 %v7875_v28, %v7873_v48 }
  0x40   :  { %10359 = vst [vmem:[#allocation32_spill] sm:$0xff] %v7881_v34  ;;  %10360 = vst [vmem:[#allocation33_spill] sm:$0xff] %v7883_v30  ;;  %v7889_v56 = vld [vmem:[#allocation2 + $0x1f0] sm:$0xff]  ;;  %v7894_v57 = vld [vmem:[#allocation2 + $0x1d8] sm:$0xff]  ;;  %v234_v3 = vadd.f32 %v7883_v30, %v7881_v34  ;;  %v221_v60 = vadd.f32 %v220_v52, %v7886_v45 }
  0x41   :  { %10361 = vst [vmem:[#allocation34_spill] sm:$0xff] %v7886_v45  ;;  %10362 = vst [vmem:[#allocation35_spill] sm:$0xff] %v7889_v56  ;;  %v7897_v47 = vld [vmem:[#allocation2 + $0x220] sm:$0xff]  ;;  %v7903_v19 = vld [vmem:[#allocation2 + $0x210] sm:$0xff]  ;;  %v230_v33 = vadd.f32 %v229_v43, %v7889_v56  ;;  %v226_v30 = vadd.f32 %v225_v51, %v7894_v57 }
  0x42   :  { %202 = vadd.xlane.f32.xlu1 %v201_v61  ;;  %10363 = vst [vmem:[#allocation36_spill] sm:$0xff] %v7894_v57  ;;  %10364 = vst [vmem:[#allocation37_spill] sm:$0xff] %v7897_v47  ;;  %v7899_v61 = vld [vmem:[#allocation2 + $0x228] sm:$0xff]  ;;  %v7905_v21 = vld [vmem:[#allocation2 + $0x240] sm:$0xff]  ;;  %v235_v28 = vadd.f32 %v234_v3, %v7903_v19 }
  0x43   :  { %207 = vadd.xlane.f32.xlu0 %v206_v15  ;;  %10365 = vst [vmem:[#allocation38_spill] sm:$0xff] %v7899_v61  ;;  %10366 = vst [vmem:[#allocation39_spill] sm:$0xff] %v7903_v19  ;;  %v7907_v63 = vld [vmem:[#allocation2 + $0x248] sm:$0xff]  ;;  %v7910_v15 = vld [vmem:[#allocation2 + $0x1f8] sm:$0xff]  ;;  %v239_v55 = vadd.f32 %v7899_v61, %v7897_v47 }
  0x44   :  { %10367 = vst [vmem:[#allocation40_spill] sm:$0xff] %v7905_v21  ;;  %10368 = vst [vmem:[#allocation41_spill] sm:$0xff] %v7907_v63  ;;  %v7913_v37 = vld [vmem:[#allocation2 + $0x230] sm:$0xff]  ;;  %v7918_v34 = vld [vmem:[#allocation2 + $0x218] sm:$0xff]  ;;  %v244_v52 = vadd.f32 %v7907_v63, %v7905_v21  ;;  %v231_v51 = vadd.f32 %v230_v33, %v7910_v15 }
  0x45   :  { %10369 = vst [vmem:[#allocation42_spill] sm:$0xff] %v7910_v15  ;;  %10370 = vst [vmem:[#allocation43_spill] sm:$0xff] %v7913_v37  ;;  %v7921_v48 = vld [vmem:[#allocation2 + $0x260] sm:$0xff]  ;;  %v7927_v43 = vld [vmem:[#allocation2 + $0x250] sm:$0xff]  ;;  %v240_v3 = vadd.f32 %v239_v55, %v7913_v37  ;;  %v236_v57 = vadd.f32 %v235_v28, %v7918_v34 }
  0x46   :  { %212 = vadd.xlane.f32.xlu1 %v211_v41  ;;  %10371 = vst [vmem:[#allocation44_spill] sm:$0xff] %v7918_v34  ;;  %10372 = vst [vmem:[#allocation45_spill] sm:$0xff] %v7921_v48  ;;  %v7923_v41 = vld [vmem:[#allocation2 + $0x268] sm:$0xff]  ;;  %v7929_v56 = vld [vmem:[#allocation2 + $0x280] sm:$0xff]  ;;  %v245_v21 = vadd.f32 %v244_v52, %v7927_v43 }
  0x47   :  { %217 = vadd.xlane.f32.xlu0 %v216_v59  ;;  %10373 = vst [vmem:[#allocation46_spill] sm:$0xff] %v7923_v41  ;;  %10374 = vst [vmem:[#allocation47_spill] sm:$0xff] %v7927_v43  ;;  %v7931_v45 = vld [vmem:[#allocation2 + $0x288] sm:$0xff]  ;;  %v7934_v59 = vld [vmem:[#allocation2 + $0x238] sm:$0xff]  ;;  %v249_v19 = vadd.f32 %v7923_v41, %v7921_v48 }
  0x48   :  { %10375 = vst [vmem:[#allocation48_spill] sm:$0xff] %v7929_v56  ;;  %10376 = vst [vmem:[#allocation49_spill] sm:$0xff] %v7931_v45  ;;  %v7940_v63 = vld [vmem:[#allocation2 + $0x270] sm:$0xff]  ;;  %v7943_v61 = vld [vmem:[#allocation2 + $0x2a0] sm:$0xff] }
  0x49   :  { %10377 = vst [vmem:[#allocation50_spill] sm:$0xff] %v7934_v59  ;;  %10378 = vst [vmem:[#allocation51_spill] sm:$0xff] %v7940_v63  ;;  %v7945_v47 = vld [vmem:[#allocation2 + $0x2a8] sm:$0xff]  ;;  %v7949_v33 = vld [vmem:[#allocation2 + $0x258] sm:$0xff]  ;;  %v250_v28 = vadd.f32 %v249_v19, %v7940_v63 }
  0x4a   :  { %222 = vadd.xlane.f32.xlu1 %v221_v60  ;;  %10379 = vst [vmem:[#allocation52_spill] sm:$0xff] %v7943_v61  ;;  %10380 = vst [vmem:[#allocation53_spill] sm:$0xff] %v7945_v47  ;;  %v254_v60 = vadd.f32 %v7931_v45, %v7929_v56  ;;  %v7951_v55 = vld [vmem:[#allocation2 + $0x290] sm:$0xff]  ;;  %v259_v34 = vadd.f32 %v7945_v47, %v7943_v61  ;;  %v7957_v52 = vld [vmem:[#allocation2 + $0x278] sm:$0xff]  ;;  %v246_v43 = vadd.f32 %v245_v21, %v7949_v33 }
  0x4b   :  { %227 = vadd.xlane.f32.xlu0 %v226_v30  ;;  %10381 = vst [vmem:[#allocation54_spill] sm:$0xff] %v7949_v33  ;;  %10382 = vst [vmem:[#allocation55_spill] sm:$0xff] %v7951_v55  ;;  %v241_v30 = vadd.f32 %v240_v3, %v7934_v59  ;;  %v7960_v37 = vld [vmem:[#allocation2 + $0x2b0] sm:$0xff]  ;;  %v7963_v56 = vld [vmem:[#allocation2 + $0x298] sm:$0xff] }
  0x4c   :  { %10383 = vst [vmem:[#allocation56_spill] sm:$0xff] %v7957_v52  ;;  %10384 = vst [vmem:[#allocation57_spill] sm:$0xff] %v7960_v37  ;;  %v255_v45 = vadd.f32 %v254_v60, %v7951_v55  ;;  %v260_v3 = vadd.f32 %v259_v34, %v7960_v37  ;;  %v7967_v19 = vld [vmem:[#allocation2 + $0x2b8] sm:$0xff]  ;;  %v969_v21 = vld [vmem:[#allocation5 + $0x380] sm:$0xff] }
  0x4d   :  { %10385 = vst [vmem:[#allocation58_spill] sm:$0xff] %v7963_v56  ;;  %10386 = vst [vmem:[#allocation59_spill] sm:$0xff] %v7967_v19  ;;  %v977_v33 = vld [vmem:[#allocation5 + $0x3c0] sm:$0xff] }
  0x4e   :  { %232 = vadd.xlane.f32.xlu1 %v231_v51  ;;  %v251_v51 = vadd.f32 %v250_v28, %v7957_v52  ;;  %v261_v63 = vadd.f32 %v260_v3, %v7967_v19  ;;  %v1225_v60 = vld [vmem:[#allocation5 + $0xb80] sm:$0xff]  ;;  %v7120_v55 = vcombine.high %v969_v21, %v977_v33 }
  0x4f   :  { %237 = vadd.xlane.f32.xlu0 %v236_v57  ;;  %v256_v57 = vadd.f32 %v255_v45, %v7963_v56  ;;  %v1233_v59 = vld [vmem:[#allocation5 + $0xbc0] sm:$0xff] }
  0x50   :  { %v953_v47 = vld [vmem:[#allocation5 + $0x300] sm:$0xff]  ;;  %v7376_v52 = vcombine.high %v1225_v60, %v1233_v59  ;;  %v7375_v34 = vcombine.low %v1225_v60, %v1233_v59  ;;  %4013 = vmatprep.subr.bf16.mxu0 %v7120_v55 }
  0x51   :  { %v961_v28 = vld [vmem:[#allocation5 + $0x340] sm:$0xff] }
  0x52   :  { %242 = vadd.xlane.f32.xlu1 %v241_v30  ;;  %v7119_v30 = vcombine.low %v969_v21, %v977_v33  ;;  %v1209_v37 = vld [vmem:[#allocation5 + $0xb00] sm:$0xff]  ;;  %4174 = vmatprep.subr.bf16.mxu1 %v7376_v52 }
  0x53   :  { %247 = vadd.xlane.f32.xlu0 %v246_v43  ;;  %v7104_v43 = vcombine.high %v953_v47, %v961_v28  ;;  %v1217_v61 = vld [vmem:[#allocation5 + $0xb40] sm:$0xff]  ;;  %4175 = vmatpush1.bf16.msra.mxu1 %v7375_v34 }
  0x54   :  { %v937_v15 = vld [vmem:[#allocation5 + $0x280] sm:$0xff]  ;;  %v7360_v45 = vcombine.high %v1209_v37, %v1217_v61  ;;  %4014 = vmatpush1.bf16.msra.mxu0 %v7119_v30  ;;  %v7359_v56 = vcombine.low %v1209_v37, %v1217_v61 }
  0x55   :  { %v1193_v3 = vld [vmem:[#allocation5 + $0xa80] sm:$0xff]  ;;  %4015 = vmatprep.subr.bf16.mxu0 %v7104_v43 }
  0x56   :  { %252 = vadd.xlane.f32.xlu1 %v251_v51  ;;  %v945_v51 = vld [vmem:[#allocation5 + $0x2c0] sm:$0xff]  ;;  %4176 = vmatprep.subr.bf16.mxu1 %v7360_v45 }
  0x57   :  { %257 = vadd.xlane.f32.xlu0 %v256_v57  ;;  %v1201_v57 = vld [vmem:[#allocation5 + $0xac0] sm:$0xff]  ;;  %v7088_v33 = vcombine.high %v937_v15, %v945_v51  ;;  %v7087_v48 = vcombine.low %v937_v15, %v945_v51  ;;  %4177 = vmatpush1.bf16.msra.mxu1 %v7359_v56 }
  0x58   :  { %v7344_v21 = vcombine.high %v1193_v3, %v1201_v57  ;;  %v921_v19 = vld [vmem:[#allocation5 + $0x200] sm:$0xff]  ;;  %v7343_v55 = vcombine.low %v1193_v3, %v1201_v57 }
  0x59   :  { %v929_v59 = vld [vmem:[#allocation5 + $0x240] sm:$0xff] }
  0x5a   :  { %262 = vadd.xlane.f32.xlu1 %v261_v63  ;;  %v7103_v63 = vcombine.low %v953_v47, %v961_v28  ;;  %v1177_v60 = vld [vmem:[#allocation5 + $0xa00] sm:$0xff]  ;;  %v7072_v46 = vcombine.high %v921_v19, %v929_v59  ;;  %4178 = vmatprep.subr.bf16.mxu1 %v7344_v21  ;;  %v7071_v37 = vcombine.low %v921_v19, %v929_v59 }
  0x5b   :  { %v1185_v41 = vld [vmem:[#allocation5 + $0xa40] sm:$0xff]  ;;  %4179 = vmatpush1.bf16.msra.mxu1 %v7343_v55 }
  0x5c   :  { %4016 = vmatpush1.bf16.msra.mxu0 %v7103_v63  ;;  %v7328_v52 = vcombine.high %v1177_v60, %v1185_v41  ;;  %v905_v30 = vld [vmem:[#allocation5 + $0x180] sm:$0xff]  ;;  %v7327_v61 = vcombine.low %v1177_v60, %v1185_v41 }
  0x5d   :  { %4017 = vmatprep.subr.bf16.mxu0 %v7088_v33  ;;  %v913_v47 = vld [vmem:[#allocation5 + $0x1c0] sm:$0xff] }
  0x5e   :  { %v1161_v28 = vld [vmem:[#allocation5 + $0x980] sm:$0xff]  ;;  %v7056_v43 = vcombine.high %v905_v30, %v913_v47  ;;  %4180 = vmatprep.subr.bf16.mxu1 %v7328_v52  ;;  %v7055_v3 = vcombine.low %v905_v30, %v913_v47 }
  0x5f   :  { %v1169_v34 = vld [vmem:[#allocation5 + $0x9c0] sm:$0xff]  ;;  %4181 = vmatpush1.bf16.msra.mxu1 %v7327_v61 }
  0x60   :  { %4018 = vmatpush1.bf16.msra.mxu0 %v7087_v48  ;;  %v7312_v45 = vcombine.high %v1161_v28, %v1169_v34  ;;  %v889_v63 = vld [vmem:[#allocation5 + $0x100] sm:$0xff]  ;;  %v7311_v57 = vcombine.low %v1161_v28, %v1169_v34 }
  0x61   :  { %4019 = vmatprep.subr.bf16.mxu0 %v7072_v46  ;;  %v897_v15 = vld [vmem:[#allocation5 + $0x140] sm:$0xff] }
  0x62   :  { %v1145_v56 = vld [vmem:[#allocation5 + $0x900] sm:$0xff]  ;;  %v7040_v33 = vcombine.high %v889_v63, %v897_v15  ;;  %4182 = vmatprep.subr.bf16.mxu1 %v7312_v45  ;;  %v7039_v41 = vcombine.low %v889_v63, %v897_v15 }
  0x63   :  { %v1153_v51 = vld [vmem:[#allocation5 + $0x940] sm:$0xff]  ;;  %4183 = vmatpush1.bf16.msra.mxu1 %v7311_v57 }
  0x64   :  { %4020 = vmatpush1.bf16.msra.mxu0 %v7071_v37  ;;  %v7296_v21 = vcombine.high %v1145_v56, %v1153_v51  ;;  %v873_v48 = vld [vmem:[#allocation5 + $0x80] sm:$0xff]  ;;  %v7295_v60 = vcombine.low %v1145_v56, %v1153_v51 }
  0x65   :  { %4021 = vmatprep.subr.bf16.mxu0 %v7056_v43  ;;  %v881_v19 = vld [vmem:[#allocation5 + $0xc0] sm:$0xff] }
  0x66   :  { %v1129_v59 = vld [vmem:[#allocation5 + $0x880] sm:$0xff]  ;;  %v7024_v55 = vcombine.high %v873_v48, %v881_v19  ;;  %4184 = vmatprep.subr.bf16.mxu1 %v7296_v21  ;;  %v7023_v28 = vcombine.low %v873_v48, %v881_v19 }
  0x67   :  { %v1137_v46 = vld [vmem:[#allocation5 + $0x8c0] sm:$0xff]  ;;  %4185 = vmatpush1.bf16.msra.mxu1 %v7295_v60 }
  0x68   :  { %4022 = vmatpush1.bf16.msra.mxu0 %v7055_v3  ;;  %v7280_v52 = vcombine.high %v1129_v59, %v1137_v46  ;;  %v857_v37 = vld [vmem:[#allocation5] sm:$0xff]  ;;  %v7279_v34 = vcombine.low %v1129_v59, %v1137_v46 }
  0x69   :  { %4023 = vmatprep.subr.bf16.mxu0 %v7040_v33  ;;  %v865_v30 = vld [vmem:[#allocation5 + $0x40] sm:$0xff] }
  0x6a   :  { %v1113_v47 = vld [vmem:[#allocation5 + $0x800] sm:$0xff]  ;;  %v7008_v43 = vcombine.high %v857_v37, %v865_v30  ;;  %4186 = vmatprep.subr.bf16.mxu1 %v7280_v52  ;;  %v7007_v56 = vcombine.low %v857_v37, %v865_v30  ;;  %v7985_v30 = vld [vmem:[#allocation2 + $0x2c8] sm:$0xff] }
  0x6b   :  { %v1121_v61 = vld [vmem:[#allocation5 + $0x840] sm:$0xff]  ;;  %4187 = vmatpush1.bf16.msra.mxu1 %v7279_v34  ;;  %v7993_v34 = vld [vmem:[#allocation2 + $0x308] sm:$0xff] }
  0x6c   :  { %4024 = vmatpush1.bf16.msra.mxu0 %v7039_v41  ;;  %v7264_v45 = vcombine.high %v1113_v47, %v1121_v61  ;;  %v1097_v3 = vld [vmem:[#allocation5 + $0x780] sm:$0xff]  ;;  %v7263_v51 = vcombine.low %v1113_v47, %v1121_v61  ;;  %v7989_v61 = vld [vmem:[#allocation2 + $0x2e8] sm:$0xff]  ;;  %10390 = vst [vmem:[#allocation63_spill] sm:$0xff] %v7993_v34 }
  0x6d   :  { %4025 = vmatprep.subr.bf16.mxu0 %v7024_v55  ;;  %v1105_v63 = vld [vmem:[#allocation5 + $0x7c0] sm:$0xff]  ;;  %10388 = vst [vmem:[#allocation61_spill] sm:$0xff] %v7989_v61 }
  0x6e   :  { %v1353_v15 = vld [vmem:[#allocation5 + $0xf80] sm:$0xff]  ;;  %v7248_v33 = vcombine.high %v1097_v3, %v1105_v63  ;;  %4188 = vmatprep.subr.bf16.mxu1 %v7264_v45  ;;  %v7247_v46 = vcombine.low %v1097_v3, %v1105_v63  ;;  %v8001_v63 = vld [vmem:[#allocation2 + $0x2d0] sm:$0xff] }
  0x6f   :  { %v1361_v57 = vld [vmem:[#allocation5 + $0xfc0] sm:$0xff]  ;;  %4189 = vmatpush1.bf16.msra.mxu1 %v7263_v51 }
  0x70   :  { %4026 = vmatpush1.bf16.msra.mxu0 %v7023_v28  ;;  %v7504_v21 = vcombine.high %v1353_v15, %v1361_v57  ;;  %v7971_v41 = vld [vmem:[#allocation5 + $0x700] sm:$0xff]  ;;  %v7503_v60 = vcombine.low %v1353_v15, %v1361_v57  ;;  %v8003_v15 = vld [vmem:[#allocation2 + $0x2f0] sm:$0xff] }
  0x71   :  { %4027 = vmatprep.subr.bf16.mxu0 %v7008_v43  ;;  %v7973_v48 = vld [vmem:[#allocation5 + $0x740] sm:$0xff]  ;;  %10391 = vst [vmem:[#allocation64_spill] sm:$0xff] %v8003_v15  ;;  %v8005_v57 = vld [vmem:[#allocation2 + $0x310] sm:$0xff] }
  0x72   :  { %v7975_v19 = vld [vmem:[#allocation5 + $0xf00] sm:$0xff]  ;;  %v7232_v55 = vcombine.high %v7971_v41, %v7973_v48  ;;  %4190 = vmatprep.subr.bf16.mxu1 %v7504_v21  ;;  %10392 = vst [vmem:[#allocation65_spill] sm:$0xff] %v8005_v57 }
  0x73   :  { %v7977_v59 = vld [vmem:[#allocation5 + $0xf40] sm:$0xff]  ;;  %4191 = vmatpush2.bf16.msra.mxu1 %v7503_v60  ;;  %v8010_v60 = vld [vmem:[#allocation2 + $0x2d8] sm:$0xff] }
  0x74   :  { %4028 = vmatpush1.bf16.msra.mxu0 %v7007_v56  ;;  %v7488_v52 = vcombine.high %v7975_v19, %v7977_v59  ;;  %v7983_v37 = vld [vmem:[#allocation2 + $0x2c0] sm:$0xff] }
  0x75   :  { %4029 = vmatprep.subr.bf16.mxu0 %v7248_v33  ;;  %v7987_v47 = vld [vmem:[#allocation2 + $0x2e0] sm:$0xff]  ;;  %v264_v43 = vadd.f32 %v7985_v30, %v7983_v37 }
  0x76   :  { %4192 = vmatprep.subr.bf16.mxu1 %v7488_v52  ;;  %10387 = vst [vmem:[#allocation60_spill] sm:$0xff] %v7987_v47  ;;  %v7991_v28 = vld [vmem:[#allocation2 + $0x300] sm:$0xff]  ;;  %v269_v45 = vadd.f32 %v7989_v61, %v7987_v47  ;;  %v8014_v52 = vld [vmem:[#allocation2 + $0x318] sm:$0xff] }
  0x77   :  { %10389 = vst [vmem:[#allocation62_spill] sm:$0xff] %v7991_v28  ;;  %v274_v3 = vadd.f32 %v7993_v34, %v7991_v28  ;;  %v265_v51 = vadd.f32 %v264_v43, %v8001_v63  ;;  %10394 = vst [vmem:[#allocation67_spill] sm:$0xff] %v8014_v52 }
  0x78   :  { %4030 = vmatpush2.bf16.msra.mxu0 %v7247_v46  ;;  %v270_v33 = vadd.f32 %v269_v45, %v8003_v15 }
  0x79   :  { %4031 = vmatprep.subr.bf16.mxu0 %v7232_v55  ;;  %v275_v21 = vadd.f32 %v274_v3, %v8005_v57  ;;  %v8012_v55 = vld [vmem:[#allocation2 + $0x2f8] sm:$0xff]  ;;  %v266_v57 = vadd.f32 %v265_v51, %v8010_v60 }
  0x7a   :  { %10393 = vst [vmem:[#allocation66_spill] sm:$0xff] %v8012_v55  ;;  %v8030_v15 = vadd.f32 %v270_v33, %v8012_v55 }
  0xb8   :  { %v158_v56 = vpop.xlane.xlu0 %157 }
  0xb9   :  { %v280_v46 = vmul.f32 0.001953125, %v158_v56 }
  0xbb   :  { %v8017_v34 = vsub.f32 %v7707_v0, %v280_v46  ;;  %v8020_v28 = vsub.f32 %v7709_v1, %v280_v46  ;;  %v168_v61 = vpop.xlane.xlu1 %167  ;;  %v8023_v43 = vsub.f32 %v7711_v2, %v280_v46  ;;  %v8026_v45 = vsub.f32 %v7719_v6, %v280_v46 }
  0xbc   :  { %v163_v3 = vpop.xlane.xlu0 %162  ;;  %v282_v56 = vmul.f32 0.001953125, %v168_v61  ;;  %v8033_v0 = vadd.f32 %v275_v21, %v8014_v52 }
  0xbd   :  { %10395 = vst [vmem:[#allocation68_spill] sm:$0xff] %v8017_v34  ;;  %10396 = vst [vmem:[#allocation69_spill] sm:$0xff] %v8020_v28  ;;  %v281_v47 = vmul.f32 0.001953125, %v163_v3  ;;  %v405_v1 = vmul.f32 %v8017_v34, %v8017_v34  ;;  %v406_v2 = vmul.f32 %v8020_v28, %v8020_v28  ;;  %v407_v6 = vmul.f32 %v8023_v43, %v8023_v43 }
  0xbe   :  { %10397 = vst [vmem:[#allocation70_spill] sm:$0xff] %v8023_v43  ;;  %10398 = vst [vmem:[#allocation71_spill] sm:$0xff] %v8026_v45  ;;  %v8042_v61 = vsub.f32 %v7725_v9, %v282_v56  ;;  %v8045_v51 = vsub.f32 %v7730_v12, %v282_v56  ;;  %v408_v33 = vmul.f32 %v8026_v45, %v8026_v45 }
  0xbf   :  { %v8050_v21 = vsub.f32 %v7732_v13, %v282_v56  ;;  %v8053_v46 = vsub.f32 %v7715_v4, %v281_v47  ;;  %v8056_v3 = vsub.f32 %v7717_v5, %v281_v47  ;;  %v173_v34 = vpop.xlane.xlu1 %172  ;;  %v505_v43 = vadd.f32 %v406_v2, %v405_v1 }
  0xc0   :  { %10399 = vst [vmem:[#allocation72_spill] sm:$0xff] %v8042_v61  ;;  %v8059_v9 = vsub.f32 %v7721_v7, %v281_v47  ;;  %v283_v28 = vmul.f32 0.001953125, %v173_v34  ;;  %v178_v12 = vpop.xlane.xlu0 %177  ;;  %v8062_v52 = vsub.f32 %v7728_v11, %v281_v47  ;;  %v8065_v45 = vsub.f32 %v7744_v20, %v282_v56 }
  0xc1   :  { %10400 = vst [vmem:[#allocation73_spill] sm:$0xff] %v8050_v21  ;;  %v413_v4 = vmul.f32 %v8042_v61, %v8042_v61  ;;  %v506_v13 = vadd.f32 %v505_v43, %v407_v6  ;;  %v284_v55 = vmul.f32 0.001953125, %v178_v12  ;;  %v409_v5 = vmul.f32 %v8053_v46, %v8053_v46 }
  0xc2   :  { %10401 = vst [vmem:[#allocation74_spill] sm:$0xff] %v8059_v9  ;;  %v410_v7 = vmul.f32 %v8056_v3, %v8056_v3  ;;  %v8074_v34 = vsub.f32 %v7737_v16, %v283_v28  ;;  %v8077_v11 = vsub.f32 %v7739_v17, %v283_v28  ;;  %v411_v20 = vmul.f32 %v8059_v9, %v8059_v9 }
  0xc3   :  { %v412_v47 = vmul.f32 %v8062_v52, %v8062_v52  ;;  %v507_v43 = vadd.f32 %v506_v13, %v408_v33  ;;  %v183_v56 = vpop.xlane.xlu1 %182  ;;  %v8084_v1 = vsub.f32 %v7757_v27, %v284_v55  ;;  %v8087_v2 = vsub.f32 %v7763_v31, %v284_v55 }
  0xc4   :  { %v510_v6 = vadd.f32 %v410_v7, %v409_v5  ;;  %v285_v16 = vmul.f32 0.001953125, %v183_v56  ;;  %v188_v12 = vpop.xlane.xlu0 %187  ;;  %v414_v17 = vmul.f32 %v8045_v51, %v8045_v51  ;;  %v415_v61 = vmul.f32 %v8050_v21, %v8050_v21 }
  0xc5   :  { %v416_v9 = vmul.f32 %v8065_v45, %v8065_v45  ;;  %508 = vadd.xlane.f32.xlu0 %v507_v43  ;;  %v8095_v13 = vmul.f32 0.001953125, %v188_v12  ;;  %v8098_v27 = vsub.f32 %v7741_v18, %v283_v28  ;;  %v8101_v31 = vsub.f32 %v7760_v29, %v283_v28 }
  0xc6   :  { %v511_v33 = vadd.f32 %v510_v6, %v411_v20  ;;  %v8104_v5 = vsub.f32 %v7748_v22, %v285_v16  ;;  %v8107_v7 = vsub.f32 %v7750_v23, %v285_v16  ;;  %v515_v56 = vadd.f32 %v414_v17, %v413_v4 }
  0xc7   :  { %v417_v21 = vmul.f32 %v8074_v34, %v8074_v34  ;;  %v193_v20 = vpop.xlane.xlu1 %192  ;;  %v8113_v6 = vsub.f32 %v7777_v39, %v8095_v13  ;;  %v8117_v18 = vsub.f32 %v7779_v40, %v8095_v13  ;;  %v418_v22 = vmul.f32 %v8077_v11, %v8077_v11 }
  0xc8   :  { %v512_v43 = vadd.f32 %v511_v33, %v412_v47  ;;  %v287_v29 = vmul.f32 0.001953125, %v193_v20  ;;  %v516_v23 = vadd.f32 %v515_v56, %v415_v61  ;;  %v198_v28 = vpop.xlane.xlu0 %197  ;;  %v419_v4 = vmul.f32 %v8098_v27, %v8098_v27 }
  0xc9   :  { %10402 = vst [vmem:[#allocation75_spill] sm:$0xff] %v8113_v6  ;;  %10403 = vst [vmem:[#allocation76_spill] sm:$0xff] %v8117_v18  ;;  %v420_v47 = vmul.f32 %v8101_v31, %v8101_v31  ;;  %267 = vadd.xlane.f32.xlu0 %v266_v57  ;;  %v8125_v39 = vmul.f32 0.001953125, %v198_v28  ;;  %v520_v12 = vadd.f32 %v418_v22, %v417_v21 }
  0xca   :  { %513 = vadd.xlane.f32.xlu1 %v512_v43  ;;  %v8128_v40 = vsub.f32 %v7753_v25, %v285_v16  ;;  %v8131_v17 = vsub.f32 %v7782_v42, %v285_v16  ;;  %v8134_v61 = vsub.f32 %v7770_v35, %v287_v29  ;;  %v8137_v33 = vsub.f32 %v7772_v36, %v287_v29 }
  0xcb   :  { %v517_v56 = vadd.f32 %v516_v23, %v416_v9  ;;  %v425_v57 = vmul.f32 %v8104_v5, %v8104_v5  ;;  %v203_v43 = vpop.xlane.xlu1 %202  ;;  %v8143_v21 = vsub.f32 %v7801_v53, %v8125_v39  ;;  %v8147_v25 = vsub.f32 %v7803_v54, %v8125_v39 }
  0xcc   :  { %10404 = vst [vmem:[#allocation77_spill] sm:$0xff] %v8128_v40  ;;  %10405 = vst [vmem:[#allocation78_spill] sm:$0xff] %v8134_v61  ;;  %v521_v42 = vadd.f32 %v520_v12, %v419_v4  ;;  %v426_v35 = vmul.f32 %v8107_v7, %v8107_v7  ;;  %v8151_v16 = vmul.f32 0.001953125, %v203_v43  ;;  %v208_v36 = vpop.xlane.xlu0 %207  ;;  %v427_v9 = vmul.f32 %v8128_v40, %v8128_v40 }
  0xcd   :  { %10406 = vst [vmem:[#allocation79_spill] sm:$0xff] %v8137_v33  ;;  %10407 = vst [vmem:[#allocation80_spill] sm:$0xff] %v8143_v21  ;;  %v428_v20 = vmul.f32 %v8131_v17, %v8131_v17  ;;  %v8158_v53 = vsub.f32 %v7765_v32, %v284_v55  ;;  %518 = vadd.xlane.f32.xlu0 %v517_v56  ;;  %v8161_v22 = vmul.f32 0.001953125, %v208_v36 }
  0xce   :  { %10408 = vst [vmem:[#allocation81_spill] sm:$0xff] %v8147_v25  ;;  %272 = vadd.xlane.f32.xlu1 %v8030_v15  ;;  %v522_v54 = vadd.f32 %v521_v42, %v420_v47  ;;  %v530_v23 = vadd.f32 %v426_v35, %v425_v57  ;;  %v8164_v28 = vsub.f32 %v7775_v38, %v284_v55 }
  0xcf   :  { %v8168_v4 = vsub.f32 %v7795_v49, %v8151_v16  ;;  %v8172_v12 = vsub.f32 %v7797_v50, %v8151_v16  ;;  %v421_v32 = vmul.f32 %v8084_v1, %v8084_v1  ;;  %v422_v15 = vmul.f32 %v8087_v2, %v8087_v2  ;;  %v213_v47 = vpop.xlane.xlu1 %212 }
  0xd0   :  { %v8180_v56 = vsub.f32 %v7817_v62, %v8161_v22  ;;  %v8184_v38 = vsub.f32 %v7825_v14, %v8161_v22  ;;  %v531_v49 = vadd.f32 %v530_v23, %v427_v9  ;;  %v423_v50 = vmul.f32 %v8158_v53, %v8158_v53  ;;  %v218_v42 = vpop.xlane.xlu0 %217 }
  0xd1   :  { %10409 = vst [vmem:[#allocation82_spill] sm:$0xff] %v8168_v4  ;;  %10410 = vst [vmem:[#allocation83_spill] sm:$0xff] %v8172_v12  ;;  %v8188_v55 = vmul.f32 0.001953125, %v213_v47  ;;  %v424_v57 = vmul.f32 %v8164_v28, %v8164_v28  ;;  %v525_v43 = vadd.f32 %v422_v15, %v421_v32  ;;  %v8193_v35 = vsub.f32 %v7785_v44, %v287_v29 }
  0xd2   :  { %10411 = vst [vmem:[#allocation84_spill] sm:$0xff] %v8180_v56  ;;  %10412 = vst [vmem:[#allocation85_spill] sm:$0xff] %v8184_v38  ;;  %277 = vadd.xlane.f32.xlu0 %v8033_v0  ;;  %523 = vadd.xlane.f32.xlu1 %v522_v54  ;;  %v532_v62 = vadd.f32 %v531_v49, %v428_v20  ;;  %v8196_v14 = vmul.f32 0.001953125, %v218_v42  ;;  %v8199_v36 = vsub.f32 %v7810_v58, %v287_v29  ;;  %v10419_v49 = vld [vmem:[#allocation12_spill] sm:$0xff] }
  0xd3   :  { %10413 = vst [vmem:[#allocation86_spill] sm:$0xff] %v8193_v35  ;;  %v433_v9 = vmul.f32 %v8134_v61, %v8134_v61  ;;  %v8205_v23 = vsub.f32 %v7821_v8, %v8188_v55  ;;  %v8209_v44 = vsub.f32 %v7823_v10, %v8188_v55  ;;  %v526_v32 = vadd.f32 %v525_v43, %v423_v50  ;;  %v223_v20 = vpop.xlane.xlu1 %222  ;;  %v10421_v43 = vld [vmem:[#allocation13_spill] sm:$0xff] }
  0xd4   :  { %10414 = vst [vmem:[#allocation87_spill] sm:$0xff] %v8199_v36  ;;  %v434_v0 = vmul.f32 %v8137_v33, %v8137_v33  ;;  %v8215_v58 = vsub.f32 %v7833_v24, %v8196_v14  ;;  %v8219_v29 = vsub.f32 %v7835_v26, %v8196_v14  ;;  %v435_v8 = vmul.f32 %v8193_v35, %v8193_v35  ;;  %v228_v24 = vpop.xlane.xlu0 %227 }
  0xd5   :  { %10415 = vst [vmem:[#allocation88_spill] sm:$0xff] %v8205_v23  ;;  %10416 = vst [vmem:[#allocation89_spill] sm:$0xff] %v8209_v44  ;;  %v436_v10 = vmul.f32 %v8199_v36, %v8199_v36  ;;  %v527_v54 = vadd.f32 %v526_v32, %v424_v57  ;;  %v8225_v15 = vmul.f32 0.001953125, %v223_v20  ;;  %v8229_v50 = vsub.f32 %v10419_v49, %v8095_v13 }
  0xd6   :  { %10417 = vst [vmem:[#allocation90_spill] sm:$0xff] %v8215_v58  ;;  %10418 = vst [vmem:[#allocation91_spill] sm:$0xff] %v8219_v29  ;;  %v540_v47 = vadd.f32 %v434_v0, %v433_v9  ;;  %533 = vadd.xlane.f32.xlu0 %v532_v62  ;;  %v8233_v26 = vsub.f32 %v10421_v43, %v8095_v13  ;;  %v429_v42 = vmul.f32 %v8113_v6, %v8113_v6  ;;  %v10423_v9 = vld [vmem:[#allocation21_spill] sm:$0xff]  ;;  %v10425_v0 = vld [vmem:[#allocation22_spill] sm:$0xff] }
  0xd7   :  { %10420 = vst [vmem:[#allocation12_spill] sm:$0xff] %v8229_v50  ;;  %v430_v35 = vmul.f32 %v8117_v18, %v8117_v18  ;;  %v8239_v57 = vmul.f32 0.001953125, %v228_v24  ;;  %528 = vadd.xlane.f32.xlu1 %v527_v54  ;;  %v8243_v32 = vsub.f32 %v10423_v9, %v8225_v15  ;;  %v8247_v62 = vsub.f32 %v10425_v0, %v8225_v15  ;;  %v233_v61 = vpop.xlane.xlu1 %232  ;;  %v10426_v24 = vld [vmem:[#allocation24_spill] sm:$0xff]  ;;  %v10428_v9 = vld [vmem:[#allocation25_spill] sm:$0xff] }
  0xd8   :  { %10422 = vst [vmem:[#allocation13_spill] sm:$0xff] %v8233_v26  ;;  %v541_v20 = vadd.f32 %v540_v47, %v435_v8  ;;  %v431_v13 = vmul.f32 %v8229_v50, %v8229_v50  ;;  %v432_v49 = vmul.f32 %v8233_v26, %v8233_v26  ;;  %v8261_v0 = vmul.f32 0.001953125, %v233_v61  ;;  %v10429_v8 = vld [vmem:[#allocation15_spill] sm:$0xff]  ;;  %v10431_v50 = vld [vmem:[#allocation18_spill] sm:$0xff]  ;;  %v238_v61 = vpop.xlane.xlu0 %237 }
  0xd9   :  { %10424 = vst [vmem:[#allocation21_spill] sm:$0xff] %v8243_v32  ;;  %v535_v43 = vadd.f32 %v430_v35, %v429_v42  ;;  %v8255_v54 = vsub.f32 %v10426_v24, %v8239_v57  ;;  %v8259_v6 = vsub.f32 %v10428_v9, %v8239_v57  ;;  %v8265_v47 = vsub.f32 %v10429_v8, %v8151_v16  ;;  %v10433_v9 = vld [vmem:[#allocation14_spill] sm:$0xff] }
  0xda   :  { %v542_v18 = vadd.f32 %v541_v20, %v436_v10  ;;  %v8269_v26 = vsub.f32 %v10431_v50, %v8151_v16  ;;  %v441_v42 = vmul.f32 %v8168_v4, %v8168_v4  ;;  %v442_v24 = vmul.f32 %v8172_v12, %v8172_v12  ;;  %v10435_v20 = vld [vmem:[#allocation29_spill] sm:$0xff]  ;;  %v10437_v16 = vld [vmem:[#allocation30_spill] sm:$0xff] }
  0xdb   :  { %10427 = vst [vmem:[#allocation22_spill] sm:$0xff] %v8255_v54  ;;  %10430 = vst [vmem:[#allocation24_spill] sm:$0xff] %v8265_v47  ;;  %v536_v35 = vadd.f32 %v535_v43, %v431_v13  ;;  %v8277_v10 = vsub.f32 %v10433_v9, %v8125_v39  ;;  %v8281_v8 = vsub.f32 %v10435_v20, %v8261_v0  ;;  %v10439_v9 = vld [vmem:[#allocation16_spill] sm:$0xff]  ;;  %v243_v20 = vpop.xlane.xlu1 %242  ;;  %v8303_v40 = vmul.f32 0.001953125, %v238_v61  ;;  %v10447_v61 = vld [vmem:[#allocation38_spill] sm:$0xff] }
  0xdc   :  { %10432 = vst [vmem:[#allocation25_spill] sm:$0xff] %v8269_v26  ;;  %543 = vadd.xlane.f32.xlu0 %v542_v18  ;;  %v8285_v50 = vsub.f32 %v10437_v16, %v8261_v0  ;;  %v443_v13 = vmul.f32 %v8265_v47, %v8265_v47  ;;  %v444_v43 = vmul.f32 %v8269_v26, %v8269_v26  ;;  %v8301_v47 = vmul.f32 0.001953125, %v243_v20 }
  0xdd   :  { %10434 = vst [vmem:[#allocation15_spill] sm:$0xff] %v8277_v10  ;;  %10436 = vst [vmem:[#allocation18_spill] sm:$0xff] %v8281_v8  ;;  %v537_v4 = vadd.f32 %v536_v35, %v432_v49  ;;  %v550_v12 = vadd.f32 %v442_v24, %v441_v42  ;;  %v8293_v36 = vsub.f32 %v10439_v9, %v8125_v39  ;;  %v10441_v35 = vld [vmem:[#allocation19_spill] sm:$0xff]  ;;  %v10443_v24 = vld [vmem:[#allocation26_spill] sm:$0xff] }
  0xde   :  { %10438 = vst [vmem:[#allocation14_spill] sm:$0xff] %v8285_v50  ;;  %v437_v18 = vmul.f32 %v8143_v21, %v8143_v21  ;;  %v438_v16 = vmul.f32 %v8147_v25, %v8147_v25  ;;  %v439_v33 = vmul.f32 %v8277_v10, %v8277_v10  ;;  %v8309_v42 = vsub.f32 %v10441_v35, %v8188_v55  ;;  %v10445_v10 = vld [vmem:[#allocation37_spill] sm:$0xff] }
  0xdf   :  { %10440 = vst [vmem:[#allocation29_spill] sm:$0xff] %v8293_v36  ;;  %538 = vadd.xlane.f32.xlu1 %v537_v4  ;;  %v551_v49 = vadd.f32 %v550_v12, %v443_v13  ;;  %v440_v39 = vmul.f32 %v8293_v36, %v8293_v36  ;;  %v8313_v9 = vsub.f32 %v10443_v24, %v8188_v55  ;;  %v10448_v12 = vld [vmem:[#allocation32_spill] sm:$0xff]  ;;  %v10449_v35 = vld [vmem:[#allocation33_spill] sm:$0xff] }
  0xe0   :  { %10442 = vst [vmem:[#allocation30_spill] sm:$0xff] %v8309_v42  ;;  %v545_v21 = vadd.f32 %v438_v16, %v437_v18  ;;  %v8317_v20 = vsub.f32 %v10445_v10, %v8301_v47  ;;  %v8321_v4 = vsub.f32 %v10447_v61, %v8301_v47  ;;  %v8325_v13 = vsub.f32 %v10448_v12, %v8303_v40  ;;  %v253_v18 = vpop.xlane.xlu1 %252  ;;  %v248_v16 = vpop.xlane.xlu0 %247 }
  0xe1   :  { %10444 = vst [vmem:[#allocation16_spill] sm:$0xff] %v8313_v9  ;;  %v552_v36 = vadd.f32 %v551_v49, %v444_v43  ;;  %v8329_v25 = vsub.f32 %v10449_v35, %v8303_v40  ;;  %v449_v55 = vmul.f32 %v8205_v23, %v8205_v23  ;;  %v450_v10 = vmul.f32 %v8209_v44, %v8209_v44  ;;  %v10450_v43 = vld [vmem:[#allocation17_spill] sm:$0xff]  ;;  %v10452_v23 = vld [vmem:[#allocation20_spill] sm:$0xff] }
  0xe2   :  { %10446 = vst [vmem:[#allocation19_spill] sm:$0xff] %v8317_v20  ;;  %v546_v24 = vadd.f32 %v545_v21, %v439_v33  ;;  %v451_v61 = vmul.f32 %v8309_v42, %v8309_v42  ;;  %v452_v12 = vmul.f32 %v8313_v9, %v8313_v9  ;;  %v8341_v49 = vsub.f32 %v10450_v43, %v8161_v22 }
  0xe3   :  { %553 = vadd.xlane.f32.xlu0 %v552_v36  ;;  %v560_v35 = vadd.f32 %v450_v10, %v449_v55  ;;  %v8345_v26 = vsub.f32 %v10452_v23, %v8161_v22  ;;  %v445_v44 = vmul.f32 %v8180_v56, %v8180_v56  ;;  %v446_v33 = vmul.f32 %v8184_v38, %v8184_v38  ;;  %v10454_v23 = vld [vmem:[#allocation27_spill] sm:$0xff]  ;;  %v10456_v56 = vld [vmem:[#allocation45_spill] sm:$0xff] }
  0xe4   :  { %10451 = vst [vmem:[#allocation26_spill] sm:$0xff] %v8341_v49  ;;  %v547_v21 = vadd.f32 %v546_v24, %v440_v39  ;;  %v447_v42 = vmul.f32 %v8341_v49, %v8341_v49  ;;  %v8353_v9 = vmul.f32 0.001953125, %v253_v18  ;;  %v8355_v43 = vmul.f32 0.001953125, %v248_v16  ;;  %v10458_v24 = vld [vmem:[#allocation46_spill] sm:$0xff]  ;;  %v10459_v16 = vld [vmem:[#allocation40_spill] sm:$0xff]  ;;  %v10464_v38 = vld [vmem:[#allocation23_spill] sm:$0xff] }
  0xe5   :  { %10453 = vst [vmem:[#allocation37_spill] sm:$0xff] %v8345_v26  ;;  %v561_v36 = vadd.f32 %v560_v35, %v451_v61  ;;  %v448_v55 = vmul.f32 %v8345_v26, %v8345_v26  ;;  %v555_v22 = vadd.f32 %v446_v33, %v445_v44  ;;  %v8361_v10 = vsub.f32 %v10454_v23, %v8225_v15  ;;  %v10461_v35 = vld [vmem:[#allocation41_spill] sm:$0xff]  ;;  %v263_v26 = vpop.xlane.xlu1 %262 }
  0xe6   :  { %548 = vadd.xlane.f32.xlu1 %v547_v21  ;;  %v8365_v39 = vsub.f32 %v10456_v56, %v8353_v9  ;;  %v8369_v18 = vsub.f32 %v10458_v24, %v8353_v9  ;;  %v8373_v61 = vsub.f32 %v10459_v16, %v8355_v43  ;;  %v8377_v44 = vsub.f32 %v10461_v35, %v8355_v43  ;;  %v10462_v21 = vld [vmem:[#allocation34_spill] sm:$0xff] }
  0xe7   :  { %10455 = vst [vmem:[#allocation38_spill] sm:$0xff] %v8361_v10  ;;  %v562_v33 = vadd.f32 %v561_v36, %v452_v12  ;;  %v556_v23 = vadd.f32 %v555_v22, %v447_v42  ;;  %v8381_v49 = vsub.f32 %v10462_v21, %v8225_v15  ;;  %v457_v56 = vmul.f32 %v8243_v32, %v8243_v32  ;;  %v10466_v42 = vld [vmem:[#allocation28_spill] sm:$0xff]  ;;  %v258_v15 = vpop.xlane.xlu0 %257 }
  0xe8   :  { %10457 = vst [vmem:[#allocation32_spill] sm:$0xff] %v8365_v39  ;;  %10460 = vst [vmem:[#allocation33_spill] sm:$0xff] %v8373_v61  ;;  %v458_v24 = vmul.f32 %v8247_v62, %v8247_v62  ;;  %v459_v16 = vmul.f32 %v8361_v10, %v8361_v10  ;;  %v8391_v35 = vsub.f32 %v10464_v38, %v8196_v14 }
  0xe9   :  { %10463 = vst [vmem:[#allocation17_spill] sm:$0xff] %v8381_v49  ;;  %v8395_v12 = vsub.f32 %v10466_v42, %v8196_v14  ;;  %563 = vadd.xlane.f32.xlu0 %v562_v33  ;;  %v557_v36 = vadd.f32 %v556_v23, %v448_v55  ;;  %v460_v22 = vmul.f32 %v8381_v49, %v8381_v49  ;;  %v8407_v42 = vmul.f32 0.001953125, %v263_v26  ;;  %v10468_v23 = vld [vmem:[#allocation35_spill] sm:$0xff]  ;;  %v10473_v26 = vld [vmem:[#allocation53_spill] sm:$0xff] }
  0xea   :  { %10465 = vst [vmem:[#allocation20_spill] sm:$0xff] %v8391_v35  ;;  %v453_v21 = vmul.f32 %v8215_v58, %v8215_v58  ;;  %v454_v10 = vmul.f32 %v8219_v29, %v8219_v29  ;;  %v570_v32 = vadd.f32 %v458_v24, %v457_v56  ;;  %v455_v38 = vmul.f32 %v8391_v35, %v8391_v35  ;;  %v10470_v58 = vld [vmem:[#allocation42_spill] sm:$0xff]  ;;  %v10471_v24 = vld [vmem:[#allocation52_spill] sm:$0xff] }
  0xeb   :  { %10467 = vst [vmem:[#allocation27_spill] sm:$0xff] %v8395_v12  ;;  %v456_v14 = vmul.f32 %v8395_v12, %v8395_v12  ;;  %558 = vadd.xlane.f32.xlu1 %v557_v36  ;;  %v8409_v33 = vmul.f32 0.001953125, %v258_v15  ;;  %v8413_v49 = vsub.f32 %v10468_v23, %v8261_v0  ;;  %v8417_v29 = vsub.f32 %v10470_v58, %v8261_v0  ;;  %v10475_v36 = vld [vmem:[#allocation48_spill] sm:$0xff]  ;;  %v10477_v58 = vld [vmem:[#allocation49_spill] sm:$0xff] }
  0xec   :  { %v565_v55 = vadd.f32 %v454_v10, %v453_v21  ;;  %v571_v56 = vadd.f32 %v570_v32, %v459_v16  ;;  %v8421_v35 = vsub.f32 %v10471_v24, %v8407_v42  ;;  %v8425_v12 = vsub.f32 %v10473_v26, %v8407_v42 }
  0xed   :  { %10469 = vst [vmem:[#allocation45_spill] sm:$0xff] %v8413_v49  ;;  %v465_v10 = vmul.f32 %v8281_v8, %v8281_v8  ;;  %v8431_v21 = vsub.f32 %v10475_v36, %v8409_v33  ;;  %v8435_v0 = vsub.f32 %v10477_v58, %v8409_v33  ;;  %v466_v32 = vmul.f32 %v8285_v50, %v8285_v50  ;;  %v10481_v8 = vld [vmem:[#allocation36_spill] sm:$0xff] }
  0xee   :  { %10472 = vst [vmem:[#allocation46_spill] sm:$0xff] %v8421_v35  ;;  %10474 = vst [vmem:[#allocation40_spill] sm:$0xff] %v8425_v12  ;;  %v566_v15 = vadd.f32 %v565_v55, %v455_v38  ;;  %v572_v16 = vadd.f32 %v571_v56, %v460_v22  ;;  %v467_v23 = vmul.f32 %v8413_v49, %v8413_v49  ;;  %v10479_v38 = vld [vmem:[#allocation31_spill] sm:$0xff] }
  0xef   :  { %10476 = vst [vmem:[#allocation41_spill] sm:$0xff] %v8431_v21  ;;  %10478 = vst [vmem:[#allocation34_spill] sm:$0xff] %v8435_v0  ;;  %v468_v24 = vmul.f32 %v8417_v29, %v8417_v29  ;;  %v8445_v55 = vsub.f32 %v10479_v38, %v8239_v57  ;;  %v580_v36 = vadd.f32 %v466_v32, %v465_v10  ;;  %v10482_v49 = vld [vmem:[#allocation43_spill] sm:$0xff] }
  0xf0   :  { %v567_v26 = vadd.f32 %v566_v15, %v456_v14  ;;  %v8449_v58 = vsub.f32 %v10481_v8, %v8239_v57  ;;  %v461_v50 = vmul.f32 %v8255_v54, %v8255_v54  ;;  %573 = vadd.xlane.f32.xlu0 %v572_v16  ;;  %v462_v22 = vmul.f32 %v8259_v6, %v8259_v6  ;;  %v10484_v14 = vld [vmem:[#allocation50_spill] sm:$0xff] }
  0xf1   :  { %10480 = vst [vmem:[#allocation23_spill] sm:$0xff] %v8445_v55  ;;  %v463_v56 = vmul.f32 %v8445_v55, %v8445_v55  ;;  %v8459_v38 = vsub.f32 %v10482_v49, %v8301_v47  ;;  %v8463_v10 = vsub.f32 %v10484_v14, %v8301_v47  ;;  %v581_v57 = vadd.f32 %v580_v36, %v467_v23  ;;  %v10486_v47 = vld [vmem:[#allocation39_spill] sm:$0xff]  ;;  %v10488_v14 = vld [vmem:[#allocation44_spill] sm:$0xff] }
  0xf2   :  { %568 = vadd.xlane.f32.xlu1 %v567_v26  ;;  %v464_v8 = vmul.f32 %v8449_v58, %v8449_v58  ;;  %v473_v15 = vmul.f32 %v8317_v20, %v8317_v20  ;;  %v474_v32 = vmul.f32 %v8321_v4, %v8321_v4  ;;  %v575_v16 = vadd.f32 %v462_v22, %v461_v50 }
  0xf3   :  { %10483 = vst [vmem:[#allocation28_spill] sm:$0xff] %v8459_v38  ;;  %10485 = vst [vmem:[#allocation35_spill] sm:$0xff] %v8463_v10  ;;  %v475_v49 = vmul.f32 %v8459_v38, %v8459_v38  ;;  %v476_v55 = vmul.f32 %v8463_v10, %v8463_v10  ;;  %v8477_v26 = vsub.f32 %v10486_v47, %v8303_v40  ;;  %v10489_v10 = vld [vmem:[#allocation51_spill] sm:$0xff] }
  0xf4   :  { %v582_v23 = vadd.f32 %v581_v57, %v468_v24  ;;  %v590_v36 = vadd.f32 %v474_v32, %v473_v15  ;;  %v8481_v54 = vsub.f32 %v10488_v14, %v8303_v40  ;;  %v469_v20 = vmul.f32 %v8325_v13, %v8325_v13  ;;  %v10491_v57 = vld [vmem:[#allocation56_spill] sm:$0xff] }
  0xf5   :  { %10487 = vst [vmem:[#allocation42_spill] sm:$0xff] %v8477_v26  ;;  %v576_v50 = vadd.f32 %v575_v16, %v463_v56  ;;  %v470_v22 = vmul.f32 %v8329_v25, %v8329_v25  ;;  %v471_v38 = vmul.f32 %v8477_v26, %v8477_v26  ;;  %v8491_v47 = vsub.f32 %v10489_v10, %v8353_v9 }
  0xf6   :  { %583 = vadd.xlane.f32.xlu0 %v582_v23  ;;  %v591_v24 = vadd.f32 %v590_v36, %v475_v49  ;;  %v472_v40 = vmul.f32 %v8481_v54, %v8481_v54  ;;  %v8497_v15 = vsub.f32 %v10491_v57, %v8353_v9  ;;  %v481_v56 = vmul.f32 %v8365_v39, %v8365_v39  ;;  %v10493_v36 = vld [vmem:[#allocation47_spill] sm:$0xff]  ;;  %v10495_v9 = vld [vmem:[#allocation54_spill] sm:$0xff] }
  0xf7   :  { %10490 = vst [vmem:[#allocation52_spill] sm:$0xff] %v8491_v47  ;;  %v577_v32 = vadd.f32 %v576_v50, %v464_v8  ;;  %v585_v16 = vadd.f32 %v470_v22, %v469_v20  ;;  %v482_v14 = vmul.f32 %v8369_v18, %v8369_v18  ;;  %v483_v10 = vmul.f32 %v8491_v47, %v8491_v47  ;;  %v1041_v39 = vld [vmem:[#allocation5 + $0x5c0] sm:$0xff] }
  0xf8   :  { %10492 = vst [vmem:[#allocation53_spill] sm:$0xff] %v8497_v15  ;;  %v592_v23 = vadd.f32 %v591_v24, %v476_v55  ;;  %v484_v49 = vmul.f32 %v8497_v15, %v8497_v15  ;;  %v8509_v26 = vsub.f32 %v10493_v36, %v8355_v43  ;;  %v8513_v57 = vsub.f32 %v10495_v9, %v8355_v43  ;;  %v10496_v36 = vld [vmem:[#allocation57_spill] sm:$0xff] }
  0xf9   :  { %578 = vadd.xlane.f32.xlu1 %v577_v32  ;;  %v586_v20 = vadd.f32 %v585_v16, %v471_v38  ;;  %v600_v8 = vadd.f32 %v482_v14, %v481_v56  ;;  %v477_v50 = vmul.f32 %v8373_v61, %v8373_v61  ;;  %v478_v55 = vmul.f32 %v8377_v44, %v8377_v44  ;;  %v10498_v38 = vld [vmem:[#allocation59_spill] sm:$0xff] }
  0xfa   :  { %10494 = vst [vmem:[#allocation48_spill] sm:$0xff] %v8509_v26  ;;  %593 = vadd.xlane.f32.xlu0 %v592_v23  ;;  %v479_v22 = vmul.f32 %v8509_v26, %v8509_v26  ;;  %v480_v24 = vmul.f32 %v8513_v57, %v8513_v57  ;;  %v8525_v43 = vsub.f32 %v10496_v36, %v8407_v42  ;;  %v10500_v26 = vld [vmem:[#allocation55_spill] sm:$0xff] }
  0xfb   :  { %v8529_v56 = vsub.f32 %v10498_v38, %v8407_v42  ;;  %v587_v32 = vadd.f32 %v586_v20, %v472_v40  ;;  %v601_v16 = vadd.f32 %v600_v8, %v483_v10  ;;  %v595_v14 = vadd.f32 %v478_v55, %v477_v50  ;;  %v1065_v42 = vld [vmem:[#allocation5 + $0x680] sm:$0xff] }
  0xfc   :  { %10497 = vst [vmem:[#allocation49_spill] sm:$0xff] %v8525_v43  ;;  %v489_v23 = vmul.f32 %v8421_v35, %v8421_v35  ;;  %v490_v9 = vmul.f32 %v8425_v12, %v8425_v12  ;;  %v491_v47 = vmul.f32 %v8525_v43, %v8525_v43  ;;  %v8541_v61 = vsub.f32 %v10500_v26, %v8409_v33  ;;  %v1073_v40 = vld [vmem:[#allocation5 + $0x6c0] sm:$0xff] }
  0xfd   :  { %10499 = vst [vmem:[#allocation31_spill] sm:$0xff] %v8529_v56  ;;  %v492_v36 = vmul.f32 %v8529_v56, %v8529_v56  ;;  %588 = vadd.xlane.f32.xlu1 %v587_v32  ;;  %v602_v10 = vadd.f32 %v601_v16, %v484_v49  ;;  %v596_v20 = vadd.f32 %v595_v14, %v479_v22  ;;  %v10502_v8 = vld [vmem:[#allocation58_spill] sm:$0xff] }
  0xfe   :  { %10501 = vst [vmem:[#allocation36_spill] sm:$0xff] %v8541_v61  ;;  %v8545_v50 = vsub.f32 %v10502_v8, %v8409_v33  ;;  %v485_v55 = vmul.f32 %v8431_v21, %v8431_v21  ;;  %v1321_v38 = vld [vmem:[#allocation5 + $0xe80] sm:$0xff]  ;;  %v610_v35 = vadd.f32 %v490_v9, %v489_v23  ;;  %v486_v56 = vmul.f32 %v8435_v0, %v8435_v0 }
  0xff   :  { %v1329_v43 = vld [vmem:[#allocation5 + $0xec0] sm:$0xff]  ;;  %v487_v26 = vmul.f32 %v8541_v61, %v8541_v61  ;;  %v7231_v49 = vcombine.low %v7971_v41, %v7973_v48  ;;  %603 = vadd.xlane.f32.xlu0 %v602_v10  ;;  %v597_v33 = vadd.f32 %v596_v20, %v480_v24  ;;  %v7487_v14 = vcombine.low %v7975_v19, %v7977_v59 }
 0x100   :  { %10503 = vst [vmem:[#allocation43_spill] sm:$0xff] %v8545_v50  ;;  %v1049_v22 = vld [vmem:[#allocation5 + $0x600] sm:$0xff]  ;;  %v488_v16 = vmul.f32 %v8545_v50, %v8545_v50  ;;  %v7216_v23 = vcombine.high %v1065_v42, %v1073_v40  ;;  %v611_v21 = vadd.f32 %v610_v35, %v491_v47  ;;  %v605_v12 = vadd.f32 %v486_v56, %v485_v55 }
 0x101   :  { %v1057_v32 = vld [vmem:[#allocation5 + $0x640] sm:$0xff]  ;;  %4032 = vmatpush2.bf16.msra.mxu0 %v7231_v49  ;;  %v7472_v61 = vcombine.high %v1321_v38, %v1329_v43  ;;  %v7215_v0 = vcombine.low %v1065_v42, %v1073_v40  ;;  %598 = vadd.xlane.f32.xlu1 %v597_v33  ;;  %v7471_v41 = vcombine.low %v1321_v38, %v1329_v43 }
 0x102   :  { %v1305_v9 = vld [vmem:[#allocation5 + $0xe00] sm:$0xff]  ;;  %4193 = vmatpush2.bf16.msra.mxu1 %v7487_v14  ;;  %v7200_v48 = vcombine.high %v1049_v22, %v1057_v32  ;;  %v612_v10 = vadd.f32 %v611_v21, %v492_v36  ;;  %v606_v24 = vadd.f32 %v605_v12, %v487_v26  ;;  %4033 = vmatprep.subr.bf16.mxu0 %v7216_v23 }
 0x103   :  { %v1313_v8 = vld [vmem:[#allocation5 + $0xe40] sm:$0xff]  ;;  %4194 = vmatprep.subr.bf16.mxu1 %v7472_v61  ;;  %v7199_v35 = vcombine.low %v1049_v22, %v1057_v32 }
 0x104   :  { %v7456_v20 = vcombine.high %v1305_v9, %v1313_v8  ;;  %v1033_v50 = vld [vmem:[#allocation5 + $0x580] sm:$0xff]  ;;  %613 = vadd.xlane.f32.xlu0 %v612_v10  ;;  %v607_v15 = vadd.f32 %v606_v24, %v488_v16  ;;  %v7455_v47 = vcombine.low %v1305_v9, %v1313_v8 }
 0x105   :  { %v1289_v19 = vld [vmem:[#allocation5 + $0xd80] sm:$0xff]  ;;  %4034 = vmatpush2.bf16.msra.mxu0 %v7215_v0  ;;  %v7184_v56 = vcombine.high %v1033_v50, %v1041_v39  ;;  %v7183_v42 = vcombine.low %v1033_v50, %v1041_v39 }
 0x106   :  { %v1297_v59 = vld [vmem:[#allocation5 + $0xdc0] sm:$0xff]  ;;  %4195 = vmatpush2.bf16.msra.mxu1 %v7471_v41  ;;  %4035 = vmatprep.subr.bf16.mxu0 %v7200_v48 }
 0x107   :  { %608 = vadd.xlane.f32.xlu1 %v607_v15  ;;  %4196 = vmatprep.subr.bf16.mxu1 %v7456_v20  ;;  %v7440_v43 = vcombine.high %v1289_v19, %v1297_v59  ;;  %v1017_v21 = vld [vmem:[#allocation5 + $0x500] sm:$0xff]  ;;  %v7439_v40 = vcombine.low %v1289_v19, %v1297_v59  ;;  %v8559_v20 = vld [vmem:[#allocation5 + $0x388] sm:$0xff] }
 0x108   :  { %v1025_v12 = vld [vmem:[#allocation5 + $0x540] sm:$0xff]  ;;  %v8561_v19 = vld [vmem:[#allocation5 + $0x3c8] sm:$0xff] }
 0x109   :  { %v1273_v36 = vld [vmem:[#allocation5 + $0xd00] sm:$0xff]  ;;  %4036 = vmatpush2.bf16.msra.mxu0 %v7199_v35  ;;  %v7168_v55 = vcombine.high %v1017_v21, %v1025_v12  ;;  %v7167_v15 = vcombine.low %v1017_v21, %v1025_v12  ;;  %v8563_v59 = vld [vmem:[#allocation5 + $0xb88] sm:$0xff]  ;;  %v7122_v35 = vcombine.high %v8559_v20, %v8561_v19 }
 0x10a   :  { %v1281_v61 = vld [vmem:[#allocation5 + $0xd40] sm:$0xff]  ;;  %4197 = vmatpush2.bf16.msra.mxu1 %v7455_v47  ;;  %4037 = vmatprep.subr.bf16.mxu0 %v7184_v56  ;;  %v8567_v47 = vld [vmem:[#allocation5 + $0xbc8] sm:$0xff] }
 0x10b   :  { %4198 = vmatprep.subr.bf16.mxu1 %v7440_v43  ;;  %v7424_v0 = vcombine.high %v1273_v36, %v1281_v61  ;;  %v1001_v38 = vld [vmem:[#allocation5 + $0x480] sm:$0xff]  ;;  %v7423_v32 = vcombine.low %v1273_v36, %v1281_v61  ;;  %v7378_v56 = vcombine.high %v8563_v59, %v8567_v47 }
 0x10c   :  { %v1009_v26 = vld [vmem:[#allocation5 + $0x4c0] sm:$0xff] }
 0x10d   :  { %v1257_v49 = vld [vmem:[#allocation5 + $0xc80] sm:$0xff]  ;;  %4038 = vmatpush2.bf16.msra.mxu0 %v7183_v42  ;;  %v7152_v33 = vcombine.high %v1001_v38, %v1009_v26  ;;  %v7151_v9 = vcombine.low %v1001_v38, %v1009_v26 }
 0x10e   :  { %v1265_v22 = vld [vmem:[#allocation5 + $0xcc0] sm:$0xff]  ;;  %4199 = vmatpush2.bf16.msra.mxu1 %v7439_v40  ;;  %4039 = vmatprep.subr.bf16.mxu0 %v7168_v55 }
 0x10f   :  { %4200 = vmatprep.subr.bf16.mxu1 %v7424_v0  ;;  %v7408_v16 = vcombine.high %v1257_v49, %v1265_v22  ;;  %v985_v14 = vld [vmem:[#allocation5 + $0x400] sm:$0xff]  ;;  %v7407_v8 = vcombine.low %v1257_v49, %v1265_v22 }
 0x110   :  { %v993_v39 = vld [vmem:[#allocation5 + $0x440] sm:$0xff] }
 0x111   :  { %v1241_v50 = vld [vmem:[#allocation5 + $0xc00] sm:$0xff]  ;;  %4040 = vmatpush2.bf16.msra.mxu0 %v7167_v15  ;;  %v7136_v41 = vcombine.high %v985_v14, %v993_v39  ;;  %v7135_v10 = vcombine.low %v985_v14, %v993_v39  ;;  %v10504_v14 = vld [vmem:[#allocation60_spill] sm:$0xff]  ;;  %v10505_v39 = vld [vmem:[#allocation61_spill] sm:$0xff] }
 0x112   :  { %v1249_v23 = vld [vmem:[#allocation5 + $0xc40] sm:$0xff]  ;;  %4201 = vmatpush2.bf16.msra.mxu1 %v7423_v32  ;;  %4041 = vmatprep.subr.bf16.mxu0 %v7152_v33 }
 0x113   :  { %4202 = vmatprep.subr.bf16.mxu1 %v7408_v16  ;;  %v7392_v48 = vcombine.high %v1241_v50, %v1249_v23  ;;  %v7391_v24 = vcombine.low %v1241_v50, %v1249_v23 }
 0x115   :  { %4042 = vmatpush2.bf16.msra.mxu0 %v7151_v9 }
 0x116   :  { %4203 = vmatpush2.bf16.msra.mxu1 %v7407_v8  ;;  %4043 = vmatprep.subr.bf16.mxu0 %v7136_v41 }
 0x117   :  { %4204 = vmatprep.subr.bf16.mxu1 %v7392_v48  ;;  %v10506_v48 = vld [vmem:[#allocation64_spill] sm:$0xff] }
 0x119   :  { %4044 = vmatpush2.bf16.msra.mxu0 %v7135_v10 }
 0x11a   :  { %4205 = vmatpush2.bf16.msra.mxu1 %v7391_v24  ;;  %4335 = vmatprep.subr.bf16.mxu0 %v7122_v35 }
 0x11b   :  { %4496 = vmatprep.subr.bf16.mxu1 %v7378_v56 }
 0x14e   :  { %v509_v43 = vpop.xlane.xlu0 %508 }
 0x14f   :  { %v630_v21 = vmul.f32 0.001953125, %v509_v43 }
 0x151   :  { %v655_v12 = vadd.f32 1e-06, %v630_v21  ;;  %v10507_v21 = vld [vmem:[#allocation66_spill] sm:$0xff] }
 0x152   :  { %v268_v61 = vpop.xlane.xlu0 %267 }
 0x153   :  { %v514_v36 = vpop.xlane.xlu1 %513  ;;  %7529 = vrsqrt.f32 %v655_v12  ;;  %v302_v40 = vmul.f32 0.001953125, %v268_v61 }
 0x154   :  { %v631_v42 = vmul.f32 0.001953125, %v514_v36 }
 0x155   :  { %v8572_v0 = vsub.f32 %v7983_v37, %v302_v40  ;;  %v8575_v38 = vsub.f32 %v7985_v30, %v302_v40  ;;  %v8578_v26 = vsub.f32 %v8001_v63, %v302_v40  ;;  %v8581_v15 = vsub.f32 %v8010_v60, %v302_v40 }
 0x156   :  { %v656_v55 = vadd.f32 1e-06, %v631_v42  ;;  %v519_v22 = vpop.xlane.xlu0 %518  ;;  %v10508_v42 = vld [vmem:[#allocation62_spill] sm:$0xff] }
 0x157   :  { %v273_v49 = vpop.xlane.xlu1 %272  ;;  %v632_v33 = vmul.f32 0.001953125, %v519_v22  ;;  %v493_v16 = vmul.f32 %v8572_v0, %v8572_v0  ;;  %v494_v37 = vmul.f32 %v8575_v38, %v8575_v38  ;;  %v495_v30 = vmul.f32 %v8578_v26, %v8578_v26  ;;  %v10511_v22 = vld [vmem:[#allocation65_spill] sm:$0xff] }
 0x158   :  { %7531 = vrsqrt.f32 %v656_v55  ;;  %v303_v32 = vmul.f32 0.001953125, %v273_v49  ;;  %v496_v8 = vmul.f32 %v8581_v15, %v8581_v15  ;;  %v10510_v55 = vld [vmem:[#allocation63_spill] sm:$0xff] }
 0x159   :  { %v657_v60 = vadd.f32 1e-06, %v632_v33  ;;  %v615_v41 = vadd.f32 %v494_v37, %v493_v16 }
 0x15a   :  { %v8590_v63 = vsub.f32 %v10504_v14, %v303_v32  ;;  %v8593_v50 = vsub.f32 %v10505_v39, %v303_v32  ;;  %v8598_v10 = vsub.f32 %v10506_v48, %v303_v32  ;;  %v8603_v12 = vsub.f32 %v10507_v21, %v303_v32  ;;  %v10513_v14 = vld [vmem:[#allocation67_spill] sm:$0xff] }
 0x15b   :  { %v524_v23 = vpop.xlane.xlu1 %523  ;;  %v278_v9 = vpop.xlane.xlu0 %277  ;;  %7533 = vrsqrt.f32 %v657_v60  ;;  %v616_v43 = vadd.f32 %v615_v41, %v495_v30 }
 0x15c   :  { %v633_v24 = vmul.f32 0.001953125, %v524_v23  ;;  %v304_v35 = vmul.f32 0.001953125, %v278_v9  ;;  %v497_v56 = vmul.f32 %v8590_v63, %v8590_v63  ;;  %v498_v36 = vmul.f32 %v8593_v50, %v8593_v50 }
 0x15d   :  { %v617_v37 = vadd.f32 %v616_v43, %v496_v8  ;;  %v499_v30 = vmul.f32 %v8598_v10, %v8598_v10  ;;  %v500_v8 = vmul.f32 %v8603_v12, %v8603_v12 }
 0x15e   :  { %v658_v61 = vadd.f32 1e-06, %v633_v24  ;;  %v8608_v40 = vsub.f32 %v10508_v42, %v304_v35  ;;  %v8611_v49 = vsub.f32 %v10510_v55, %v304_v35  ;;  %v8614_v33 = vsub.f32 %v10511_v22, %v304_v35 }
 0x15f   :  { %v534_v16 = vpop.xlane.xlu0 %533  ;;  %v620_v32 = vadd.f32 %v498_v36, %v497_v56  ;;  %v8619_v39 = vsub.f32 %v10513_v14, %v304_v35  ;;  %618 = vadd.xlane.f32.xlu1 %v617_v37  ;;  %v7121_v37 = vcombine.low %v8559_v20, %v8561_v19  ;;  %v8643_v20 = vld [vmem:[#allocation5 + $0xb08] sm:$0xff] }
 0x160   :  { %10509 = vst [vmem:[#allocation50_spill] sm:$0xff] %v8608_v40  ;;  %10512 = vst [vmem:[#allocation39_spill] sm:$0xff] %v8614_v33  ;;  %7535 = vrsqrt.f32 %v658_v61  ;;  %v529_v60 = vpop.xlane.xlu1 %528  ;;  %v635_v23 = vmul.f32 0.001953125, %v534_v16  ;;  %v501_v9 = vmul.f32 %v8608_v40, %v8608_v40  ;;  %v502_v41 = vmul.f32 %v8611_v49, %v8611_v49  ;;  %v7530_v48 = vpop.eup %7529  ;;  %v10515_v16 = vld [vmem:[#allocation69_spill] sm:$0xff]  ;;  %v8645_v19 = vld [vmem:[#allocation5 + $0xb48] sm:$0xff] }
 0x161   :  { %10514 = vst [vmem:[#allocation44_spill] sm:$0xff] %v8619_v39  ;;  %v634_v24 = vmul.f32 0.001953125, %v529_v60  ;;  %v621_v43 = vadd.f32 %v620_v32, %v499_v30  ;;  %v503_v35 = vmul.f32 %v8614_v33, %v8614_v33  ;;  %v504_v21 = vmul.f32 %v8619_v39, %v8619_v39  ;;  %v10516_v32 = vld [vmem:[#allocation71_spill] sm:$0xff]  ;;  %v10517_v33 = vld [vmem:[#allocation68_spill] sm:$0xff] }
 0x162   :  { %v660_v56 = vadd.f32 1e-06, %v635_v23  ;;  %v625_v36 = vadd.f32 %v502_v41, %v501_v9  ;;  %v706_v14 = vmul.f32 %v7530_v48, %v10515_v16  ;;  %v708_v23 = vmul.f32 %v7530_v48, %v10516_v32  ;;  %v8636_v39 = vld [vmem:[#allocation5 + $0x308] sm:$0xff] }
 0x163   :  { %v659_v61 = vadd.f32 1e-06, %v634_v24  ;;  %v622_v42 = vadd.f32 %v621_v43, %v500_v8  ;;  %v705_v40 = vmul.f32 %v7530_v48, %v10517_v33  ;;  %v8641_v43 = vld [vmem:[#allocation5 + $0x348] sm:$0xff]  ;;  %v10519_v33 = vld [vmem:[#allocation74_spill] sm:$0xff] }
 0x164   :  { %7537 = vrsqrt.f32 %v660_v56  ;;  %v626_v22 = vadd.f32 %v625_v36, %v503_v35  ;;  %v10518_v36 = vld [vmem:[#allocation70_spill] sm:$0xff]  ;;  %v8671_v32 = vld [vmem:[#allocation5 + $0x208] sm:$0xff] }
 0x165   :  { %v544_v55 = vpop.xlane.xlu0 %543  ;;  %v7532_v60 = vpop.eup %7531  ;;  %7539 = vrsqrt.f32 %v659_v61  ;;  %623 = vadd.xlane.f32.xlu0 %v622_v42  ;;  %v707_v61 = vmul.f32 %v7530_v48, %v10518_v36  ;;  %v8663_v48 = vld [vmem:[#allocation5 + $0xac8] sm:$0xff] }
 0x166   :  { %v637_v30 = vmul.f32 0.001953125, %v544_v55  ;;  %v627_v9 = vadd.f32 %v626_v22, %v504_v21  ;;  %v710_v41 = vmul.f32 %v7532_v60, %v8056_v3  ;;  %v712_v24 = vmul.f32 %v7532_v60, %v8062_v52  ;;  %v8651_v3 = vld [vmem:[#allocation5 + $0x288] sm:$0xff] }
 0x167   :  { %v709_v8 = vmul.f32 %v7532_v60, %v8053_v46  ;;  %v711_v42 = vmul.f32 %v7532_v60, %v10519_v33  ;;  %v7377_v21 = vcombine.low %v8563_v59, %v8567_v47  ;;  %v8653_v52 = vld [vmem:[#allocation5 + $0x2c8] sm:$0xff]  ;;  %v7106_v59 = vcombine.high %v8636_v39, %v8641_v43 }
 0x168   :  { %v539_v35 = vpop.xlane.xlu1 %538  ;;  %v662_v56 = vadd.f32 1e-06, %v637_v30  ;;  %628 = vadd.xlane.f32.xlu1 %v627_v9  ;;  %v8655_v55 = vpack.c.bf16 %v710_v41, %v706_v14  ;;  %v8657_v22 = vpack.c.bf16 %v712_v24, %v708_v23  ;;  %v8661_v30 = vld [vmem:[#allocation5 + $0xa88] sm:$0xff]  ;;  %v7362_v47 = vcombine.high %v8643_v20, %v8645_v19  ;;  %v7534_v23 = vpop.eup %7533 }
 0x169   :  { %v636_v46 = vmul.f32 0.001953125, %v539_v35  ;;  %v8659_v16 = vpack.c.bf16 %v709_v8, %v705_v40  ;;  %v8665_v60 = vpack.c.bf16 %v711_v42, %v707_v61  ;;  %v8673_v14 = vld [vmem:[#allocation5 + $0x248] sm:$0xff]  ;;  %v7105_v9 = vcombine.low %v8636_v39, %v8641_v43 }
 0x16a   :  { %10520 = vst [vmem:[#allocation51_spill] sm:$0xff] %v8655_v55  ;;  %10521 = vst [vmem:[#allocation56_spill] sm:$0xff] %v8657_v22  ;;  %7541 = vrsqrt.f32 %v662_v56  ;;  %4045 = vmatprep.mubr.bf16.mxu0 %v8655_v55  ;;  %4206 = vmatprep.mubr.bf16.mxu1 %v8657_v22  ;;  %v7361_v41 = vcombine.low %v8643_v20, %v8645_v19  ;;  %v7090_v35 = vcombine.high %v8651_v3, %v8653_v52  ;;  %v8695_v36 = vld [vmem:[#allocation5 + $0xa08] sm:$0xff] }
 0x16b   :  { %10522 = vst [vmem:[#allocation47_spill] sm:$0xff] %v8659_v16  ;;  %10523 = vst [vmem:[#allocation54_spill] sm:$0xff] %v8665_v60  ;;  %v661_v40 = vadd.f32 1e-06, %v636_v46  ;;  %4046 = vmatmul.mubr.bf16.vlgmr.msra.gmra.mxu0 %v8659_v16  ;;  %4207 = vmatmul.mubr.bf16.vlgmr.msra.gmra.mxu1 %v8665_v60  ;;  %v7345_v56 = vcombine.low %v8661_v30, %v8663_v48  ;;  %v7346_v39 = vcombine.high %v8661_v30, %v8663_v48  ;;  %v8697_v61 = vld [vmem:[#allocation5 + $0xa48] sm:$0xff]  ;;  %v10524_v30 = vld [vmem:[#allocation72_spill] sm:$0xff] }
 0x16c   :  { %v554_v8 = vpop.xlane.xlu0 %553  ;;  %4336 = vmatpush1.bf16.msra.mxu0 %v7121_v37  ;;  %4497 = vmatpush1.bf16.msra.mxu1 %v7377_v21  ;;  %v7074_v19 = vcombine.high %v8671_v32, %v8673_v14  ;;  %v714_v42 = vmul.f32 %v7534_v23, %v8045_v51  ;;  %v716_v46 = vmul.f32 %v7534_v23, %v8065_v45  ;;  %v8705_v24 = vld [vmem:[#allocation5 + $0x188] sm:$0xff]  ;;  %v10525_v51 = vld [vmem:[#allocation73_spill] sm:$0xff] }
 0x16d   :  { %7543 = vrsqrt.f32 %v661_v40  ;;  %v639_v43 = vmul.f32 0.001953125, %v554_v8  ;;  %v7536_v33 = vpop.eup %7535  ;;  %v713_v48 = vmul.f32 %v7534_v23, %v10524_v30  ;;  %4337 = vmatprep.subr.bf16.mxu0 %v7106_v59  ;;  %4498 = vmatprep.subr.bf16.mxu1 %v7362_v47  ;;  %v8707_v60 = vld [vmem:[#allocation5 + $0x1c8] sm:$0xff]  ;;  %v715_v22 = vmul.f32 %v7534_v23, %v10525_v51 }
 0x16e   :  { %v718_v40 = vmul.f32 %v7536_v33, %v8077_v11  ;;  %v720_v8 = vmul.f32 %v7536_v33, %v8101_v31  ;;  %v717_v20 = vmul.f32 %v7536_v33, %v8074_v34  ;;  %v719_v45 = vmul.f32 %v7536_v33, %v8098_v27  ;;  %v8713_v47 = vld [vmem:[#allocation5 + $0x988] sm:$0xff] }
 0x16f   :  { %v549_v37 = vpop.xlane.xlu1 %548  ;;  %v664_v21 = vadd.f32 1e-06, %v639_v43  ;;  %v7329_v59 = vcombine.low %v8695_v36, %v8697_v61  ;;  %v8715_v43 = vld [vmem:[#allocation5 + $0x9c8] sm:$0xff]  ;;  %v7330_v33 = vcombine.high %v8695_v36, %v8697_v61 }
 0x170   :  { %v638_v16 = vmul.f32 0.001953125, %v549_v37  ;;  %v8717_v11 = vpack.c.bf16 %v718_v40, %v714_v42  ;;  %v8719_v34 = vpack.c.bf16 %v720_v8, %v716_v46  ;;  %v8721_v31 = vpack.c.bf16 %v717_v20, %v713_v48  ;;  %4338 = vmatpush1.bf16.msra.mxu0 %v7105_v9  ;;  %4499 = vmatpush1.bf16.msra.mxu1 %v7361_v41  ;;  %v8745_v40 = vld [vmem:[#allocation5 + $0x108] sm:$0xff] }
 0x171   :  { %7545 = vrsqrt.f32 %v664_v21  ;;  %v7538_v30 = vpop.eup %7537  ;;  %v8723_v27 = vpack.c.bf16 %v719_v45, %v715_v22  ;;  %4339 = vmatprep.subr.bf16.mxu0 %v7090_v35  ;;  %4500 = vmatprep.subr.bf16.mxu1 %v7346_v39  ;;  %v7058_v42 = vcombine.high %v8705_v24, %v8707_v60  ;;  %v7314_v22 = vcombine.high %v8713_v47, %v8715_v43  ;;  %v8747_v8 = vld [vmem:[#allocation5 + $0x148] sm:$0xff] }
 0x172   :  { %10526 = vst [vmem:[#allocation57_spill] sm:$0xff] %v8717_v11  ;;  %10527 = vst [vmem:[#allocation59_spill] sm:$0xff] %v8719_v34  ;;  %v663_v23 = vadd.f32 1e-06, %v638_v16  ;;  %v564_v37 = vpop.xlane.xlu0 %563  ;;  %v7540_v21 = vpop.eup %7539  ;;  %4055 = vmatprep.mubr.bf16.mxu0 %v8717_v11  ;;  %4216 = vmatprep.mubr.bf16.mxu1 %v8719_v34  ;;  %v726_v9 = vmul.f32 %v7538_v30, %v8107_v7  ;;  %v728_v16 = vmul.f32 %v7538_v30, %v8131_v17 }
 0x173   :  { %10528 = vst [vmem:[#allocation55_spill] sm:$0xff] %v8721_v31  ;;  %10529 = vst [vmem:[#allocation58_spill] sm:$0xff] %v8723_v27  ;;  %v641_v46 = vmul.f32 0.001953125, %v564_v37  ;;  %4056 = vmatmul.mubr.bf16.gmra.mxu0 %v8721_v31  ;;  %4217 = vmatmul.mubr.bf16.gmra.mxu1 %v8723_v27  ;;  %v722_v35 = vmul.f32 %v7540_v21, %v8087_v2  ;;  %v724_v39 = vmul.f32 %v7540_v21, %v8164_v28 }
 0x174   :  { %7547 = vrsqrt.f32 %v663_v23  ;;  %v559_v41 = vpop.xlane.xlu1 %558  ;;  %v725_v20 = vmul.f32 %v7538_v30, %v8104_v5  ;;  %v721_v7 = vmul.f32 %v7540_v21, %v8084_v1  ;;  %v723_v17 = vmul.f32 %v7540_v21, %v8158_v53  ;;  %4501 = vmatpush1.bf16.msra.mxu1 %v7345_v56  ;;  %v10533_v5 = vld [vmem:[#allocation77_spill] sm:$0xff]  ;;  %v8754_v53 = vld [vmem:[#allocation5 + $0x908] sm:$0xff] }
 0x175   :  { %v640_v36 = vmul.f32 0.001953125, %v559_v41  ;;  %v666_v61 = vadd.f32 1e-06, %v641_v46  ;;  %v10530_v48 = vcombine.low %v8651_v3, %v8653_v52  ;;  %v8749_v2 = vpack.c.bf16 %v726_v9, %v722_v35  ;;  %4502 = vmatprep.subr.bf16.mxu1 %v7330_v33  ;;  %v8756_v3 = vld [vmem:[#allocation5 + $0x948] sm:$0xff] }
 0x176   :  { %v8751_v28 = vpack.c.bf16 %v728_v16, %v724_v39  ;;  %v727_v51 = vmul.f32 %v7538_v30, %v10533_v5  ;;  %v7057_v52 = vcombine.low %v8705_v24, %v8707_v60  ;;  %v7313_v56 = vcombine.low %v8713_v47, %v8715_v43  ;;  %v10534_v23 = vld [vmem:[#allocation79_spill] sm:$0xff]  ;;  %v10540_v39 = vld [vmem:[#allocation13_spill] sm:$0xff]  ;;  %v10543_v5 = vld [vmem:[#allocation86_spill] sm:$0xff] }
 0x177   :  { %4340 = vmatpush1.bf16.msra.mxu0 %v10530_v48  ;;  %10531 = vst [vmem:[#allocation60_spill] sm:$0xff] %v8749_v2  ;;  %v7542_v1 = vpop.eup %7541  ;;  %v665_v45 = vadd.f32 1e-06, %v640_v36  ;;  %7549 = vrsqrt.f32 %v666_v61  ;;  %4065 = vmatprep.mubr.bf16.mxu0 %v8749_v2  ;;  %v10535_v33 = vld [vmem:[#allocation87_spill] sm:$0xff]  ;;  %v10536_v46 = vcombine.low %v8671_v32, %v8673_v14  ;;  %v7042_v60 = vcombine.high %v8745_v40, %v8747_v8  ;;  %v10539_v14 = vld [vmem:[#allocation76_spill] sm:$0xff] }
 0x178   :  { %10532 = vst [vmem:[#allocation61_spill] sm:$0xff] %v8751_v28  ;;  %4341 = vmatprep.subr.bf16.mxu0 %v7074_v19  ;;  %4226 = vmatprep.mubr.bf16.mxu1 %v8751_v28  ;;  %v7041_v19 = vcombine.low %v8745_v40, %v8747_v8  ;;  %v734_v37 = vmul.f32 %v7542_v1, %v10534_v23  ;;  %v8779_v35 = vld [vmem:[#allocation5 + $0x88] sm:$0xff]  ;;  %v10542_v40 = vld [vmem:[#allocation78_spill] sm:$0xff] }
 0x179   :  { %7551 = vrsqrt.f32 %v665_v45  ;;  %v574_v30 = vpop.xlane.xlu0 %573  ;;  %v736_v21 = vmul.f32 %v7542_v1, %v10535_v33  ;;  %4503 = vmatpush1.bf16.msra.mxu1 %v7329_v59  ;;  %v8773_v43 = vpack.c.bf16 %v725_v20, %v721_v7  ;;  %v8775_v16 = vpack.c.bf16 %v727_v51, %v723_v17  ;;  %v8785_v48 = vld [vmem:[#allocation5 + $0xc8] sm:$0xff] }
 0x17a   :  { %v7544_v24 = vpop.eup %7543  ;;  %v643_v47 = vmul.f32 0.001953125, %v574_v30  ;;  %4504 = vmatprep.subr.bf16.mxu1 %v7314_v22  ;;  %v7298_v41 = vcombine.high %v8754_v53, %v8756_v3  ;;  %v7297_v61 = vcombine.low %v8754_v53, %v8756_v3  ;;  %v8787_v20 = vld [vmem:[#allocation5 + $0x888] sm:$0xff]  ;;  %v733_v8 = vmul.f32 %v7542_v1, %v10542_v40  ;;  %v10546_v3 = vld [vmem:[#allocation12_spill] sm:$0xff] }
 0x17b   :  { %4342 = vmatpush1.bf16.msra.mxu0 %v10536_v46  ;;  %v569_v9 = vpop.xlane.xlu1 %568  ;;  %10537 = vst [vmem:[#allocation64_spill] sm:$0xff] %v8773_v43  ;;  %10538 = vst [vmem:[#allocation66_spill] sm:$0xff] %v8775_v16  ;;  %v730_v59 = vmul.f32 %v7544_v24, %v10539_v14  ;;  %v732_v36 = vmul.f32 %v7544_v24, %v10540_v39  ;;  %v8789_v7 = vld [vmem:[#allocation5 + $0x8c8] sm:$0xff]  ;;  %4227 = vmatmul.mubr.bf16.gmra.mxu1 %v8775_v16 }
 0x17c   :  { %4343 = vmatprep.subr.bf16.mxu0 %v7058_v42  ;;  %v642_v32 = vmul.f32 0.001953125, %v569_v9  ;;  %v668_v42 = vadd.f32 1e-06, %v643_v47  ;;  %4066 = vmatmul.mubr.bf16.gmra.mxu0 %v8773_v43  ;;  %v10541_v22 = vld [vmem:[#allocation75_spill] sm:$0xff]  ;;  %v735_v51 = vmul.f32 %v7542_v1, %v10543_v5  ;;  %v731_v23 = vmul.f32 %v7544_v24, %v10546_v3 }
 0x17d   :  { %v729_v17 = vmul.f32 %v7544_v24, %v10541_v22  ;;  %v8796_v30 = vpack.c.bf16 %v734_v37, %v730_v59  ;;  %v8798_v53 = vpack.c.bf16 %v736_v21, %v732_v36  ;;  %4505 = vmatpush1.bf16.msra.mxu1 %v7313_v56  ;;  %v7026_v9 = vcombine.high %v8779_v35, %v8785_v48  ;;  %v8805_v47 = vld [vmem:[#allocation5 + $0x8] sm:$0xff]  ;;  %v10548_v24 = vld [vmem:[#allocation25_spill] sm:$0xff] }
 0x17e   :  { %v667_v45 = vadd.f32 1e-06, %v642_v32  ;;  %v7546_v33 = vpop.eup %7545  ;;  %7553 = vrsqrt.f32 %v668_v42  ;;  %4506 = vmatprep.subr.bf16.mxu1 %v7298_v41  ;;  %v7282_v1 = vcombine.high %v8787_v20, %v8789_v7  ;;  %v8807_v37 = vld [vmem:[#allocation5 + $0x48] sm:$0xff]  ;;  %v7025_v32 = vcombine.low %v8779_v35, %v8785_v48 }
 0x17f   :  { %10544 = vst [vmem:[#allocation62_spill] sm:$0xff] %v8796_v30  ;;  %10545 = vst [vmem:[#allocation63_spill] sm:$0xff] %v8798_v53  ;;  %4344 = vmatpush1.bf16.msra.mxu0 %v7057_v52  ;;  %v584_v46 = vpop.xlane.xlu0 %583  ;;  %4075 = vmatprep.mubr.bf16.mxu0 %v8796_v30  ;;  %v1114_v52 = vld [vmem:[#allocation5 + $0x808] sm:$0xff]  ;;  %v744_v41 = vmul.f32 %v7546_v33, %v10548_v24  ;;  %v7281_v14 = vcombine.low %v8787_v20, %v8789_v7  ;;  %v10552_v24 = vld [vmem:[#allocation29_spill] sm:$0xff] }
 0x180   :  { %4345 = vmatprep.subr.bf16.mxu0 %v7042_v60  ;;  %7555 = vrsqrt.f32 %v667_v45  ;;  %v645_v21 = vmul.f32 0.001953125, %v584_v46  ;;  %4236 = vmatprep.mubr.bf16.mxu1 %v8798_v53  ;;  %v10547_v56 = vld [vmem:[#allocation83_spill] sm:$0xff]  ;;  %v8821_v40 = vpack.c.bf16 %v733_v8, %v729_v17  ;;  %v8823_v5 = vpack.c.bf16 %v735_v51, %v731_v23  ;;  %v10551_v46 = vld [vmem:[#allocation81_spill] sm:$0xff] }
 0x181   :  { %v742_v60 = vmul.f32 %v7546_v33, %v10547_v56  ;;  %v1122_v59 = vld [vmem:[#allocation5 + $0x848] sm:$0xff]  ;;  %v7548_v42 = vpop.eup %7547  ;;  %4507 = vmatpush1.bf16.msra.mxu1 %v7297_v61  ;;  %v7009_v45 = vcombine.low %v8805_v47, %v8807_v37 }
 0x182   :  { %v8817_v39 = vld [vmem:[#allocation5 + $0x788] sm:$0xff]  ;;  %v579_v22 = vpop.xlane.xlu1 %578  ;;  %10549 = vst [vmem:[#allocation65_spill] sm:$0xff] %v8821_v40  ;;  %10550 = vst [vmem:[#allocation67_spill] sm:$0xff] %v8823_v5  ;;  %v670_v7 = vadd.f32 1e-06, %v645_v21  ;;  %v738_v56 = vmul.f32 %v7548_v42, %v10551_v46  ;;  %v740_v53 = vmul.f32 %v7548_v42, %v10552_v24  ;;  %4508 = vmatprep.subr.bf16.mxu1 %v7282_v1  ;;  %v10557_v24 = vld [vmem:[#allocation24_spill] sm:$0xff] }
 0x183   :  { %v8819_v36 = vld [vmem:[#allocation5 + $0x7c8] sm:$0xff]  ;;  %4346 = vmatpush1.bf16.msra.mxu0 %v7041_v19  ;;  %v644_v20 = vmul.f32 0.001953125, %v579_v22  ;;  %v594_v3 = vpop.xlane.xlu0 %593  ;;  %v7010_v19 = vcombine.high %v8805_v47, %v8807_v37  ;;  %v7265_v61 = vcombine.low %v1114_v52, %v1122_v59  ;;  %v7266_v17 = vcombine.high %v1114_v52, %v1122_v59  ;;  %4237 = vmatmul.mubr.bf16.gmra.mxu1 %v8823_v5  ;;  %v10555_v37 = vld [vmem:[#allocation80_spill] sm:$0xff]  ;;  %v10556_v59 = vld [vmem:[#allocation82_spill] sm:$0xff] }
 0x184   :  { %v8827_v35 = vld [vmem:[#allocation5 + $0xf88] sm:$0xff]  ;;  %4347 = vmatprep.subr.bf16.mxu0 %v7026_v9  ;;  %v7250_v8 = vcombine.high %v8817_v39, %v8819_v36  ;;  %v8837_v51 = vpop.eup %7549  ;;  %4076 = vmatmul.mubr.bf16.gmra.mxu0 %v8821_v40  ;;  %v8841_v21 = vpack.c.bf16 %v742_v60, %v738_v56  ;;  %v8843_v22 = vpack.c.bf16 %v744_v41, %v740_v53  ;;  %v647_v47 = vmul.f32 0.001953125, %v594_v3  ;;  %v10559_v41 = vld [vmem:[#allocation89_spill] sm:$0xff] }
 0x185   :  { %v8829_v48 = vld [vmem:[#allocation5 + $0xfc8] sm:$0xff]  ;;  %v669_v23 = vadd.f32 1e-06, %v644_v20  ;;  %v737_v52 = vmul.f32 %v7548_v42, %v10555_v37  ;;  %v741_v46 = vmul.f32 %v7546_v33, %v10556_v59  ;;  %v743_v30 = vmul.f32 %v7546_v33, %v10557_v24  ;;  %4509 = vmatpush1.bf16.msra.mxu1 %v7281_v14  ;;  %v10560_v56 = vld [vmem:[#allocation85_spill] sm:$0xff]  ;;  %v10562_v33 = vld [vmem:[#allocation16_spill] sm:$0xff] }
 0x186   :  { %10553 = vst [vmem:[#allocation69_spill] sm:$0xff] %v8841_v21  ;;  %10554 = vst [vmem:[#allocation71_spill] sm:$0xff] %v8843_v22  ;;  %v7506_v9 = vcombine.high %v8827_v35, %v8829_v48  ;;  %v589_v1 = vpop.xlane.xlu1 %588  ;;  %v7552_v20 = vpop.eup %7551  ;;  %7557 = vrsqrt.f32 %v670_v7  ;;  %4085 = vmatprep.mubr.bf16.mxu0 %v8841_v21  ;;  %4246 = vmatprep.mubr.bf16.mxu1 %v8843_v22  ;;  %v10558_v53 = vld [vmem:[#allocation15_spill] sm:$0xff]  ;;  %v750_v3 = vmul.f32 %v8837_v51, %v10559_v41  ;;  %v10561_v59 = vld [vmem:[#allocation37_spill] sm:$0xff] }
 0x187   :  { %4348 = vmatpush1.bf16.msra.mxu0 %v7025_v32  ;;  %v646_v5 = vmul.f32 0.001953125, %v589_v1  ;;  %v739_v60 = vmul.f32 %v7548_v42, %v10558_v53  ;;  %7559 = vrsqrt.f32 %v669_v23  ;;  %v746_v37 = vmul.f32 %v7552_v20, %v10560_v56  ;;  %4510 = vmatprep.subr.bf16.mxu1 %v7266_v17  ;;  %v1082_v14 = vld [vmem:[#allocation5 + $0x708] sm:$0xff] }
 0x188   :  { %v748_v40 = vmul.f32 %v7552_v20, %v10561_v59  ;;  %v752_v32 = vmul.f32 %v8837_v51, %v10562_v33  ;;  %4349 = vmatprep.subr.bf16.mxu0 %v7010_v19  ;;  %v1090_v7 = vld [vmem:[#allocation5 + $0x748] sm:$0xff]  ;;  %v672_v42 = vadd.f32 1e-06, %v647_v47  ;;  %v7249_v23 = vcombine.low %v8817_v39, %v8819_v36  ;;  %v604_v59 = vpop.xlane.xlu0 %603 }
 0x189   :  { %v1338_v1 = vld [vmem:[#allocation5 + $0xf08] sm:$0xff]  ;;  %4511 = vmatpush1.bf16.msra.mxu1 %v7265_v61  ;;  %v7505_v53 = vcombine.low %v8827_v35, %v8829_v48  ;;  %v671_v17 = vadd.f32 1e-06, %v646_v5  ;;  %v8871_v33 = vpack.c.bf16 %v741_v46, %v737_v52  ;;  %v8873_v21 = vpack.c.bf16 %v743_v30, %v739_v60  ;;  %v10566_v46 = vld [vmem:[#allocation30_spill] sm:$0xff] }
 0x18a   :  { %v1346_v24 = vld [vmem:[#allocation5 + $0xf48] sm:$0xff]  ;;  %4512 = vmatprep.subr.bf16.mxu1 %v7506_v9  ;;  %v8877_v39 = vpack.c.bf16 %v750_v3, %v746_v37  ;;  %v8879_v36 = vpack.c.bf16 %v752_v32, %v748_v40  ;;  %v7234_v35 = vcombine.high %v1082_v14, %v1090_v7  ;;  %v599_v16 = vpop.xlane.xlu1 %598  ;;  %7561 = vrsqrt.f32 %v672_v42  ;;  %v10565_v40 = vld [vmem:[#allocation88_spill] sm:$0xff]  ;;  %v10568_v32 = vld [vmem:[#allocation26_spill] sm:$0xff] }
 0x18b   :  { %v8859_v22 = vld [vmem:[#allocation5 + $0x688] sm:$0xff]  ;;  %4350 = vmatpush1.bf16.msra.mxu0 %v7009_v45  ;;  %v7233_v45 = vcombine.low %v1082_v14, %v1090_v7  ;;  %v8875_v61 = vpop.eup %7553  ;;  %v7490_v48 = vcombine.high %v1338_v1, %v1346_v24  ;;  %4247 = vmatmul.mubr.bf16.gmra.mxu1 %v8873_v21  ;;  %v7489_v5 = vcombine.low %v1338_v1, %v1346_v24  ;;  %v649_v9 = vmul.f32 0.001953125, %v604_v59  ;;  %v10567_v3 = vld [vmem:[#allocation84_spill] sm:$0xff] }
 0x18c   :  { %v8865_v41 = vld [vmem:[#allocation5 + $0x6c8] sm:$0xff]  ;;  %4351 = vmatprep.subr.bf16.mxu0 %v7250_v8  ;;  %10563 = vst [vmem:[#allocation68_spill] sm:$0xff] %v8877_v39  ;;  %10564 = vst [vmem:[#allocation70_spill] sm:$0xff] %v8879_v36  ;;  %4086 = vmatmul.mubr.bf16.gmra.mxu0 %v8871_v33  ;;  %v749_v52 = vmul.f32 %v8837_v51, %v10565_v40  ;;  %v751_v60 = vmul.f32 %v8837_v51, %v10566_v46  ;;  %7563 = vrsqrt.f32 %v671_v17  ;;  %v8901_v46 = vld [vmem:[#allocation5 + $0x390] sm:$0xff] }
 0x18d   :  { %v8867_v56 = vld [vmem:[#allocation5 + $0xe88] sm:$0xff]  ;;  %v7556_v47 = vpop.eup %7555  ;;  %v7218_v30 = vcombine.high %v8859_v22, %v8865_v41  ;;  %4095 = vmatprep.mubr.bf16.mxu0 %v8877_v39  ;;  %4256 = vmatprep.mubr.bf16.mxu1 %v8879_v36  ;;  %v745_v37 = vmul.f32 %v7552_v20, %v10567_v3  ;;  %v747_v14 = vmul.f32 %v7552_v20, %v10568_v32  ;;  %v648_v1 = vmul.f32 0.001953125, %v599_v16  ;;  %v10571_v39 = vld [vmem:[#allocation17_spill] sm:$0xff]  ;;  %v8907_v3 = vld [vmem:[#allocation5 + $0x3d0] sm:$0xff]  ;;  %v614_v32 = vpop.xlane.xlu0 %613 }
 0x18e   :  { %v8869_v19 = vld [vmem:[#allocation5 + $0xec8] sm:$0xff]  ;;  %v758_v7 = vmul.f32 %v8875_v61, %v8247_v62  ;;  %4513 = vmatpush2.bf16.msra.mxu1 %v7505_v53  ;;  %v760_v40 = vmul.f32 %v8875_v61, %v10571_v39  ;;  %v674_v20 = vadd.f32 1e-06, %v649_v9  ;;  %v7217_v62 = vcombine.low %v8859_v22, %v8865_v41 }
 0x18f   :  { %v7474_v8 = vcombine.high %v8867_v56, %v8869_v19  ;;  %4352 = vmatpush2.bf16.msra.mxu0 %v7249_v23  ;;  %v10569_v24 = vld [vmem:[#allocation91_spill] sm:$0xff]  ;;  %4514 = vmatprep.subr.bf16.mxu1 %v7490_v48  ;;  %v7473_v16 = vcombine.low %v8867_v56, %v8869_v19  ;;  %v8911_v39 = vpack.c.bf16 %v751_v60, %v747_v14  ;;  %v673_v9 = vadd.f32 1e-06, %v648_v1 }
 0x190   :  { %v754_v42 = vmul.f32 %v7556_v47, %v10569_v24  ;;  %v10570_v59 = vld [vmem:[#allocation27_spill] sm:$0xff]  ;;  %4353 = vmatprep.subr.bf16.mxu0 %v7234_v35  ;;  %v8909_v24 = vpack.c.bf16 %v749_v52, %v745_v37  ;;  %7565 = vrsqrt.f32 %v674_v20  ;;  %v651_v60 = vmul.f32 0.001953125, %v614_v32 }
 0x191   :  { %v756_v36 = vmul.f32 %v7556_v47, %v10570_v59  ;;  %v1050_v51 = vld [vmem:[#allocation5 + $0x608] sm:$0xff]  ;;  %v609_v59 = vpop.xlane.xlu1 %608  ;;  %7567 = vrsqrt.f32 %v673_v9 }
 0x192   :  { %v1058_v17 = vld [vmem:[#allocation5 + $0x648] sm:$0xff]  ;;  %4515 = vmatpush2.bf16.msra.mxu1 %v7489_v5  ;;  %v8915_v22 = vpack.c.bf16 %v758_v7, %v754_v42  ;;  %v650_v14 = vmul.f32 0.001953125, %v609_v59  ;;  %v10576_v7 = vld [vmem:[#allocation20_spill] sm:$0xff]  ;;  %v10577_v42 = vld [vmem:[#allocation38_spill] sm:$0xff] }
 0x193   :  { %v1306_v23 = vld [vmem:[#allocation5 + $0xe08] sm:$0xff]  ;;  %4354 = vmatpush2.bf16.msra.mxu0 %v7233_v45  ;;  %v7202_v35 = vcombine.high %v1050_v51, %v1058_v17  ;;  %v8913_v48 = vpop.eup %7557  ;;  %v8917_v41 = vpack.c.bf16 %v760_v40, %v756_v36  ;;  %4516 = vmatprep.subr.bf16.mxu1 %v7474_v8  ;;  %v7201_v45 = vcombine.low %v1050_v51, %v1058_v17  ;;  %v10574_v36 = vld [vmem:[#allocation90_spill] sm:$0xff]  ;;  %v10575_v8 = vld [vmem:[#allocation21_spill] sm:$0xff] }
 0x194   :  { %v1314_v53 = vld [vmem:[#allocation5 + $0xe48] sm:$0xff]  ;;  %10572 = vst [vmem:[#allocation74_spill] sm:$0xff] %v8915_v22  ;;  %4355 = vmatprep.subr.bf16.mxu0 %v7218_v30  ;;  %v7560_v19 = vpop.eup %7559  ;;  %4096 = vmatmul.mubr.bf16.gmra.mxu0 %v8909_v24  ;;  %v753_v30 = vmul.f32 %v7556_v47, %v10574_v36  ;;  %v757_v37 = vmul.f32 %v8875_v61, %v10575_v8  ;;  %v10578_v51 = vld [vmem:[#allocation14_spill] sm:$0xff]  ;;  %v675_v9 = vadd.f32 1e-06, %v650_v14 }
 0x195   :  { %10573 = vst [vmem:[#allocation72_spill] sm:$0xff] %v8917_v41  ;;  %4257 = vmatmul.mubr.bf16.gmra.mxu1 %v8911_v39  ;;  %v7457_v5 = vcombine.low %v1306_v23, %v1314_v53  ;;  %v7458_v52 = vcombine.high %v1306_v23, %v1314_v53  ;;  %4105 = vmatprep.mubr.bf16.mxu0 %v8915_v22  ;;  %v1034_v20 = vld [vmem:[#allocation5 + $0x588] sm:$0xff]  ;;  %v10580_v14 = vld [vmem:[#allocation18_spill] sm:$0xff] }
 0x196   :  { %4266 = vmatprep.mubr.bf16.mxu1 %v8917_v41  ;;  %v755_v1 = vmul.f32 %v7556_v47, %v10576_v7  ;;  %v759_v40 = vmul.f32 %v8875_v61, %v10577_v42  ;;  %v766_v17 = vmul.f32 %v8913_v48, %v10578_v51  ;;  %v1042_v23 = vld [vmem:[#allocation5 + $0x5c8] sm:$0xff]  ;;  %v762_v53 = vmul.f32 %v7560_v19, %v8259_v6 }
 0x197   :  { %4356 = vmatpush2.bf16.msra.mxu0 %v7217_v62  ;;  %v764_v32 = vmul.f32 %v7560_v19, %v8449_v58  ;;  %v768_v36 = vmul.f32 %v8913_v48, %v8417_v29  ;;  %4517 = vmatpush2.bf16.msra.mxu1 %v7473_v16  ;;  %v1290_v47 = vld [vmem:[#allocation5 + $0xd88] sm:$0xff]  ;;  %v676_v61 = vadd.f32 1e-06, %v651_v60  ;;  %v7186_v8 = vcombine.high %v1034_v20, %v1042_v23  ;;  %v8939_v51 = vpop.eup %7561 }
 0x198   :  { %4357 = vmatprep.subr.bf16.mxu0 %v7202_v35  ;;  %v1298_v59 = vld [vmem:[#allocation5 + $0xdc8] sm:$0xff]  ;;  %4518 = vmatprep.subr.bf16.mxu1 %v7458_v52  ;;  %v8941_v6 = vpack.c.bf16 %v757_v37, %v753_v30  ;;  %v8943_v58 = vpack.c.bf16 %v759_v40, %v755_v1  ;;  %v8947_v35 = vld [vmem:[#allocation5 + $0xb90] sm:$0xff]  ;;  %v8951_v56 = vpack.c.bf16 %v766_v17, %v762_v53  ;;  %v10581_v17 = vld [vmem:[#allocation22_spill] sm:$0xff] }
 0x199   :  { %v1018_v7 = vld [vmem:[#allocation5 + $0x508] sm:$0xff]  ;;  %v7442_v29 = vcombine.high %v1290_v47, %v1298_v59  ;;  %v8949_v52 = vld [vmem:[#allocation5 + $0xbd0] sm:$0xff]  ;;  %v7564_v60 = vpop.eup %7563  ;;  %v8953_v41 = vpack.c.bf16 %v768_v36, %v764_v32  ;;  %v7185_v22 = vcombine.low %v1034_v20, %v1042_v23  ;;  %v7441_v30 = vcombine.low %v1290_v47, %v1298_v59  ;;  %v10583_v32 = vld [vmem:[#allocation45_spill] sm:$0xff] }
 0x19a   :  { %v1026_v42 = vld [vmem:[#allocation5 + $0x548] sm:$0xff]  ;;  %7569 = vrsqrt.f32 %v676_v61  ;;  %v765_v1 = vmul.f32 %v8913_v48, %v10580_v14  ;;  %v761_v20 = vmul.f32 %v7560_v19, %v10581_v17  ;;  %v767_v36 = vmul.f32 %v8913_v48, %v10583_v32 }
 0x19b   :  { %v8937_v62 = vld [vmem:[#allocation5 + $0xd08] sm:$0xff]  ;;  %4358 = vmatpush2.bf16.msra.mxu0 %v7201_v45  ;;  %10579 = vst [vmem:[#allocation73_spill] sm:$0xff] %v8953_v41  ;;  %4519 = vmatpush2.bf16.msra.mxu1 %v7457_v5  ;;  %v7169_v45 = vcombine.low %v1018_v7, %v1026_v42  ;;  %v7170_v37 = vcombine.high %v1018_v7, %v1026_v42  ;;  %7571 = vrsqrt.f32 %v675_v9 }
 0x19c   :  { %v8945_v16 = vld [vmem:[#allocation5 + $0xd48] sm:$0xff]  ;;  %4106 = vmatmul.mubr.bf16.gmra.mxu0 %v8941_v6  ;;  %4359 = vmatprep.subr.bf16.mxu0 %v7186_v8  ;;  %v770_v47 = vmul.f32 %v7564_v60, %v8329_v25  ;;  %v774_v59 = vmul.f32 %v8939_v51, %v8321_v4  ;;  %v772_v61 = vmul.f32 %v7564_v60, %v8481_v54 }
 0x19d   :  { %4267 = vmatmul.mubr.bf16.gmra.mxu1 %v8943_v58  ;;  %4115 = vmatprep.mubr.bf16.mxu0 %v8951_v56  ;;  %v7426_v40 = vcombine.high %v8937_v62, %v8945_v16  ;;  %v10582_v23 = vld [vmem:[#allocation23_spill] sm:$0xff]  ;;  %v8975_v25 = vpack.c.bf16 %v765_v1, %v761_v20  ;;  %v7425_v54 = vcombine.low %v8937_v62, %v8945_v16 }
 0x19e   :  { %4276 = vmatprep.mubr.bf16.mxu1 %v8953_v41  ;;  %v763_v53 = vmul.f32 %v7560_v19, %v10582_v23  ;;  %4520 = vmatprep.subr.bf16.mxu1 %v7442_v29  ;;  %v10584_v7 = vld [vmem:[#allocation35_spill] sm:$0xff]  ;;  %v7566_v29 = vpop.eup %7565 }
 0x19f   :  { %v776_v42 = vmul.f32 %v8939_v51, %v10584_v7  ;;  %4360 = vmatpush2.bf16.msra.mxu0 %v7185_v22  ;;  %v1002_v9 = vld [vmem:[#allocation5 + $0x488] sm:$0xff]  ;;  %4521 = vmatpush2.bf16.msra.mxu1 %v7441_v30  ;;  %v8981_v7 = vpack.c.bf16 %v774_v59, %v770_v47  ;;  %v7568_v5 = vpop.eup %7567  ;;  %v769_v59 = vmul.f32 %v7564_v60, %v8325_v13 }
 0x1a0   :  { %v1010_v14 = vld [vmem:[#allocation5 + $0x4c8] sm:$0xff]  ;;  %4361 = vmatprep.subr.bf16.mxu0 %v7170_v37  ;;  %4522 = vmatprep.subr.bf16.mxu1 %v7426_v40  ;;  %v8977_v23 = vpack.c.bf16 %v767_v36, %v763_v53  ;;  %v10586_v36 = vld [vmem:[#allocation28_spill] sm:$0xff] }
 0x1a1   :  { %v1258_v19 = vld [vmem:[#allocation5 + $0xc88] sm:$0xff]  ;;  %v7154_v4 = vcombine.high %v1002_v9, %v1010_v14  ;;  %v8983_v30 = vpack.c.bf16 %v776_v42, %v772_v61  ;;  %v7153_v37 = vcombine.low %v1002_v9, %v1010_v14  ;;  %v10587_v61 = vld [vmem:[#allocation42_spill] sm:$0xff]  ;;  %v782_v9 = vmul.f32 %v7566_v29, %v8369_v18 }
 0x1a2   :  { %v1266_v17 = vld [vmem:[#allocation5 + $0xcc8] sm:$0xff]  ;;  %v771_v42 = vmul.f32 %v7564_v60, %v10587_v61  ;;  %v778_v14 = vmul.f32 %v7568_v5, %v8377_v44  ;;  %v7124_v18 = vcombine.high %v8901_v46, %v8907_v3 }
 0x1a3   :  { %v986_v48 = vld [vmem:[#allocation5 + $0x408] sm:$0xff]  ;;  %4362 = vmatpush2.bf16.msra.mxu0 %v7169_v45  ;;  %v7410_v40 = vcombine.high %v1258_v19, %v1266_v17  ;;  %v7409_v1 = vcombine.low %v1258_v19, %v1266_v17  ;;  %v775_v45 = vmul.f32 %v8939_v51, %v10586_v36  ;;  %4523 = vmatpush2.bf16.msra.mxu1 %v7425_v54  ;;  %v10588_v17 = vld [vmem:[#allocation53_spill] sm:$0xff] }
 0x1a4   :  { %v994_v8 = vld [vmem:[#allocation5 + $0x448] sm:$0xff]  ;;  %4116 = vmatmul.mubr.bf16.gmra.mxu0 %v8975_v25  ;;  %4363 = vmatprep.subr.bf16.mxu0 %v7154_v4  ;;  %v780_v19 = vmul.f32 %v7568_v5, %v8513_v57  ;;  %v9005_v54 = vpack.c.bf16 %v782_v9, %v778_v14  ;;  %v7380_v57 = vcombine.high %v8947_v35, %v8949_v52  ;;  %v10589_v4 = vld [vmem:[#allocation32_spill] sm:$0xff] }
 0x1a5   :  { %v1242_v32 = vld [vmem:[#allocation5 + $0xc08] sm:$0xff]  ;;  %4277 = vmatmul.mubr.bf16.gmra.mxu1 %v8977_v23  ;;  %v7137_v20 = vcombine.low %v986_v48, %v994_v8  ;;  %v7138_v53 = vcombine.high %v986_v48, %v994_v8  ;;  %4125 = vmatprep.mubr.bf16.mxu0 %v8981_v7  ;;  %v784_v48 = vmul.f32 %v7566_v29, %v10588_v17 }
 0x1a6   :  { %v1250_v22 = vld [vmem:[#allocation5 + $0xc48] sm:$0xff]  ;;  %4286 = vmatprep.mubr.bf16.mxu1 %v8983_v30  ;;  %4524 = vmatprep.subr.bf16.mxu1 %v7410_v40  ;;  %v10591_v40 = vld [vmem:[#allocation48_spill] sm:$0xff] }
 0x1a7   :  { %v10585_v62 = vld [vmem:[#allocation19_spill] sm:$0xff]  ;;  %v7394_v47 = vcombine.high %v1242_v32, %v1250_v22  ;;  %4364 = vmatpush2.bf16.msra.mxu0 %v7153_v37  ;;  %v7570_v8 = vpop.eup %7569  ;;  %4525 = vmatpush2.bf16.msra.mxu1 %v7409_v1  ;;  %v7393_v13 = vcombine.low %v1242_v32, %v1250_v22  ;;  %v9007_v44 = vpack.c.bf16 %v784_v48, %v780_v19  ;;  %v10590_v22 = vld [vmem:[#allocation33_spill] sm:$0xff] }
 0x1a8   :  { %v773_v16 = vmul.f32 %v8939_v51, %v10585_v62  ;;  %4365 = vmatprep.subr.bf16.mxu0 %v7138_v53  ;;  %v9001_v62 = vpack.c.bf16 %v775_v45, %v771_v42  ;;  %v7572_v60 = vpop.eup %7571  ;;  %v781_v32 = vmul.f32 %v7566_v29, %v10589_v4  ;;  %v777_v37 = vmul.f32 %v7568_v5, %v10590_v22  ;;  %v10592_v53 = vld [vmem:[#allocation52_spill] sm:$0xff]  ;;  %v10596_v42 = vld [vmem:[#allocation31_spill] sm:$0xff] }
 0x1a9   :  { %4526 = vmatprep.subr.bf16.mxu1 %v7394_v47  ;;  %v779_v1 = vmul.f32 %v7568_v5, %v10591_v40  ;;  %v10594_v45 = vld [vmem:[#allocation40_spill] sm:$0xff]  ;;  %v792_v9 = vmul.f32 %v7570_v8, %v10596_v42 }
 0x1aa   :  { %v8999_v51 = vpack.c.bf16 %v773_v16, %v769_v59  ;;  %v10593_v16 = vld [vmem:[#allocation34_spill] sm:$0xff]  ;;  %v790_v47 = vmul.f32 %v7570_v8, %v10594_v45  ;;  %v10595_v59 = vld [vmem:[#allocation43_spill] sm:$0xff]  ;;  %v9023_v14 = vpack.c.bf16 %v781_v32, %v777_v37  ;;  %v10600_v32 = vld [vmem:[#allocation49_spill] sm:$0xff] }
 0x1ab   :  { %4366 = vmatpush2.bf16.msra.mxu0 %v7137_v20  ;;  %v783_v20 = vmul.f32 %v7566_v29, %v10592_v53  ;;  %4527 = vmatpush2.bf16.msra.mxu1 %v7393_v13  ;;  %v786_v36 = vmul.f32 %v7572_v60, %v10593_v16  ;;  %v788_v61 = vmul.f32 %v7572_v60, %v10595_v59  ;;  %v10597_v29 = vld [vmem:[#allocation41_spill] sm:$0xff]  ;;  %v10598_v13 = vld [vmem:[#allocation46_spill] sm:$0xff] }
 0x1ac   :  { %4126 = vmatmul.mubr.bf16.gmra.mxu0 %v8999_v51  ;;  %4657 = vmatprep.subr.bf16.mxu0 %v7124_v18  ;;  %v785_v48 = vmul.f32 %v7572_v60, %v10597_v29  ;;  %v789_v18 = vmul.f32 %v7570_v8, %v10598_v13  ;;  %v791_v22 = vmul.f32 %v7570_v8, %v10600_v32 }
 0x1ad   :  { %4287 = vmatmul.mubr.bf16.gmra.mxu1 %v9001_v62  ;;  %4135 = vmatprep.mubr.bf16.mxu0 %v9005_v54  ;;  %v9025_v19 = vpack.c.bf16 %v783_v20, %v779_v1  ;;  %v9027_v17 = vpack.c.bf16 %v790_v47, %v786_v36  ;;  %v9029_v5 = vpack.c.bf16 %v792_v9, %v788_v61 }
 0x1ae   :  { %4296 = vmatprep.mubr.bf16.mxu1 %v9007_v44  ;;  %4818 = vmatprep.subr.bf16.mxu1 %v7380_v57  ;;  %v10599_v57 = vld [vmem:[#allocation36_spill] sm:$0xff]  ;;  %v9039_v37 = vpack.c.bf16 %v789_v18, %v785_v48 }
 0x1af   :  { %v787_v4 = vmul.f32 %v7572_v60, %v10599_v57 }
 0x1b1   :  { %v9041_v40 = vpack.c.bf16 %v791_v22, %v787_v4 }
 0x1b4   :  { %4136 = vmatmul.mubr.bf16.gmra.mxu0 %v9023_v14 }
 0x1b5   :  { %4297 = vmatmul.mubr.bf16.gmra.mxu1 %v9025_v19  ;;  %4145 = vmatprep.mubr.bf16.mxu0 %v9027_v17 }
 0x1b6   :  { %4306 = vmatprep.mubr.bf16.mxu1 %v9029_v5 }
 0x1bc   :  { %4146 = vmatmul.mubr.bf16.gmra.mxu0 %v9039_v37 }
 0x1bd   :  { %4307 = vmatmul.mubr.bf16.gmra.mxu1 %v9041_v40 }
 0x1e8   :  { %v619_v1 = vpop.xlane.xlu1 %618 }
 0x1e9   :  { %v652_v53 = vmul.f32 0.001953125, %v619_v1 }
 0x1eb   :  { %v677_v20 = vadd.f32 1e-06, %v652_v53 }
 0x1ed   :  { %7573 = vrsqrt.f32 %v677_v20 }
 0x1ee   :  { %v624_v16 = vpop.xlane.xlu0 %623 }
 0x1ef   :  { %v653_v36 = vmul.f32 0.001953125, %v624_v16 }
 0x1f1   :  { %v678_v45 = vadd.f32 1e-06, %v653_v36  ;;  %v629_v47 = vpop.xlane.xlu1 %628 }
 0x1f2   :  { %v654_v59 = vmul.f32 0.001953125, %v629_v47  ;;  %v955_v47 = vld [vmem:[#allocation5 + $0x310] sm:$0xff] }
 0x1f3   :  { %7575 = vrsqrt.f32 %v678_v45  ;;  %v10605_v45 = vld [vmem:[#allocation56_spill] sm:$0xff] }
 0x1f4   :  { %v679_v60 = vadd.f32 1e-06, %v654_v59  ;;  %v963_v59 = vld [vmem:[#allocation5 + $0x350] sm:$0xff] }
 0x1f6   :  { %7577 = vrsqrt.f32 %v679_v60  ;;  %v1211_v60 = vld [vmem:[#allocation5 + $0xb10] sm:$0xff] }
 0x1fa   :  { %v7574_v8 = vpop.eup %7573 }
 0x1fb   :  { %v794_v42 = vmul.f32 %v7574_v8, %v8575_v38  ;;  %v796_v9 = vmul.f32 %v7574_v8, %v8581_v15  ;;  %v793_v29 = vmul.f32 %v7574_v8, %v8572_v0  ;;  %v795_v48 = vmul.f32 %v7574_v8, %v8578_v26  ;;  %v10601_v26 = vld [vmem:[#allocation44_spill] sm:$0xff] }
 0x1fc   :  { %v1219_v8 = vld [vmem:[#allocation5 + $0xb50] sm:$0xff] }
 0x200   :  { %v7576_v61 = vpop.eup %7575 }
 0x201   :  { %v798_v13 = vmul.f32 %v7576_v61, %v8593_v50  ;;  %v800_v18 = vmul.f32 %v7576_v61, %v8603_v12  ;;  %v797_v57 = vmul.f32 %v7576_v61, %v8590_v63  ;;  %v799_v4 = vmul.f32 %v7576_v61, %v8598_v10  ;;  %v10602_v10 = vld [vmem:[#allocation50_spill] sm:$0xff] }
 0x202   :  { %v7108_v61 = vcombine.high %v955_v47, %v963_v59 }
 0x203   :  { %v7578_v32 = vpop.eup %7577  ;;  %v9053_v22 = vpack.c.bf16 %v798_v13, %v794_v42  ;;  %v9055_v1 = vpack.c.bf16 %v800_v18, %v796_v9  ;;  %v9057_v38 = vpack.c.bf16 %v797_v57, %v793_v29  ;;  %v9059_v15 = vpack.c.bf16 %v799_v4, %v795_v48  ;;  %v939_v9 = vld [vmem:[#allocation5 + $0x290] sm:$0xff]  ;;  %v10606_v48 = vld [vmem:[#allocation47_spill] sm:$0xff]  ;;  %v10607_v13 = vld [vmem:[#allocation54_spill] sm:$0xff] }
 0x204   :  { %v802_v0 = vmul.f32 %v7578_v32, %v8611_v49  ;;  %v804_v53 = vmul.f32 %v7578_v32, %v10601_v26  ;;  %v801_v12 = vmul.f32 %v7578_v32, %v10602_v10  ;;  %v10603_v49 = vld [vmem:[#allocation39_spill] sm:$0xff]  ;;  %v7364_v42 = vcombine.high %v1211_v60, %v1219_v8  ;;  %v947_v29 = vld [vmem:[#allocation5 + $0x2d0] sm:$0xff] }
 0x205   :  { %4155 = vmatprep.mubr.bf16.mxu0 %v9053_v22  ;;  %4316 = vmatprep.mubr.bf16.mxu1 %v9055_v1  ;;  %v803_v20 = vmul.f32 %v7578_v32, %v10603_v49  ;;  %v1195_v18 = vld [vmem:[#allocation5 + $0xa90] sm:$0xff]  ;;  %v10608_v4 = vcombine.low %v8901_v46, %v8907_v3  ;;  %v7107_v32 = vcombine.low %v955_v47, %v963_v59  ;;  %v1373_v47 = vlaneseq }
 0x206   :  { %4156 = vmatmul.mubr.bf16.gmra.mxu0 %v9057_v38  ;;  %4317 = vmatmul.mubr.bf16.gmra.mxu1 %v9059_v15  ;;  %v9067_v63 = vpack.c.bf16 %v802_v0, %v802_v0  ;;  %v9069_v50 = vpack.c.bf16 %v804_v53, %v804_v53  ;;  %v9075_v16 = vpack.c.bf16 %v801_v12, %v801_v12  ;;  %v1203_v57 = vld [vmem:[#allocation5 + $0xad0] sm:$0xff] }
 0x207   :  { %v9077_v36 = vpack.c.bf16 %v803_v20, %v803_v20  ;;  %v10609_v0 = vcombine.low %v8947_v35, %v8949_v52  ;;  %v7363_v26 = vcombine.low %v1211_v60, %v1219_v8  ;;  %v7092_v53 = vcombine.high %v939_v9, %v947_v29  ;;  %v923_v12 = vld [vmem:[#allocation5 + $0x210] sm:$0xff] }
 0x208   :  { %4165 = vmatprep.mubr.bf16.mxu0 %v9067_v63  ;;  %4326 = vmatprep.mubr.bf16.mxu1 %v9069_v50  ;;  %v7348_v10 = vcombine.high %v1195_v18, %v1203_v57  ;;  %v931_v49 = vld [vmem:[#allocation5 + $0x250] sm:$0xff]  ;;  %v7091_v46 = vcombine.low %v939_v9, %v947_v29  ;;  %v7347_v3 = vcombine.low %v1195_v18, %v1203_v57  ;;  %v9097_v9 = vshrl.u32 %v1373_v47, 7 }
 0x209   :  { %10604 = vst [vmem:[#allocation77_spill] sm:$0xff] %v9077_v36  ;;  %v1179_v20 = vld [vmem:[#allocation5 + $0xa10] sm:$0xff]  ;;  %v7076_v59 = vcombine.high %v923_v12, %v931_v49 }
 0x20a   :  { %v907_v35 = vld [vmem:[#allocation5 + $0x190] sm:$0xff]  ;;  %10610 = vst [vmem:[#allocation79_spill] sm:$0xff] %v9097_v9 }
 0x20b   :  { %v915_v52 = vld [vmem:[#allocation5 + $0x1d0] sm:$0xff] }
 0x20c   :  { %v1163_v60 = vld [vmem:[#allocation5 + $0x990] sm:$0xff]  ;;  %v7060_v29 = vcombine.high %v907_v35, %v915_v52 }
 0x20d   :  { %v1171_v8 = vld [vmem:[#allocation5 + $0x9d0] sm:$0xff] }
 0x20e   :  { %4166 = vmatmul.mubr.bf16.gmra.mxu0 %v9075_v16  ;;  %4327 = vmatmul.mubr.bf16.gmra.mxu1 %v9077_v36  ;;  %v7316_v18 = vcombine.high %v1163_v60, %v1171_v8  ;;  %v891_v57 = vld [vmem:[#allocation5 + $0x110] sm:$0xff] }
 0x20f   :  { %4367 = vmatprep.mubr.bf16.mxu0 %v8655_v55  ;;  %4528 = vmatprep.mubr.bf16.mxu1 %v10605_v45  ;;  %v883_v47 = vld [vmem:[#allocation5 + $0xd0] sm:$0xff] }
 0x216   :  { %4368 = vmatmul.mubr.bf16.vlgmr.msra.gmra.mxu0 %v10606_v48  ;;  %4529 = vmatmul.mubr.bf16.vlgmr.msra.gmra.mxu1 %v10607_v13  ;;  %v1187_v13 = vld [vmem:[#allocation5 + $0xa50] sm:$0xff] }
 0x217   :  { %4658 = vmatpush1.bf16.msra.mxu0 %v10608_v4  ;;  %4377 = vmatprep.mubr.bf16.mxu0 %v8717_v11  ;;  %v7332_v4 = vcombine.high %v1179_v20, %v1187_v13 }
 0x218   :  { %4538 = vmatprep.mubr.bf16.mxu1 %v8719_v34  ;;  %4819 = vmatpush1.bf16.msra.mxu1 %v10609_v0  ;;  %v1147_v0 = vld [vmem:[#allocation5 + $0x910] sm:$0xff] }
 0x219   :  { %4659 = vmatprep.subr.bf16.mxu0 %v7108_v61  ;;  %4820 = vmatprep.subr.bf16.mxu1 %v7364_v42  ;;  %v7075_v61 = vcombine.low %v923_v12, %v931_v49  ;;  %v7331_v42 = vcombine.low %v1179_v20, %v1187_v13  ;;  %v875_v49 = vld [vmem:[#allocation5 + $0x90] sm:$0xff]  ;;  %v10611_v20 = vld [vmem:[#allocation66_spill] sm:$0xff] }
 0x21b   :  { %4660 = vmatpush1.bf16.msra.mxu0 %v7107_v32  ;;  %v899_v32 = vld [vmem:[#allocation5 + $0x150] sm:$0xff] }
 0x21c   :  { %4821 = vmatpush1.bf16.msra.mxu1 %v7363_v26  ;;  %4661 = vmatprep.subr.bf16.mxu0 %v7092_v53  ;;  %v1155_v26 = vld [vmem:[#allocation5 + $0x950] sm:$0xff]  ;;  %v10310_v53 = vsub.s32 0, %v9097_v9  ;;  %v7044_v13 = vcombine.high %v891_v57, %v899_v32 }
 0x21d   :  { %4822 = vmatprep.subr.bf16.mxu1 %v7348_v10  ;;  %v7059_v10 = vcombine.low %v907_v35, %v915_v52  ;;  %v7300_v12 = vcombine.high %v1147_v0, %v1155_v26  ;;  %v7043_v52 = vcombine.low %v891_v57, %v899_v32 }
 0x21e   :  { %4378 = vmatmul.mubr.bf16.gmra.mxu0 %v8721_v31  ;;  %4539 = vmatmul.mubr.bf16.gmra.mxu1 %v8723_v27 }
 0x21f   :  { %4387 = vmatprep.mubr.bf16.mxu0 %v8749_v2  ;;  %4548 = vmatprep.mubr.bf16.mxu1 %v8751_v28  ;;  %v7315_v28 = vcombine.low %v1163_v60, %v1171_v8  ;;  %v7299_v60 = vcombine.low %v1147_v0, %v1155_v26  ;;  %v7028_v8 = vcombine.high %v875_v49, %v883_v47 }
 0x220   :  { %4662 = vmatpush1.bf16.msra.mxu0 %v7091_v46  ;;  %4823 = vmatpush1.bf16.msra.mxu1 %v7347_v3  ;;  %v1369_v46 = vld [vmem:[#allocation7] sm:$0xff]  ;;  %v10311_v3 = vsub.s32 1, %v9097_v9  ;;  %v10615_v9 = vld [vmem:[#allocation67_spill] sm:$0xff] }
 0x221   :  { %4663 = vmatprep.subr.bf16.mxu0 %v7076_v59  ;;  %4824 = vmatprep.subr.bf16.mxu1 %v7332_v4  ;;  %v1131_v59 = vld [vmem:[#allocation5 + $0x890] sm:$0xff]  ;;  %v9107_v35 = vrot.slane %v1369_v46, %v10310_v53 }
 0x222   :  { %v1139_v4 = vld [vmem:[#allocation5 + $0x8d0] sm:$0xff] }
 0x223   :  { %v7283_v57 = vcombine.low %v1131_v59, %v1139_v4 }
 0x224   :  { %4664 = vmatpush1.bf16.msra.mxu0 %v7075_v61  ;;  %4825 = vmatpush1.bf16.msra.mxu1 %v7331_v42  ;;  %v10612_v61 = vld [vmem:[#allocation62_spill] sm:$0xff]  ;;  %v10613_v42 = vld [vmem:[#allocation63_spill] sm:$0xff] }
 0x225   :  { %4665 = vmatprep.subr.bf16.mxu0 %v7060_v29  ;;  %4826 = vmatprep.subr.bf16.mxu1 %v7316_v18  ;;  %v7284_v29 = vcombine.high %v1131_v59, %v1139_v4  ;;  %v859_v18 = vld [vmem:[#allocation5 + $0x10] sm:$0xff] }
 0x226   :  { %4388 = vmatmul.mubr.bf16.gmra.mxu0 %v8773_v43  ;;  %4549 = vmatmul.mubr.bf16.gmra.mxu1 %v10611_v20  ;;  %v9111_v20 = vrot.slane %v1369_v46, %v10311_v3  ;;  %v1115_v43 = vld [vmem:[#allocation5 + $0x810] sm:$0xff]  ;;  %v10614_v3 = vld [vmem:[#allocation65_spill] sm:$0xff] }
 0x227   :  { %4397 = vmatprep.mubr.bf16.mxu0 %v10612_v61  ;;  %4558 = vmatprep.mubr.bf16.mxu1 %v10613_v42  ;;  %v867_v61 = vld [vmem:[#allocation5 + $0x50] sm:$0xff] }
 0x228   :  { %4666 = vmatpush1.bf16.msra.mxu0 %v7059_v10  ;;  %4827 = vmatpush1.bf16.msra.mxu1 %v7315_v28  ;;  %v1123_v42 = vld [vmem:[#allocation5 + $0x850] sm:$0xff]  ;;  %v7027_v28 = vcombine.low %v875_v49, %v883_v47  ;;  %v7012_v26 = vcombine.high %v859_v18, %v867_v61  ;;  %v10616_v49 = vld [vmem:[#allocation69_spill] sm:$0xff]  ;;  %v10617_v47 = vld [vmem:[#allocation71_spill] sm:$0xff] }
 0x229   :  { %4667 = vmatprep.subr.bf16.mxu0 %v7044_v13  ;;  %4828 = vmatprep.subr.bf16.mxu1 %v7300_v12  ;;  %v7268_v10 = vcombine.high %v1115_v43, %v1123_v42  ;;  %v9114_v13 = vld [vmem:[#allocation5 + $0x790] sm:$0xff] }
 0x22b   :  { %v4047_v2 = vpop.f32.mrf.mxu0  ;;  %v4208_v27 = vpop.f32.mrf.mxu1 }
 0x22c   :  { %v4048_v53 = vadd.f32 %v4047_v2, %v9107_v35  ;;  %4668 = vmatpush1.bf16.msra.mxu0 %v7043_v52  ;;  %4829 = vmatpush1.bf16.msra.mxu1 %v7299_v60  ;;  %v1107_v2 = vld [vmem:[#allocation5 + $0x7d0] sm:$0xff] }
 0x22d   :  { %v4049_v32 = vpop.f32.mrf.mxu0  ;;  %v4210_v0 = vpop.f32.mrf.mxu1  ;;  %4669 = vmatprep.subr.bf16.mxu0 %v7028_v8  ;;  %4830 = vmatprep.subr.bf16.mxu1 %v7284_v29  ;;  %v1355_v52 = vld [vmem:[#allocation5 + $0xf90] sm:$0xff]  ;;  %v7011_v8 = vcombine.low %v859_v18, %v867_v61 }
 0x22e   :  { %v4209_v46 = vadd.f32 %v4208_v27, %v4048_v53  ;;  %v4050_v12 = vadd.f32 %v4049_v32, %v9111_v20  ;;  %4398 = vmatmul.mubr.bf16.gmra.mxu0 %v10614_v3  ;;  %4559 = vmatmul.mubr.bf16.gmra.mxu1 %v10615_v9  ;;  %v1363_v60 = vld [vmem:[#allocation5 + $0xfd0] sm:$0xff]  ;;  %v7267_v53 = vcombine.low %v1115_v43, %v1123_v42 }
 0x22f   :  { %4407 = vmatprep.mubr.bf16.mxu0 %v10616_v49  ;;  %4568 = vmatprep.mubr.bf16.mxu1 %v10617_v47  ;;  %v4051_v59 = vpop.f32.mrf.mxu0  ;;  %v4212_v4 = vpop.f32.mrf.mxu1  ;;  %v7252_v9 = vcombine.high %v9114_v13, %v1107_v2  ;;  %v7508_v31 = vcombine.high %v1355_v52, %v1363_v60  ;;  %v1083_v49 = vld [vmem:[#allocation5 + $0x710] sm:$0xff] }
 0x230   :  { %6589 = vst [vmem:[#allocation8] sm:$0xff] %v4209_v46  ;;  %v4211_v29 = vadd.f32 %v4210_v0, %v4050_v12  ;;  %v4052_v27 = vadd.f32 %v4051_v59, %v9107_v35  ;;  %4670 = vmatpush1.bf16.msra.mxu0 %v7027_v28  ;;  %4831 = vmatpush1.bf16.msra.mxu1 %v7283_v57  ;;  %v1091_v61 = vld [vmem:[#allocation5 + $0x750] sm:$0xff] }
 0x231   :  { %v4053_v32 = vpop.f32.mrf.mxu0  ;;  %v4214_v3 = vpop.f32.mrf.mxu1  ;;  %4671 = vmatprep.subr.bf16.mxu0 %v7012_v26  ;;  %4832 = vmatprep.subr.bf16.mxu1 %v7268_v10  ;;  %v1339_v18 = vld [vmem:[#allocation5 + $0xf10] sm:$0xff]  ;;  %v7251_v28 = vcombine.low %v9114_v13, %v1107_v2  ;;  %v7507_v57 = vcombine.low %v1355_v52, %v1363_v60  ;;  %v7236_v59 = vcombine.high %v1083_v49, %v1091_v61  ;;  %v10619_v52 = vld [vmem:[#allocation70_spill] sm:$0xff] }
 0x232   :  { %6590 = vst [vmem:[#allocation8 + $0x8] sm:$0xff] %v4211_v29  ;;  %v4213_v47 = vadd.f32 %v4212_v4, %v4052_v27  ;;  %v4054_v34 = vadd.f32 %v4053_v32, %v9111_v20  ;;  %v1347_v0 = vld [vmem:[#allocation5 + $0xf50] sm:$0xff]  ;;  %v7235_v60 = vcombine.low %v1083_v49, %v1091_v61 }
 0x233   :  { %v4057_v46 = vpop.f32.mrf.mxu0  ;;  %v4218_v12 = vpop.f32.mrf.mxu1  ;;  %v7492_v4 = vcombine.high %v1339_v18, %v1347_v0  ;;  %v9126_v29 = vld [vmem:[#allocation5 + $0x690] sm:$0xff] }
 0x234   :  { %6605 = vst [vmem:[#allocation8 + $0x80] sm:$0xff] %v4213_v47  ;;  %v4215_v43 = vadd.f32 %v4214_v3, %v4054_v34  ;;  %v4058_v42 = vadd.f32 %v4057_v46, %v9107_v35  ;;  %4672 = vmatpush1.bf16.msra.mxu0 %v7011_v8  ;;  %4833 = vmatpush1.bf16.msra.mxu1 %v7267_v53  ;;  %v1075_v34 = vld [vmem:[#allocation5 + $0x6d0] sm:$0xff] }
 0x235   :  { %v4059_v26 = vpop.f32.mrf.mxu0  ;;  %v4220_v10 = vpop.f32.mrf.mxu1  ;;  %4673 = vmatprep.subr.bf16.mxu0 %v7252_v9  ;;  %4834 = vmatprep.subr.bf16.mxu1 %v7508_v31  ;;  %v1323_v3 = vld [vmem:[#allocation5 + $0xe90] sm:$0xff]  ;;  %v7491_v53 = vcombine.low %v1339_v18, %v1347_v0 }
 0x236   :  { %6606 = vst [vmem:[#allocation8 + $0x88] sm:$0xff] %v4215_v43  ;;  %v4219_v27 = vadd.f32 %v4218_v12, %v4058_v42  ;;  %v4060_v32 = vadd.f32 %v4059_v26, %v9111_v20  ;;  %4408 = vmatmul.mubr.bf16.gmra.mxu0 %v8871_v33  ;;  %4569 = vmatmul.mubr.bf16.gmra.mxu1 %v8873_v21  ;;  %v1331_v13 = vld [vmem:[#allocation5 + $0xed0] sm:$0xff] }
 0x237   :  { %v10618_v2 = vld [vmem:[#allocation68_spill] sm:$0xff]  ;;  %4578 = vmatprep.mubr.bf16.mxu1 %v10619_v52  ;;  %v4061_v31 = vpop.f32.mrf.mxu0  ;;  %v4222_v9 = vpop.f32.mrf.mxu1  ;;  %v7220_v43 = vcombine.high %v9126_v29, %v1075_v34  ;;  %v7476_v42 = vcombine.high %v1323_v3, %v1331_v13 }
 0x238   :  { %4417 = vmatprep.mubr.bf16.mxu0 %v10618_v2  ;;  %6621 = vst [vmem:[#allocation8 + $0x100] sm:$0xff] %v4219_v27  ;;  %v4221_v47 = vadd.f32 %v4220_v10, %v4060_v32  ;;  %v4062_v8 = vadd.f32 %v4061_v31, %v9107_v35  ;;  %4674 = vmatpush2.bf16.msra.mxu0 %v7251_v28  ;;  %v1051_v26 = vld [vmem:[#allocation5 + $0x610] sm:$0xff] }
 0x239   :  { %4835 = vmatpush2.bf16.msra.mxu1 %v7507_v57  ;;  %v4063_v46 = vpop.f32.mrf.mxu0  ;;  %v4224_v12 = vpop.f32.mrf.mxu1  ;;  %4675 = vmatprep.subr.bf16.mxu0 %v7236_v59  ;;  %v1059_v49 = vld [vmem:[#allocation5 + $0x650] sm:$0xff]  ;;  %v7219_v28 = vcombine.low %v9126_v29, %v1075_v34  ;;  %v7475_v57 = vcombine.low %v1323_v3, %v1331_v13  ;;  %v10620_v3 = vld [vmem:[#allocation74_spill] sm:$0xff] }
 0x23a   :  { %4836 = vmatprep.subr.bf16.mxu1 %v7492_v4  ;;  %6622 = vst [vmem:[#allocation8 + $0x108] sm:$0xff] %v4221_v47  ;;  %v4223_v52 = vadd.f32 %v4222_v9, %v4062_v8  ;;  %v4064_v2 = vadd.f32 %v4063_v46, %v9111_v20  ;;  %v1307_v61 = vld [vmem:[#allocation5 + $0xe10] sm:$0xff]  ;;  %v7204_v31 = vcombine.high %v1051_v26, %v1059_v49 }
 0x23b   :  { %v1315_v10 = vld [vmem:[#allocation5 + $0xe50] sm:$0xff]  ;;  %v4228_v32 = vpop.f32.mrf.mxu1 }
 0x23c   :  { %v4067_v27 = vpop.f32.mrf.mxu0  ;;  %6637 = vst [vmem:[#allocation8 + $0x180] sm:$0xff] %v4223_v52  ;;  %v4225_v18 = vadd.f32 %v4224_v12, %v4064_v2  ;;  %4676 = vmatpush2.bf16.msra.mxu0 %v7235_v60  ;;  %v7460_v9 = vcombine.high %v1307_v61, %v1315_v10  ;;  %v9138_v47 = vld [vmem:[#allocation5 + $0x590] sm:$0xff] }
 0x23d   :  { %v4068_v0 = vadd.f32 %v4067_v27, %v9107_v35  ;;  %4837 = vmatpush2.bf16.msra.mxu1 %v7491_v53  ;;  %v4230_v4 = vpop.f32.mrf.mxu1  ;;  %4677 = vmatprep.subr.bf16.mxu0 %v7220_v43  ;;  %v1043_v29 = vld [vmem:[#allocation5 + $0x5d0] sm:$0xff]  ;;  %v7203_v53 = vcombine.low %v1051_v26, %v1059_v49 }
 0x23e   :  { %v4069_v59 = vpop.f32.mrf.mxu0  ;;  %4838 = vmatprep.subr.bf16.mxu1 %v7476_v42  ;;  %6638 = vst [vmem:[#allocation8 + $0x188] sm:$0xff] %v4225_v18  ;;  %4418 = vmatmul.mubr.bf16.gmra.mxu0 %v8909_v24  ;;  %v1291_v34 = vld [vmem:[#allocation5 + $0xd90] sm:$0xff]  ;;  %v7459_v42 = vcombine.low %v1307_v61, %v1315_v10  ;;  %v7188_v18 = vcombine.high %v9138_v47, %v1043_v29 }
 0x23f   :  { %v4229_v8 = vadd.f32 %v4228_v32, %v4068_v0  ;;  %v4070_v46 = vadd.f32 %v4069_v59, %v9111_v20  ;;  %4579 = vmatmul.mubr.bf16.gmra.mxu1 %v8911_v39  ;;  %v1299_v2 = vld [vmem:[#allocation5 + $0xdd0] sm:$0xff]  ;;  %4427 = vmatprep.mubr.bf16.mxu0 %v10620_v3  ;;  %v4232_v60 = vpop.f32.mrf.mxu1 }
 0x240   :  { %v10621_v13 = vld [vmem:[#allocation72_spill] sm:$0xff]  ;;  %v4071_v52 = vpop.f32.mrf.mxu0  ;;  %4678 = vmatpush2.bf16.msra.mxu0 %v7219_v28  ;;  %v7444_v0 = vcombine.high %v1291_v34, %v1299_v2  ;;  %v7187_v28 = vcombine.low %v9138_v47, %v1043_v29 }
 0x241   :  { %4588 = vmatprep.mubr.bf16.mxu1 %v10621_v13  ;;  %6653 = vst [vmem:[#allocation8 + $0x200] sm:$0xff] %v4229_v8  ;;  %v4231_v12 = vadd.f32 %v4230_v4, %v4070_v46  ;;  %v4072_v43 = vadd.f32 %v4071_v52, %v9107_v35  ;;  %4839 = vmatpush2.bf16.msra.mxu1 %v7475_v57  ;;  %v4234_v32 = vpop.f32.mrf.mxu1  ;;  %v1019_v59 = vld [vmem:[#allocation5 + $0x510] sm:$0xff] }
 0x242   :  { %v4073_v27 = vpop.f32.mrf.mxu0  ;;  %4679 = vmatprep.subr.bf16.mxu0 %v7204_v31  ;;  %4840 = vmatprep.subr.bf16.mxu1 %v7460_v9  ;;  %v1027_v26 = vld [vmem:[#allocation5 + $0x550] sm:$0xff]  ;;  %v7443_v57 = vcombine.low %v1291_v34, %v1299_v2 }
 0x243   :  { %6654 = vst [vmem:[#allocation8 + $0x208] sm:$0xff] %v4231_v12  ;;  %v4233_v13 = vadd.f32 %v4232_v60, %v4072_v43  ;;  %v4074_v3 = vadd.f32 %v4073_v27, %v9111_v20  ;;  %v1275_v49 = vld [vmem:[#allocation5 + $0xd10] sm:$0xff]  ;;  %v4238_v46 = vpop.f32.mrf.mxu1  ;;  %v7172_v52 = vcombine.high %v1019_v59, %v1027_v26 }
 0x244   :  { %v1283_v4 = vld [vmem:[#allocation5 + $0xd50] sm:$0xff]  ;;  %v4077_v8 = vpop.f32.mrf.mxu0  ;;  %4680 = vmatpush2.bf16.msra.mxu0 %v7203_v53 }
 0x245   :  { %6669 = vst [vmem:[#allocation8 + $0x280] sm:$0xff] %v4233_v13  ;;  %v4235_v61 = vadd.f32 %v4234_v32, %v4074_v3  ;;  %v4078_v10 = vadd.f32 %v4077_v8, %v9107_v35  ;;  %4841 = vmatpush2.bf16.msra.mxu1 %v7459_v42  ;;  %v4240_v9 = vpop.f32.mrf.mxu1  ;;  %4681 = vmatprep.subr.bf16.mxu0 %v7188_v18  ;;  %v9150_v12 = vld [vmem:[#allocation5 + $0x490] sm:$0xff] }
 0x246   :  { %v4079_v31 = vpop.f32.mrf.mxu0  ;;  %4842 = vmatprep.subr.bf16.mxu1 %v7444_v0  ;;  %v7428_v60 = vcombine.high %v1275_v49, %v1283_v4  ;;  %4428 = vmatmul.mubr.bf16.gmra.mxu0 %v8941_v6  ;;  %v1011_v47 = vld [vmem:[#allocation5 + $0x4d0] sm:$0xff]  ;;  %v7171_v13 = vcombine.low %v1019_v59, %v1027_v26  ;;  %v7427_v32 = vcombine.low %v1275_v49, %v1283_v4 }
 0x247   :  { %6670 = vst [vmem:[#allocation8 + $0x288] sm:$0xff] %v4235_v61  ;;  %v4239_v43 = vadd.f32 %v4238_v46, %v4078_v10  ;;  %v4080_v27 = vadd.f32 %v4079_v31, %v9111_v20  ;;  %4589 = vmatmul.mubr.bf16.gmra.mxu1 %v8943_v58  ;;  %v1259_v29 = vld [vmem:[#allocation5 + $0xc90] sm:$0xff]  ;;  %4437 = vmatprep.mubr.bf16.mxu0 %v8951_v56  ;;  %v4242_v2 = vpop.f32.mrf.mxu1 }
 0x248   :  { %v1267_v3 = vld [vmem:[#allocation5 + $0xcd0] sm:$0xff]  ;;  %4598 = vmatprep.mubr.bf16.mxu1 %v8953_v41  ;;  %v4081_v34 = vpop.f32.mrf.mxu0  ;;  %4682 = vmatpush2.bf16.msra.mxu0 %v7187_v28  ;;  %v7156_v8 = vcombine.high %v9150_v12, %v1011_v47  ;;  %v7155_v28 = vcombine.low %v9150_v12, %v1011_v47  ;;  %v9167_v12 = vld [vmem:[#allocation5 + $0x3d8] sm:$0xff] }
 0x249   :  { %6685 = vst [vmem:[#allocation8 + $0x300] sm:$0xff] %v4239_v43  ;;  %v4241_v53 = vadd.f32 %v4240_v9, %v4080_v27  ;;  %v4082_v42 = vadd.f32 %v4081_v34, %v9107_v35  ;;  %4843 = vmatpush2.bf16.msra.mxu1 %v7443_v57  ;;  %v4244_v0 = vpop.f32.mrf.mxu1  ;;  %4683 = vmatprep.subr.bf16.mxu0 %v7172_v52  ;;  %v987_v61 = vld [vmem:[#allocation5 + $0x410] sm:$0xff]  ;;  %v9169_v47 = vld [vmem:[#allocation5 + $0xb98] sm:$0xff] }
 0x24a   :  { %v4083_v18 = vpop.f32.mrf.mxu0  ;;  %4844 = vmatprep.subr.bf16.mxu1 %v7428_v60  ;;  %v7412_v46 = vcombine.high %v1259_v29, %v1267_v3  ;;  %v995_v59 = vld [vmem:[#allocation5 + $0x450] sm:$0xff]  ;;  %v7411_v57 = vcombine.low %v1259_v29, %v1267_v3  ;;  %v9171_v29 = vld [vmem:[#allocation5 + $0xbd8] sm:$0xff] }
 0x24b   :  { %6686 = vst [vmem:[#allocation8 + $0x308] sm:$0xff] %v4241_v53  ;;  %v4243_v10 = vadd.f32 %v4242_v2, %v4082_v42  ;;  %v4084_v31 = vadd.f32 %v4083_v18, %v9111_v20  ;;  %v1243_v26 = vld [vmem:[#allocation5 + $0xc10] sm:$0xff]  ;;  %v4248_v27 = vpop.f32.mrf.mxu1  ;;  %v7140_v34 = vcombine.high %v987_v61, %v995_v59  ;;  %v9162_v53 = vld [vmem:[#allocation5 + $0x398] sm:$0xff] }
 0x24c   :  { %v1251_v9 = vld [vmem:[#allocation5 + $0xc50] sm:$0xff]  ;;  %v4087_v43 = vpop.f32.mrf.mxu0  ;;  %4684 = vmatpush2.bf16.msra.mxu0 %v7171_v13 }
 0x24d   :  { %6701 = vst [vmem:[#allocation8 + $0x380] sm:$0xff] %v4243_v10  ;;  %v4245_v49 = vadd.f32 %v4244_v0, %v4084_v31  ;;  %v4088_v4 = vadd.f32 %v4087_v43, %v9107_v35  ;;  %4845 = vmatpush2.bf16.msra.mxu1 %v7427_v32  ;;  %v4250_v60 = vpop.f32.mrf.mxu1  ;;  %4685 = vmatprep.subr.bf16.mxu0 %v7156_v8 }
 0x24e   :  { %v4089_v52 = vpop.f32.mrf.mxu0  ;;  %4846 = vmatprep.subr.bf16.mxu1 %v7412_v46  ;;  %v7396_v2 = vcombine.high %v1243_v26, %v1251_v9  ;;  %4438 = vmatmul.mubr.bf16.gmra.mxu0 %v8975_v25  ;;  %v7139_v32 = vcombine.low %v987_v61, %v995_v59  ;;  %v7395_v46 = vcombine.low %v1243_v26, %v1251_v9 }
 0x24f   :  { %6702 = vst [vmem:[#allocation8 + $0x388] sm:$0xff] %v4245_v49  ;;  %v4249_v42 = vadd.f32 %v4248_v27, %v4088_v4  ;;  %v4090_v18 = vadd.f32 %v4089_v52, %v9111_v20  ;;  %4599 = vmatmul.mubr.bf16.gmra.mxu1 %v8977_v23  ;;  %4447 = vmatprep.mubr.bf16.mxu0 %v8981_v7  ;;  %v4252_v13 = vpop.f32.mrf.mxu1 }
 0x250   :  { %4608 = vmatprep.mubr.bf16.mxu1 %v8983_v30  ;;  %v4091_v3 = vpop.f32.mrf.mxu0  ;;  %4686 = vmatpush2.bf16.msra.mxu0 %v7155_v28  ;;  %v7126_v43 = vcombine.high %v9162_v53, %v9167_v12  ;;  %v7382_v27 = vcombine.high %v9169_v47, %v9171_v29 }
 0x251   :  { %6717 = vst [vmem:[#allocation8 + $0x400] sm:$0xff] %v4249_v42  ;;  %v4251_v0 = vadd.f32 %v4250_v60, %v4090_v18  ;;  %v4092_v8 = vadd.f32 %v4091_v3, %v9107_v35  ;;  %4847 = vmatpush2.bf16.msra.mxu1 %v7411_v57  ;;  %v4254_v31 = vpop.f32.mrf.mxu1  ;;  %4687 = vmatprep.subr.bf16.mxu0 %v7140_v34 }
 0x252   :  { %v4093_v10 = vpop.f32.mrf.mxu0  ;;  %4848 = vmatprep.subr.bf16.mxu1 %v7396_v2 }
 0x253   :  { %6718 = vst [vmem:[#allocation8 + $0x408] sm:$0xff] %v4251_v0  ;;  %v4253_v49 = vadd.f32 %v4252_v13, %v4092_v8  ;;  %v4094_v61 = vadd.f32 %v4093_v10, %v9111_v20 }
 0x254   :  { %v4097_v59 = vpop.f32.mrf.mxu0  ;;  %4688 = vmatpush2.bf16.msra.mxu0 %v7139_v32 }
 0x255   :  { %v4258_v4 = vpop.f32.mrf.mxu1  ;;  %6733 = vst [vmem:[#allocation8 + $0x480] sm:$0xff] %v4253_v49  ;;  %v4255_v28 = vadd.f32 %v4254_v31, %v4094_v61  ;;  %v4098_v26 = vadd.f32 %v4097_v59, %v9107_v35  ;;  %4849 = vmatpush2.bf16.msra.mxu1 %v7395_v46  ;;  %4979 = vmatprep.subr.bf16.mxu0 %v7126_v43 }
 0x256   :  { %v4099_v9 = vpop.f32.mrf.mxu0  ;;  %5140 = vmatprep.subr.bf16.mxu1 %v7382_v27  ;;  %4448 = vmatmul.mubr.bf16.gmra.mxu0 %v8999_v51 }
 0x257   :  { %v4260_v57 = vpop.f32.mrf.mxu1  ;;  %6734 = vst [vmem:[#allocation8 + $0x488] sm:$0xff] %v4255_v28  ;;  %v4259_v52 = vadd.f32 %v4258_v4, %v4098_v26  ;;  %v4100_v60 = vadd.f32 %v4099_v9, %v9111_v20  ;;  %4609 = vmatmul.mubr.bf16.gmra.mxu1 %v9001_v62  ;;  %4457 = vmatprep.mubr.bf16.mxu0 %v9005_v54 }
 0x258   :  { %4618 = vmatprep.mubr.bf16.mxu1 %v9007_v44  ;;  %v4101_v34 = vpop.f32.mrf.mxu0 }
 0x259   :  { %v4262_v2 = vpop.f32.mrf.mxu1  ;;  %6749 = vst [vmem:[#allocation8 + $0x500] sm:$0xff] %v4259_v52  ;;  %v4261_v42 = vadd.f32 %v4260_v57, %v4100_v60  ;;  %v4102_v18 = vadd.f32 %v4101_v34, %v9107_v35 }
 0x25a   :  { %v4103_v3 = vpop.f32.mrf.mxu0 }
 0x25b   :  { %v4264_v13 = vpop.f32.mrf.mxu1  ;;  %6750 = vst [vmem:[#allocation8 + $0x508] sm:$0xff] %v4261_v42  ;;  %v4263_v32 = vadd.f32 %v4262_v2, %v4102_v18  ;;  %v4104_v0 = vadd.f32 %v4103_v3, %v9111_v20 }
 0x25c   :  { %v4107_v8 = vpop.f32.mrf.mxu0 }
 0x25d   :  { %v4268_v46 = vpop.f32.mrf.mxu1  ;;  %6765 = vst [vmem:[#allocation8 + $0x580] sm:$0xff] %v4263_v32  ;;  %v4265_v10 = vadd.f32 %v4264_v13, %v4104_v0  ;;  %v4108_v31 = vadd.f32 %v4107_v8, %v9107_v35 }
 0x25e   :  { %v4109_v43 = vpop.f32.mrf.mxu0  ;;  %4458 = vmatmul.mubr.bf16.gmra.mxu0 %v9023_v14 }
 0x25f   :  { %v4270_v27 = vpop.f32.mrf.mxu1  ;;  %6766 = vst [vmem:[#allocation8 + $0x588] sm:$0xff] %v4265_v10  ;;  %v4269_v49 = vadd.f32 %v4268_v46, %v4108_v31  ;;  %v4110_v61 = vadd.f32 %v4109_v43, %v9111_v20  ;;  %4619 = vmatmul.mubr.bf16.gmra.mxu1 %v9025_v19  ;;  %4467 = vmatprep.mubr.bf16.mxu0 %v9027_v17 }
 0x260   :  { %4628 = vmatprep.mubr.bf16.mxu1 %v9029_v5  ;;  %v4111_v59 = vpop.f32.mrf.mxu0 }
 0x261   :  { %v4272_v4 = vpop.f32.mrf.mxu1  ;;  %6781 = vst [vmem:[#allocation8 + $0x600] sm:$0xff] %v4269_v49  ;;  %v4271_v28 = vadd.f32 %v4270_v27, %v4110_v61  ;;  %v4112_v26 = vadd.f32 %v4111_v59, %v9107_v35 }
 0x262   :  { %v4113_v9 = vpop.f32.mrf.mxu0 }
 0x263   :  { %v4274_v57 = vpop.f32.mrf.mxu1  ;;  %6782 = vst [vmem:[#allocation8 + $0x608] sm:$0xff] %v4271_v28  ;;  %v4273_v52 = vadd.f32 %v4272_v4, %v4112_v26  ;;  %v4114_v60 = vadd.f32 %v4113_v9, %v9111_v20 }
 0x264   :  { %v4117_v34 = vpop.f32.mrf.mxu0 }
 0x265   :  { %v4278_v2 = vpop.f32.mrf.mxu1  ;;  %6797 = vst [vmem:[#allocation8 + $0x680] sm:$0xff] %v4273_v52  ;;  %v4275_v42 = vadd.f32 %v4274_v57, %v4114_v60  ;;  %v4118_v18 = vadd.f32 %v4117_v34, %v9107_v35 }
 0x266   :  { %v4119_v3 = vpop.f32.mrf.mxu0  ;;  %4468 = vmatmul.mubr.bf16.gmra.mxu0 %v9039_v37 }
 0x267   :  { %v4280_v13 = vpop.f32.mrf.mxu1  ;;  %6798 = vst [vmem:[#allocation8 + $0x688] sm:$0xff] %v4275_v42  ;;  %v4279_v32 = vadd.f32 %v4278_v2, %v4118_v18  ;;  %v4120_v0 = vadd.f32 %v4119_v3, %v9111_v20  ;;  %4629 = vmatmul.mubr.bf16.gmra.mxu1 %v9041_v40  ;;  %4477 = vmatprep.mubr.bf16.mxu0 %v9053_v22 }
 0x268   :  { %4638 = vmatprep.mubr.bf16.mxu1 %v9055_v1  ;;  %v4121_v8 = vpop.f32.mrf.mxu0 }
 0x269   :  { %v4282_v46 = vpop.f32.mrf.mxu1  ;;  %6813 = vst [vmem:[#allocation8 + $0x700] sm:$0xff] %v4279_v32  ;;  %v4281_v10 = vadd.f32 %v4280_v13, %v4120_v0  ;;  %v4122_v31 = vadd.f32 %v4121_v8, %v9107_v35 }
 0x26a   :  { %v4123_v43 = vpop.f32.mrf.mxu0 }
 0x26b   :  { %v4284_v27 = vpop.f32.mrf.mxu1  ;;  %6814 = vst [vmem:[#allocation8 + $0x708] sm:$0xff] %v4281_v10  ;;  %v4283_v49 = vadd.f32 %v4282_v46, %v4122_v31  ;;  %v4124_v61 = vadd.f32 %v4123_v43, %v9111_v20 }
 0x26c   :  { %v4127_v59 = vpop.f32.mrf.mxu0 }
 0x26d   :  { %v4288_v4 = vpop.f32.mrf.mxu1  ;;  %6829 = vst [vmem:[#allocation8 + $0x780] sm:$0xff] %v4283_v49  ;;  %v4285_v28 = vadd.f32 %v4284_v27, %v4124_v61  ;;  %v4128_v26 = vadd.f32 %v4127_v59, %v9107_v35 }
 0x26e   :  { %v4129_v9 = vpop.f32.mrf.mxu0  ;;  %4478 = vmatmul.mubr.bf16.gmra.mxu0 %v9057_v38 }
 0x26f   :  { %v4290_v57 = vpop.f32.mrf.mxu1  ;;  %6830 = vst [vmem:[#allocation8 + $0x788] sm:$0xff] %v4285_v28  ;;  %v4289_v52 = vadd.f32 %v4288_v4, %v4128_v26  ;;  %v4130_v60 = vadd.f32 %v4129_v9, %v9111_v20  ;;  %4639 = vmatmul.mubr.bf16.gmra.mxu1 %v9059_v15  ;;  %4487 = vmatprep.mubr.bf16.mxu0 %v9067_v63 }
 0x270   :  { %4648 = vmatprep.mubr.bf16.mxu1 %v9069_v50  ;;  %v4131_v34 = vpop.f32.mrf.mxu0 }
 0x271   :  { %v4292_v2 = vpop.f32.mrf.mxu1  ;;  %6845 = vst [vmem:[#allocation8 + $0x800] sm:$0xff] %v4289_v52  ;;  %v4291_v42 = vadd.f32 %v4290_v57, %v4130_v60  ;;  %v4132_v18 = vadd.f32 %v4131_v34, %v9107_v35  ;;  %v956_v52 = vld [vmem:[#allocation5 + $0x318] sm:$0xff] }
 0x272   :  { %v4133_v3 = vpop.f32.mrf.mxu0 }
 0x273   :  { %v4294_v13 = vpop.f32.mrf.mxu1  ;;  %6846 = vst [vmem:[#allocation8 + $0x808] sm:$0xff] %v4291_v42  ;;  %v4293_v32 = vadd.f32 %v4292_v2, %v4132_v18  ;;  %v4134_v0 = vadd.f32 %v4133_v3, %v9111_v20  ;;  %v964_v2 = vld [vmem:[#allocation5 + $0x358] sm:$0xff] }
 0x274   :  { %v4137_v8 = vpop.f32.mrf.mxu0  ;;  %v1212_v42 = vld [vmem:[#allocation5 + $0xb18] sm:$0xff] }
 0x275   :  { %v4298_v46 = vpop.f32.mrf.mxu1  ;;  %6861 = vst [vmem:[#allocation8 + $0x880] sm:$0xff] %v4293_v32  ;;  %v4295_v10 = vadd.f32 %v4294_v13, %v4134_v0  ;;  %v4138_v31 = vadd.f32 %v4137_v8, %v9107_v35  ;;  %v1220_v18 = vld [vmem:[#allocation5 + $0xb58] sm:$0xff]  ;;  %v7125_v32 = vcombine.low %v9162_v53, %v9167_v12  ;;  %v10622_v53 = vld [vmem:[#allocation54_spill] sm:$0xff] }
 0x276   :  { %v4139_v43 = vpop.f32.mrf.mxu0  ;;  %4488 = vmatmul.mubr.bf16.gmra.mxu0 %v9075_v16  ;;  %v1196_v12 = vld [vmem:[#allocation5 + $0xa98] sm:$0xff] }
 0x277   :  { %v4300_v27 = vpop.f32.mrf.mxu1  ;;  %6862 = vst [vmem:[#allocation8 + $0x888] sm:$0xff] %v4295_v10  ;;  %v4299_v49 = vadd.f32 %v4298_v46, %v4138_v31  ;;  %v4140_v61 = vadd.f32 %v4139_v43, %v9111_v20  ;;  %4649 = vmatmul.mubr.bf16.gmra.mxu1 %v9077_v36  ;;  %4689 = vmatprep.mubr.bf16.mxu0 %v8655_v55 }
 0x278   :  { %4850 = vmatprep.mubr.bf16.mxu1 %v10605_v45  ;;  %v4141_v59 = vpop.f32.mrf.mxu0  ;;  %v7381_v46 = vcombine.low %v9169_v47, %v9171_v29  ;;  %v7110_v43 = vcombine.high %v956_v52, %v964_v2 }
 0x279   :  { %v4302_v4 = vpop.f32.mrf.mxu1  ;;  %6877 = vst [vmem:[#allocation8 + $0x900] sm:$0xff] %v4299_v49  ;;  %v4301_v28 = vadd.f32 %v4300_v27, %v4140_v61  ;;  %v4142_v26 = vadd.f32 %v4141_v59, %v9107_v35  ;;  %v7366_v27 = vcombine.high %v1212_v42, %v1220_v18  ;;  %v940_v49 = vld [vmem:[#allocation5 + $0x298] sm:$0xff] }
 0x27a   :  { %v4143_v9 = vpop.f32.mrf.mxu0  ;;  %v948_v61 = vld [vmem:[#allocation5 + $0x2d8] sm:$0xff] }
 0x27b   :  { %v4304_v57 = vpop.f32.mrf.mxu1  ;;  %6878 = vst [vmem:[#allocation8 + $0x908] sm:$0xff] %v4301_v28  ;;  %v4303_v60 = vadd.f32 %v4302_v4, %v4142_v26  ;;  %v4144_v34 = vadd.f32 %v4143_v9, %v9111_v20  ;;  %v1204_v28 = vld [vmem:[#allocation5 + $0xad8] sm:$0xff]  ;;  %v7109_v26 = vcombine.low %v956_v52, %v964_v2  ;;  %v7365_v9 = vcombine.low %v1212_v42, %v1220_v18 }
 0x27c   :  { %v4147_v3 = vpop.f32.mrf.mxu0  ;;  %v1180_v52 = vld [vmem:[#allocation5 + $0xa18] sm:$0xff] }
 0x27d   :  { %v4308_v13 = vpop.f32.mrf.mxu1  ;;  %6893 = vst [vmem:[#allocation8 + $0x980] sm:$0xff] %v4303_v60  ;;  %v4305_v0 = vadd.f32 %v4304_v57, %v4144_v34  ;;  %v4148_v8 = vadd.f32 %v4147_v3, %v9107_v35  ;;  %v10623_v60 = vld [vmem:[#allocation59_spill] sm:$0xff]  ;;  %v7094_v3 = vcombine.high %v940_v49, %v948_v61  ;;  %v1188_v2 = vld [vmem:[#allocation5 + $0xa58] sm:$0xff] }
 0x27e   :  { %v4149_v10 = vpop.f32.mrf.mxu0  ;;  %4690 = vmatmul.mubr.bf16.vlgmr.msra.gmra.mxu0 %v10606_v48 }
 0x27f   :  { %v4310_v31 = vpop.f32.mrf.mxu1  ;;  %6894 = vst [vmem:[#allocation8 + $0x988] sm:$0xff] %v4305_v0  ;;  %v4309_v59 = vadd.f32 %v4308_v13, %v4148_v8  ;;  %v4150_v4 = vadd.f32 %v4149_v10, %v9111_v20  ;;  %4851 = vmatmul.mubr.bf16.vlgmr.msra.gmra.mxu1 %v10622_v53  ;;  %4980 = vmatpush1.bf16.msra.mxu0 %v7125_v32  ;;  %v924_v8 = vld [vmem:[#allocation5 + $0x218] sm:$0xff] }
 0x280   :  { %4699 = vmatprep.mubr.bf16.mxu0 %v8717_v11  ;;  %v4151_v47 = vpop.f32.mrf.mxu0  ;;  %4860 = vmatprep.mubr.bf16.mxu1 %v10623_v60  ;;  %v7350_v0 = vcombine.high %v1196_v12, %v1204_v28  ;;  %v932_v11 = vld [vmem:[#allocation5 + $0x258] sm:$0xff] }
 0x281   :  { %v4312_v29 = vpop.f32.mrf.mxu1  ;;  %6909 = vst [vmem:[#allocation8 + $0xa00] sm:$0xff] %v4309_v59  ;;  %v4311_v57 = vadd.f32 %v4310_v31, %v4150_v4  ;;  %v4152_v34 = vadd.f32 %v4151_v47, %v9107_v35  ;;  %5141 = vmatpush1.bf16.msra.mxu1 %v7381_v46  ;;  %4981 = vmatprep.subr.bf16.mxu0 %v7110_v43  ;;  %v908_v59 = vld [vmem:[#allocation5 + $0x198] sm:$0xff]  ;;  %v10624_v4 = vld [vmem:[#allocation55_spill] sm:$0xff]  ;;  %v10625_v47 = vld [vmem:[#allocation58_spill] sm:$0xff] }
 0x282   :  { %v4153_v13 = vpop.f32.mrf.mxu0  ;;  %5142 = vmatprep.subr.bf16.mxu1 %v7366_v27  ;;  %v7093_v31 = vcombine.low %v940_v49, %v948_v61  ;;  %v7349_v46 = vcombine.low %v1196_v12, %v1204_v28  ;;  %v7078_v43 = vcombine.high %v924_v8, %v932_v11  ;;  %v7334_v27 = vcombine.high %v1180_v52, %v1188_v2 }
 0x283   :  { %6910 = vst [vmem:[#allocation8 + $0xa08] sm:$0xff] %v4311_v57  ;;  %v4313_v32 = vadd.f32 %v4312_v29, %v4152_v34  ;;  %v4154_v10 = vadd.f32 %v4153_v13, %v9111_v20  ;;  %v4314_v42 = vpop.f32.mrf.mxu1  ;;  %4982 = vmatpush1.bf16.msra.mxu0 %v7109_v26  ;;  %v916_v29 = vld [vmem:[#allocation5 + $0x1d8] sm:$0xff]  ;;  %v10626_v13 = vld [vmem:[#allocation60_spill] sm:$0xff]  ;;  %v7077_v49 = vcombine.low %v924_v8, %v932_v11  ;;  %v10629_v11 = vld [vmem:[#allocation66_spill] sm:$0xff] }
 0x284   :  { %4983 = vmatprep.subr.bf16.mxu0 %v7094_v3  ;;  %v1164_v57 = vld [vmem:[#allocation5 + $0x998] sm:$0xff]  ;;  %v7333_v61 = vcombine.low %v1180_v52, %v1188_v2  ;;  %v7062_v12 = vcombine.high %v908_v59, %v916_v29 }
 0x285   :  { %6925 = vst [vmem:[#allocation8 + $0xa80] sm:$0xff] %v4313_v32  ;;  %v4315_v18 = vadd.f32 %v4314_v42, %v4154_v10  ;;  %5143 = vmatpush1.bf16.msra.mxu1 %v7365_v9  ;;  %v1172_v34 = vld [vmem:[#allocation5 + $0x9d8] sm:$0xff]  ;;  %v7061_v10 = vcombine.low %v908_v59, %v916_v29 }
 0x286   :  { %5144 = vmatprep.subr.bf16.mxu1 %v7350_v0  ;;  %4700 = vmatmul.mubr.bf16.gmra.mxu0 %v10624_v4  ;;  %v10627_v26 = vld [vmem:[#allocation61_spill] sm:$0xff]  ;;  %v7318_v28 = vcombine.high %v1164_v57, %v1172_v34  ;;  %v7317_v42 = vcombine.low %v1164_v57, %v1172_v34 }
 0x287   :  { %6926 = vst [vmem:[#allocation8 + $0xa88] sm:$0xff] %v4315_v18  ;;  %4861 = vmatmul.mubr.bf16.gmra.mxu1 %v10625_v47  ;;  %4709 = vmatprep.mubr.bf16.mxu0 %v10626_v13  ;;  %v892_v9 = vld [vmem:[#allocation5 + $0x118] sm:$0xff] }
 0x288   :  { %4870 = vmatprep.mubr.bf16.mxu1 %v10627_v26  ;;  %4984 = vmatpush1.bf16.msra.mxu0 %v7093_v31  ;;  %v900_v3 = vld [vmem:[#allocation5 + $0x158] sm:$0xff] }
 0x289   :  { %5145 = vmatpush1.bf16.msra.mxu1 %v7349_v46  ;;  %4985 = vmatprep.subr.bf16.mxu0 %v7078_v43  ;;  %v1148_v0 = vld [vmem:[#allocation5 + $0x918] sm:$0xff]  ;;  %v7046_v18 = vcombine.high %v892_v9, %v900_v3  ;;  %v10628_v46 = vld [vmem:[#allocation64_spill] sm:$0xff]  ;;  %v10630_v43 = vld [vmem:[#allocation62_spill] sm:$0xff]  ;;  %v7045_v59 = vcombine.low %v892_v9, %v900_v3 }
 0x28a   :  { %5146 = vmatprep.subr.bf16.mxu1 %v7334_v27  ;;  %v1156_v32 = vld [vmem:[#allocation5 + $0x958] sm:$0xff]  ;;  %v10631_v27 = vld [vmem:[#allocation63_spill] sm:$0xff] }
 0x28b   :  { %v7302_v26 = vcombine.high %v1148_v0, %v1156_v32  ;;  %v876_v31 = vld [vmem:[#allocation5 + $0x98] sm:$0xff]  ;;  %v7301_v29 = vcombine.low %v1148_v0, %v1156_v32  ;;  %v10633_v9 = vld [vmem:[#allocation67_spill] sm:$0xff] }
 0x28c   :  { %4986 = vmatpush1.bf16.msra.mxu0 %v7077_v49  ;;  %v884_v8 = vld [vmem:[#allocation5 + $0xd8] sm:$0xff] }
 0x28d   :  { %5147 = vmatpush1.bf16.msra.mxu1 %v7333_v61  ;;  %4987 = vmatprep.subr.bf16.mxu0 %v7062_v12  ;;  %v1132_v52 = vld [vmem:[#allocation5 + $0x898] sm:$0xff]  ;;  %v7030_v57 = vcombine.high %v876_v31, %v884_v8 }
 0x28e   :  { %5148 = vmatprep.subr.bf16.mxu1 %v7318_v28  ;;  %4710 = vmatmul.mubr.bf16.gmra.mxu0 %v10628_v46  ;;  %v1140_v2 = vld [vmem:[#allocation5 + $0x8d8] sm:$0xff] }
 0x28f   :  { %4871 = vmatmul.mubr.bf16.gmra.mxu1 %v10629_v11  ;;  %4719 = vmatprep.mubr.bf16.mxu0 %v10630_v43  ;;  %v7286_v34 = vcombine.high %v1132_v52, %v1140_v2  ;;  %v860_v49 = vld [vmem:[#allocation5 + $0x18] sm:$0xff]  ;;  %v7029_v11 = vcombine.low %v876_v31, %v884_v8  ;;  %v7285_v46 = vcombine.low %v1132_v52, %v1140_v2 }
 0x290   :  { %4880 = vmatprep.mubr.bf16.mxu1 %v10631_v27  ;;  %4988 = vmatpush1.bf16.msra.mxu0 %v7061_v10  ;;  %v868_v61 = vld [vmem:[#allocation5 + $0x58] sm:$0xff] }
 0x291   :  { %5149 = vmatpush1.bf16.msra.mxu1 %v7317_v42  ;;  %4989 = vmatprep.subr.bf16.mxu0 %v7046_v18  ;;  %v1116_v12 = vld [vmem:[#allocation5 + $0x818] sm:$0xff]  ;;  %v7014_v43 = vcombine.high %v860_v49, %v868_v61  ;;  %v10635_v18 = vld [vmem:[#allocation71_spill] sm:$0xff]  ;;  %v7013_v31 = vcombine.low %v860_v49, %v868_v61  ;;  %v10636_v49 = vld [vmem:[#allocation68_spill] sm:$0xff] }
 0x292   :  { %5150 = vmatprep.subr.bf16.mxu1 %v7302_v26  ;;  %v1124_v28 = vld [vmem:[#allocation5 + $0x858] sm:$0xff]  ;;  %v10637_v61 = vld [vmem:[#allocation70_spill] sm:$0xff] }
 0x293   :  { %v7270_v27 = vcombine.high %v1116_v12, %v1124_v28  ;;  %v1100_v10 = vld [vmem:[#allocation5 + $0x798] sm:$0xff]  ;;  %v7269_v8 = vcombine.low %v1116_v12, %v1124_v28 }
 0x294   :  { %4990 = vmatpush1.bf16.msra.mxu0 %v7045_v59  ;;  %v10632_v42 = vld [vmem:[#allocation65_spill] sm:$0xff] }
 0x295   :  { %5151 = vmatpush1.bf16.msra.mxu1 %v7301_v29  ;;  %4991 = vmatprep.subr.bf16.mxu0 %v7030_v57  ;;  %v1108_v26 = vld [vmem:[#allocation5 + $0x7d8] sm:$0xff] }
 0x296   :  { %5152 = vmatprep.subr.bf16.mxu1 %v7286_v34  ;;  %4720 = vmatmul.mubr.bf16.gmra.mxu0 %v10632_v42  ;;  %v1356_v3 = vld [vmem:[#allocation5 + $0xf98] sm:$0xff]  ;;  %v7254_v52 = vcombine.high %v1100_v10, %v1108_v26 }
 0x297   :  { %4881 = vmatmul.mubr.bf16.gmra.mxu1 %v10633_v9  ;;  %v1364_v0 = vld [vmem:[#allocation5 + $0xfd8] sm:$0xff]  ;;  %v7253_v9 = vcombine.low %v1100_v10, %v1108_v26 }
 0x298   :  { %v10634_v32 = vld [vmem:[#allocation69_spill] sm:$0xff]  ;;  %4890 = vmatprep.mubr.bf16.mxu1 %v10635_v18  ;;  %4992 = vmatpush1.bf16.msra.mxu0 %v7029_v11  ;;  %v7510_v2 = vcombine.high %v1356_v3, %v1364_v0  ;;  %v7509_v42 = vcombine.low %v1356_v3, %v1364_v0 }
 0x299   :  { %4729 = vmatprep.mubr.bf16.mxu0 %v10634_v32  ;;  %5153 = vmatpush1.bf16.msra.mxu1 %v7285_v46  ;;  %v1084_v59 = vld [vmem:[#allocation5 + $0x718] sm:$0xff] }
 0x29a   :  { %4993 = vmatprep.subr.bf16.mxu0 %v7014_v43  ;;  %5154 = vmatprep.subr.bf16.mxu1 %v7270_v27  ;;  %v1092_v29 = vld [vmem:[#allocation5 + $0x758] sm:$0xff] }
 0x29b   :  { %v1340_v57 = vld [vmem:[#allocation5 + $0xf18] sm:$0xff]  ;;  %v7238_v32 = vcombine.high %v1084_v59, %v1092_v29  ;;  %v7237_v12 = vcombine.low %v1084_v59, %v1092_v29  ;;  %v10638_v59 = vld [vmem:[#allocation74_spill] sm:$0xff]  ;;  %v10639_v29 = vld [vmem:[#allocation72_spill] sm:$0xff] }
 0x29c   :  { %v1348_v34 = vld [vmem:[#allocation5 + $0xf58] sm:$0xff]  ;;  %4994 = vmatpush1.bf16.msra.mxu0 %v7013_v31 }
 0x29d   :  { %5155 = vmatpush1.bf16.msra.mxu1 %v7269_v8  ;;  %4995 = vmatprep.subr.bf16.mxu0 %v7254_v52  ;;  %v7494_v18 = vcombine.high %v1340_v57, %v1348_v34  ;;  %v1068_v11 = vld [vmem:[#allocation5 + $0x698] sm:$0xff]  ;;  %v7493_v28 = vcombine.low %v1340_v57, %v1348_v34 }
 0x29e   :  { %5156 = vmatprep.subr.bf16.mxu1 %v7510_v2  ;;  %4730 = vmatmul.mubr.bf16.gmra.mxu0 %v8871_v33  ;;  %v1076_v46 = vld [vmem:[#allocation5 + $0x6d8] sm:$0xff] }
 0x29f   :  { %4891 = vmatmul.mubr.bf16.gmra.mxu1 %v8873_v21  ;;  %v1324_v43 = vld [vmem:[#allocation5 + $0xe98] sm:$0xff]  ;;  %4739 = vmatprep.mubr.bf16.mxu0 %v10636_v49  ;;  %v7222_v10 = vcombine.high %v1068_v11, %v1076_v46  ;;  %v7221_v52 = vcombine.low %v1068_v11, %v1076_v46 }
 0x2a0   :  { %v1332_v27 = vld [vmem:[#allocation5 + $0xed8] sm:$0xff]  ;;  %4900 = vmatprep.mubr.bf16.mxu1 %v10637_v61  ;;  %4996 = vmatpush2.bf16.msra.mxu0 %v7253_v9 }
 0x2a1   :  { %5157 = vmatpush2.bf16.msra.mxu1 %v7509_v42  ;;  %4997 = vmatprep.subr.bf16.mxu0 %v7238_v32  ;;  %v7478_v26 = vcombine.high %v1324_v43, %v1332_v27  ;;  %v1052_v3 = vld [vmem:[#allocation5 + $0x618] sm:$0xff]  ;;  %v7477_v2 = vcombine.low %v1324_v43, %v1332_v27 }
 0x2a2   :  { %5158 = vmatprep.subr.bf16.mxu1 %v7494_v18  ;;  %v1060_v0 = vld [vmem:[#allocation5 + $0x658] sm:$0xff] }
 0x2a3   :  { %v1308_v31 = vld [vmem:[#allocation5 + $0xe18] sm:$0xff]  ;;  %v7206_v49 = vcombine.high %v1052_v3, %v1060_v0  ;;  %v7205_v57 = vcombine.low %v1052_v3, %v1060_v0 }
 0x2a4   :  { %v1316_v8 = vld [vmem:[#allocation5 + $0xe58] sm:$0xff]  ;;  %4998 = vmatpush2.bf16.msra.mxu0 %v7237_v12 }
 0x2a5   :  { %5159 = vmatpush2.bf16.msra.mxu1 %v7493_v28  ;;  %4999 = vmatprep.subr.bf16.mxu0 %v7222_v10  ;;  %v7462_v61 = vcombine.high %v1308_v31, %v1316_v8  ;;  %v1036_v9 = vld [vmem:[#allocation5 + $0x598] sm:$0xff]  ;;  %v7461_v34 = vcombine.low %v1308_v31, %v1316_v8 }
 0x2a6   :  { %5160 = vmatprep.subr.bf16.mxu1 %v7478_v26  ;;  %4740 = vmatmul.mubr.bf16.gmra.mxu0 %v8909_v24  ;;  %v1044_v42 = vld [vmem:[#allocation5 + $0x5d8] sm:$0xff] }
 0x2a7   :  { %4901 = vmatmul.mubr.bf16.gmra.mxu1 %v8911_v39  ;;  %v1292_v32 = vld [vmem:[#allocation5 + $0xd98] sm:$0xff]  ;;  %4749 = vmatprep.mubr.bf16.mxu0 %v10638_v59  ;;  %v7190_v11 = vcombine.high %v1036_v9, %v1044_v42  ;;  %v7189_v10 = vcombine.low %v1036_v9, %v1044_v42 }
 0x2a8   :  { %v1300_v18 = vld [vmem:[#allocation5 + $0xdd8] sm:$0xff]  ;;  %4910 = vmatprep.mubr.bf16.mxu1 %v10639_v29  ;;  %5000 = vmatpush2.bf16.msra.mxu0 %v7221_v52 }
 0x2a9   :  { %5161 = vmatpush2.bf16.msra.mxu1 %v7477_v2  ;;  %5001 = vmatprep.subr.bf16.mxu0 %v7206_v49  ;;  %v7446_v46 = vcombine.high %v1292_v32, %v1300_v18  ;;  %v1020_v43 = vld [vmem:[#allocation5 + $0x518] sm:$0xff]  ;;  %v7445_v26 = vcombine.low %v1292_v32, %v1300_v18 }
 0x2aa   :  { %5162 = vmatprep.subr.bf16.mxu1 %v7462_v61  ;;  %v1028_v27 = vld [vmem:[#allocation5 + $0x558] sm:$0xff] }
 0x2ab   :  { %v1276_v12 = vld [vmem:[#allocation5 + $0xd18] sm:$0xff]  ;;  %v7174_v59 = vcombine.high %v1020_v43, %v1028_v27  ;;  %v7173_v0 = vcombine.low %v1020_v43, %v1028_v27  ;;  %v9265_v43 = vld [vmem:[#allocation5 + $0xbe0] sm:$0xff] }
 0x2ac   :  { %v1284_v28 = vld [vmem:[#allocation5 + $0xd58] sm:$0xff]  ;;  %5002 = vmatpush2.bf16.msra.mxu0 %v7205_v57 }
 0x2ad   :  { %5163 = vmatpush2.bf16.msra.mxu1 %v7461_v34  ;;  %5003 = vmatprep.subr.bf16.mxu0 %v7190_v11  ;;  %v7430_v29 = vcombine.high %v1276_v12, %v1284_v28  ;;  %v1004_v52 = vld [vmem:[#allocation5 + $0x498] sm:$0xff]  ;;  %v7429_v31 = vcombine.low %v1276_v12, %v1284_v28 }
 0x2ae   :  { %5164 = vmatprep.subr.bf16.mxu1 %v7446_v46  ;;  %4750 = vmatmul.mubr.bf16.gmra.mxu0 %v8941_v6  ;;  %v1012_v49 = vld [vmem:[#allocation5 + $0x4d8] sm:$0xff] }
 0x2af   :  { %4911 = vmatmul.mubr.bf16.gmra.mxu1 %v8943_v58  ;;  %v1260_v61 = vld [vmem:[#allocation5 + $0xc98] sm:$0xff]  ;;  %4759 = vmatprep.mubr.bf16.mxu0 %v8951_v56  ;;  %v7158_v8 = vcombine.high %v1004_v52, %v1012_v49  ;;  %v7157_v57 = vcombine.low %v1004_v52, %v1012_v49 }
 0x2b0   :  { %v1268_v3 = vld [vmem:[#allocation5 + $0xcd8] sm:$0xff]  ;;  %4920 = vmatprep.mubr.bf16.mxu1 %v8953_v41  ;;  %5004 = vmatpush2.bf16.msra.mxu0 %v7189_v10  ;;  %v9257_v10 = vld [vmem:[#allocation5 + $0x3a0] sm:$0xff] }
 0x2b1   :  { %5165 = vmatpush2.bf16.msra.mxu1 %v7445_v26  ;;  %5005 = vmatprep.subr.bf16.mxu0 %v7174_v59  ;;  %v7414_v2 = vcombine.high %v1260_v61, %v1268_v3  ;;  %v988_v9 = vld [vmem:[#allocation5 + $0x418] sm:$0xff]  ;;  %v7413_v34 = vcombine.low %v1260_v61, %v1268_v3  ;;  %v9261_v59 = vld [vmem:[#allocation5 + $0x3e0] sm:$0xff] }
 0x2b2   :  { %5166 = vmatprep.subr.bf16.mxu1 %v7430_v29  ;;  %v996_v42 = vld [vmem:[#allocation5 + $0x458] sm:$0xff]  ;;  %v9263_v29 = vld [vmem:[#allocation5 + $0xba0] sm:$0xff]  ;;  %v7128_v28 = vcombine.high %v9257_v10, %v9261_v59 }
 0x2b3   :  { %v1244_v32 = vld [vmem:[#allocation5 + $0xc18] sm:$0xff]  ;;  %v7142_v11 = vcombine.high %v988_v9, %v996_v42  ;;  %v7141_v27 = vcombine.low %v988_v9, %v996_v42  ;;  %v7384_v26 = vcombine.high %v9263_v29, %v9265_v43 }
 0x2b4   :  { %v1252_v18 = vld [vmem:[#allocation5 + $0xc58] sm:$0xff]  ;;  %5006 = vmatpush2.bf16.msra.mxu0 %v7173_v0 }
 0x2b5   :  { %5167 = vmatpush2.bf16.msra.mxu1 %v7429_v31  ;;  %5007 = vmatprep.subr.bf16.mxu0 %v7158_v8  ;;  %v7398_v46 = vcombine.high %v1244_v32, %v1252_v18  ;;  %v7397_v12 = vcombine.low %v1244_v32, %v1252_v18 }
 0x2b6   :  { %5168 = vmatprep.subr.bf16.mxu1 %v7414_v2  ;;  %4760 = vmatmul.mubr.bf16.gmra.mxu0 %v8975_v25 }
 0x2b7   :  { %4921 = vmatmul.mubr.bf16.gmra.mxu1 %v8977_v23  ;;  %4769 = vmatprep.mubr.bf16.mxu0 %v8981_v7 }
 0x2b8   :  { %4930 = vmatprep.mubr.bf16.mxu1 %v8983_v30  ;;  %5008 = vmatpush2.bf16.msra.mxu0 %v7157_v57 }
 0x2b9   :  { %5169 = vmatpush2.bf16.msra.mxu1 %v7413_v34  ;;  %5009 = vmatprep.subr.bf16.mxu0 %v7142_v11 }
 0x2ba   :  { %5170 = vmatprep.subr.bf16.mxu1 %v7398_v46 }
 0x2bc   :  { %5010 = vmatpush2.bf16.msra.mxu0 %v7141_v27 }
 0x2bd   :  { %5171 = vmatpush2.bf16.msra.mxu1 %v7397_v12  ;;  %5301 = vmatprep.subr.bf16.mxu0 %v7128_v28 }
 0x2be   :  { %5462 = vmatprep.subr.bf16.mxu1 %v7384_v26  ;;  %4770 = vmatmul.mubr.bf16.gmra.mxu0 %v8999_v51  ;;  %v10640_v26 = vld [vmem:[#allocation79_spill] sm:$0xff] }
 0x2bf   :  { %4931 = vmatmul.mubr.bf16.gmra.mxu1 %v9001_v62  ;;  %4779 = vmatprep.mubr.bf16.mxu0 %v9005_v54 }
 0x2c0   :  { %4940 = vmatprep.mubr.bf16.mxu1 %v9007_v44 }
 0x2c6   :  { %v4157_v52 = vpop.f32.mrf.mxu0  ;;  %v4318_v49 = vpop.f32.mrf.mxu1  ;;  %4780 = vmatmul.mubr.bf16.gmra.mxu0 %v9023_v14 }
 0x2c7   :  { %4941 = vmatmul.mubr.bf16.gmra.mxu1 %v9025_v19  ;;  %v4158_v61 = vadd.f32 %v4157_v52, %v9107_v35  ;;  %4789 = vmatprep.mubr.bf16.mxu0 %v9027_v17  ;;  %v10321_v52 = vsub.s32 2, %v10640_v26 }
 0x2c8   :  { %4950 = vmatprep.mubr.bf16.mxu1 %v9029_v5  ;;  %v4159_v3 = vpop.f32.mrf.mxu0  ;;  %v4320_v0 = vpop.f32.mrf.mxu1 }
 0x2c9   :  { %v4319_v31 = vadd.f32 %v4318_v49, %v4158_v61  ;;  %v4160_v8 = vadd.f32 %v4159_v3, %v9111_v20 }
 0x2ca   :  { %v4161_v2 = vpop.f32.mrf.mxu0  ;;  %v4322_v9 = vpop.f32.mrf.mxu1 }
 0x2cb   :  { %6941 = vst [vmem:[#allocation8 + $0xb00] sm:$0xff] %v4319_v31  ;;  %v4321_v42 = vadd.f32 %v4320_v0, %v4160_v8  ;;  %v4162_v32 = vadd.f32 %v4161_v2, %v9107_v35  ;;  %v10320_v31 = vsub.s32 3, %v10640_v26 }
 0x2cc   :  { %v4163_v18 = vpop.f32.mrf.mxu0  ;;  %v4324_v57 = vpop.f32.mrf.mxu1 }
 0x2cd   :  { %6942 = vst [vmem:[#allocation8 + $0xb08] sm:$0xff] %v4321_v42  ;;  %v4323_v34 = vadd.f32 %v4322_v9, %v4162_v32  ;;  %v4164_v11 = vadd.f32 %v4163_v18, %v9111_v20  ;;  %v9293_v42 = vld [vmem:[#allocation7] sm:$0xff] }
 0x2ce   :  { %v4167_v46 = vpop.f32.mrf.mxu0  ;;  %v4328_v27 = vpop.f32.mrf.mxu1  ;;  %4790 = vmatmul.mubr.bf16.gmra.mxu0 %v9039_v37 }
 0x2cf   :  { %4951 = vmatmul.mubr.bf16.gmra.mxu1 %v9041_v40  ;;  %6957 = vst [vmem:[#allocation8 + $0xb80] sm:$0xff] %v4323_v34  ;;  %v4325_v12 = vadd.f32 %v4324_v57, %v4164_v11  ;;  %v4168_v28 = vadd.f32 %v4167_v46, %v9107_v35  ;;  %4799 = vmatprep.mubr.bf16.mxu0 %v9053_v22 }
 0x2d0   :  { %4960 = vmatprep.mubr.bf16.mxu1 %v9055_v1  ;;  %v4169_v49 = vpop.f32.mrf.mxu0  ;;  %v4330_v61 = vpop.f32.mrf.mxu1  ;;  %v9298_v35 = vrot.slane %v9293_v42, %v10321_v52 }
 0x2d1   :  { %6958 = vst [vmem:[#allocation8 + $0xb88] sm:$0xff] %v4325_v12  ;;  %v4329_v3 = vadd.f32 %v4328_v27, %v4168_v28  ;;  %v4170_v0 = vadd.f32 %v4169_v49, %v9111_v20  ;;  %v9303_v20 = vrot.slane %v9293_v42, %v10320_v31  ;;  %v1221_v31 = vld [vmem:[#allocation5 + $0xb60] sm:$0xff] }
 0x2d2   :  { %v4171_v8 = vpop.f32.mrf.mxu0  ;;  %v4332_v2 = vpop.f32.mrf.mxu1 }
 0x2d3   :  { %6973 = vst [vmem:[#allocation8 + $0xc00] sm:$0xff] %v4329_v3  ;;  %v4331_v9 = vadd.f32 %v4330_v61, %v4170_v0 }
 0x2d4   :  { %v4172_v32 = vpop.f32.mrf.mxu0  ;;  %v4333_v18 = vpop.f32.mrf.mxu1 }
 0x2d5   :  { %6974 = vst [vmem:[#allocation8 + $0xc08] sm:$0xff] %v4331_v9 }
 0x2d6   :  { %v4369_v57 = vpop.f32.mrf.mxu0  ;;  %v4530_v34 = vpop.f32.mrf.mxu1  ;;  %4800 = vmatmul.mubr.bf16.gmra.mxu0 %v9057_v38 }
 0x2d7   :  { %4961 = vmatmul.mubr.bf16.gmra.mxu1 %v9059_v15  ;;  %v4370_v11 = vadd.f32 %v4369_v57, %v9298_v35  ;;  %4809 = vmatprep.mubr.bf16.mxu0 %v9067_v63 }
 0x2d8   :  { %4970 = vmatprep.mubr.bf16.mxu1 %v9069_v50  ;;  %v4371_v46 = vpop.f32.mrf.mxu0  ;;  %v4532_v27 = vpop.f32.mrf.mxu1 }
 0x2d9   :  { %v4531_v12 = vadd.f32 %v4530_v34, %v4370_v11  ;;  %v4372_v28 = vadd.f32 %v4371_v46, %v9303_v20 }
 0x2da   :  { %v4373_v49 = vpop.f32.mrf.mxu0  ;;  %v4534_v61 = vpop.f32.mrf.mxu1 }
 0x2db   :  { %6591 = vst [vmem:[#allocation8 + $0x10] sm:$0xff] %v4531_v12  ;;  %v4533_v3 = vadd.f32 %v4532_v27, %v4372_v28  ;;  %v4374_v0 = vadd.f32 %v4373_v49, %v9298_v35  ;;  %v957_v49 = vld [vmem:[#allocation5 + $0x320] sm:$0xff] }
 0x2dc   :  { %v4375_v8 = vpop.f32.mrf.mxu0  ;;  %v4536_v2 = vpop.f32.mrf.mxu1 }
 0x2dd   :  { %6592 = vst [vmem:[#allocation8 + $0x18] sm:$0xff] %v4533_v3  ;;  %v4535_v9 = vadd.f32 %v4534_v61, %v4374_v0  ;;  %v4376_v32 = vadd.f32 %v4375_v8, %v9303_v20  ;;  %v965_v0 = vld [vmem:[#allocation5 + $0x360] sm:$0xff] }
 0x2de   :  { %v4379_v18 = vpop.f32.mrf.mxu0  ;;  %v4540_v57 = vpop.f32.mrf.mxu1  ;;  %4810 = vmatmul.mubr.bf16.gmra.mxu0 %v9075_v16  ;;  %v1213_v8 = vld [vmem:[#allocation5 + $0xb20] sm:$0xff] }
 0x2df   :  { %4971 = vmatmul.mubr.bf16.gmra.mxu1 %v9077_v36  ;;  %6607 = vst [vmem:[#allocation8 + $0x90] sm:$0xff] %v4535_v9  ;;  %v4537_v34 = vadd.f32 %v4536_v2, %v4376_v32  ;;  %v4380_v11 = vadd.f32 %v4379_v18, %v9298_v35  ;;  %5011 = vmatprep.mubr.bf16.mxu0 %v8655_v55  ;;  %v9325_v55 = vld [vmem:[#allocation5 + $0x2a0] sm:$0xff] }
 0x2e0   :  { %5172 = vmatprep.mubr.bf16.mxu1 %v10605_v45  ;;  %v4381_v46 = vpop.f32.mrf.mxu0  ;;  %v4542_v27 = vpop.f32.mrf.mxu1  ;;  %v7127_v32 = vcombine.low %v9257_v10, %v9261_v59  ;;  %v7368_v45 = vcombine.high %v1213_v8, %v1221_v31  ;;  %v1197_v10 = vld [vmem:[#allocation5 + $0xaa0] sm:$0xff] }
 0x2e1   :  { %6608 = vst [vmem:[#allocation8 + $0x98] sm:$0xff] %v4537_v34  ;;  %v4541_v12 = vadd.f32 %v4540_v57, %v4380_v11  ;;  %v4382_v28 = vadd.f32 %v4381_v46, %v9303_v20  ;;  %v7383_v57 = vcombine.low %v9263_v29, %v9265_v43  ;;  %v7112_v46 = vcombine.high %v957_v49, %v965_v0  ;;  %v1205_v59 = vld [vmem:[#allocation5 + $0xae0] sm:$0xff]  ;;  %v10641_v43 = vld [vmem:[#allocation57_spill] sm:$0xff] }
 0x2e2   :  { %v4383_v61 = vpop.f32.mrf.mxu0  ;;  %v4544_v3 = vpop.f32.mrf.mxu1 }
 0x2e3   :  { %6623 = vst [vmem:[#allocation8 + $0x110] sm:$0xff] %v4541_v12  ;;  %v4543_v2 = vadd.f32 %v4542_v27, %v4382_v28  ;;  %v4384_v9 = vadd.f32 %v4383_v61, %v9298_v35  ;;  %v949_v12 = vld [vmem:[#allocation5 + $0x2e0] sm:$0xff] }
 0x2e4   :  { %v4385_v18 = vpop.f32.mrf.mxu0  ;;  %v4546_v52 = vpop.f32.mrf.mxu1 }
 0x2e5   :  { %6624 = vst [vmem:[#allocation8 + $0x118] sm:$0xff] %v4543_v2  ;;  %v4545_v34 = vadd.f32 %v4544_v3, %v4384_v9  ;;  %v4386_v11 = vadd.f32 %v4385_v18, %v9303_v20  ;;  %v7111_v3 = vcombine.low %v957_v49, %v965_v0  ;;  %v7367_v18 = vcombine.low %v1213_v8, %v1221_v31  ;;  %v1181_v49 = vld [vmem:[#allocation5 + $0xa20] sm:$0xff] }
 0x2e6   :  { %v4389_v27 = vpop.f32.mrf.mxu0  ;;  %v4550_v28 = vpop.f32.mrf.mxu1  ;;  %5012 = vmatmul.mubr.bf16.vlgmr.msra.gmra.mxu0 %v10606_v48  ;;  %v7096_v48 = vcombine.high %v9325_v55, %v949_v12  ;;  %v1189_v0 = vld [vmem:[#allocation5 + $0xa60] sm:$0xff] }
 0x2e7   :  { %5173 = vmatmul.mubr.bf16.vlgmr.msra.gmra.mxu1 %v10622_v53  ;;  %6639 = vst [vmem:[#allocation8 + $0x190] sm:$0xff] %v4545_v34  ;;  %v4547_v61 = vadd.f32 %v4546_v52, %v4386_v11  ;;  %v4390_v29 = vadd.f32 %v4389_v27, %v9298_v35  ;;  %5302 = vmatpush1.bf16.msra.mxu0 %v7127_v32  ;;  %v925_v34 = vld [vmem:[#allocation5 + $0x220] sm:$0xff] }
 0x2e8   :  { %5021 = vmatprep.mubr.bf16.mxu0 %v10641_v43  ;;  %5182 = vmatprep.mubr.bf16.mxu1 %v10623_v60  ;;  %v4391_v2 = vpop.f32.mrf.mxu0  ;;  %v4552_v9 = vpop.f32.mrf.mxu1  ;;  %v7352_v52 = vcombine.high %v1197_v10, %v1205_v59  ;;  %v933_v27 = vld [vmem:[#allocation5 + $0x260] sm:$0xff] }
 0x2e9   :  { %5463 = vmatpush1.bf16.msra.mxu1 %v7383_v57  ;;  %6640 = vst [vmem:[#allocation8 + $0x198] sm:$0xff] %v4547_v61  ;;  %v4551_v53 = vadd.f32 %v4550_v28, %v4390_v29  ;;  %v4392_v36 = vadd.f32 %v4391_v2, %v9303_v20  ;;  %5303 = vmatprep.subr.bf16.mxu0 %v7112_v46  ;;  %v9337_v43 = vld [vmem:[#allocation5 + $0x1a0] sm:$0xff] }
 0x2ea   :  { %5464 = vmatprep.subr.bf16.mxu1 %v7368_v45  ;;  %v4393_v32 = vpop.f32.mrf.mxu0  ;;  %v4554_v11 = vpop.f32.mrf.mxu1  ;;  %v7095_v28 = vcombine.low %v9325_v55, %v949_v12  ;;  %v7351_v46 = vcombine.low %v1197_v10, %v1205_v59  ;;  %v7080_v29 = vcombine.high %v925_v34, %v933_v27  ;;  %v7336_v2 = vcombine.high %v1181_v49, %v1189_v0  ;;  %v1173_v55 = vld [vmem:[#allocation5 + $0x9e0] sm:$0xff]  ;;  %v10642_v12 = vld [vmem:[#allocation61_spill] sm:$0xff] }
 0x2eb   :  { %6655 = vst [vmem:[#allocation8 + $0x210] sm:$0xff] %v4551_v53  ;;  %v4553_v60 = vadd.f32 %v4552_v9, %v4392_v36  ;;  %v4394_v57 = vadd.f32 %v4393_v32, %v9298_v35  ;;  %5304 = vmatpush1.bf16.msra.mxu0 %v7111_v3  ;;  %v917_v36 = vld [vmem:[#allocation5 + $0x1e0] sm:$0xff] }
 0x2ec   :  { %v4395_v31 = vpop.f32.mrf.mxu0  ;;  %v4556_v8 = vpop.f32.mrf.mxu1  ;;  %5305 = vmatprep.subr.bf16.mxu0 %v7096_v48  ;;  %v1165_v3 = vld [vmem:[#allocation5 + $0x9a0] sm:$0xff]  ;;  %v7064_v32 = vcombine.high %v9337_v43, %v917_v36 }
 0x2ed   :  { %5465 = vmatpush1.bf16.msra.mxu1 %v7367_v18  ;;  %6656 = vst [vmem:[#allocation8 + $0x218] sm:$0xff] %v4553_v60  ;;  %v4555_v45 = vadd.f32 %v4554_v11, %v4394_v57  ;;  %v4396_v61 = vadd.f32 %v4395_v31, %v9303_v20  ;;  %v7079_v18 = vcombine.low %v925_v34, %v933_v27 }
 0x2ee   :  { %5466 = vmatprep.subr.bf16.mxu1 %v7352_v52  ;;  %v4399_v53 = vpop.f32.mrf.mxu0  ;;  %v4560_v9 = vpop.f32.mrf.mxu1  ;;  %5022 = vmatmul.mubr.bf16.gmra.mxu0 %v10624_v4  ;;  %v7335_v52 = vcombine.low %v1181_v49, %v1189_v0  ;;  %v7320_v31 = vcombine.high %v1165_v3, %v1173_v55  ;;  %v7063_v0 = vcombine.low %v9337_v43, %v917_v36  ;;  %v1141_v43 = vld [vmem:[#allocation5 + $0x8e0] sm:$0xff] }
 0x2ef   :  { %5183 = vmatmul.mubr.bf16.gmra.mxu1 %v10625_v47  ;;  %6671 = vst [vmem:[#allocation8 + $0x290] sm:$0xff] %v4555_v45  ;;  %v4557_v48 = vadd.f32 %v4556_v8, %v4396_v61  ;;  %v4400_v60 = vadd.f32 %v4399_v53, %v9298_v35  ;;  %5031 = vmatprep.mubr.bf16.mxu0 %v10626_v13  ;;  %v893_v8 = vld [vmem:[#allocation5 + $0x120] sm:$0xff] }
 0x2f0   :  { %5192 = vmatprep.mubr.bf16.mxu1 %v10642_v12  ;;  %v4401_v10 = vpop.f32.mrf.mxu0  ;;  %v4562_v59 = vpop.f32.mrf.mxu1  ;;  %5306 = vmatpush1.bf16.msra.mxu0 %v7095_v28  ;;  %v901_v45 = vld [vmem:[#allocation5 + $0x160] sm:$0xff] }
 0x2f1   :  { %5467 = vmatpush1.bf16.msra.mxu1 %v7351_v46  ;;  %6672 = vst [vmem:[#allocation8 + $0x298] sm:$0xff] %v4557_v48  ;;  %v4561_v11 = vadd.f32 %v4560_v9, %v4400_v60  ;;  %v4402_v57 = vadd.f32 %v4401_v10, %v9303_v20  ;;  %5307 = vmatprep.subr.bf16.mxu0 %v7080_v29  ;;  %v1149_v12 = vld [vmem:[#allocation5 + $0x920] sm:$0xff] }
 0x2f2   :  { %5468 = vmatprep.subr.bf16.mxu1 %v7336_v2  ;;  %v4403_v61 = vpop.f32.mrf.mxu0  ;;  %v4564_v53 = vpop.f32.mrf.mxu1  ;;  %v1157_v13 = vld [vmem:[#allocation5 + $0x960] sm:$0xff]  ;;  %v7319_v46 = vcombine.low %v1165_v3, %v1173_v55  ;;  %v7048_v29 = vcombine.high %v893_v8, %v901_v45 }
 0x2f3   :  { %6687 = vst [vmem:[#allocation8 + $0x310] sm:$0xff] %v4561_v11  ;;  %v4563_v28 = vadd.f32 %v4562_v59, %v4402_v57  ;;  %v4404_v34 = vadd.f32 %v4403_v61, %v9298_v35  ;;  %v7304_v48 = vcombine.high %v1149_v12, %v1157_v13  ;;  %v9349_v60 = vld [vmem:[#allocation5 + $0xa0] sm:$0xff]  ;;  %v10643_v57 = vld [vmem:[#allocation64_spill] sm:$0xff] }
 0x2f4   :  { %v4405_v27 = vpop.f32.mrf.mxu0  ;;  %v4566_v49 = vpop.f32.mrf.mxu1  ;;  %5308 = vmatpush1.bf16.msra.mxu0 %v7079_v18  ;;  %v885_v10 = vld [vmem:[#allocation5 + $0xe0] sm:$0xff] }
 0x2f5   :  { %5469 = vmatpush1.bf16.msra.mxu1 %v7335_v52  ;;  %6688 = vst [vmem:[#allocation8 + $0x318] sm:$0xff] %v4563_v28  ;;  %v4565_v2 = vadd.f32 %v4564_v53, %v4404_v34  ;;  %v4406_v9 = vadd.f32 %v4405_v27, %v9303_v20  ;;  %5309 = vmatprep.subr.bf16.mxu0 %v7064_v32  ;;  %v10644_v18 = vld [vmem:[#allocation66_spill] sm:$0xff]  ;;  %v10646_v32 = vld [vmem:[#allocation63_spill] sm:$0xff] }
 0x2f6   :  { %5470 = vmatprep.subr.bf16.mxu1 %v7320_v31  ;;  %v4409_v59 = vpop.f32.mrf.mxu0  ;;  %v4570_v11 = vpop.f32.mrf.mxu1  ;;  %5032 = vmatmul.mubr.bf16.gmra.mxu0 %v10643_v57  ;;  %v1133_v52 = vld [vmem:[#allocation5 + $0x8a0] sm:$0xff]  ;;  %v7047_v53 = vcombine.low %v893_v8, %v901_v45  ;;  %v7303_v28 = vcombine.low %v1149_v12, %v1157_v13  ;;  %v7032_v34 = vcombine.high %v9349_v60, %v885_v10 }
 0x2f7   :  { %5193 = vmatmul.mubr.bf16.gmra.mxu1 %v10644_v18  ;;  %6703 = vst [vmem:[#allocation8 + $0x390] sm:$0xff] %v4565_v2  ;;  %v4567_v36 = vadd.f32 %v4566_v49, %v4406_v9  ;;  %v4410_v3 = vadd.f32 %v4409_v59, %v9298_v35  ;;  %v10645_v55 = vld [vmem:[#allocation62_spill] sm:$0xff]  ;;  %v7288_v49 = vcombine.high %v1133_v52, %v1141_v43 }
 0x2f8   :  { %5041 = vmatprep.mubr.bf16.mxu0 %v10645_v55  ;;  %5202 = vmatprep.mubr.bf16.mxu1 %v10646_v32  ;;  %v4411_v31 = vpop.f32.mrf.mxu0  ;;  %v4572_v61 = vpop.f32.mrf.mxu1  ;;  %v861_v2 = vld [vmem:[#allocation5 + $0x20] sm:$0xff]  ;;  %v7031_v45 = vcombine.low %v9349_v60, %v885_v10 }
 0x2f9   :  { %5310 = vmatpush1.bf16.msra.mxu0 %v7063_v0  ;;  %5471 = vmatpush1.bf16.msra.mxu1 %v7319_v46  ;;  %6704 = vst [vmem:[#allocation8 + $0x398] sm:$0xff] %v4567_v36  ;;  %v4571_v27 = vadd.f32 %v4570_v11, %v4410_v3  ;;  %v4412_v18 = vadd.f32 %v4411_v31, %v9303_v20  ;;  %v869_v9 = vld [vmem:[#allocation5 + $0x60] sm:$0xff] }
 0x2fa   :  { %5311 = vmatprep.subr.bf16.mxu0 %v7048_v29  ;;  %5472 = vmatprep.subr.bf16.mxu1 %v7304_v48  ;;  %v4413_v59 = vpop.f32.mrf.mxu0  ;;  %v4574_v55 = vpop.f32.mrf.mxu1  ;;  %v1117_v32 = vld [vmem:[#allocation5 + $0x820] sm:$0xff]  ;;  %v7287_v46 = vcombine.low %v1133_v52, %v1141_v43  ;;  %v7016_v29 = vcombine.high %v861_v2, %v869_v9  ;;  %v10649_v43 = vld [vmem:[#allocation69_spill] sm:$0xff] }
 0x2fb   :  { %v1125_v57 = vld [vmem:[#allocation5 + $0x860] sm:$0xff]  ;;  %6719 = vst [vmem:[#allocation8 + $0x410] sm:$0xff] %v4571_v27  ;;  %v4573_v0 = vadd.f32 %v4572_v61, %v4412_v18  ;;  %v4414_v8 = vadd.f32 %v4413_v59, %v9298_v35  ;;  %v10647_v27 = vld [vmem:[#allocation65_spill] sm:$0xff]  ;;  %v7015_v59 = vcombine.low %v861_v2, %v869_v9 }
 0x2fc   :  { %v4415_v13 = vpop.f32.mrf.mxu0  ;;  %v4576_v12 = vpop.f32.mrf.mxu1  ;;  %v7272_v36 = vcombine.high %v1117_v32, %v1125_v57  ;;  %v9361_v3 = vld [vmem:[#allocation5 + $0x7a0] sm:$0xff] }
 0x2fd   :  { %5312 = vmatpush1.bf16.msra.mxu0 %v7047_v53  ;;  %5473 = vmatpush1.bf16.msra.mxu1 %v7303_v28  ;;  %6720 = vst [vmem:[#allocation8 + $0x418] sm:$0xff] %v4573_v0  ;;  %v4575_v48 = vadd.f32 %v4574_v55, %v4414_v8  ;;  %v4416_v11 = vadd.f32 %v4415_v13, %v9303_v20  ;;  %v1109_v18 = vld [vmem:[#allocation5 + $0x7e0] sm:$0xff]  ;;  %v10648_v53 = vld [vmem:[#allocation67_spill] sm:$0xff] }
 0x2fe   :  { %5313 = vmatprep.subr.bf16.mxu0 %v7032_v34  ;;  %5474 = vmatprep.subr.bf16.mxu1 %v7288_v49  ;;  %v4419_v31 = vpop.f32.mrf.mxu0  ;;  %v1357_v28 = vld [vmem:[#allocation5 + $0xfa0] sm:$0xff]  ;;  %v10650_v55 = vld [vmem:[#allocation71_spill] sm:$0xff]  ;;  %v7271_v0 = vcombine.low %v1117_v32, %v1125_v57  ;;  %v7256_v8 = vcombine.high %v9361_v3, %v1109_v18  ;;  %v7255_v9 = vcombine.low %v9361_v3, %v1109_v18 }
 0x2ff   :  { %v4580_v61 = vpop.f32.mrf.mxu1  ;;  %5042 = vmatmul.mubr.bf16.gmra.mxu0 %v10647_v27  ;;  %5203 = vmatmul.mubr.bf16.gmra.mxu1 %v10648_v53  ;;  %v1365_v60 = vld [vmem:[#allocation5 + $0xfe0] sm:$0xff]  ;;  %6735 = vst [vmem:[#allocation8 + $0x490] sm:$0xff] %v4575_v48  ;;  %v4577_v10 = vadd.f32 %v4576_v12, %v4416_v11  ;;  %v4420_v52 = vadd.f32 %v4419_v31, %v9298_v35 }
 0x300   :  { %5051 = vmatprep.mubr.bf16.mxu0 %v10649_v43  ;;  %5212 = vmatprep.mubr.bf16.mxu1 %v10650_v55  ;;  %v4421_v34 = vpop.f32.mrf.mxu0  ;;  %v7512_v12 = vcombine.high %v1357_v28, %v1365_v60  ;;  %v1085_v48 = vld [vmem:[#allocation5 + $0x720] sm:$0xff] }
 0x301   :  { %v4582_v49 = vpop.f32.mrf.mxu1  ;;  %5314 = vmatpush1.bf16.msra.mxu0 %v7031_v45  ;;  %5475 = vmatpush1.bf16.msra.mxu1 %v7287_v46  ;;  %6736 = vst [vmem:[#allocation8 + $0x498] sm:$0xff] %v4577_v10  ;;  %v4581_v13 = vadd.f32 %v4580_v61, %v4420_v52  ;;  %v4422_v53 = vadd.f32 %v4421_v34, %v9303_v20  ;;  %v1093_v11 = vld [vmem:[#allocation5 + $0x760] sm:$0xff] }
 0x302   :  { %5315 = vmatprep.subr.bf16.mxu0 %v7016_v29  ;;  %5476 = vmatprep.subr.bf16.mxu1 %v7272_v36  ;;  %v4423_v31 = vpop.f32.mrf.mxu0  ;;  %v1341_v55 = vld [vmem:[#allocation5 + $0xf20] sm:$0xff]  ;;  %v7511_v46 = vcombine.low %v1357_v28, %v1365_v60  ;;  %v7240_v29 = vcombine.high %v1085_v48, %v1093_v11  ;;  %v10651_v60 = vld [vmem:[#allocation68_spill] sm:$0xff] }
 0x303   :  { %v4584_v43 = vpop.f32.mrf.mxu1  ;;  %v1349_v27 = vld [vmem:[#allocation5 + $0xf60] sm:$0xff]  ;;  %6751 = vst [vmem:[#allocation8 + $0x510] sm:$0xff] %v4581_v13  ;;  %v4583_v45 = vadd.f32 %v4582_v49, %v4422_v53  ;;  %v4424_v2 = vadd.f32 %v4423_v31, %v9298_v35  ;;  %v7239_v13 = vcombine.low %v1085_v48, %v1093_v11 }
 0x304   :  { %v4425_v57 = vpop.f32.mrf.mxu0  ;;  %v7496_v10 = vcombine.high %v1341_v55, %v1349_v27  ;;  %v9373_v52 = vld [vmem:[#allocation5 + $0x6a0] sm:$0xff] }
 0x305   :  { %v4586_v32 = vpop.f32.mrf.mxu1  ;;  %5316 = vmatpush1.bf16.msra.mxu0 %v7015_v59  ;;  %5477 = vmatpush1.bf16.msra.mxu1 %v7271_v0  ;;  %6752 = vst [vmem:[#allocation8 + $0x518] sm:$0xff] %v4583_v45  ;;  %v4585_v36 = vadd.f32 %v4584_v43, %v4424_v2  ;;  %v4426_v61 = vadd.f32 %v4425_v57, %v9303_v20  ;;  %v1077_v53 = vld [vmem:[#allocation5 + $0x6e0] sm:$0xff] }
 0x306   :  { %5317 = vmatprep.subr.bf16.mxu0 %v7256_v8  ;;  %5478 = vmatprep.subr.bf16.mxu1 %v7512_v12  ;;  %v4429_v34 = vpop.f32.mrf.mxu0  ;;  %v1325_v59 = vld [vmem:[#allocation5 + $0xea0] sm:$0xff]  ;;  %v7495_v12 = vcombine.low %v1341_v55, %v1349_v27  ;;  %v7224_v31 = vcombine.high %v9373_v52, %v1077_v53  ;;  %v7223_v11 = vcombine.low %v9373_v52, %v1077_v53 }
 0x307   :  { %v4590_v49 = vpop.f32.mrf.mxu1  ;;  %5052 = vmatmul.mubr.bf16.gmra.mxu0 %v8871_v33  ;;  %5213 = vmatmul.mubr.bf16.gmra.mxu1 %v8873_v21  ;;  %v1333_v3 = vld [vmem:[#allocation5 + $0xee0] sm:$0xff]  ;;  %6767 = vst [vmem:[#allocation8 + $0x590] sm:$0xff] %v4585_v36  ;;  %v4587_v18 = vadd.f32 %v4586_v32, %v4426_v61  ;;  %v4430_v28 = vadd.f32 %v4429_v34, %v9298_v35 }
 0x308   :  { %5061 = vmatprep.mubr.bf16.mxu0 %v10651_v60  ;;  %v10652_v43 = vld [vmem:[#allocation70_spill] sm:$0xff]  ;;  %v4431_v0 = vpop.f32.mrf.mxu0  ;;  %v7480_v57 = vcombine.high %v1325_v59, %v1333_v3 }
 0x309   :  { %5222 = vmatprep.mubr.bf16.mxu1 %v10652_v43  ;;  %v4592_v8 = vpop.f32.mrf.mxu1  ;;  %5318 = vmatpush2.bf16.msra.mxu0 %v7255_v9  ;;  %6768 = vst [vmem:[#allocation8 + $0x598] sm:$0xff] %v4587_v18  ;;  %v4591_v45 = vadd.f32 %v4590_v49, %v4430_v28  ;;  %v4432_v2 = vadd.f32 %v4431_v0, %v9303_v20  ;;  %v1053_v32 = vld [vmem:[#allocation5 + $0x620] sm:$0xff] }
 0x30a   :  { %5479 = vmatpush2.bf16.msra.mxu1 %v7511_v46  ;;  %5319 = vmatprep.subr.bf16.mxu0 %v7240_v29  ;;  %v1061_v36 = vld [vmem:[#allocation5 + $0x660] sm:$0xff]  ;;  %v4433_v61 = vpop.f32.mrf.mxu0  ;;  %v7479_v46 = vcombine.low %v1325_v59, %v1333_v3 }
 0x30b   :  { %5480 = vmatprep.subr.bf16.mxu1 %v7496_v10  ;;  %v4594_v34 = vpop.f32.mrf.mxu1  ;;  %v1309_v43 = vld [vmem:[#allocation5 + $0xe20] sm:$0xff]  ;;  %6783 = vst [vmem:[#allocation8 + $0x610] sm:$0xff] %v4591_v45  ;;  %v4593_v9 = vadd.f32 %v4592_v8, %v4432_v2  ;;  %v4434_v48 = vadd.f32 %v4433_v61, %v9298_v35  ;;  %v7208_v29 = vcombine.high %v1053_v32, %v1061_v36 }
 0x30c   :  { %v1317_v60 = vld [vmem:[#allocation5 + $0xe60] sm:$0xff]  ;;  %v4435_v27 = vpop.f32.mrf.mxu0 }
 0x30d   :  { %v4596_v55 = vpop.f32.mrf.mxu1  ;;  %5320 = vmatpush2.bf16.msra.mxu0 %v7239_v13  ;;  %6784 = vst [vmem:[#allocation8 + $0x618] sm:$0xff] %v4593_v9  ;;  %v4595_v10 = vadd.f32 %v4594_v34, %v4434_v48  ;;  %v4436_v49 = vadd.f32 %v4435_v27, %v9303_v20  ;;  %v7464_v18 = vcombine.high %v1309_v43, %v1317_v60  ;;  %v9385_v28 = vld [vmem:[#allocation5 + $0x5a0] sm:$0xff] }
 0x30e   :  { %5481 = vmatpush2.bf16.msra.mxu1 %v7495_v12  ;;  %5321 = vmatprep.subr.bf16.mxu0 %v7224_v31  ;;  %v1045_v0 = vld [vmem:[#allocation5 + $0x5e0] sm:$0xff]  ;;  %v4439_v8 = vpop.f32.mrf.mxu0  ;;  %v10654_v12 = vld [vmem:[#allocation72_spill] sm:$0xff]  ;;  %v7463_v61 = vcombine.low %v1309_v43, %v1317_v60 }
 0x30f   :  { %5482 = vmatprep.subr.bf16.mxu1 %v7480_v57  ;;  %v4600_v45 = vpop.f32.mrf.mxu1  ;;  %5062 = vmatmul.mubr.bf16.gmra.mxu0 %v8909_v24  ;;  %v1293_v13 = vld [vmem:[#allocation5 + $0xda0] sm:$0xff]  ;;  %6799 = vst [vmem:[#allocation8 + $0x690] sm:$0xff] %v4595_v10  ;;  %v4597_v53 = vadd.f32 %v4596_v55, %v4436_v49  ;;  %v4440_v59 = vadd.f32 %v4439_v8, %v9298_v35 }
 0x310   :  { %5223 = vmatmul.mubr.bf16.gmra.mxu1 %v8911_v39  ;;  %v1301_v52 = vld [vmem:[#allocation5 + $0xde0] sm:$0xff]  ;;  %v4441_v31 = vpop.f32.mrf.mxu0  ;;  %v7207_v57 = vcombine.low %v1053_v32, %v1061_v36  ;;  %v7192_v34 = vcombine.high %v9385_v28, %v1045_v0  ;;  %v7191_v36 = vcombine.low %v9385_v28, %v1045_v0 }
 0x311   :  { %v10653_v3 = vld [vmem:[#allocation74_spill] sm:$0xff]  ;;  %5232 = vmatprep.mubr.bf16.mxu1 %v10654_v12  ;;  %v4602_v2 = vpop.f32.mrf.mxu1  ;;  %5322 = vmatpush2.bf16.msra.mxu0 %v7223_v11  ;;  %6800 = vst [vmem:[#allocation8 + $0x698] sm:$0xff] %v4597_v53  ;;  %v4601_v9 = vadd.f32 %v4600_v45, %v4440_v59  ;;  %v4442_v48 = vadd.f32 %v4441_v31, %v9303_v20 }
 0x312   :  { %5071 = vmatprep.mubr.bf16.mxu0 %v10653_v3  ;;  %5483 = vmatpush2.bf16.msra.mxu1 %v7479_v46  ;;  %v7448_v27 = vcombine.high %v1293_v13, %v1301_v52  ;;  %v1021_v55 = vld [vmem:[#allocation5 + $0x520] sm:$0xff]  ;;  %v4443_v49 = vpop.f32.mrf.mxu0  ;;  %v7447_v46 = vcombine.low %v1293_v13, %v1301_v52 }
 0x313   :  { %5323 = vmatprep.subr.bf16.mxu0 %v7208_v29  ;;  %5484 = vmatprep.subr.bf16.mxu1 %v7464_v18  ;;  %v1029_v10 = vld [vmem:[#allocation5 + $0x560] sm:$0xff]  ;;  %v4604_v8 = vpop.f32.mrf.mxu1  ;;  %6815 = vst [vmem:[#allocation8 + $0x710] sm:$0xff] %v4601_v9  ;;  %v4603_v11 = vadd.f32 %v4602_v2, %v4442_v48  ;;  %v4444_v32 = vadd.f32 %v4443_v49, %v9298_v35 }
 0x314   :  { %v1277_v12 = vld [vmem:[#allocation5 + $0xd20] sm:$0xff]  ;;  %v4445_v60 = vpop.f32.mrf.mxu0  ;;  %v7176_v29 = vcombine.high %v1021_v55, %v1029_v10 }
 0x315   :  { %v1285_v3 = vld [vmem:[#allocation5 + $0xd60] sm:$0xff]  ;;  %v4606_v43 = vpop.f32.mrf.mxu1  ;;  %5324 = vmatpush2.bf16.msra.mxu0 %v7207_v57  ;;  %6816 = vst [vmem:[#allocation8 + $0x718] sm:$0xff] %v4603_v11  ;;  %v4605_v18 = vadd.f32 %v4604_v8, %v4444_v32  ;;  %v4446_v45 = vadd.f32 %v4445_v60, %v9303_v20 }
 0x316   :  { %5485 = vmatpush2.bf16.msra.mxu1 %v7463_v61  ;;  %5325 = vmatprep.subr.bf16.mxu0 %v7192_v34  ;;  %v7432_v53 = vcombine.high %v1277_v12, %v1285_v3  ;;  %v9397_v59 = vld [vmem:[#allocation5 + $0x4a0] sm:$0xff]  ;;  %v4449_v2 = vpop.f32.mrf.mxu0  ;;  %v7175_v34 = vcombine.low %v1021_v55, %v1029_v10  ;;  %v7431_v48 = vcombine.low %v1277_v12, %v1285_v3 }
 0x317   :  { %5486 = vmatprep.subr.bf16.mxu1 %v7448_v27  ;;  %v1013_v31 = vld [vmem:[#allocation5 + $0x4e0] sm:$0xff]  ;;  %v4610_v9 = vpop.f32.mrf.mxu1  ;;  %5072 = vmatmul.mubr.bf16.gmra.mxu0 %v8941_v6  ;;  %6831 = vst [vmem:[#allocation8 + $0x790] sm:$0xff] %v4605_v18  ;;  %v4607_v0 = vadd.f32 %v4606_v43, %v4446_v45  ;;  %v4450_v13 = vadd.f32 %v4449_v2, %v9298_v35 }
 0x318   :  { %5233 = vmatmul.mubr.bf16.gmra.mxu1 %v8943_v58  ;;  %v1261_v57 = vld [vmem:[#allocation5 + $0xca0] sm:$0xff]  ;;  %5081 = vmatprep.mubr.bf16.mxu0 %v8951_v56  ;;  %v4451_v52 = vpop.f32.mrf.mxu0  ;;  %v7160_v27 = vcombine.high %v9397_v59, %v1013_v31  ;;  %v7159_v10 = vcombine.low %v9397_v59, %v1013_v31  ;;  %v9415_v59 = vld [vmem:[#allocation5 + $0xba8] sm:$0xff] }
 0x319   :  { %v1269_v28 = vld [vmem:[#allocation5 + $0xce0] sm:$0xff]  ;;  %5242 = vmatprep.mubr.bf16.mxu1 %v8953_v41  ;;  %v4612_v61 = vpop.f32.mrf.mxu1  ;;  %5326 = vmatpush2.bf16.msra.mxu0 %v7191_v36  ;;  %6832 = vst [vmem:[#allocation8 + $0x798] sm:$0xff] %v4607_v0  ;;  %v4611_v49 = vadd.f32 %v4610_v9, %v4450_v13  ;;  %v4452_v8 = vadd.f32 %v4451_v52, %v9303_v20  ;;  %v9409_v13 = vld [vmem:[#allocation5 + $0x3a8] sm:$0xff] }
 0x31a   :  { %5487 = vmatpush2.bf16.msra.mxu1 %v7447_v46  ;;  %5327 = vmatprep.subr.bf16.mxu0 %v7176_v29  ;;  %v7416_v11 = vcombine.high %v1261_v57, %v1269_v28  ;;  %v989_v32 = vld [vmem:[#allocation5 + $0x420] sm:$0xff]  ;;  %v4453_v43 = vpop.f32.mrf.mxu0  ;;  %v7415_v46 = vcombine.low %v1261_v57, %v1269_v28  ;;  %v9411_v52 = vld [vmem:[#allocation5 + $0x3e8] sm:$0xff] }
 0x31b   :  { %5488 = vmatprep.subr.bf16.mxu1 %v7432_v53  ;;  %v997_v60 = vld [vmem:[#allocation5 + $0x460] sm:$0xff]  ;;  %v4614_v18 = vpop.f32.mrf.mxu1  ;;  %6847 = vst [vmem:[#allocation8 + $0x810] sm:$0xff] %v4611_v49  ;;  %v4613_v36 = vadd.f32 %v4612_v61, %v4452_v8  ;;  %v4454_v55 = vadd.f32 %v4453_v43, %v9298_v35  ;;  %v9417_v31 = vld [vmem:[#allocation5 + $0xbe8] sm:$0xff] }
 0x31c   :  { %v1245_v45 = vld [vmem:[#allocation5 + $0xc20] sm:$0xff]  ;;  %v4455_v3 = vpop.f32.mrf.mxu0  ;;  %v7144_v29 = vcombine.high %v989_v32, %v997_v60 }
 0x31d   :  { %v1253_v2 = vld [vmem:[#allocation5 + $0xc60] sm:$0xff]  ;;  %v4616_v12 = vpop.f32.mrf.mxu1  ;;  %5328 = vmatpush2.bf16.msra.mxu0 %v7175_v34  ;;  %6848 = vst [vmem:[#allocation8 + $0x818] sm:$0xff] %v4613_v36  ;;  %v4615_v53 = vadd.f32 %v4614_v18, %v4454_v55  ;;  %v4456_v9 = vadd.f32 %v4455_v3, %v9303_v20  ;;  %v7386_v36 = vcombine.high %v9415_v59, %v9417_v31 }
 0x31e   :  { %5489 = vmatpush2.bf16.msra.mxu1 %v7431_v48  ;;  %5329 = vmatprep.subr.bf16.mxu0 %v7160_v27  ;;  %v7400_v0 = vcombine.high %v1245_v45, %v1253_v2  ;;  %v4459_v61 = vpop.f32.mrf.mxu0  ;;  %v7143_v27 = vcombine.low %v989_v32, %v997_v60  ;;  %v7399_v8 = vcombine.low %v1245_v45, %v1253_v2 }
 0x31f   :  { %5490 = vmatprep.subr.bf16.mxu1 %v7416_v11  ;;  %v4620_v49 = vpop.f32.mrf.mxu1  ;;  %5082 = vmatmul.mubr.bf16.gmra.mxu0 %v8975_v25  ;;  %6863 = vst [vmem:[#allocation8 + $0x890] sm:$0xff] %v4615_v53  ;;  %v4617_v57 = vadd.f32 %v4616_v12, %v4456_v9  ;;  %v4460_v28 = vadd.f32 %v4459_v61, %v9298_v35 }
 0x320   :  { %5243 = vmatmul.mubr.bf16.gmra.mxu1 %v8977_v23  ;;  %5091 = vmatprep.mubr.bf16.mxu0 %v8981_v7  ;;  %v4461_v34 = vpop.f32.mrf.mxu0  ;;  %v7130_v11 = vcombine.high %v9409_v13, %v9411_v52 }
 0x321   :  { %5252 = vmatprep.mubr.bf16.mxu1 %v8983_v30  ;;  %v4622_v48 = vpop.f32.mrf.mxu1  ;;  %5330 = vmatpush2.bf16.msra.mxu0 %v7159_v10  ;;  %6864 = vst [vmem:[#allocation8 + $0x898] sm:$0xff] %v4617_v57  ;;  %v4621_v43 = vadd.f32 %v4620_v49, %v4460_v28  ;;  %v4462_v18 = vadd.f32 %v4461_v34, %v9303_v20 }
 0x322   :  { %5491 = vmatpush2.bf16.msra.mxu1 %v7415_v46  ;;  %5331 = vmatprep.subr.bf16.mxu0 %v7144_v29  ;;  %v4463_v55 = vpop.f32.mrf.mxu0 }
 0x323   :  { %5492 = vmatprep.subr.bf16.mxu1 %v7400_v0  ;;  %v4624_v3 = vpop.f32.mrf.mxu1  ;;  %6879 = vst [vmem:[#allocation8 + $0x910] sm:$0xff] %v4621_v43  ;;  %v4623_v12 = vadd.f32 %v4622_v48, %v4462_v18  ;;  %v4464_v10 = vadd.f32 %v4463_v55, %v9298_v35 }
 0x324   :  { %v4465_v32 = vpop.f32.mrf.mxu0 }
 0x325   :  { %v4626_v60 = vpop.f32.mrf.mxu1  ;;  %5332 = vmatpush2.bf16.msra.mxu0 %v7143_v27  ;;  %6880 = vst [vmem:[#allocation8 + $0x918] sm:$0xff] %v4623_v12  ;;  %v4625_v45 = vadd.f32 %v4624_v3, %v4464_v10  ;;  %v4466_v2 = vadd.f32 %v4465_v32, %v9303_v20 }
 0x326   :  { %5493 = vmatpush2.bf16.msra.mxu1 %v7399_v8  ;;  %5623 = vmatprep.subr.bf16.mxu0 %v7130_v11  ;;  %v4469_v46 = vpop.f32.mrf.mxu0 }
 0x327   :  { %5784 = vmatprep.subr.bf16.mxu1 %v7386_v36  ;;  %v4630_v29 = vpop.f32.mrf.mxu1  ;;  %5092 = vmatmul.mubr.bf16.gmra.mxu0 %v8999_v51  ;;  %6895 = vst [vmem:[#allocation8 + $0x990] sm:$0xff] %v4625_v45  ;;  %v4627_v53 = vadd.f32 %v4626_v60, %v4466_v2  ;;  %v4470_v9 = vadd.f32 %v4469_v46, %v9298_v35 }
 0x328   :  { %5253 = vmatmul.mubr.bf16.gmra.mxu1 %v9001_v62  ;;  %5101 = vmatprep.mubr.bf16.mxu0 %v9005_v54  ;;  %v4471_v0 = vpop.f32.mrf.mxu0 }
 0x329   :  { %5262 = vmatprep.mubr.bf16.mxu1 %v9007_v44  ;;  %v4632_v61 = vpop.f32.mrf.mxu1  ;;  %6896 = vst [vmem:[#allocation8 + $0x998] sm:$0xff] %v4627_v53  ;;  %v4631_v49 = vadd.f32 %v4630_v29, %v4470_v9  ;;  %v4472_v57 = vadd.f32 %v4471_v0, %v9303_v20 }
 0x32a   :  { %v4473_v28 = vpop.f32.mrf.mxu0 }
 0x32b   :  { %v4634_v34 = vpop.f32.mrf.mxu1  ;;  %6911 = vst [vmem:[#allocation8 + $0xa10] sm:$0xff] %v4631_v49  ;;  %v4633_v48 = vadd.f32 %v4632_v61, %v4472_v57  ;;  %v4474_v27 = vadd.f32 %v4473_v28, %v9298_v35 }
 0x32c   :  { %v4475_v8 = vpop.f32.mrf.mxu0 }
 0x32d   :  { %v4636_v11 = vpop.f32.mrf.mxu1  ;;  %6912 = vst [vmem:[#allocation8 + $0xa18] sm:$0xff] %v4633_v48  ;;  %v4635_v43 = vadd.f32 %v4634_v34, %v4474_v27  ;;  %v4476_v18 = vadd.f32 %v4475_v8, %v9303_v20  ;;  %v10332_v27 = vsub.s32 4, %v10640_v26 }
 0x32e   :  { %v4479_v36 = vpop.f32.mrf.mxu0 }
 0x32f   :  { %v4640_v55 = vpop.f32.mrf.mxu1  ;;  %5102 = vmatmul.mubr.bf16.gmra.mxu0 %v9023_v14  ;;  %6927 = vst [vmem:[#allocation8 + $0xa90] sm:$0xff] %v4635_v43  ;;  %v4637_v3 = vadd.f32 %v4636_v11, %v4476_v18  ;;  %v4480_v12 = vadd.f32 %v4479_v36, %v9298_v35  ;;  %v10331_v36 = vsub.s32 5, %v10640_v26 }
 0x330   :  { %5263 = vmatmul.mubr.bf16.gmra.mxu1 %v9025_v19  ;;  %5111 = vmatprep.mubr.bf16.mxu0 %v9027_v17  ;;  %v4481_v10 = vpop.f32.mrf.mxu0 }
 0x331   :  { %5272 = vmatprep.mubr.bf16.mxu1 %v9029_v5  ;;  %v4642_v32 = vpop.f32.mrf.mxu1  ;;  %6928 = vst [vmem:[#allocation8 + $0xa98] sm:$0xff] %v4637_v3  ;;  %v4641_v60 = vadd.f32 %v4640_v55, %v4480_v12  ;;  %v4482_v45 = vadd.f32 %v4481_v10, %v9303_v20 }
 0x332   :  { %v4483_v2 = vpop.f32.mrf.mxu0 }
 0x333   :  { %v4644_v46 = vpop.f32.mrf.mxu1  ;;  %6943 = vst [vmem:[#allocation8 + $0xb10] sm:$0xff] %v4641_v60  ;;  %v4643_v29 = vadd.f32 %v4642_v32, %v4482_v45  ;;  %v4484_v53 = vadd.f32 %v4483_v2, %v9298_v35  ;;  %v9461_v60 = vrot.slane %v9293_v42, %v10331_v36 }
 0x334   :  { %v4485_v9 = vpop.f32.mrf.mxu0 }
 0x335   :  { %v4646_v0 = vpop.f32.mrf.mxu1  ;;  %6944 = vst [vmem:[#allocation8 + $0xb18] sm:$0xff] %v4643_v29  ;;  %v4645_v61 = vadd.f32 %v4644_v46, %v4484_v53  ;;  %v4486_v49 = vadd.f32 %v4485_v9, %v9303_v20 }
 0x336   :  { %v4489_v57 = vpop.f32.mrf.mxu0 }
 0x337   :  { %v4650_v28 = vpop.f32.mrf.mxu1  ;;  %5112 = vmatmul.mubr.bf16.gmra.mxu0 %v9039_v37  ;;  %6959 = vst [vmem:[#allocation8 + $0xb90] sm:$0xff] %v4645_v61  ;;  %v4647_v34 = vadd.f32 %v4646_v0, %v4486_v49  ;;  %v4490_v48 = vadd.f32 %v4489_v57, %v9298_v35  ;;  %v9456_v35 = vrot.slane %v9293_v42, %v10332_v27 }
 0x338   :  { %5273 = vmatmul.mubr.bf16.gmra.mxu1 %v9041_v40  ;;  %5121 = vmatprep.mubr.bf16.mxu0 %v9053_v22  ;;  %v4491_v8 = vpop.f32.mrf.mxu0 }
 0x339   :  { %5282 = vmatprep.mubr.bf16.mxu1 %v9055_v1  ;;  %v4652_v11 = vpop.f32.mrf.mxu1  ;;  %6960 = vst [vmem:[#allocation8 + $0xb98] sm:$0xff] %v4647_v34  ;;  %v4651_v43 = vadd.f32 %v4650_v28, %v4490_v48  ;;  %v4492_v18 = vadd.f32 %v4491_v8, %v9303_v20 }
 0x33a   :  { %v4493_v55 = vpop.f32.mrf.mxu0 }
 0x33b   :  { %v4654_v3 = vpop.f32.mrf.mxu1  ;;  %6975 = vst [vmem:[#allocation8 + $0xc10] sm:$0xff] %v4651_v43  ;;  %v4653_v12 = vadd.f32 %v4652_v11, %v4492_v18  ;;  %v10655_v43 = vld [vmem:[#allocation77_spill] sm:$0xff] }
 0x33c   :  { %v4494_v10 = vpop.f32.mrf.mxu0  ;;  %v10656_v3 = vld [vmem:[#allocation51_spill] sm:$0xff] }
 0x33d   :  { %v4655_v32 = vpop.f32.mrf.mxu1  ;;  %6976 = vst [vmem:[#allocation8 + $0xc18] sm:$0xff] %v4653_v12  ;;  %v10657_v12 = vld [vmem:[#allocation56_spill] sm:$0xff] }
 0x33e   :  { %v4691_v20 = vpop.f32.mrf.mxu0 }
 0x33f   :  { %v4852_v45 = vpop.f32.mrf.mxu1  ;;  %5122 = vmatmul.mubr.bf16.gmra.mxu0 %v9057_v38  ;;  %v4692_v2 = vadd.f32 %v4691_v20, %v9456_v35 }
 0x340   :  { %5283 = vmatmul.mubr.bf16.gmra.mxu1 %v9059_v15  ;;  %5131 = vmatprep.mubr.bf16.mxu0 %v9067_v63  ;;  %v4693_v46 = vpop.f32.mrf.mxu0 }
 0x341   :  { %5292 = vmatprep.mubr.bf16.mxu1 %v9069_v50  ;;  %v4854_v29 = vpop.f32.mrf.mxu1  ;;  %v4853_v53 = vadd.f32 %v4852_v45, %v4692_v2  ;;  %v4694_v9 = vadd.f32 %v4693_v46, %v9461_v60  ;;  %v958_v2 = vld [vmem:[#allocation5 + $0x328] sm:$0xff] }
 0x342   :  { %v4695_v0 = vpop.f32.mrf.mxu0 }
 0x343   :  { %v4856_v42 = vpop.f32.mrf.mxu1  ;;  %6593 = vst [vmem:[#allocation8 + $0x20] sm:$0xff] %v4853_v53  ;;  %v4855_v61 = vadd.f32 %v4854_v29, %v4694_v9  ;;  %v4696_v49 = vadd.f32 %v4695_v0, %v9456_v35  ;;  %v966_v53 = vld [vmem:[#allocation5 + $0x368] sm:$0xff] }
 0x344   :  { %v4697_v57 = vpop.f32.mrf.mxu0  ;;  %v1214_v9 = vld [vmem:[#allocation5 + $0xb28] sm:$0xff] }
 0x345   :  { %v4858_v28 = vpop.f32.mrf.mxu1  ;;  %6594 = vst [vmem:[#allocation8 + $0x28] sm:$0xff] %v4855_v61  ;;  %v4857_v34 = vadd.f32 %v4856_v42, %v4696_v49  ;;  %v4698_v48 = vadd.f32 %v4697_v57, %v9461_v60  ;;  %v1222_v0 = vld [vmem:[#allocation5 + $0xb68] sm:$0xff]  ;;  %v7129_v49 = vcombine.low %v9409_v13, %v9411_v52 }
 0x346   :  { %v4701_v8 = vpop.f32.mrf.mxu0  ;;  %v1198_v13 = vld [vmem:[#allocation5 + $0xaa8] sm:$0xff]  ;;  %v7369_v27 = vcombine.low %v1214_v9, %v1222_v0 }
 0x347   :  { %v4862_v11 = vpop.f32.mrf.mxu1  ;;  %5132 = vmatmul.mubr.bf16.gmra.mxu0 %v9075_v16  ;;  %6609 = vst [vmem:[#allocation8 + $0xa0] sm:$0xff] %v4857_v34  ;;  %v4859_v18 = vadd.f32 %v4858_v28, %v4698_v48  ;;  %v4702_v55 = vadd.f32 %v4701_v8, %v9456_v35  ;;  %v7385_v34 = vcombine.low %v9415_v59, %v9417_v31  ;;  %v1206_v52 = vld [vmem:[#allocation5 + $0xae8] sm:$0xff]  ;;  %v10660_v31 = vld [vmem:[#allocation57_spill] sm:$0xff] }
 0x348   :  { %5293 = vmatmul.mubr.bf16.gmra.mxu1 %v10655_v43  ;;  %5333 = vmatprep.mubr.bf16.mxu0 %v10656_v3  ;;  %v4703_v10 = vpop.f32.mrf.mxu0 }
 0x349   :  { %5494 = vmatprep.mubr.bf16.mxu1 %v10657_v12  ;;  %v4864_v32 = vpop.f32.mrf.mxu1  ;;  %6610 = vst [vmem:[#allocation8 + $0xa8] sm:$0xff] %v4859_v18  ;;  %v4863_v20 = vadd.f32 %v4862_v11, %v4702_v55  ;;  %v4704_v45 = vadd.f32 %v4703_v10, %v9461_v60  ;;  %v7114_v11 = vcombine.high %v958_v2, %v966_v53  ;;  %v9483_v55 = vld [vmem:[#allocation5 + $0x2a8] sm:$0xff] }
 0x34a   :  { %v4705_v46 = vpop.f32.mrf.mxu0  ;;  %v7370_v18 = vcombine.high %v1214_v9, %v1222_v0  ;;  %v950_v10 = vld [vmem:[#allocation5 + $0x2e8] sm:$0xff] }
 0x34b   :  { %v4866_v29 = vpop.f32.mrf.mxu1  ;;  %6625 = vst [vmem:[#allocation8 + $0x120] sm:$0xff] %v4863_v20  ;;  %v4865_v42 = vadd.f32 %v4864_v32, %v4704_v45  ;;  %v4706_v61 = vadd.f32 %v4705_v46, %v9456_v35  ;;  %v10658_v45 = vld [vmem:[#allocation47_spill] sm:$0xff]  ;;  %v10659_v46 = vld [vmem:[#allocation54_spill] sm:$0xff] }
 0x34c   :  { %v4707_v57 = vpop.f32.mrf.mxu0 }
 0x34d   :  { %v4868_v28 = vpop.f32.mrf.mxu1  ;;  %6626 = vst [vmem:[#allocation8 + $0x128] sm:$0xff] %v4865_v42  ;;  %v4867_v48 = vadd.f32 %v4866_v29, %v4706_v61  ;;  %v4708_v8 = vadd.f32 %v4707_v57, %v9461_v60  ;;  %v7113_v29 = vcombine.low %v958_v2, %v966_v53  ;;  %v10661_v42 = vld [vmem:[#allocation59_spill] sm:$0xff] }
 0x34e   :  { %v4711_v32 = vpop.f32.mrf.mxu0  ;;  %v1182_v2 = vld [vmem:[#allocation5 + $0xa28] sm:$0xff] }
 0x34f   :  { %v4872_v20 = vpop.f32.mrf.mxu1  ;;  %5334 = vmatmul.mubr.bf16.vlgmr.msra.gmra.mxu0 %v10658_v45  ;;  %6641 = vst [vmem:[#allocation8 + $0x1a0] sm:$0xff] %v4867_v48  ;;  %v4869_v36 = vadd.f32 %v4868_v28, %v4708_v8  ;;  %v4712_v59 = vadd.f32 %v4711_v32, %v9456_v35  ;;  %v7098_v45 = vcombine.high %v9483_v55, %v950_v10  ;;  %v926_v48 = vld [vmem:[#allocation5 + $0x228] sm:$0xff] }
 0x350   :  { %5495 = vmatmul.mubr.bf16.vlgmr.msra.gmra.mxu1 %v10659_v46  ;;  %5624 = vmatpush1.bf16.msra.mxu0 %v7129_v49  ;;  %v4713_v61 = vpop.f32.mrf.mxu0  ;;  %v7354_v28 = vcombine.high %v1198_v13, %v1206_v52  ;;  %v934_v32 = vld [vmem:[#allocation5 + $0x268] sm:$0xff] }
 0x351   :  { %5343 = vmatprep.mubr.bf16.mxu0 %v10660_v31  ;;  %5504 = vmatprep.mubr.bf16.mxu1 %v10661_v42  ;;  %v4874_v57 = vpop.f32.mrf.mxu1  ;;  %6642 = vst [vmem:[#allocation8 + $0x1a8] sm:$0xff] %v4869_v36  ;;  %v4873_v46 = vadd.f32 %v4872_v20, %v4712_v59  ;;  %v4714_v12 = vadd.f32 %v4713_v61, %v9461_v60  ;;  %v1190_v53 = vld [vmem:[#allocation5 + $0xa68] sm:$0xff] }
 0x352   :  { %5785 = vmatpush1.bf16.msra.mxu1 %v7385_v34  ;;  %5625 = vmatprep.subr.bf16.mxu0 %v7114_v11  ;;  %v4715_v49 = vpop.f32.mrf.mxu0  ;;  %v7097_v36 = vcombine.low %v9483_v55, %v950_v10  ;;  %v7353_v11 = vcombine.low %v1198_v13, %v1206_v52  ;;  %v7082_v59 = vcombine.high %v926_v48, %v934_v32  ;;  %v9495_v31 = vld [vmem:[#allocation5 + $0x1a8] sm:$0xff]  ;;  %v10662_v13 = vld [vmem:[#allocation60_spill] sm:$0xff]  ;;  %v10663_v52 = vld [vmem:[#allocation61_spill] sm:$0xff] }
 0x353   :  { %5786 = vmatprep.subr.bf16.mxu1 %v7370_v18  ;;  %v4876_v8 = vpop.f32.mrf.mxu1  ;;  %6657 = vst [vmem:[#allocation8 + $0x220] sm:$0xff] %v4873_v46  ;;  %v4875_v42 = vadd.f32 %v4874_v57, %v4714_v12  ;;  %v4716_v34 = vadd.f32 %v4715_v49, %v9456_v35  ;;  %v7338_v61 = vcombine.high %v1182_v2, %v1190_v53  ;;  %v918_v12 = vld [vmem:[#allocation5 + $0x1e8] sm:$0xff] }
 0x354   :  { %5626 = vmatpush1.bf16.msra.mxu0 %v7113_v29  ;;  %v4717_v9 = vpop.f32.mrf.mxu0  ;;  %v1174_v55 = vld [vmem:[#allocation5 + $0x9e8] sm:$0xff]  ;;  %v7337_v49 = vcombine.low %v1182_v2, %v1190_v53  ;;  %v7065_v53 = vcombine.low %v9495_v31, %v918_v12 }
 0x355   :  { %v4878_v0 = vpop.f32.mrf.mxu1  ;;  %5627 = vmatprep.subr.bf16.mxu0 %v7098_v45  ;;  %6658 = vst [vmem:[#allocation8 + $0x228] sm:$0xff] %v4875_v42  ;;  %v4877_v18 = vadd.f32 %v4876_v8, %v4716_v34  ;;  %v4718_v20 = vadd.f32 %v4717_v9, %v9461_v60  ;;  %v7066_v8 = vcombine.high %v9495_v31, %v918_v12  ;;  %v1142_v31 = vld [vmem:[#allocation5 + $0x8e8] sm:$0xff] }
 0x356   :  { %5787 = vmatpush1.bf16.msra.mxu1 %v7369_v27  ;;  %v4721_v46 = vpop.f32.mrf.mxu0  ;;  %v1166_v27 = vld [vmem:[#allocation5 + $0x9a8] sm:$0xff] }
 0x357   :  { %5788 = vmatprep.subr.bf16.mxu1 %v7354_v28  ;;  %v4882_v57 = vpop.f32.mrf.mxu1  ;;  %5344 = vmatmul.mubr.bf16.gmra.mxu0 %v10624_v4  ;;  %6673 = vst [vmem:[#allocation8 + $0x2a0] sm:$0xff] %v4877_v18  ;;  %v4879_v10 = vadd.f32 %v4878_v0, %v4718_v20  ;;  %v4722_v45 = vadd.f32 %v4721_v46, %v9456_v35  ;;  %v894_v18 = vld [vmem:[#allocation5 + $0x128] sm:$0xff] }
 0x358   :  { %5505 = vmatmul.mubr.bf16.gmra.mxu1 %v10625_v47  ;;  %5353 = vmatprep.mubr.bf16.mxu0 %v10662_v13  ;;  %v4723_v29 = vpop.f32.mrf.mxu0  ;;  %v7081_v28 = vcombine.low %v926_v48, %v934_v32  ;;  %v7322_v0 = vcombine.high %v1166_v27, %v1174_v55  ;;  %v902_v20 = vld [vmem:[#allocation5 + $0x168] sm:$0xff] }
 0x359   :  { %5514 = vmatprep.mubr.bf16.mxu1 %v10663_v52  ;;  %v4884_v42 = vpop.f32.mrf.mxu1  ;;  %5628 = vmatpush1.bf16.msra.mxu0 %v7097_v36  ;;  %6674 = vst [vmem:[#allocation8 + $0x2a8] sm:$0xff] %v4879_v10  ;;  %v4883_v34 = vadd.f32 %v4882_v57, %v4722_v45  ;;  %v4724_v9 = vadd.f32 %v4723_v29, %v9461_v60  ;;  %v1150_v52 = vld [vmem:[#allocation5 + $0x928] sm:$0xff] }
 0x35a   :  { %5789 = vmatpush1.bf16.msra.mxu1 %v7353_v11  ;;  %5629 = vmatprep.subr.bf16.mxu0 %v7082_v59  ;;  %v4725_v46 = vpop.f32.mrf.mxu0  ;;  %v1158_v47 = vld [vmem:[#allocation5 + $0x968] sm:$0xff]  ;;  %v7321_v11 = vcombine.low %v1166_v27, %v1174_v55  ;;  %v7050_v59 = vcombine.high %v894_v18, %v902_v20  ;;  %v10666_v55 = vld [vmem:[#allocation62_spill] sm:$0xff] }
 0x35b   :  { %5790 = vmatprep.subr.bf16.mxu1 %v7338_v61  ;;  %v4886_v13 = vpop.f32.mrf.mxu1  ;;  %6689 = vst [vmem:[#allocation8 + $0x320] sm:$0xff] %v4883_v34  ;;  %v4885_v36 = vadd.f32 %v4884_v42, %v4724_v9  ;;  %v4726_v48 = vadd.f32 %v4725_v46, %v9456_v35  ;;  %v7306_v10 = vcombine.high %v1150_v52, %v1158_v47  ;;  %v9507_v45 = vld [vmem:[#allocation5 + $0xa8] sm:$0xff]  ;;  %v10664_v9 = vld [vmem:[#allocation64_spill] sm:$0xff] }
 0x35c   :  { %v4727_v32 = vpop.f32.mrf.mxu0  ;;  %v886_v29 = vld [vmem:[#allocation5 + $0xe8] sm:$0xff]  ;;  %v7049_v46 = vcombine.low %v894_v18, %v902_v20 }
 0x35d   :  { %v4888_v2 = vpop.f32.mrf.mxu1  ;;  %5630 = vmatpush1.bf16.msra.mxu0 %v7081_v28  ;;  %6690 = vst [vmem:[#allocation8 + $0x328] sm:$0xff] %v4885_v36  ;;  %v4887_v61 = vadd.f32 %v4886_v13, %v4726_v48  ;;  %v4728_v57 = vadd.f32 %v4727_v32, %v9461_v60  ;;  %v10665_v28 = vld [vmem:[#allocation66_spill] sm:$0xff]  ;;  %v10667_v13 = vld [vmem:[#allocation63_spill] sm:$0xff]  ;;  %v7305_v36 = vcombine.low %v1150_v52, %v1158_v47 }
 0x35e   :  { %5791 = vmatpush1.bf16.msra.mxu1 %v7337_v49  ;;  %5631 = vmatprep.subr.bf16.mxu0 %v7066_v8  ;;  %v4731_v42 = vpop.f32.mrf.mxu0  ;;  %v1134_v49 = vld [vmem:[#allocation5 + $0x8a8] sm:$0xff]  ;;  %v7034_v48 = vcombine.high %v9507_v45, %v886_v29  ;;  %v7033_v20 = vcombine.low %v9507_v45, %v886_v29 }
 0x35f   :  { %5792 = vmatprep.subr.bf16.mxu1 %v7322_v0  ;;  %v4892_v34 = vpop.f32.mrf.mxu1  ;;  %5354 = vmatmul.mubr.bf16.gmra.mxu0 %v10664_v9  ;;  %6705 = vst [vmem:[#allocation8 + $0x3a0] sm:$0xff] %v4887_v61  ;;  %v4889_v12 = vadd.f32 %v4888_v2, %v4728_v57  ;;  %v4732_v27 = vadd.f32 %v4731_v42, %v9456_v35  ;;  %v862_v61 = vld [vmem:[#allocation5 + $0x28] sm:$0xff] }
 0x360   :  { %5515 = vmatmul.mubr.bf16.gmra.mxu1 %v10665_v28  ;;  %5363 = vmatprep.mubr.bf16.mxu0 %v10666_v55  ;;  %v4733_v8 = vpop.f32.mrf.mxu0  ;;  %v7290_v2 = vcombine.high %v1134_v49, %v1142_v31  ;;  %v870_v57 = vld [vmem:[#allocation5 + $0x68] sm:$0xff] }
 0x361   :  { %5524 = vmatprep.mubr.bf16.mxu1 %v10667_v13  ;;  %v4894_v0 = vpop.f32.mrf.mxu1  ;;  %5632 = vmatpush1.bf16.msra.mxu0 %v7065_v53  ;;  %6706 = vst [vmem:[#allocation8 + $0x3a8] sm:$0xff] %v4889_v12  ;;  %v4893_v32 = vadd.f32 %v4892_v34, %v4732_v27  ;;  %v4734_v28 = vadd.f32 %v4733_v8, %v9461_v60  ;;  %v1118_v13 = vld [vmem:[#allocation5 + $0x828] sm:$0xff] }
 0x362   :  { %5793 = vmatpush1.bf16.msra.mxu1 %v7321_v11  ;;  %5633 = vmatprep.subr.bf16.mxu0 %v7050_v59  ;;  %v4735_v42 = vpop.f32.mrf.mxu0  ;;  %v1126_v9 = vld [vmem:[#allocation5 + $0x868] sm:$0xff]  ;;  %v7289_v11 = vcombine.low %v1134_v49, %v1142_v31  ;;  %v7018_v59 = vcombine.high %v862_v61, %v870_v57  ;;  %v10670_v31 = vld [vmem:[#allocation69_spill] sm:$0xff] }
 0x363   :  { %5794 = vmatprep.subr.bf16.mxu1 %v7306_v10  ;;  %v4896_v55 = vpop.f32.mrf.mxu1  ;;  %6721 = vst [vmem:[#allocation8 + $0x420] sm:$0xff] %v4893_v32  ;;  %v4895_v53 = vadd.f32 %v4894_v0, %v4734_v28  ;;  %v4736_v18 = vadd.f32 %v4735_v42, %v9456_v35  ;;  %v7274_v12 = vcombine.high %v1118_v13, %v1126_v9  ;;  %v9519_v27 = vld [vmem:[#allocation5 + $0x7a8] sm:$0xff]  ;;  %v10668_v32 = vld [vmem:[#allocation65_spill] sm:$0xff] }
 0x364   :  { %v4737_v47 = vpop.f32.mrf.mxu0  ;;  %v1110_v28 = vld [vmem:[#allocation5 + $0x7e8] sm:$0xff]  ;;  %v7017_v42 = vcombine.low %v862_v61, %v870_v57 }
 0x365   :  { %v4898_v52 = vpop.f32.mrf.mxu1  ;;  %5634 = vmatpush1.bf16.msra.mxu0 %v7049_v46  ;;  %6722 = vst [vmem:[#allocation8 + $0x428] sm:$0xff] %v4895_v53  ;;  %v4897_v10 = vadd.f32 %v4896_v55, %v4736_v18  ;;  %v4738_v34 = vadd.f32 %v4737_v47, %v9461_v60  ;;  %v10669_v46 = vld [vmem:[#allocation67_spill] sm:$0xff]  ;;  %v7273_v53 = vcombine.low %v1118_v13, %v1126_v9 }
 0x366   :  { %5795 = vmatpush1.bf16.msra.mxu1 %v7305_v36  ;;  %5635 = vmatprep.subr.bf16.mxu0 %v7034_v48  ;;  %v4741_v8 = vpop.f32.mrf.mxu0  ;;  %v1358_v36 = vld [vmem:[#allocation5 + $0xfa8] sm:$0xff]  ;;  %v7258_v18 = vcombine.high %v9519_v27, %v1110_v28  ;;  %v7257_v57 = vcombine.low %v9519_v27, %v1110_v28 }
 0x367   :  { %5796 = vmatprep.subr.bf16.mxu1 %v7290_v2  ;;  %v4902_v0 = vpop.f32.mrf.mxu1  ;;  %5364 = vmatmul.mubr.bf16.gmra.mxu0 %v10668_v32  ;;  %v1366_v45 = vld [vmem:[#allocation5 + $0xfe8] sm:$0xff]  ;;  %6737 = vst [vmem:[#allocation8 + $0x4a0] sm:$0xff] %v4897_v10  ;;  %v4899_v29 = vadd.f32 %v4898_v52, %v4738_v34  ;;  %v4742_v49 = vadd.f32 %v4741_v8, %v9456_v35 }
 0x368   :  { %5525 = vmatmul.mubr.bf16.gmra.mxu1 %v10669_v46  ;;  %5373 = vmatprep.mubr.bf16.mxu0 %v10670_v31  ;;  %v10671_v55 = vld [vmem:[#allocation71_spill] sm:$0xff]  ;;  %v4743_v48 = vpop.f32.mrf.mxu0  ;;  %v7514_v52 = vcombine.high %v1358_v36, %v1366_v45 }
 0x369   :  { %5534 = vmatprep.mubr.bf16.mxu1 %v10671_v55  ;;  %v4904_v2 = vpop.f32.mrf.mxu1  ;;  %5636 = vmatpush1.bf16.msra.mxu0 %v7033_v20  ;;  %6738 = vst [vmem:[#allocation8 + $0x4a8] sm:$0xff] %v4899_v29  ;;  %v4903_v47 = vadd.f32 %v4902_v0, %v4742_v49  ;;  %v4744_v46 = vadd.f32 %v4743_v48, %v9461_v60  ;;  %v1086_v10 = vld [vmem:[#allocation5 + $0x728] sm:$0xff] }
 0x36a   :  { %5797 = vmatpush1.bf16.msra.mxu1 %v7289_v11  ;;  %5637 = vmatprep.subr.bf16.mxu0 %v7018_v59  ;;  %v1094_v34 = vld [vmem:[#allocation5 + $0x768] sm:$0xff]  ;;  %v4745_v8 = vpop.f32.mrf.mxu0  ;;  %v7513_v11 = vcombine.low %v1358_v36, %v1366_v45  ;;  %v10672_v45 = vld [vmem:[#allocation68_spill] sm:$0xff] }
 0x36b   :  { %5798 = vmatprep.subr.bf16.mxu1 %v7274_v12  ;;  %v4906_v31 = vpop.f32.mrf.mxu1  ;;  %v1342_v55 = vld [vmem:[#allocation5 + $0xf28] sm:$0xff]  ;;  %6753 = vst [vmem:[#allocation8 + $0x520] sm:$0xff] %v4903_v47  ;;  %v4905_v20 = vadd.f32 %v4904_v2, %v4744_v46  ;;  %v4746_v61 = vadd.f32 %v4745_v8, %v9456_v35  ;;  %v7242_v59 = vcombine.high %v1086_v10, %v1094_v34 }
 0x36c   :  { %v1350_v32 = vld [vmem:[#allocation5 + $0xf68] sm:$0xff]  ;;  %v4747_v9 = vpop.f32.mrf.mxu0  ;;  %v7241_v47 = vcombine.low %v1086_v10, %v1094_v34 }
 0x36d   :  { %v4908_v13 = vpop.f32.mrf.mxu1  ;;  %5638 = vmatpush1.bf16.msra.mxu0 %v7017_v42  ;;  %6754 = vst [vmem:[#allocation8 + $0x528] sm:$0xff] %v4905_v20  ;;  %v4907_v12 = vadd.f32 %v4906_v31, %v4746_v61  ;;  %v4748_v0 = vadd.f32 %v4747_v9, %v9461_v60  ;;  %v7498_v29 = vcombine.high %v1342_v55, %v1350_v32  ;;  %v9531_v49 = vld [vmem:[#allocation5 + $0x6a8] sm:$0xff]  ;;  %v10673_v31 = vld [vmem:[#allocation70_spill] sm:$0xff] }
 0x36e   :  { %5799 = vmatpush1.bf16.msra.mxu1 %v7273_v53  ;;  %5639 = vmatprep.subr.bf16.mxu0 %v7258_v18  ;;  %v1078_v46 = vld [vmem:[#allocation5 + $0x6e8] sm:$0xff]  ;;  %v4751_v48 = vpop.f32.mrf.mxu0 }
 0x36f   :  { %5800 = vmatprep.subr.bf16.mxu1 %v7514_v52  ;;  %v4912_v2 = vpop.f32.mrf.mxu1  ;;  %5374 = vmatmul.mubr.bf16.gmra.mxu0 %v8871_v33  ;;  %v1326_v42 = vld [vmem:[#allocation5 + $0xea8] sm:$0xff]  ;;  %6769 = vst [vmem:[#allocation8 + $0x5a0] sm:$0xff] %v4907_v12  ;;  %v4909_v28 = vadd.f32 %v4908_v13, %v4748_v0  ;;  %v4752_v36 = vadd.f32 %v4751_v48, %v9456_v35 }
 0x370   :  { %5535 = vmatmul.mubr.bf16.gmra.mxu1 %v8873_v21  ;;  %v1334_v27 = vld [vmem:[#allocation5 + $0xee8] sm:$0xff]  ;;  %5383 = vmatprep.mubr.bf16.mxu0 %v10672_v45  ;;  %v4753_v53 = vpop.f32.mrf.mxu0  ;;  %v7497_v52 = vcombine.low %v1342_v55, %v1350_v32  ;;  %v7226_v8 = vcombine.high %v9531_v49, %v1078_v46  ;;  %v7225_v34 = vcombine.low %v9531_v49, %v1078_v46 }
 0x371   :  { %5544 = vmatprep.mubr.bf16.mxu1 %v10673_v31  ;;  %v4914_v18 = vpop.f32.mrf.mxu1  ;;  %5640 = vmatpush2.bf16.msra.mxu0 %v7257_v57  ;;  %6770 = vst [vmem:[#allocation8 + $0x5a8] sm:$0xff] %v4909_v28  ;;  %v4913_v20 = vadd.f32 %v4912_v2, %v4752_v36  ;;  %v4754_v61 = vadd.f32 %v4753_v53, %v9461_v60  ;;  %v1054_v13 = vld [vmem:[#allocation5 + $0x628] sm:$0xff] }
 0x372   :  { %5801 = vmatpush2.bf16.msra.mxu1 %v7513_v11  ;;  %5641 = vmatprep.subr.bf16.mxu0 %v7242_v59  ;;  %v7482_v9 = vcombine.high %v1326_v42, %v1334_v27  ;;  %v1062_v12 = vld [vmem:[#allocation5 + $0x668] sm:$0xff]  ;;  %v4755_v0 = vpop.f32.mrf.mxu0  ;;  %v7481_v11 = vcombine.low %v1326_v42, %v1334_v27  ;;  %v10674_v27 = vld [vmem:[#allocation74_spill] sm:$0xff] }
 0x373   :  { %5802 = vmatprep.subr.bf16.mxu1 %v7498_v29  ;;  %v4916_v48 = vpop.f32.mrf.mxu1  ;;  %v1310_v31 = vld [vmem:[#allocation5 + $0xe28] sm:$0xff]  ;;  %6785 = vst [vmem:[#allocation8 + $0x620] sm:$0xff] %v4913_v20  ;;  %v4915_v57 = vadd.f32 %v4914_v18, %v4754_v61  ;;  %v4756_v10 = vadd.f32 %v4755_v0, %v9456_v35  ;;  %v7210_v59 = vcombine.high %v1054_v13, %v1062_v12 }
 0x374   :  { %v1318_v45 = vld [vmem:[#allocation5 + $0xe68] sm:$0xff]  ;;  %v4757_v32 = vpop.f32.mrf.mxu0 }
 0x375   :  { %v4918_v55 = vpop.f32.mrf.mxu1  ;;  %5642 = vmatpush2.bf16.msra.mxu0 %v7241_v47  ;;  %6786 = vst [vmem:[#allocation8 + $0x628] sm:$0xff] %v4915_v57  ;;  %v4917_v29 = vadd.f32 %v4916_v48, %v4756_v10  ;;  %v4758_v2 = vadd.f32 %v4757_v32, %v9461_v60  ;;  %v7466_v28 = vcombine.high %v1310_v31, %v1318_v45  ;;  %v9543_v36 = vld [vmem:[#allocation5 + $0x5a8] sm:$0xff] }
 0x376   :  { %5803 = vmatpush2.bf16.msra.mxu1 %v7497_v52  ;;  %5643 = vmatprep.subr.bf16.mxu0 %v7226_v8  ;;  %v1046_v53 = vld [vmem:[#allocation5 + $0x5e8] sm:$0xff]  ;;  %v4761_v18 = vpop.f32.mrf.mxu0  ;;  %v10675_v52 = vld [vmem:[#allocation72_spill] sm:$0xff]  ;;  %v7465_v0 = vcombine.low %v1310_v31, %v1318_v45 }
 0x377   :  { %5804 = vmatprep.subr.bf16.mxu1 %v7482_v9  ;;  %v4922_v20 = vpop.f32.mrf.mxu1  ;;  %5384 = vmatmul.mubr.bf16.gmra.mxu0 %v8909_v24  ;;  %v1294_v47 = vld [vmem:[#allocation5 + $0xda8] sm:$0xff]  ;;  %6801 = vst [vmem:[#allocation8 + $0x6a0] sm:$0xff] %v4917_v29  ;;  %v4919_v46 = vadd.f32 %v4918_v55, %v4758_v2  ;;  %v4762_v42 = vadd.f32 %v4761_v18, %v9456_v35 }
 0x378   :  { %5545 = vmatmul.mubr.bf16.gmra.mxu1 %v8911_v39  ;;  %v1302_v49 = vld [vmem:[#allocation5 + $0xde8] sm:$0xff]  ;;  %5393 = vmatprep.mubr.bf16.mxu0 %v10674_v27  ;;  %v4763_v8 = vpop.f32.mrf.mxu0  ;;  %v7209_v9 = vcombine.low %v1054_v13, %v1062_v12  ;;  %v7194_v48 = vcombine.high %v9543_v36, %v1046_v53  ;;  %v7193_v12 = vcombine.low %v9543_v36, %v1046_v53 }
 0x379   :  { %5554 = vmatprep.mubr.bf16.mxu1 %v10675_v52  ;;  %v4924_v61 = vpop.f32.mrf.mxu1  ;;  %5644 = vmatpush2.bf16.msra.mxu0 %v7225_v34  ;;  %6802 = vst [vmem:[#allocation8 + $0x6a8] sm:$0xff] %v4919_v46  ;;  %v4923_v57 = vadd.f32 %v4922_v20, %v4762_v42  ;;  %v4764_v10 = vadd.f32 %v4763_v8, %v9461_v60  ;;  %v1022_v55 = vld [vmem:[#allocation5 + $0x528] sm:$0xff] }
 0x37a   :  { %5805 = vmatpush2.bf16.msra.mxu1 %v7481_v11  ;;  %5645 = vmatprep.subr.bf16.mxu0 %v7210_v59  ;;  %v7450_v32 = vcombine.high %v1294_v47, %v1302_v49  ;;  %v1030_v29 = vld [vmem:[#allocation5 + $0x568] sm:$0xff]  ;;  %v4765_v2 = vpop.f32.mrf.mxu0  ;;  %v7449_v11 = vcombine.low %v1294_v47, %v1302_v49 }
 0x37b   :  { %5806 = vmatprep.subr.bf16.mxu1 %v7466_v28  ;;  %v4926_v18 = vpop.f32.mrf.mxu1  ;;  %v1278_v52 = vld [vmem:[#allocation5 + $0xd28] sm:$0xff]  ;;  %6817 = vst [vmem:[#allocation8 + $0x720] sm:$0xff] %v4923_v57  ;;  %v4925_v34 = vadd.f32 %v4924_v61, %v4764_v10  ;;  %v4766_v13 = vadd.f32 %v4765_v2, %v9456_v35  ;;  %v7178_v59 = vcombine.high %v1022_v55, %v1030_v29 }
 0x37c   :  { %v1286_v27 = vld [vmem:[#allocation5 + $0xd68] sm:$0xff]  ;;  %v4767_v45 = vpop.f32.mrf.mxu0 }
 0x37d   :  { %v4928_v31 = vpop.f32.mrf.mxu1  ;;  %5646 = vmatpush2.bf16.msra.mxu0 %v7209_v9  ;;  %6818 = vst [vmem:[#allocation8 + $0x728] sm:$0xff] %v4925_v34  ;;  %v4927_v28 = vadd.f32 %v4926_v18, %v4766_v13  ;;  %v4768_v20 = vadd.f32 %v4767_v45, %v9461_v60  ;;  %v7434_v46 = vcombine.high %v1278_v52, %v1286_v27  ;;  %v9555_v42 = vld [vmem:[#allocation5 + $0x4a8] sm:$0xff] }
 0x37e   :  { %5807 = vmatpush2.bf16.msra.mxu1 %v7465_v0  ;;  %5647 = vmatprep.subr.bf16.mxu0 %v7194_v48  ;;  %v1014_v8 = vld [vmem:[#allocation5 + $0x4e8] sm:$0xff]  ;;  %v4771_v61 = vpop.f32.mrf.mxu0  ;;  %v7177_v48 = vcombine.low %v1022_v55, %v1030_v29  ;;  %v7433_v10 = vcombine.low %v1278_v52, %v1286_v27 }
 0x37f   :  { %5808 = vmatprep.subr.bf16.mxu1 %v7450_v32  ;;  %v4932_v57 = vpop.f32.mrf.mxu1  ;;  %5394 = vmatmul.mubr.bf16.gmra.mxu0 %v8941_v6  ;;  %v1262_v9 = vld [vmem:[#allocation5 + $0xca8] sm:$0xff]  ;;  %6833 = vst [vmem:[#allocation8 + $0x7a0] sm:$0xff] %v4927_v28  ;;  %v4929_v53 = vadd.f32 %v4928_v31, %v4768_v20  ;;  %v4772_v47 = vadd.f32 %v4771_v61, %v9456_v35 }
 0x380   :  { %5555 = vmatmul.mubr.bf16.gmra.mxu1 %v8943_v58  ;;  %v1270_v36 = vld [vmem:[#allocation5 + $0xce8] sm:$0xff]  ;;  %5403 = vmatprep.mubr.bf16.mxu0 %v8951_v56  ;;  %v4773_v49 = vpop.f32.mrf.mxu0  ;;  %v7162_v32 = vcombine.high %v9555_v42, %v1014_v8  ;;  %v7161_v29 = vcombine.low %v9555_v42, %v1014_v8  ;;  %v9573_v42 = vld [vmem:[#allocation5 + $0xbb0] sm:$0xff] }
 0x381   :  { %5564 = vmatprep.mubr.bf16.mxu1 %v8953_v41  ;;  %v4934_v0 = vpop.f32.mrf.mxu1  ;;  %5648 = vmatpush2.bf16.msra.mxu0 %v7193_v12  ;;  %6834 = vst [vmem:[#allocation8 + $0x7a8] sm:$0xff] %v4929_v53  ;;  %v4933_v2 = vadd.f32 %v4932_v57, %v4772_v47  ;;  %v4774_v18 = vadd.f32 %v4773_v49, %v9461_v60  ;;  %v990_v13 = vld [vmem:[#allocation5 + $0x428] sm:$0xff]  ;;  %v9567_v47 = vld [vmem:[#allocation5 + $0x3b0] sm:$0xff] }
 0x382   :  { %5809 = vmatpush2.bf16.msra.mxu1 %v7449_v11  ;;  %5649 = vmatprep.subr.bf16.mxu0 %v7178_v59  ;;  %v7418_v34 = vcombine.high %v1262_v9, %v1270_v36  ;;  %v998_v45 = vld [vmem:[#allocation5 + $0x468] sm:$0xff]  ;;  %v4775_v31 = vpop.f32.mrf.mxu0  ;;  %v7417_v11 = vcombine.low %v1262_v9, %v1270_v36  ;;  %v9569_v49 = vld [vmem:[#allocation5 + $0x3f0] sm:$0xff] }
 0x383   :  { %5810 = vmatprep.subr.bf16.mxu1 %v7434_v46  ;;  %v4936_v28 = vpop.f32.mrf.mxu1  ;;  %v1246_v20 = vld [vmem:[#allocation5 + $0xc28] sm:$0xff]  ;;  %6849 = vst [vmem:[#allocation8 + $0x820] sm:$0xff] %v4933_v2  ;;  %v4935_v12 = vadd.f32 %v4934_v0, %v4774_v18  ;;  %v4776_v55 = vadd.f32 %v4775_v31, %v9456_v35  ;;  %v7146_v59 = vcombine.high %v990_v13, %v998_v45  ;;  %v9575_v8 = vld [vmem:[#allocation5 + $0xbf0] sm:$0xff] }
 0x384   :  { %v1254_v61 = vld [vmem:[#allocation5 + $0xc68] sm:$0xff]  ;;  %v4777_v27 = vpop.f32.mrf.mxu0 }
 0x385   :  { %v4938_v52 = vpop.f32.mrf.mxu1  ;;  %5650 = vmatpush2.bf16.msra.mxu0 %v7177_v48  ;;  %6850 = vst [vmem:[#allocation8 + $0x828] sm:$0xff] %v4935_v12  ;;  %v4937_v46 = vadd.f32 %v4936_v28, %v4776_v55  ;;  %v4778_v57 = vadd.f32 %v4777_v27, %v9461_v60  ;;  %v7402_v53 = vcombine.high %v1246_v20, %v1254_v61 }
 0x386   :  { %5811 = vmatpush2.bf16.msra.mxu1 %v7433_v10  ;;  %5651 = vmatprep.subr.bf16.mxu0 %v7162_v32  ;;  %v4781_v0 = vpop.f32.mrf.mxu0  ;;  %v7145_v32 = vcombine.low %v990_v13, %v998_v45  ;;  %v7401_v18 = vcombine.low %v1246_v20, %v1254_v61  ;;  %v7388_v12 = vcombine.high %v9573_v42, %v9575_v8 }
 0x387   :  { %5812 = vmatprep.subr.bf16.mxu1 %v7418_v34  ;;  %v4942_v2 = vpop.f32.mrf.mxu1  ;;  %5404 = vmatmul.mubr.bf16.gmra.mxu0 %v8975_v25  ;;  %6865 = vst [vmem:[#allocation8 + $0x8a0] sm:$0xff] %v4937_v46  ;;  %v4939_v9 = vadd.f32 %v4938_v52, %v4778_v57  ;;  %v4782_v36 = vadd.f32 %v4781_v0, %v9456_v35 }
 0x388   :  { %5565 = vmatmul.mubr.bf16.gmra.mxu1 %v8977_v23  ;;  %5413 = vmatprep.mubr.bf16.mxu0 %v8981_v7  ;;  %v4783_v48 = vpop.f32.mrf.mxu0  ;;  %v7132_v34 = vcombine.high %v9567_v47, %v9569_v49 }
 0x389   :  { %5574 = vmatprep.mubr.bf16.mxu1 %v8983_v30  ;;  %v4944_v10 = vpop.f32.mrf.mxu1  ;;  %5652 = vmatpush2.bf16.msra.mxu0 %v7161_v29  ;;  %6866 = vst [vmem:[#allocation8 + $0x8a8] sm:$0xff] %v4939_v9  ;;  %v4943_v31 = vadd.f32 %v4942_v2, %v4782_v36  ;;  %v4784_v28 = vadd.f32 %v4783_v48, %v9461_v60 }
 0x38a   :  { %5813 = vmatpush2.bf16.msra.mxu1 %v7417_v11  ;;  %5653 = vmatprep.subr.bf16.mxu0 %v7146_v59  ;;  %v4785_v55 = vpop.f32.mrf.mxu0 }
 0x38b   :  { %5814 = vmatprep.subr.bf16.mxu1 %v7402_v53  ;;  %v4946_v27 = vpop.f32.mrf.mxu1  ;;  %6881 = vst [vmem:[#allocation8 + $0x920] sm:$0xff] %v4943_v31  ;;  %v4945_v52 = vadd.f32 %v4944_v10, %v4784_v28  ;;  %v4786_v29 = vadd.f32 %v4785_v55, %v9456_v35 }
 0x38c   :  { %v4787_v13 = vpop.f32.mrf.mxu0 }
 0x38d   :  { %v4948_v45 = vpop.f32.mrf.mxu1  ;;  %5654 = vmatpush2.bf16.msra.mxu0 %v7145_v32  ;;  %6882 = vst [vmem:[#allocation8 + $0x928] sm:$0xff] %v4945_v52  ;;  %v4947_v20 = vadd.f32 %v4946_v27, %v4786_v29  ;;  %v4788_v61 = vadd.f32 %v4787_v13, %v9461_v60 }
 0x38e   :  { %5815 = vmatpush2.bf16.msra.mxu1 %v7401_v18  ;;  %5945 = vmatprep.subr.bf16.mxu0 %v7132_v34  ;;  %v4791_v11 = vpop.f32.mrf.mxu0 }
 0x38f   :  { %6106 = vmatprep.subr.bf16.mxu1 %v7388_v12  ;;  %v4952_v59 = vpop.f32.mrf.mxu1  ;;  %5414 = vmatmul.mubr.bf16.gmra.mxu0 %v8999_v51  ;;  %6897 = vst [vmem:[#allocation8 + $0x9a0] sm:$0xff] %v4947_v20  ;;  %v4949_v46 = vadd.f32 %v4948_v45, %v4788_v61  ;;  %v4792_v57 = vadd.f32 %v4791_v11, %v9456_v35 }
 0x390   :  { %5575 = vmatmul.mubr.bf16.gmra.mxu1 %v9001_v62  ;;  %5423 = vmatprep.mubr.bf16.mxu0 %v9005_v54  ;;  %v4793_v53 = vpop.f32.mrf.mxu0 }
 0x391   :  { %5584 = vmatprep.mubr.bf16.mxu1 %v9007_v44  ;;  %v4954_v0 = vpop.f32.mrf.mxu1  ;;  %6898 = vst [vmem:[#allocation8 + $0x9a8] sm:$0xff] %v4949_v46  ;;  %v4953_v2 = vadd.f32 %v4952_v59, %v4792_v57  ;;  %v4794_v9 = vadd.f32 %v4793_v53, %v9461_v60 }
 0x392   :  { %v4795_v36 = vpop.f32.mrf.mxu0 }
 0x393   :  { %v4956_v48 = vpop.f32.mrf.mxu1  ;;  %6913 = vst [vmem:[#allocation8 + $0xa20] sm:$0xff] %v4953_v2  ;;  %v4955_v10 = vadd.f32 %v4954_v0, %v4794_v9  ;;  %v4796_v32 = vadd.f32 %v4795_v36, %v9456_v35 }
 0x394   :  { %v4797_v18 = vpop.f32.mrf.mxu0 }
 0x395   :  { %v4958_v34 = vpop.f32.mrf.mxu1  ;;  %6914 = vst [vmem:[#allocation8 + $0xa28] sm:$0xff] %v4955_v10  ;;  %v4957_v31 = vadd.f32 %v4956_v48, %v4796_v32  ;;  %v4798_v28 = vadd.f32 %v4797_v18, %v9461_v60  ;;  %v10335_v32 = vsub.s32 6, %v10640_v26 }
 0x396   :  { %v4801_v12 = vpop.f32.mrf.mxu0 }
 0x397   :  { %v4962_v55 = vpop.f32.mrf.mxu1  ;;  %5424 = vmatmul.mubr.bf16.gmra.mxu0 %v9023_v14  ;;  %6929 = vst [vmem:[#allocation8 + $0xaa0] sm:$0xff] %v4957_v31  ;;  %v4959_v27 = vadd.f32 %v4958_v34, %v4798_v28  ;;  %v4802_v52 = vadd.f32 %v4801_v12, %v9456_v35  ;;  %v10334_v12 = vsub.s32 7, %v10640_v26 }
 0x398   :  { %5585 = vmatmul.mubr.bf16.gmra.mxu1 %v9025_v19  ;;  %5433 = vmatprep.mubr.bf16.mxu0 %v9027_v17  ;;  %v4803_v29 = vpop.f32.mrf.mxu0 }
 0x399   :  { %5594 = vmatprep.mubr.bf16.mxu1 %v9029_v5  ;;  %v4964_v13 = vpop.f32.mrf.mxu1  ;;  %6930 = vst [vmem:[#allocation8 + $0xaa8] sm:$0xff] %v4959_v27  ;;  %v4963_v45 = vadd.f32 %v4962_v55, %v4802_v52  ;;  %v4804_v20 = vadd.f32 %v4803_v29, %v9461_v60  ;;  %v7580_v29 = vld [vmem:[#allocation7] sm:$0xff] }
 0x39a   :  { %v4805_v61 = vpop.f32.mrf.mxu0 }
 0x39b   :  { %v4966_v11 = vpop.f32.mrf.mxu1  ;;  %6945 = vst [vmem:[#allocation8 + $0xb20] sm:$0xff] %v4963_v45  ;;  %v4965_v59 = vadd.f32 %v4964_v13, %v4804_v20  ;;  %v4806_v46 = vadd.f32 %v4805_v61, %v9456_v35  ;;  %v9617_v20 = vrot.slane %v7580_v29, %v10334_v12 }
 0x39c   :  { %v4807_v57 = vpop.f32.mrf.mxu0 }
 0x39d   :  { %v4968_v53 = vpop.f32.mrf.mxu1  ;;  %6946 = vst [vmem:[#allocation8 + $0xb28] sm:$0xff] %v4965_v59  ;;  %v4967_v0 = vadd.f32 %v4966_v11, %v4806_v46  ;;  %v4808_v2 = vadd.f32 %v4807_v57, %v9461_v60 }
 0x39e   :  { %v4811_v9 = vpop.f32.mrf.mxu0 }
 0x39f   :  { %v4972_v36 = vpop.f32.mrf.mxu1  ;;  %5434 = vmatmul.mubr.bf16.gmra.mxu0 %v9039_v37  ;;  %6961 = vst [vmem:[#allocation8 + $0xba0] sm:$0xff] %v4967_v0  ;;  %v4969_v48 = vadd.f32 %v4968_v53, %v4808_v2  ;;  %v4812_v10 = vadd.f32 %v4811_v9, %v9456_v35  ;;  %v9613_v35 = vrot.slane %v7580_v29, %v10335_v32 }
 0x3a0   :  { %5595 = vmatmul.mubr.bf16.gmra.mxu1 %v9041_v40  ;;  %5443 = vmatprep.mubr.bf16.mxu0 %v9053_v22  ;;  %v4813_v18 = vpop.f32.mrf.mxu0 }
 0x3a1   :  { %5604 = vmatprep.mubr.bf16.mxu1 %v9055_v1  ;;  %v4974_v34 = vpop.f32.mrf.mxu1  ;;  %6962 = vst [vmem:[#allocation8 + $0xba8] sm:$0xff] %v4969_v48  ;;  %v4973_v31 = vadd.f32 %v4972_v36, %v4812_v10  ;;  %v4814_v28 = vadd.f32 %v4813_v18, %v9461_v60 }
 0x3a2   :  { %v4815_v55 = vpop.f32.mrf.mxu0 }
 0x3a3   :  { %v4976_v27 = vpop.f32.mrf.mxu1  ;;  %6977 = vst [vmem:[#allocation8 + $0xc20] sm:$0xff] %v4973_v31  ;;  %v4975_v52 = vadd.f32 %v4974_v34, %v4814_v28 }
 0x3a4   :  { %v4816_v13 = vpop.f32.mrf.mxu0 }
 0x3a5   :  { %v4977_v45 = vpop.f32.mrf.mxu1  ;;  %6978 = vst [vmem:[#allocation8 + $0xc28] sm:$0xff] %v4975_v52  ;;  %v10676_v52 = vld [vmem:[#allocation56_spill] sm:$0xff] }
 0x3a6   :  { %v5013_v61 = vpop.f32.mrf.mxu0 }
 0x3a7   :  { %v5174_v60 = vpop.f32.mrf.mxu1  ;;  %5444 = vmatmul.mubr.bf16.gmra.mxu0 %v9057_v38  ;;  %v5014_v11 = vadd.f32 %v5013_v61, %v9613_v35 }
 0x3a8   :  { %5605 = vmatmul.mubr.bf16.gmra.mxu1 %v9059_v15  ;;  %5453 = vmatprep.mubr.bf16.mxu0 %v9067_v63  ;;  %v5015_v59 = vpop.f32.mrf.mxu0 }
 0x3a9   :  { %5614 = vmatprep.mubr.bf16.mxu1 %v9069_v50  ;;  %v5176_v46 = vpop.f32.mrf.mxu1  ;;  %v5175_v57 = vadd.f32 %v5174_v60, %v5014_v11  ;;  %v5016_v53 = vadd.f32 %v5015_v59, %v9617_v20  ;;  %v959_v60 = vld [vmem:[#allocation5 + $0x330] sm:$0xff] }
 0x3aa   :  { %v5017_v0 = vpop.f32.mrf.mxu0 }
 0x3ab   :  { %v5178_v2 = vpop.f32.mrf.mxu1  ;;  %6595 = vst [vmem:[#allocation8 + $0x30] sm:$0xff] %v5175_v57  ;;  %v5177_v9 = vadd.f32 %v5176_v46, %v5016_v53  ;;  %v5018_v36 = vadd.f32 %v5017_v0, %v9613_v35  ;;  %v967_v46 = vld [vmem:[#allocation5 + $0x370] sm:$0xff] }
 0x3ac   :  { %v5019_v48 = vpop.f32.mrf.mxu0  ;;  %v1215_v57 = vld [vmem:[#allocation5 + $0xb30] sm:$0xff] }
 0x3ad   :  { %v5180_v10 = vpop.f32.mrf.mxu1  ;;  %6596 = vst [vmem:[#allocation8 + $0x38] sm:$0xff] %v5177_v9  ;;  %v5179_v18 = vadd.f32 %v5178_v2, %v5018_v36  ;;  %v5020_v34 = vadd.f32 %v5019_v48, %v9617_v20  ;;  %v1223_v53 = vld [vmem:[#allocation5 + $0xb70] sm:$0xff]  ;;  %v7131_v9 = vcombine.low %v9567_v47, %v9569_v49 }
 0x3ae   :  { %v5023_v31 = vpop.f32.mrf.mxu0  ;;  %v1199_v47 = vld [vmem:[#allocation5 + $0xab0] sm:$0xff]  ;;  %v7371_v12 = vcombine.low %v1215_v57, %v1223_v53 }
 0x3af   :  { %v5184_v28 = vpop.f32.mrf.mxu1  ;;  %5454 = vmatmul.mubr.bf16.gmra.mxu0 %v9075_v16  ;;  %6611 = vst [vmem:[#allocation8 + $0xb0] sm:$0xff] %v5179_v18  ;;  %v5181_v55 = vadd.f32 %v5180_v10, %v5020_v34  ;;  %v5024_v27 = vadd.f32 %v5023_v31, %v9613_v35  ;;  %v7387_v10 = vcombine.low %v9573_v42, %v9575_v8  ;;  %v1207_v49 = vld [vmem:[#allocation5 + $0xaf0] sm:$0xff]  ;;  %v10679_v8 = vld [vmem:[#allocation57_spill] sm:$0xff] }
 0x3b0   :  { %5615 = vmatmul.mubr.bf16.gmra.mxu1 %v10655_v43  ;;  %5655 = vmatprep.mubr.bf16.mxu0 %v10656_v3  ;;  %v5025_v29 = vpop.f32.mrf.mxu0  ;;  %v7116_v31 = vcombine.high %v959_v60, %v967_v46 }
 0x3b1   :  { %5816 = vmatprep.mubr.bf16.mxu1 %v10676_v52  ;;  %v5186_v13 = vpop.f32.mrf.mxu1  ;;  %6612 = vst [vmem:[#allocation8 + $0xb8] sm:$0xff] %v5181_v55  ;;  %v5185_v45 = vadd.f32 %v5184_v28, %v5024_v27  ;;  %v5026_v61 = vadd.f32 %v5025_v29, %v9617_v20  ;;  %v7372_v28 = vcombine.high %v1215_v57, %v1223_v53  ;;  %v9639_v55 = vld [vmem:[#allocation5 + $0x2b0] sm:$0xff] }
 0x3b2   :  { %v5027_v11 = vpop.f32.mrf.mxu0  ;;  %v951_v27 = vld [vmem:[#allocation5 + $0x2f0] sm:$0xff] }
 0x3b3   :  { %v5188_v59 = vpop.f32.mrf.mxu1  ;;  %6627 = vst [vmem:[#allocation8 + $0x130] sm:$0xff] %v5185_v45  ;;  %v5187_v0 = vadd.f32 %v5186_v13, %v5026_v61  ;;  %v5028_v2 = vadd.f32 %v5027_v11, %v9613_v35  ;;  %v10677_v45 = vld [vmem:[#allocation47_spill] sm:$0xff]  ;;  %v10678_v61 = vld [vmem:[#allocation54_spill] sm:$0xff]  ;;  %v7100_v32 = vcombine.high %v9639_v55, %v951_v27 }
 0x3b4   :  { %v5029_v36 = vpop.f32.mrf.mxu0 }
 0x3b5   :  { %v5190_v48 = vpop.f32.mrf.mxu1  ;;  %6628 = vst [vmem:[#allocation8 + $0x138] sm:$0xff] %v5187_v0  ;;  %v5189_v18 = vadd.f32 %v5188_v59, %v5028_v2  ;;  %v5030_v34 = vadd.f32 %v5029_v36, %v9617_v20  ;;  %v7115_v59 = vcombine.low %v959_v60, %v967_v46  ;;  %v10680_v0 = vld [vmem:[#allocation59_spill] sm:$0xff]  ;;  %v1183_v60 = vld [vmem:[#allocation5 + $0xa30] sm:$0xff] }
 0x3b6   :  { %v5033_v29 = vpop.f32.mrf.mxu0  ;;  %v1191_v46 = vld [vmem:[#allocation5 + $0xa70] sm:$0xff] }
 0x3b7   :  { %v5194_v13 = vpop.f32.mrf.mxu1  ;;  %5656 = vmatmul.mubr.bf16.vlgmr.msra.gmra.mxu0 %v10677_v45  ;;  %6643 = vst [vmem:[#allocation8 + $0x1b0] sm:$0xff] %v5189_v18  ;;  %v5191_v11 = vadd.f32 %v5190_v48, %v5030_v34  ;;  %v5034_v42 = vadd.f32 %v5033_v29, %v9613_v35  ;;  %v7356_v48 = vcombine.high %v1199_v47, %v1207_v49  ;;  %v927_v18 = vld [vmem:[#allocation5 + $0x230] sm:$0xff] }
 0x3b8   :  { %5817 = vmatmul.mubr.bf16.vlgmr.msra.gmra.mxu1 %v10678_v61  ;;  %5946 = vmatpush1.bf16.msra.mxu0 %v7131_v9  ;;  %v5035_v2 = vpop.f32.mrf.mxu0  ;;  %v935_v29 = vld [vmem:[#allocation5 + $0x270] sm:$0xff] }
 0x3b9   :  { %5665 = vmatprep.mubr.bf16.mxu0 %v10679_v8  ;;  %5826 = vmatprep.mubr.bf16.mxu1 %v10680_v0  ;;  %v5196_v36 = vpop.f32.mrf.mxu1  ;;  %6644 = vst [vmem:[#allocation8 + $0x1b8] sm:$0xff] %v5191_v11  ;;  %v5195_v61 = vadd.f32 %v5194_v13, %v5034_v42  ;;  %v5036_v45 = vadd.f32 %v5035_v2, %v9617_v20  ;;  %v9651_v8 = vld [vmem:[#allocation5 + $0x1b0] sm:$0xff] }
 0x3ba   :  { %6107 = vmatpush1.bf16.msra.mxu1 %v7387_v10  ;;  %5947 = vmatprep.subr.bf16.mxu0 %v7116_v31  ;;  %v5037_v9 = vpop.f32.mrf.mxu0  ;;  %v7099_v13 = vcombine.low %v9639_v55, %v951_v27  ;;  %v7355_v31 = vcombine.low %v1199_v47, %v1207_v49  ;;  %v7084_v42 = vcombine.high %v927_v18, %v935_v29  ;;  %v1175_v55 = vld [vmem:[#allocation5 + $0x9f0] sm:$0xff]  ;;  %v10683_v49 = vld [vmem:[#allocation61_spill] sm:$0xff] }
 0x3bb   :  { %6108 = vmatprep.subr.bf16.mxu1 %v7372_v28  ;;  %v5198_v34 = vpop.f32.mrf.mxu1  ;;  %6659 = vst [vmem:[#allocation8 + $0x230] sm:$0xff] %v5195_v61  ;;  %v5197_v0 = vadd.f32 %v5196_v36, %v5036_v45  ;;  %v5038_v10 = vadd.f32 %v5037_v9, %v9613_v35  ;;  %v7340_v2 = vcombine.high %v1183_v60, %v1191_v46  ;;  %v919_v45 = vld [vmem:[#allocation5 + $0x1f0] sm:$0xff] }
 0x3bc   :  { %5948 = vmatpush1.bf16.msra.mxu0 %v7115_v59  ;;  %v5039_v57 = vpop.f32.mrf.mxu0  ;;  %v10681_v59 = vld [vmem:[#allocation58_spill] sm:$0xff]  ;;  %v10682_v47 = vld [vmem:[#allocation60_spill] sm:$0xff]  ;;  %v7083_v9 = vcombine.low %v927_v18, %v935_v29 }
 0x3bd   :  { %v5200_v53 = vpop.f32.mrf.mxu1  ;;  %5949 = vmatprep.subr.bf16.mxu0 %v7100_v32  ;;  %6660 = vst [vmem:[#allocation8 + $0x238] sm:$0xff] %v5197_v0  ;;  %v5199_v28 = vadd.f32 %v5198_v34, %v5038_v10  ;;  %v5040_v11 = vadd.f32 %v5039_v57, %v9617_v20  ;;  %v7339_v34 = vcombine.low %v1183_v60, %v1191_v46 }
 0x3be   :  { %6109 = vmatpush1.bf16.msra.mxu1 %v7371_v12  ;;  %v1167_v12 = vld [vmem:[#allocation5 + $0x9b0] sm:$0xff]  ;;  %v7068_v10 = vcombine.high %v9651_v8, %v919_v45  ;;  %v7067_v46 = vcombine.low %v9651_v8, %v919_v45 }
 0x3bf   :  { %6110 = vmatprep.subr.bf16.mxu1 %v7356_v48  ;;  %v5043_v61 = vpop.f32.mrf.mxu0  ;;  %v5204_v36 = vpop.f32.mrf.mxu1  ;;  %5666 = vmatmul.mubr.bf16.gmra.mxu0 %v10624_v4  ;;  %6675 = vst [vmem:[#allocation8 + $0x2b0] sm:$0xff] %v5199_v28  ;;  %v5201_v32 = vadd.f32 %v5200_v53, %v5040_v11  ;;  %v7324_v53 = vcombine.high %v1167_v12, %v1175_v55  ;;  %v895_v28 = vld [vmem:[#allocation5 + $0x130] sm:$0xff] }
 0x3c0   :  { %5827 = vmatmul.mubr.bf16.gmra.mxu1 %v10681_v59  ;;  %v5044_v27 = vadd.f32 %v5043_v61, %v9613_v35  ;;  %5675 = vmatprep.mubr.bf16.mxu0 %v10682_v47  ;;  %v903_v11 = vld [vmem:[#allocation5 + $0x170] sm:$0xff] }
 0x3c1   :  { %5836 = vmatprep.mubr.bf16.mxu1 %v10683_v49  ;;  %v5045_v0 = vpop.f32.mrf.mxu0  ;;  %v5206_v48 = vpop.f32.mrf.mxu1  ;;  %5950 = vmatpush1.bf16.msra.mxu0 %v7099_v13  ;;  %6676 = vst [vmem:[#allocation8 + $0x2b8] sm:$0xff] %v5201_v32  ;;  %v1151_v49 = vld [vmem:[#allocation5 + $0x930] sm:$0xff] }
 0x3c2   :  { %6111 = vmatpush1.bf16.msra.mxu1 %v7355_v31  ;;  %v5205_v57 = vadd.f32 %v5204_v36, %v5044_v27  ;;  %v5046_v59 = vadd.f32 %v5045_v0, %v9617_v20  ;;  %5951 = vmatprep.subr.bf16.mxu0 %v7084_v42  ;;  %v1159_v4 = vld [vmem:[#allocation5 + $0x970] sm:$0xff]  ;;  %v7323_v31 = vcombine.low %v1167_v12, %v1175_v55  ;;  %v10686_v55 = vld [vmem:[#allocation62_spill] sm:$0xff] }
 0x3c3   :  { %6112 = vmatprep.subr.bf16.mxu1 %v7340_v2  ;;  %v5047_v61 = vpop.f32.mrf.mxu0  ;;  %v5208_v47 = vpop.f32.mrf.mxu1  ;;  %v7052_v42 = vcombine.high %v895_v28, %v903_v11  ;;  %v7308_v32 = vcombine.high %v1151_v49, %v1159_v4  ;;  %v9663_v27 = vld [vmem:[#allocation5 + $0xb0] sm:$0xff] }
 0x3c4   :  { %6691 = vst [vmem:[#allocation8 + $0x330] sm:$0xff] %v5205_v57  ;;  %v5207_v13 = vadd.f32 %v5206_v48, %v5046_v59  ;;  %v5048_v18 = vadd.f32 %v5047_v61, %v9613_v35  ;;  %v887_v59 = vld [vmem:[#allocation5 + $0xf0] sm:$0xff]  ;;  %v7051_v61 = vcombine.low %v895_v28, %v903_v11 }
 0x3c5   :  { %v5049_v29 = vpop.f32.mrf.mxu0  ;;  %v5210_v60 = vpop.f32.mrf.mxu1  ;;  %5952 = vmatpush1.bf16.msra.mxu0 %v7083_v9  ;;  %v10684_v57 = vld [vmem:[#allocation64_spill] sm:$0xff]  ;;  %v10685_v9 = vld [vmem:[#allocation66_spill] sm:$0xff]  ;;  %v7035_v11 = vcombine.low %v9663_v27, %v887_v59 }
 0x3c6   :  { %6113 = vmatpush1.bf16.msra.mxu1 %v7339_v34  ;;  %6692 = vst [vmem:[#allocation8 + $0x338] sm:$0xff] %v5207_v13  ;;  %v5209_v2 = vadd.f32 %v5208_v47, %v5048_v18  ;;  %v5050_v36 = vadd.f32 %v5049_v29, %v9617_v20  ;;  %5953 = vmatprep.subr.bf16.mxu0 %v7068_v10  ;;  %v1135_v34 = vld [vmem:[#allocation5 + $0x8b0] sm:$0xff]  ;;  %v10687_v47 = vld [vmem:[#allocation63_spill] sm:$0xff] }
 0x3c7   :  { %6114 = vmatprep.subr.bf16.mxu1 %v7324_v53  ;;  %v5053_v0 = vpop.f32.mrf.mxu0  ;;  %v5214_v48 = vpop.f32.mrf.mxu1  ;;  %5676 = vmatmul.mubr.bf16.gmra.mxu0 %v10684_v57  ;;  %v1143_v8 = vld [vmem:[#allocation5 + $0x8f0] sm:$0xff]  ;;  %v7307_v13 = vcombine.low %v1151_v49, %v1159_v4  ;;  %v7036_v18 = vcombine.high %v9663_v27, %v887_v59 }
 0x3c8   :  { %5837 = vmatmul.mubr.bf16.gmra.mxu1 %v10685_v9  ;;  %6707 = vst [vmem:[#allocation8 + $0x3b0] sm:$0xff] %v5209_v2  ;;  %v5211_v45 = vadd.f32 %v5210_v60, %v5050_v36  ;;  %v5054_v12 = vadd.f32 %v5053_v0, %v9613_v35  ;;  %5685 = vmatprep.mubr.bf16.mxu0 %v10686_v55  ;;  %v863_v2 = vld [vmem:[#allocation5 + $0x30] sm:$0xff] }
 0x3c9   :  { %5846 = vmatprep.mubr.bf16.mxu1 %v10687_v47  ;;  %v5055_v10 = vpop.f32.mrf.mxu0  ;;  %v5216_v53 = vpop.f32.mrf.mxu1  ;;  %5954 = vmatpush1.bf16.msra.mxu0 %v7067_v46  ;;  %v7292_v60 = vcombine.high %v1135_v34, %v1143_v8  ;;  %v871_v36 = vld [vmem:[#allocation5 + $0x70] sm:$0xff] }
 0x3ca   :  { %6115 = vmatpush1.bf16.msra.mxu1 %v7323_v31  ;;  %6708 = vst [vmem:[#allocation8 + $0x3b8] sm:$0xff] %v5211_v45  ;;  %v5215_v29 = vadd.f32 %v5214_v48, %v5054_v12  ;;  %v5056_v9 = vadd.f32 %v5055_v10, %v9617_v20  ;;  %5955 = vmatprep.subr.bf16.mxu0 %v7052_v42  ;;  %v1119_v47 = vld [vmem:[#allocation5 + $0x830] sm:$0xff] }
 0x3cb   :  { %6116 = vmatprep.subr.bf16.mxu1 %v7308_v32  ;;  %v5057_v0 = vpop.f32.mrf.mxu0  ;;  %v5218_v55 = vpop.f32.mrf.mxu1  ;;  %v1127_v57 = vld [vmem:[#allocation5 + $0x870] sm:$0xff]  ;;  %v7291_v31 = vcombine.low %v1135_v34, %v1143_v8  ;;  %v7020_v42 = vcombine.high %v863_v2, %v871_v36  ;;  %v10690_v8 = vld [vmem:[#allocation69_spill] sm:$0xff] }
 0x3cc   :  { %6723 = vst [vmem:[#allocation8 + $0x430] sm:$0xff] %v5215_v29  ;;  %v5217_v46 = vadd.f32 %v5216_v53, %v5056_v9  ;;  %v5058_v28 = vadd.f32 %v5057_v0, %v9613_v35  ;;  %v7276_v45 = vcombine.high %v1119_v47, %v1127_v57  ;;  %v9675_v12 = vld [vmem:[#allocation5 + $0x7b0] sm:$0xff]  ;;  %v10688_v29 = vld [vmem:[#allocation65_spill] sm:$0xff]  ;;  %v7019_v0 = vcombine.low %v863_v2, %v871_v36 }
 0x3cd   :  { %v5059_v4 = vpop.f32.mrf.mxu0  ;;  %v5220_v49 = vpop.f32.mrf.mxu1  ;;  %5956 = vmatpush1.bf16.msra.mxu0 %v7051_v61  ;;  %v1111_v9 = vld [vmem:[#allocation5 + $0x7f0] sm:$0xff]  ;;  %v10689_v61 = vld [vmem:[#allocation67_spill] sm:$0xff] }
 0x3ce   :  { %6117 = vmatpush1.bf16.msra.mxu1 %v7307_v13  ;;  %6724 = vst [vmem:[#allocation8 + $0x438] sm:$0xff] %v5217_v46  ;;  %v5219_v32 = vadd.f32 %v5218_v55, %v5058_v28  ;;  %v5060_v48 = vadd.f32 %v5059_v4, %v9617_v20  ;;  %5957 = vmatprep.subr.bf16.mxu0 %v7036_v18  ;;  %v1359_v13 = vld [vmem:[#allocation5 + $0xfb0] sm:$0xff]  ;;  %v10691_v55 = vld [vmem:[#allocation71_spill] sm:$0xff] }
 0x3cf   :  { %6118 = vmatprep.subr.bf16.mxu1 %v7292_v60  ;;  %v5063_v10 = vpop.f32.mrf.mxu0  ;;  %5686 = vmatmul.mubr.bf16.gmra.mxu0 %v10688_v29  ;;  %v1367_v27 = vld [vmem:[#allocation5 + $0xff0] sm:$0xff]  ;;  %v7275_v46 = vcombine.low %v1119_v47, %v1127_v57  ;;  %v7260_v28 = vcombine.high %v9675_v12, %v1111_v9  ;;  %v7259_v36 = vcombine.low %v9675_v12, %v1111_v9 }
 0x3d0   :  { %v5224_v53 = vpop.f32.mrf.mxu1  ;;  %5847 = vmatmul.mubr.bf16.gmra.mxu1 %v10689_v61  ;;  %6739 = vst [vmem:[#allocation8 + $0x4b0] sm:$0xff] %v5219_v32  ;;  %v5221_v59 = vadd.f32 %v5220_v49, %v5060_v48  ;;  %v5064_v34 = vadd.f32 %v5063_v10, %v9613_v35  ;;  %5695 = vmatprep.mubr.bf16.mxu0 %v10690_v8  ;;  %v1087_v32 = vld [vmem:[#allocation5 + $0x730] sm:$0xff] }
 0x3d1   :  { %5856 = vmatprep.mubr.bf16.mxu1 %v10691_v55  ;;  %v5065_v18 = vpop.f32.mrf.mxu0  ;;  %5958 = vmatpush1.bf16.msra.mxu0 %v7035_v11  ;;  %v7516_v49 = vcombine.high %v1359_v13, %v1367_v27  ;;  %v1095_v48 = vld [vmem:[#allocation5 + $0x770] sm:$0xff] }
 0x3d2   :  { %v5226_v60 = vpop.f32.mrf.mxu1  ;;  %6119 = vmatpush1.bf16.msra.mxu1 %v7291_v31  ;;  %6740 = vst [vmem:[#allocation8 + $0x4b8] sm:$0xff] %v5221_v59  ;;  %v5225_v4 = vadd.f32 %v5224_v53, %v5064_v34  ;;  %v5066_v61 = vadd.f32 %v5065_v18, %v9617_v20  ;;  %5959 = vmatprep.subr.bf16.mxu0 %v7020_v42  ;;  %v1343_v55 = vld [vmem:[#allocation5 + $0xf30] sm:$0xff] }
 0x3d3   :  { %6120 = vmatprep.subr.bf16.mxu1 %v7276_v45  ;;  %v5067_v10 = vpop.f32.mrf.mxu0  ;;  %v1351_v29 = vld [vmem:[#allocation5 + $0xf70] sm:$0xff]  ;;  %v7515_v31 = vcombine.low %v1359_v13, %v1367_v27  ;;  %v7244_v42 = vcombine.high %v1087_v32, %v1095_v48 }
 0x3d4   :  { %v5228_v8 = vpop.f32.mrf.mxu1  ;;  %6755 = vst [vmem:[#allocation8 + $0x530] sm:$0xff] %v5225_v4  ;;  %v5227_v11 = vadd.f32 %v5226_v60, %v5066_v61  ;;  %v5068_v2 = vadd.f32 %v5067_v10, %v9613_v35  ;;  %v7500_v59 = vcombine.high %v1343_v55, %v1351_v29  ;;  %v9687_v34 = vld [vmem:[#allocation5 + $0x6b0] sm:$0xff]  ;;  %v7243_v4 = vcombine.low %v1087_v32, %v1095_v48 }
 0x3d5   :  { %v5069_v57 = vpop.f32.mrf.mxu0  ;;  %5960 = vmatpush1.bf16.msra.mxu0 %v7019_v0  ;;  %v1079_v61 = vld [vmem:[#allocation5 + $0x6f0] sm:$0xff] }
 0x3d6   :  { %v5230_v47 = vpop.f32.mrf.mxu1  ;;  %6121 = vmatpush1.bf16.msra.mxu1 %v7275_v46  ;;  %6756 = vst [vmem:[#allocation8 + $0x538] sm:$0xff] %v5227_v11  ;;  %v5229_v45 = vadd.f32 %v5228_v8, %v5068_v2  ;;  %v5070_v53 = vadd.f32 %v5069_v57, %v9617_v20  ;;  %5961 = vmatprep.subr.bf16.mxu0 %v7260_v28  ;;  %v1327_v0 = vld [vmem:[#allocation5 + $0xeb0] sm:$0xff]  ;;  %v10693_v8 = vld [vmem:[#allocation70_spill] sm:$0xff] }
 0x3d7   :  { %6122 = vmatprep.subr.bf16.mxu1 %v7516_v49  ;;  %v5073_v18 = vpop.f32.mrf.mxu0  ;;  %5696 = vmatmul.mubr.bf16.gmra.mxu0 %v8871_v33  ;;  %v1335_v12 = vld [vmem:[#allocation5 + $0xef0] sm:$0xff]  ;;  %v7499_v49 = vcombine.low %v1343_v55, %v1351_v29  ;;  %v7228_v10 = vcombine.high %v9687_v34, %v1079_v61  ;;  %v7227_v48 = vcombine.low %v9687_v34, %v1079_v61 }
 0x3d8   :  { %v5234_v60 = vpop.f32.mrf.mxu1  ;;  %5857 = vmatmul.mubr.bf16.gmra.mxu1 %v8873_v21  ;;  %6771 = vst [vmem:[#allocation8 + $0x5b0] sm:$0xff] %v5229_v45  ;;  %v5231_v9 = vadd.f32 %v5230_v47, %v5070_v53  ;;  %v5074_v13 = vadd.f32 %v5073_v18, %v9613_v35  ;;  %v10692_v27 = vld [vmem:[#allocation68_spill] sm:$0xff]  ;;  %v7484_v57 = vcombine.high %v1327_v0, %v1335_v12 }
 0x3d9   :  { %5705 = vmatprep.mubr.bf16.mxu0 %v10692_v27  ;;  %5866 = vmatprep.mubr.bf16.mxu1 %v10693_v8  ;;  %v5075_v46 = vpop.f32.mrf.mxu0  ;;  %v1055_v47 = vld [vmem:[#allocation5 + $0x630] sm:$0xff] }
 0x3da   :  { %v5236_v28 = vpop.f32.mrf.mxu1  ;;  %5962 = vmatpush2.bf16.msra.mxu0 %v7259_v36  ;;  %6123 = vmatpush2.bf16.msra.mxu1 %v7515_v31  ;;  %6772 = vst [vmem:[#allocation8 + $0x5b8] sm:$0xff] %v5231_v9  ;;  %v5235_v11 = vadd.f32 %v5234_v60, %v5074_v13  ;;  %v5076_v2 = vadd.f32 %v5075_v46, %v9617_v20  ;;  %v1063_v45 = vld [vmem:[#allocation5 + $0x670] sm:$0xff] }
 0x3db   :  { %5963 = vmatprep.subr.bf16.mxu0 %v7244_v42  ;;  %6124 = vmatprep.subr.bf16.mxu1 %v7500_v59  ;;  %v5077_v53 = vpop.f32.mrf.mxu0  ;;  %v1311_v8 = vld [vmem:[#allocation5 + $0xe30] sm:$0xff]  ;;  %v7483_v31 = vcombine.low %v1327_v0, %v1335_v12  ;;  %v7212_v42 = vcombine.high %v1055_v47, %v1063_v45  ;;  %v10694_v12 = vld [vmem:[#allocation74_spill] sm:$0xff] }
 0x3dc   :  { %v5238_v18 = vpop.f32.mrf.mxu1  ;;  %v1319_v27 = vld [vmem:[#allocation5 + $0xe70] sm:$0xff]  ;;  %6787 = vst [vmem:[#allocation8 + $0x630] sm:$0xff] %v5235_v11  ;;  %v5237_v36 = vadd.f32 %v5236_v28, %v5076_v2  ;;  %v5078_v32 = vadd.f32 %v5077_v53, %v9613_v35 }
 0x3dd   :  { %v5079_v29 = vpop.f32.mrf.mxu0  ;;  %v7468_v9 = vcombine.high %v1311_v8, %v1319_v27  ;;  %v9699_v13 = vld [vmem:[#allocation5 + $0x5b0] sm:$0xff]  ;;  %v7467_v53 = vcombine.low %v1311_v8, %v1319_v27 }
 0x3de   :  { %v5240_v55 = vpop.f32.mrf.mxu1  ;;  %5964 = vmatpush2.bf16.msra.mxu0 %v7243_v4  ;;  %6125 = vmatpush2.bf16.msra.mxu1 %v7499_v49  ;;  %6788 = vst [vmem:[#allocation8 + $0x638] sm:$0xff] %v5237_v36  ;;  %v5239_v59 = vadd.f32 %v5238_v18, %v5078_v32  ;;  %v5080_v60 = vadd.f32 %v5079_v29, %v9617_v20  ;;  %v1047_v46 = vld [vmem:[#allocation5 + $0x5f0] sm:$0xff] }
 0x3df   :  { %5965 = vmatprep.subr.bf16.mxu0 %v7228_v10  ;;  %6126 = vmatprep.subr.bf16.mxu1 %v7484_v57  ;;  %v5083_v28 = vpop.f32.mrf.mxu0  ;;  %v1295_v4 = vld [vmem:[#allocation5 + $0xdb0] sm:$0xff]  ;;  %v7211_v57 = vcombine.low %v1055_v47, %v1063_v45  ;;  %v7196_v18 = vcombine.high %v9699_v13, %v1047_v46  ;;  %v7195_v45 = vcombine.low %v9699_v13, %v1047_v46 }
 0x3e0   :  { %v5244_v11 = vpop.f32.mrf.mxu1  ;;  %5706 = vmatmul.mubr.bf16.gmra.mxu0 %v8909_v24  ;;  %5867 = vmatmul.mubr.bf16.gmra.mxu1 %v8911_v39  ;;  %v1303_v34 = vld [vmem:[#allocation5 + $0xdf0] sm:$0xff]  ;;  %6803 = vst [vmem:[#allocation8 + $0x6b0] sm:$0xff] %v5239_v59  ;;  %v5241_v61 = vadd.f32 %v5240_v55, %v5080_v60  ;;  %v5084_v0 = vadd.f32 %v5083_v28, %v9613_v35 }
 0x3e1   :  { %5715 = vmatprep.mubr.bf16.mxu0 %v10694_v12  ;;  %v10695_v49 = vld [vmem:[#allocation72_spill] sm:$0xff]  ;;  %v5085_v10 = vpop.f32.mrf.mxu0  ;;  %v7452_v29 = vcombine.high %v1295_v4, %v1303_v34 }
 0x3e2   :  { %5876 = vmatprep.mubr.bf16.mxu1 %v10695_v49  ;;  %v5246_v2 = vpop.f32.mrf.mxu1  ;;  %5966 = vmatpush2.bf16.msra.mxu0 %v7227_v48  ;;  %6804 = vst [vmem:[#allocation8 + $0x6b8] sm:$0xff] %v5241_v61  ;;  %v5245_v36 = vadd.f32 %v5244_v11, %v5084_v0  ;;  %v5086_v32 = vadd.f32 %v5085_v10, %v9617_v20  ;;  %v1023_v55 = vld [vmem:[#allocation5 + $0x530] sm:$0xff] }
 0x3e3   :  { %6127 = vmatpush2.bf16.msra.mxu1 %v7483_v31  ;;  %5967 = vmatprep.subr.bf16.mxu0 %v7212_v42  ;;  %v1031_v59 = vld [vmem:[#allocation5 + $0x570] sm:$0xff]  ;;  %v5087_v60 = vpop.f32.mrf.mxu0  ;;  %v7451_v31 = vcombine.low %v1295_v4, %v1303_v34 }
 0x3e4   :  { %6128 = vmatprep.subr.bf16.mxu1 %v7468_v9  ;;  %v5248_v28 = vpop.f32.mrf.mxu1  ;;  %v1279_v49 = vld [vmem:[#allocation5 + $0xd30] sm:$0xff]  ;;  %6819 = vst [vmem:[#allocation8 + $0x730] sm:$0xff] %v5245_v36  ;;  %v5247_v48 = vadd.f32 %v5246_v2, %v5086_v32  ;;  %v5088_v47 = vadd.f32 %v5087_v60, %v9613_v35  ;;  %v7180_v42 = vcombine.high %v1023_v55, %v1031_v59 }
 0x3e5   :  { %v1287_v12 = vld [vmem:[#allocation5 + $0xd70] sm:$0xff]  ;;  %v5089_v27 = vpop.f32.mrf.mxu0 }
 0x3e6   :  { %v5250_v8 = vpop.f32.mrf.mxu1  ;;  %5968 = vmatpush2.bf16.msra.mxu0 %v7211_v57  ;;  %6820 = vst [vmem:[#allocation8 + $0x738] sm:$0xff] %v5247_v48  ;;  %v5249_v9 = vadd.f32 %v5248_v28, %v5088_v47  ;;  %v5090_v11 = vadd.f32 %v5089_v27, %v9617_v20  ;;  %v7436_v61 = vcombine.high %v1279_v49, %v1287_v12  ;;  %v9711_v0 = vld [vmem:[#allocation5 + $0x4b0] sm:$0xff] }
 0x3e7   :  { %6129 = vmatpush2.bf16.msra.mxu1 %v7467_v53  ;;  %5969 = vmatprep.subr.bf16.mxu0 %v7196_v18  ;;  %v1015_v10 = vld [vmem:[#allocation5 + $0x4f0] sm:$0xff]  ;;  %v5093_v2 = vpop.f32.mrf.mxu0  ;;  %v7179_v18 = vcombine.low %v1023_v55, %v1031_v59  ;;  %v7435_v32 = vcombine.low %v1279_v49, %v1287_v12 }
 0x3e8   :  { %6130 = vmatprep.subr.bf16.mxu1 %v7452_v29  ;;  %v5254_v36 = vpop.f32.mrf.mxu1  ;;  %5716 = vmatmul.mubr.bf16.gmra.mxu0 %v8941_v6  ;;  %v1263_v57 = vld [vmem:[#allocation5 + $0xcb0] sm:$0xff]  ;;  %6835 = vst [vmem:[#allocation8 + $0x7b0] sm:$0xff] %v5249_v9  ;;  %v5251_v46 = vadd.f32 %v5250_v8, %v5090_v11  ;;  %v5094_v4 = vadd.f32 %v5093_v2, %v9613_v35 }
 0x3e9   :  { %5877 = vmatmul.mubr.bf16.gmra.mxu1 %v8943_v58  ;;  %v1271_v13 = vld [vmem:[#allocation5 + $0xcf0] sm:$0xff]  ;;  %5725 = vmatprep.mubr.bf16.mxu0 %v8951_v56  ;;  %v5095_v34 = vpop.f32.mrf.mxu0  ;;  %v7164_v29 = vcombine.high %v9711_v0, %v1015_v10  ;;  %v7163_v59 = vcombine.low %v9711_v0, %v1015_v10  ;;  %v9729_v0 = vld [vmem:[#allocation5 + $0xbb8] sm:$0xff] }
 0x3ea   :  { %5886 = vmatprep.mubr.bf16.mxu1 %v8953_v41  ;;  %v5256_v53 = vpop.f32.mrf.mxu1  ;;  %5970 = vmatpush2.bf16.msra.mxu0 %v7195_v45  ;;  %6836 = vst [vmem:[#allocation8 + $0x7b8] sm:$0xff] %v5251_v46  ;;  %v5255_v60 = vadd.f32 %v5254_v36, %v5094_v4  ;;  %v5096_v28 = vadd.f32 %v5095_v34, %v9617_v20  ;;  %v991_v47 = vld [vmem:[#allocation5 + $0x430] sm:$0xff]  ;;  %v9723_v4 = vld [vmem:[#allocation5 + $0x3b8] sm:$0xff] }
 0x3eb   :  { %6131 = vmatpush2.bf16.msra.mxu1 %v7451_v31  ;;  %5971 = vmatprep.subr.bf16.mxu0 %v7180_v42  ;;  %v7420_v48 = vcombine.high %v1263_v57, %v1271_v13  ;;  %v999_v27 = vld [vmem:[#allocation5 + $0x470] sm:$0xff]  ;;  %v5097_v8 = vpop.f32.mrf.mxu0  ;;  %v7419_v31 = vcombine.low %v1263_v57, %v1271_v13  ;;  %v9725_v34 = vld [vmem:[#allocation5 + $0x3f8] sm:$0xff] }
 0x3ec   :  { %6132 = vmatprep.subr.bf16.mxu1 %v7436_v61  ;;  %v5258_v9 = vpop.f32.mrf.mxu1  ;;  %v1247_v11 = vld [vmem:[#allocation5 + $0xc30] sm:$0xff]  ;;  %6851 = vst [vmem:[#allocation8 + $0x830] sm:$0xff] %v5255_v60  ;;  %v5257_v45 = vadd.f32 %v5256_v53, %v5096_v28  ;;  %v5098_v55 = vadd.f32 %v5097_v8, %v9613_v35  ;;  %v7148_v42 = vcombine.high %v991_v47, %v999_v27  ;;  %v9731_v10 = vld [vmem:[#allocation5 + $0xbf8] sm:$0xff] }
 0x3ed   :  { %v1255_v2 = vld [vmem:[#allocation5 + $0xc70] sm:$0xff]  ;;  %v5099_v12 = vpop.f32.mrf.mxu0 }
 0x3ee   :  { %v5260_v49 = vpop.f32.mrf.mxu1  ;;  %5972 = vmatpush2.bf16.msra.mxu0 %v7179_v18  ;;  %6852 = vst [vmem:[#allocation8 + $0x838] sm:$0xff] %v5257_v45  ;;  %v5259_v61 = vadd.f32 %v5258_v9, %v5098_v55  ;;  %v5100_v36 = vadd.f32 %v5099_v12, %v9617_v20  ;;  %v7404_v46 = vcombine.high %v1247_v11, %v1255_v2 }
 0x3ef   :  { %6133 = vmatpush2.bf16.msra.mxu1 %v7435_v32  ;;  %5973 = vmatprep.subr.bf16.mxu0 %v7164_v29  ;;  %v5103_v53 = vpop.f32.mrf.mxu0  ;;  %v7147_v29 = vcombine.low %v991_v47, %v999_v27  ;;  %v7403_v28 = vcombine.low %v1247_v11, %v1255_v2  ;;  %v7390_v45 = vcombine.high %v9729_v0, %v9731_v10 }
 0x3f0   :  { %6134 = vmatprep.subr.bf16.mxu1 %v7420_v48  ;;  %v5264_v60 = vpop.f32.mrf.mxu1  ;;  %5726 = vmatmul.mubr.bf16.gmra.mxu0 %v8975_v25  ;;  %6867 = vst [vmem:[#allocation8 + $0x8b0] sm:$0xff] %v5259_v61  ;;  %v5261_v57 = vadd.f32 %v5260_v49, %v5100_v36  ;;  %v5104_v13 = vadd.f32 %v5103_v53, %v9613_v35 }
 0x3f1   :  { %5887 = vmatmul.mubr.bf16.gmra.mxu1 %v8977_v23  ;;  %5735 = vmatprep.mubr.bf16.mxu0 %v8981_v7  ;;  %v5105_v18 = vpop.f32.mrf.mxu0  ;;  %v7134_v48 = vcombine.high %v9723_v4, %v9725_v34 }
 0x3f2   :  { %5896 = vmatprep.mubr.bf16.mxu1 %v8983_v30  ;;  %v5266_v32 = vpop.f32.mrf.mxu1  ;;  %5974 = vmatpush2.bf16.msra.mxu0 %v7163_v59  ;;  %6868 = vst [vmem:[#allocation8 + $0x8b8] sm:$0xff] %v5261_v57  ;;  %v5265_v8 = vadd.f32 %v5264_v60, %v5104_v13  ;;  %v5106_v9 = vadd.f32 %v5105_v18, %v9617_v20 }
 0x3f3   :  { %6135 = vmatpush2.bf16.msra.mxu1 %v7419_v31  ;;  %5975 = vmatprep.subr.bf16.mxu0 %v7148_v42  ;;  %v5107_v55 = vpop.f32.mrf.mxu0 }
 0x3f4   :  { %6136 = vmatprep.subr.bf16.mxu1 %v7404_v46  ;;  %v5268_v12 = vpop.f32.mrf.mxu1  ;;  %6883 = vst [vmem:[#allocation8 + $0x930] sm:$0xff] %v5265_v8  ;;  %v5267_v49 = vadd.f32 %v5266_v32, %v5106_v9  ;;  %v5108_v59 = vadd.f32 %v5107_v55, %v9613_v35 }
 0x3f5   :  { %v5109_v47 = vpop.f32.mrf.mxu0 }
 0x3f6   :  { %v5270_v27 = vpop.f32.mrf.mxu1  ;;  %5976 = vmatpush2.bf16.msra.mxu0 %v7147_v29  ;;  %6884 = vst [vmem:[#allocation8 + $0x938] sm:$0xff] %v5267_v49  ;;  %v5269_v11 = vadd.f32 %v5268_v12, %v5108_v59  ;;  %v5110_v2 = vadd.f32 %v5109_v47, %v9617_v20 }
 0x3f7   :  { %6137 = vmatpush2.bf16.msra.mxu1 %v7403_v28  ;;  %6267 = vmatprep.subr.bf16.mxu0 %v7134_v48  ;;  %v5113_v31 = vpop.f32.mrf.mxu0 }
 0x3f8   :  { %6428 = vmatprep.subr.bf16.mxu1 %v7390_v45  ;;  %v5274_v42 = vpop.f32.mrf.mxu1  ;;  %5736 = vmatmul.mubr.bf16.gmra.mxu0 %v8999_v51  ;;  %6899 = vst [vmem:[#allocation8 + $0x9b0] sm:$0xff] %v5269_v11  ;;  %v5271_v61 = vadd.f32 %v5270_v27, %v5110_v2  ;;  %v5114_v36 = vadd.f32 %v5113_v31, %v9613_v35 }
 0x3f9   :  { %5897 = vmatmul.mubr.bf16.gmra.mxu1 %v9001_v62  ;;  %5745 = vmatprep.mubr.bf16.mxu0 %v9005_v54  ;;  %v5115_v46 = vpop.f32.mrf.mxu0 }
 0x3fa   :  { %5906 = vmatprep.mubr.bf16.mxu1 %v9007_v44  ;;  %v5276_v53 = vpop.f32.mrf.mxu1  ;;  %6900 = vst [vmem:[#allocation8 + $0x9b8] sm:$0xff] %v5271_v61  ;;  %v5275_v60 = vadd.f32 %v5274_v42, %v5114_v36  ;;  %v5116_v57 = vadd.f32 %v5115_v46, %v9617_v20 }
 0x3fb   :  { %v5117_v13 = vpop.f32.mrf.mxu0 }
 0x3fc   :  { %v5278_v18 = vpop.f32.mrf.mxu1  ;;  %6915 = vst [vmem:[#allocation8 + $0xa30] sm:$0xff] %v5275_v60  ;;  %v5277_v32 = vadd.f32 %v5276_v53, %v5116_v57  ;;  %v5118_v29 = vadd.f32 %v5117_v13, %v9613_v35 }
 0x3fd   :  { %v5119_v28 = vpop.f32.mrf.mxu0 }
 0x3fe   :  { %v5280_v48 = vpop.f32.mrf.mxu1  ;;  %6916 = vst [vmem:[#allocation8 + $0xa38] sm:$0xff] %v5277_v32  ;;  %v5279_v8 = vadd.f32 %v5278_v18, %v5118_v29  ;;  %v5120_v9 = vadd.f32 %v5119_v28, %v9617_v20 }
 0x3ff   :  { %v5123_v45 = vpop.f32.mrf.mxu0 }
 0x400   :  { %v5284_v55 = vpop.f32.mrf.mxu1  ;;  %5746 = vmatmul.mubr.bf16.gmra.mxu0 %v9023_v14  ;;  %6931 = vst [vmem:[#allocation8 + $0xab0] sm:$0xff] %v5279_v8  ;;  %v5281_v12 = vadd.f32 %v5280_v48, %v5120_v9  ;;  %v5124_v49 = vadd.f32 %v5123_v45, %v9613_v35  ;;  %v9764_v48 = vld [vmem:[#allocation7 + $0x8] sm:$0xff] }
 0x401   :  { %5907 = vmatmul.mubr.bf16.gmra.mxu1 %v9025_v19  ;;  %5755 = vmatprep.mubr.bf16.mxu0 %v9027_v17  ;;  %v5125_v59 = vpop.f32.mrf.mxu0 }
 0x402   :  { %5916 = vmatprep.mubr.bf16.mxu1 %v9029_v5  ;;  %v5286_v47 = vpop.f32.mrf.mxu1  ;;  %6932 = vst [vmem:[#allocation8 + $0xab8] sm:$0xff] %v5281_v12  ;;  %v5285_v27 = vadd.f32 %v5284_v55, %v5124_v49  ;;  %v5126_v11 = vadd.f32 %v5125_v59, %v9617_v20  ;;  %v10696_v49 = vsub.s32 0, %v10640_v26 }
 0x403   :  { %v5127_v2 = vpop.f32.mrf.mxu0 }
 0x404   :  { %v5288_v31 = vpop.f32.mrf.mxu1  ;;  %6947 = vst [vmem:[#allocation8 + $0xb30] sm:$0xff] %v5285_v27  ;;  %v5287_v42 = vadd.f32 %v5286_v47, %v5126_v11  ;;  %v5128_v61 = vadd.f32 %v5127_v2, %v9613_v35  ;;  %v10697_v27 = vsub.s32 1, %v10640_v26 }
 0x405   :  { %v5129_v36 = vpop.f32.mrf.mxu0 }
 0x406   :  { %v5290_v46 = vpop.f32.mrf.mxu1  ;;  %6948 = vst [vmem:[#allocation8 + $0xb38] sm:$0xff] %v5287_v42  ;;  %v5289_v53 = vadd.f32 %v5288_v31, %v5128_v61  ;;  %v5130_v60 = vadd.f32 %v5129_v36, %v9617_v20  ;;  %v9775_v11 = vrot.slane %v9764_v48, %v10697_v27  ;;  %v960_v27 = vld [vmem:[#allocation5 + $0x338] sm:$0xff] }
 0x407   :  { %v5133_v57 = vpop.f32.mrf.mxu0 }
 0x408   :  { %v5294_v13 = vpop.f32.mrf.mxu1  ;;  %5756 = vmatmul.mubr.bf16.gmra.mxu0 %v9039_v37  ;;  %6963 = vst [vmem:[#allocation8 + $0xbb0] sm:$0xff] %v5289_v53  ;;  %v5291_v18 = vadd.f32 %v5290_v46, %v5130_v60  ;;  %v5134_v32 = vadd.f32 %v5133_v57, %v9613_v35  ;;  %v9770_v35 = vrot.slane %v9764_v48, %v10696_v49 }
 0x409   :  { %5917 = vmatmul.mubr.bf16.gmra.mxu1 %v9041_v40  ;;  %5765 = vmatprep.mubr.bf16.mxu0 %v9053_v22  ;;  %v5135_v29 = vpop.f32.mrf.mxu0 }
 0x40a   :  { %5926 = vmatprep.mubr.bf16.mxu1 %v9055_v1  ;;  %v5296_v28 = vpop.f32.mrf.mxu1  ;;  %6964 = vst [vmem:[#allocation8 + $0xbb8] sm:$0xff] %v5291_v18  ;;  %v5295_v8 = vadd.f32 %v5294_v13, %v5134_v32  ;;  %v5136_v9 = vadd.f32 %v5135_v29, %v9617_v20 }
 0x40b   :  { %v5137_v45 = vpop.f32.mrf.mxu0 }
 0x40c   :  { %v5298_v55 = vpop.f32.mrf.mxu1  ;;  %6979 = vst [vmem:[#allocation8 + $0xc30] sm:$0xff] %v5295_v8  ;;  %v5297_v12 = vadd.f32 %v5296_v28, %v5136_v9 }
 0x40d   :  { %v5138_v59 = vpop.f32.mrf.mxu0 }
 0x40e   :  { %v5299_v47 = vpop.f32.mrf.mxu1  ;;  %6980 = vst [vmem:[#allocation8 + $0xc38] sm:$0xff] %v5297_v12 }
 0x40f   :  { %v5335_v2 = vpop.f32.mrf.mxu0 }
 0x410   :  { %v5496_v31 = vpop.f32.mrf.mxu1  ;;  %5766 = vmatmul.mubr.bf16.gmra.mxu0 %v9057_v38  ;;  %v5336_v20 = vadd.f32 %v5335_v2, %v9770_v35 }
 0x411   :  { %5927 = vmatmul.mubr.bf16.gmra.mxu1 %v9059_v15  ;;  %5775 = vmatprep.mubr.bf16.mxu0 %v9067_v63  ;;  %v5337_v42 = vpop.f32.mrf.mxu0 }
 0x412   :  { %5936 = vmatprep.mubr.bf16.mxu1 %v9069_v50  ;;  %v5498_v61 = vpop.f32.mrf.mxu1  ;;  %v5497_v36 = vadd.f32 %v5496_v31, %v5336_v20  ;;  %v5338_v46 = vadd.f32 %v5337_v42, %v9775_v11  ;;  %v968_v20 = vld [vmem:[#allocation5 + $0x378] sm:$0xff] }
 0x413   :  { %v5339_v53 = vpop.f32.mrf.mxu0  ;;  %v1216_v42 = vld [vmem:[#allocation5 + $0xb38] sm:$0xff] }
 0x414   :  { %v5500_v60 = vpop.f32.mrf.mxu1  ;;  %6597 = vst [vmem:[#allocation8 + $0x40] sm:$0xff] %v5497_v36  ;;  %v5499_v57 = vadd.f32 %v5498_v61, %v5338_v46  ;;  %v5340_v13 = vadd.f32 %v5339_v53, %v9770_v35  ;;  %v1224_v61 = vld [vmem:[#allocation5 + $0xb78] sm:$0xff]  ;;  %v7133_v53 = vcombine.low %v9723_v4, %v9725_v34 }
 0x415   :  { %v5341_v18 = vpop.f32.mrf.mxu0  ;;  %v1200_v4 = vld [vmem:[#allocation5 + $0xab8] sm:$0xff] }
 0x416   :  { %v5502_v32 = vpop.f32.mrf.mxu1  ;;  %6598 = vst [vmem:[#allocation8 + $0x48] sm:$0xff] %v5499_v57  ;;  %v5501_v29 = vadd.f32 %v5500_v60, %v5340_v13  ;;  %v5342_v28 = vadd.f32 %v5341_v18, %v9775_v11  ;;  %v7389_v13 = vcombine.low %v9729_v0, %v9731_v10  ;;  %v1208_v34 = vld [vmem:[#allocation5 + $0xaf8] sm:$0xff] }
 0x417   :  { %v5345_v8 = vpop.f32.mrf.mxu0  ;;  %v10700_v10 = vld [vmem:[#allocation57_spill] sm:$0xff] }
 0x418   :  { %v5506_v9 = vpop.f32.mrf.mxu1  ;;  %5776 = vmatmul.mubr.bf16.gmra.mxu0 %v9075_v16  ;;  %6613 = vst [vmem:[#allocation8 + $0xc0] sm:$0xff] %v5501_v29  ;;  %v5503_v45 = vadd.f32 %v5502_v32, %v5342_v28  ;;  %v5346_v55 = vadd.f32 %v5345_v8, %v9770_v35  ;;  %v7118_v29 = vcombine.high %v960_v27, %v968_v20  ;;  %v9797_v8 = vld [vmem:[#allocation5 + $0x2b8] sm:$0xff] }
 0x419   :  { %5937 = vmatmul.mubr.bf16.gmra.mxu1 %v10655_v43  ;;  %5977 = vmatprep.mubr.bf16.mxu0 %v10656_v3  ;;  %v5347_v12 = vpop.f32.mrf.mxu0  ;;  %v7374_v28 = vcombine.high %v1216_v42, %v1224_v61 }
 0x41a   :  { %6138 = vmatprep.mubr.bf16.mxu1 %v10676_v52  ;;  %v5508_v49 = vpop.f32.mrf.mxu1  ;;  %6614 = vst [vmem:[#allocation8 + $0xc8] sm:$0xff] %v5503_v45  ;;  %v5507_v59 = vadd.f32 %v5506_v9, %v5346_v55  ;;  %v5348_v47 = vadd.f32 %v5347_v12, %v9775_v11  ;;  %v952_v9 = vld [vmem:[#allocation5 + $0x2f8] sm:$0xff]  ;;  %v10698_v12 = vld [vmem:[#allocation47_spill] sm:$0xff] }
 0x41b   :  { %v5349_v2 = vpop.f32.mrf.mxu0  ;;  %v1160_v52 = vld [vmem:[#allocation5 + $0x978] sm:$0xff] }
 0x41c   :  { %v5510_v31 = vpop.f32.mrf.mxu1  ;;  %6629 = vst [vmem:[#allocation8 + $0x140] sm:$0xff] %v5507_v59  ;;  %v5509_v36 = vadd.f32 %v5508_v49, %v5348_v47  ;;  %v5350_v46 = vadd.f32 %v5349_v2, %v9770_v35  ;;  %v10699_v49 = vld [vmem:[#allocation54_spill] sm:$0xff]  ;;  %v7117_v47 = vcombine.low %v960_v27, %v968_v20  ;;  %v10701_v2 = vld [vmem:[#allocation59_spill] sm:$0xff]  ;;  %v1184_v27 = vld [vmem:[#allocation5 + $0xa38] sm:$0xff] }
 0x41d   :  { %v5351_v60 = vpop.f32.mrf.mxu0  ;;  %v1192_v20 = vld [vmem:[#allocation5 + $0xa78] sm:$0xff] }
 0x41e   :  { %v5512_v57 = vpop.f32.mrf.mxu1  ;;  %6630 = vst [vmem:[#allocation8 + $0x148] sm:$0xff] %v5509_v36  ;;  %v5511_v18 = vadd.f32 %v5510_v31, %v5350_v46  ;;  %v5352_v32 = vadd.f32 %v5351_v60, %v9775_v11  ;;  %v7373_v46 = vcombine.low %v1216_v42, %v1224_v61  ;;  %v7102_v60 = vcombine.high %v9797_v8, %v952_v9 }
 0x41f   :  { %v5355_v45 = vpop.f32.mrf.mxu0 }
 0x420   :  { %v5516_v55 = vpop.f32.mrf.mxu1  ;;  %5978 = vmatmul.mubr.bf16.vlgmr.msra.gmra.mxu0 %v10698_v12  ;;  %6645 = vst [vmem:[#allocation8 + $0x1c0] sm:$0xff] %v5511_v18  ;;  %v5513_v59 = vadd.f32 %v5512_v57, %v5352_v32  ;;  %v5356_v0 = vadd.f32 %v5355_v45, %v9770_v35  ;;  %v7358_v57 = vcombine.high %v1200_v4, %v1208_v34  ;;  %v928_v18 = vld [vmem:[#allocation5 + $0x238] sm:$0xff] }
 0x421   :  { %6139 = vmatmul.mubr.bf16.vlgmr.msra.gmra.mxu1 %v10699_v49  ;;  %6268 = vmatpush1.bf16.msra.mxu0 %v7133_v53  ;;  %v5357_v31 = vpop.f32.mrf.mxu0  ;;  %v936_v45 = vld [vmem:[#allocation5 + $0x278] sm:$0xff] }
 0x422   :  { %5987 = vmatprep.mubr.bf16.mxu0 %v10700_v10  ;;  %6148 = vmatprep.mubr.bf16.mxu1 %v10701_v2  ;;  %v5518_v36 = vpop.f32.mrf.mxu1  ;;  %6646 = vst [vmem:[#allocation8 + $0x1c8] sm:$0xff] %v5513_v59  ;;  %v5517_v49 = vadd.f32 %v5516_v55, %v5356_v0  ;;  %v5358_v12 = vadd.f32 %v5357_v31, %v9775_v11  ;;  %v9809_v10 = vld [vmem:[#allocation5 + $0x1b8] sm:$0xff] }
 0x423   :  { %6429 = vmatpush1.bf16.msra.mxu1 %v7389_v13  ;;  %6269 = vmatprep.subr.bf16.mxu0 %v7118_v29  ;;  %v5359_v53 = vpop.f32.mrf.mxu0  ;;  %v7101_v55 = vcombine.low %v9797_v8, %v952_v9  ;;  %v7357_v29 = vcombine.low %v1200_v4, %v1208_v34  ;;  %v7086_v0 = vcombine.high %v928_v18, %v936_v45  ;;  %v1176_v8 = vld [vmem:[#allocation5 + $0x9f8] sm:$0xff]  ;;  %v10704_v34 = vld [vmem:[#allocation60_spill] sm:$0xff] }
 0x424   :  { %6430 = vmatprep.subr.bf16.mxu1 %v7374_v28  ;;  %v5520_v32 = vpop.f32.mrf.mxu1  ;;  %6661 = vst [vmem:[#allocation8 + $0x240] sm:$0xff] %v5517_v49  ;;  %v5519_v2 = vadd.f32 %v5518_v36, %v5358_v12  ;;  %v5360_v13 = vadd.f32 %v5359_v53, %v9770_v35  ;;  %v7342_v31 = vcombine.high %v1184_v27, %v1192_v20  ;;  %v920_v12 = vld [vmem:[#allocation5 + $0x1f8] sm:$0xff]  ;;  %v10703_v53 = vld [vmem:[#allocation58_spill] sm:$0xff] }
 0x425   :  { %6270 = vmatpush1.bf16.msra.mxu0 %v7117_v47  ;;  %v5361_v42 = vpop.f32.mrf.mxu0  ;;  %v10702_v47 = vld [vmem:[#allocation55_spill] sm:$0xff] }
 0x426   :  { %v5522_v61 = vpop.f32.mrf.mxu1  ;;  %6271 = vmatprep.subr.bf16.mxu0 %v7102_v60  ;;  %6662 = vst [vmem:[#allocation8 + $0x248] sm:$0xff] %v5519_v2  ;;  %v5521_v28 = vadd.f32 %v5520_v32, %v5360_v13  ;;  %v5362_v59 = vadd.f32 %v5361_v42, %v9775_v11  ;;  %v10705_v2 = vld [vmem:[#allocation61_spill] sm:$0xff]  ;;  %v7085_v32 = vcombine.low %v928_v18, %v936_v45 }
 0x427   :  { %6431 = vmatpush1.bf16.msra.mxu1 %v7373_v46  ;;  %v5365_v49 = vpop.f32.mrf.mxu0  ;;  %v1168_v46 = vld [vmem:[#allocation5 + $0x9b8] sm:$0xff]  ;;  %v7341_v13 = vcombine.low %v1184_v27, %v1192_v20  ;;  %v7070_v42 = vcombine.high %v9809_v10, %v920_v12  ;;  %v7069_v20 = vcombine.low %v9809_v10, %v920_v12 }
 0x428   :  { %6432 = vmatprep.subr.bf16.mxu1 %v7358_v57  ;;  %v5526_v36 = vpop.f32.mrf.mxu1  ;;  %5988 = vmatmul.mubr.bf16.gmra.mxu0 %v10702_v47  ;;  %6677 = vst [vmem:[#allocation8 + $0x2c0] sm:$0xff] %v5521_v28  ;;  %v5523_v9 = vadd.f32 %v5522_v61, %v5362_v59  ;;  %v5366_v4 = vadd.f32 %v5365_v49, %v9770_v35  ;;  %v896_v28 = vld [vmem:[#allocation5 + $0x138] sm:$0xff] }
 0x429   :  { %6149 = vmatmul.mubr.bf16.gmra.mxu1 %v10703_v53  ;;  %5997 = vmatprep.mubr.bf16.mxu0 %v10704_v34  ;;  %v5367_v60 = vpop.f32.mrf.mxu0  ;;  %v7326_v61 = vcombine.high %v1168_v46, %v1176_v8  ;;  %v904_v59 = vld [vmem:[#allocation5 + $0x178] sm:$0xff] }
 0x42a   :  { %6158 = vmatprep.mubr.bf16.mxu1 %v10705_v2  ;;  %v5528_v57 = vpop.f32.mrf.mxu1  ;;  %6272 = vmatpush1.bf16.msra.mxu0 %v7101_v55  ;;  %6678 = vst [vmem:[#allocation8 + $0x2c8] sm:$0xff] %v5523_v9  ;;  %v5527_v53 = vadd.f32 %v5526_v36, %v5366_v4  ;;  %v5368_v47 = vadd.f32 %v5367_v60, %v9775_v11  ;;  %v1152_v2 = vld [vmem:[#allocation5 + $0x938] sm:$0xff] }
 0x42b   :  { %6433 = vmatpush1.bf16.msra.mxu1 %v7357_v29  ;;  %6273 = vmatprep.subr.bf16.mxu0 %v7086_v0  ;;  %v5369_v49 = vpop.f32.mrf.mxu0  ;;  %v7325_v29 = vcombine.low %v1168_v46, %v1176_v8  ;;  %v7054_v0 = vcombine.high %v896_v28, %v904_v59  ;;  %v7310_v9 = vcombine.high %v1152_v2, %v1160_v52  ;;  %v9821_v4 = vld [vmem:[#allocation5 + $0xb8] sm:$0xff]  ;;  %v10708_v8 = vld [vmem:[#allocation62_spill] sm:$0xff] }
 0x42c   :  { %6434 = vmatprep.subr.bf16.mxu1 %v7342_v31  ;;  %v5530_v34 = vpop.f32.mrf.mxu1  ;;  %6693 = vst [vmem:[#allocation8 + $0x340] sm:$0xff] %v5527_v53  ;;  %v5529_v55 = vadd.f32 %v5528_v57, %v5368_v47  ;;  %v5370_v18 = vadd.f32 %v5369_v49, %v9770_v35  ;;  %v888_v47 = vld [vmem:[#allocation5 + $0xf8] sm:$0xff]  ;;  %v10706_v57 = vld [vmem:[#allocation64_spill] sm:$0xff]  ;;  %v7053_v49 = vcombine.low %v896_v28, %v904_v59 }
 0x42d   :  { %v5371_v45 = vpop.f32.mrf.mxu0  ;;  %v1144_v10 = vld [vmem:[#allocation5 + $0x8f8] sm:$0xff]  ;;  %v7037_v59 = vcombine.low %v9821_v4, %v888_v47 }
 0x42e   :  { %v5532_v27 = vpop.f32.mrf.mxu1  ;;  %6274 = vmatpush1.bf16.msra.mxu0 %v7085_v32  ;;  %6694 = vst [vmem:[#allocation8 + $0x348] sm:$0xff] %v5529_v55  ;;  %v5531_v31 = vadd.f32 %v5530_v34, %v5370_v18  ;;  %v5372_v36 = vadd.f32 %v5371_v45, %v9775_v11  ;;  %v10707_v32 = vld [vmem:[#allocation66_spill] sm:$0xff]  ;;  %v10709_v34 = vld [vmem:[#allocation63_spill] sm:$0xff]  ;;  %v7309_v55 = vcombine.low %v1152_v2, %v1160_v52 }
 0x42f   :  { %6435 = vmatpush1.bf16.msra.mxu1 %v7341_v13  ;;  %6275 = vmatprep.subr.bf16.mxu0 %v7070_v42  ;;  %v5375_v53 = vpop.f32.mrf.mxu0  ;;  %v1136_v13 = vld [vmem:[#allocation5 + $0x8b8] sm:$0xff]  ;;  %v7038_v18 = vcombine.high %v9821_v4, %v888_v47 }
 0x430   :  { %6436 = vmatprep.subr.bf16.mxu1 %v7326_v61  ;;  %v5536_v60 = vpop.f32.mrf.mxu1  ;;  %5998 = vmatmul.mubr.bf16.gmra.mxu0 %v10706_v57  ;;  %6709 = vst [vmem:[#allocation8 + $0x3c0] sm:$0xff] %v5531_v31  ;;  %v5533_v12 = vadd.f32 %v5532_v27, %v5372_v36  ;;  %v5376_v46 = vadd.f32 %v5375_v53, %v9770_v35  ;;  %v864_v31 = vld [vmem:[#allocation5 + $0x38] sm:$0xff] }
 0x431   :  { %6159 = vmatmul.mubr.bf16.gmra.mxu1 %v10707_v32  ;;  %6007 = vmatprep.mubr.bf16.mxu0 %v10708_v8  ;;  %v5377_v42 = vpop.f32.mrf.mxu0  ;;  %v7294_v27 = vcombine.high %v1136_v13, %v1144_v10  ;;  %v872_v36 = vld [vmem:[#allocation5 + $0x78] sm:$0xff] }
 0x432   :  { %6168 = vmatprep.mubr.bf16.mxu1 %v10709_v34  ;;  %v5538_v61 = vpop.f32.mrf.mxu1  ;;  %6276 = vmatpush1.bf16.msra.mxu0 %v7069_v20  ;;  %6710 = vst [vmem:[#allocation8 + $0x3c8] sm:$0xff] %v5533_v12  ;;  %v5537_v45 = vadd.f32 %v5536_v60, %v5376_v46  ;;  %v5378_v32 = vadd.f32 %v5377_v42, %v9775_v11  ;;  %v1120_v34 = vld [vmem:[#allocation5 + $0x838] sm:$0xff] }
 0x433   :  { %6437 = vmatpush1.bf16.msra.mxu1 %v7325_v29  ;;  %6277 = vmatprep.subr.bf16.mxu0 %v7054_v0  ;;  %v5379_v53 = vpop.f32.mrf.mxu0  ;;  %v1128_v57 = vld [vmem:[#allocation5 + $0x878] sm:$0xff]  ;;  %v7293_v29 = vcombine.low %v1136_v13, %v1144_v10  ;;  %v7022_v0 = vcombine.high %v864_v31, %v872_v36 }
 0x434   :  { %6438 = vmatprep.subr.bf16.mxu1 %v7310_v9  ;;  %v5540_v8 = vpop.f32.mrf.mxu1  ;;  %6725 = vst [vmem:[#allocation8 + $0x440] sm:$0xff] %v5537_v45  ;;  %v5539_v20 = vadd.f32 %v5538_v61, %v5378_v32  ;;  %v5380_v28 = vadd.f32 %v5379_v53, %v9770_v35  ;;  %v7278_v12 = vcombine.high %v1120_v34, %v1128_v57  ;;  %v9833_v46 = vld [vmem:[#allocation5 + $0x7b8] sm:$0xff] }
 0x435   :  { %v5381_v52 = vpop.f32.mrf.mxu0  ;;  %v1112_v32 = vld [vmem:[#allocation5 + $0x7f8] sm:$0xff]  ;;  %v7021_v53 = vcombine.low %v864_v31, %v872_v36 }
 0x436   :  { %v5542_v2 = vpop.f32.mrf.mxu1  ;;  %6278 = vmatpush1.bf16.msra.mxu0 %v7053_v49  ;;  %6726 = vst [vmem:[#allocation8 + $0x448] sm:$0xff] %v5539_v20  ;;  %v5541_v9 = vadd.f32 %v5540_v8, %v5380_v28  ;;  %v5382_v60 = vadd.f32 %v5381_v52, %v9775_v11  ;;  %v10710_v45 = vld [vmem:[#allocation65_spill] sm:$0xff]  ;;  %v10711_v49 = vld [vmem:[#allocation67_spill] sm:$0xff]  ;;  %v7277_v20 = vcombine.low %v1120_v34, %v1128_v57 }
 0x437   :  { %6439 = vmatpush1.bf16.msra.mxu1 %v7309_v55  ;;  %6279 = vmatprep.subr.bf16.mxu0 %v7038_v18  ;;  %v5385_v42 = vpop.f32.mrf.mxu0  ;;  %v1360_v55 = vld [vmem:[#allocation5 + $0xfb8] sm:$0xff]  ;;  %v10713_v8 = vld [vmem:[#allocation71_spill] sm:$0xff]  ;;  %v7262_v28 = vcombine.high %v9833_v46, %v1112_v32  ;;  %v7261_v36 = vcombine.low %v9833_v46, %v1112_v32 }
 0x438   :  { %6440 = vmatprep.subr.bf16.mxu1 %v7294_v27  ;;  %v5546_v61 = vpop.f32.mrf.mxu1  ;;  %6008 = vmatmul.mubr.bf16.gmra.mxu0 %v10710_v45  ;;  %v1368_v4 = vld [vmem:[#allocation5 + $0xff8] sm:$0xff]  ;;  %6741 = vst [vmem:[#allocation8 + $0x4c0] sm:$0xff] %v5541_v9  ;;  %v5543_v47 = vadd.f32 %v5542_v2, %v5382_v60  ;;  %v5386_v13 = vadd.f32 %v5385_v42, %v9770_v35 }
 0x439   :  { %6169 = vmatmul.mubr.bf16.gmra.mxu1 %v10711_v49  ;;  %v10712_v10 = vld [vmem:[#allocation69_spill] sm:$0xff]  ;;  %v5387_v18 = vpop.f32.mrf.mxu0  ;;  %v7518_v2 = vcombine.high %v1360_v55, %v1368_v4 }
 0x43a   :  { %6017 = vmatprep.mubr.bf16.mxu0 %v10712_v10  ;;  %6178 = vmatprep.mubr.bf16.mxu1 %v10713_v8  ;;  %v5548_v27 = vpop.f32.mrf.mxu1  ;;  %6742 = vst [vmem:[#allocation8 + $0x4c8] sm:$0xff] %v5543_v47  ;;  %v5547_v52 = vadd.f32 %v5546_v61, %v5386_v13  ;;  %v5388_v49 = vadd.f32 %v5387_v18, %v9775_v11  ;;  %v1088_v9 = vld [vmem:[#allocation5 + $0x738] sm:$0xff] }
 0x43b   :  { %6280 = vmatpush1.bf16.msra.mxu0 %v7037_v59  ;;  %6441 = vmatpush1.bf16.msra.mxu1 %v7293_v29  ;;  %v1096_v60 = vld [vmem:[#allocation5 + $0x778] sm:$0xff]  ;;  %v5389_v42 = vpop.f32.mrf.mxu0  ;;  %v7517_v29 = vcombine.low %v1360_v55, %v1368_v4  ;;  %v10714_v4 = vld [vmem:[#allocation68_spill] sm:$0xff] }
 0x43c   :  { %6281 = vmatprep.subr.bf16.mxu0 %v7022_v0  ;;  %6442 = vmatprep.subr.bf16.mxu1 %v7278_v12  ;;  %v5550_v10 = vpop.f32.mrf.mxu1  ;;  %v1344_v8 = vld [vmem:[#allocation5 + $0xf38] sm:$0xff]  ;;  %6757 = vst [vmem:[#allocation8 + $0x540] sm:$0xff] %v5547_v52  ;;  %v5549_v59 = vadd.f32 %v5548_v27, %v5388_v49  ;;  %v5390_v31 = vadd.f32 %v5389_v42, %v9770_v35 }
 0x43d   :  { %v1352_v45 = vld [vmem:[#allocation5 + $0xf78] sm:$0xff]  ;;  %v5391_v57 = vpop.f32.mrf.mxu0  ;;  %v7246_v0 = vcombine.high %v1088_v9, %v1096_v60  ;;  %v7245_v52 = vcombine.low %v1088_v9, %v1096_v60 }
 0x43e   :  { %v5552_v34 = vpop.f32.mrf.mxu1  ;;  %6758 = vst [vmem:[#allocation8 + $0x548] sm:$0xff] %v5549_v59  ;;  %v5551_v12 = vadd.f32 %v5550_v10, %v5390_v31  ;;  %v5392_v61 = vadd.f32 %v5391_v57, %v9775_v11  ;;  %v7502_v47 = vcombine.high %v1344_v8, %v1352_v45  ;;  %v9845_v13 = vld [vmem:[#allocation5 + $0x6b8] sm:$0xff]  ;;  %v10715_v10 = vld [vmem:[#allocation70_spill] sm:$0xff] }
 0x43f   :  { %6282 = vmatpush1.bf16.msra.mxu0 %v7021_v53  ;;  %6443 = vmatpush1.bf16.msra.mxu1 %v7277_v20  ;;  %v1080_v49 = vld [vmem:[#allocation5 + $0x6f8] sm:$0xff]  ;;  %v5395_v18 = vpop.f32.mrf.mxu0 }
 0x440   :  { %6283 = vmatprep.subr.bf16.mxu0 %v7262_v28  ;;  %6444 = vmatprep.subr.bf16.mxu1 %v7518_v2  ;;  %v5556_v27 = vpop.f32.mrf.mxu1  ;;  %v1328_v53 = vld [vmem:[#allocation5 + $0xeb8] sm:$0xff]  ;;  %6773 = vst [vmem:[#allocation8 + $0x5c0] sm:$0xff] %v5551_v12  ;;  %v5553_v32 = vadd.f32 %v5552_v34, %v5392_v61  ;;  %v5396_v55 = vadd.f32 %v5395_v18, %v9770_v35 }
 0x441   :  { %6018 = vmatmul.mubr.bf16.gmra.mxu0 %v8871_v33  ;;  %6179 = vmatmul.mubr.bf16.gmra.mxu1 %v8873_v21  ;;  %v1336_v46 = vld [vmem:[#allocation5 + $0xef8] sm:$0xff]  ;;  %v5397_v20 = vpop.f32.mrf.mxu0  ;;  %v7501_v2 = vcombine.low %v1344_v8, %v1352_v45  ;;  %v7230_v42 = vcombine.high %v9845_v13, %v1080_v49  ;;  %v7229_v60 = vcombine.low %v9845_v13, %v1080_v49 }
 0x442   :  { %6027 = vmatprep.mubr.bf16.mxu0 %v10714_v4  ;;  %6188 = vmatprep.mubr.bf16.mxu1 %v10715_v10  ;;  %v5558_v28 = vpop.f32.mrf.mxu1  ;;  %6774 = vst [vmem:[#allocation8 + $0x5c8] sm:$0xff] %v5553_v32  ;;  %v5557_v59 = vadd.f32 %v5556_v27, %v5396_v55  ;;  %v5398_v31 = vadd.f32 %v5397_v20, %v9775_v11  ;;  %v1056_v34 = vld [vmem:[#allocation5 + $0x638] sm:$0xff] }
 0x443   :  { %6284 = vmatpush2.bf16.msra.mxu0 %v7261_v36  ;;  %6445 = vmatpush2.bf16.msra.mxu1 %v7517_v29  ;;  %v7486_v57 = vcombine.high %v1328_v53, %v1336_v46  ;;  %v1064_v12 = vld [vmem:[#allocation5 + $0x678] sm:$0xff]  ;;  %v5399_v61 = vpop.f32.mrf.mxu0  ;;  %v7485_v29 = vcombine.low %v1328_v53, %v1336_v46  ;;  %v10716_v46 = vld [vmem:[#allocation74_spill] sm:$0xff] }
 0x444   :  { %6285 = vmatprep.subr.bf16.mxu0 %v7246_v0  ;;  %6446 = vmatprep.subr.bf16.mxu1 %v7502_v47  ;;  %v5560_v18 = vpop.f32.mrf.mxu1  ;;  %v1312_v10 = vld [vmem:[#allocation5 + $0xe38] sm:$0xff]  ;;  %6789 = vst [vmem:[#allocation8 + $0x640] sm:$0xff] %v5557_v59  ;;  %v5559_v36 = vadd.f32 %v5558_v28, %v5398_v31  ;;  %v5400_v9 = vadd.f32 %v5399_v61, %v9770_v35 }
 0x445   :  { %v1320_v4 = vld [vmem:[#allocation5 + $0xe78] sm:$0xff]  ;;  %v5401_v45 = vpop.f32.mrf.mxu0  ;;  %v7214_v0 = vcombine.high %v1056_v34, %v1064_v12 }
 0x446   :  { %v5562_v8 = vpop.f32.mrf.mxu1  ;;  %6790 = vst [vmem:[#allocation8 + $0x648] sm:$0xff] %v5559_v36  ;;  %v5561_v47 = vadd.f32 %v5560_v18, %v5400_v9  ;;  %v5402_v27 = vadd.f32 %v5401_v45, %v9775_v11  ;;  %v7470_v32 = vcombine.high %v1312_v10, %v1320_v4  ;;  %v9857_v55 = vld [vmem:[#allocation5 + $0x5b8] sm:$0xff]  ;;  %v7469_v61 = vcombine.low %v1312_v10, %v1320_v4 }
 0x447   :  { %6286 = vmatpush2.bf16.msra.mxu0 %v7245_v52  ;;  %6447 = vmatpush2.bf16.msra.mxu1 %v7501_v2  ;;  %v1048_v20 = vld [vmem:[#allocation5 + $0x5f8] sm:$0xff]  ;;  %v5405_v28 = vpop.f32.mrf.mxu0  ;;  %v10717_v2 = vld [vmem:[#allocation72_spill] sm:$0xff] }
 0x448   :  { %6287 = vmatprep.subr.bf16.mxu0 %v7230_v42  ;;  %6448 = vmatprep.subr.bf16.mxu1 %v7486_v57  ;;  %v5566_v59 = vpop.f32.mrf.mxu1  ;;  %v1296_v52 = vld [vmem:[#allocation5 + $0xdb8] sm:$0xff]  ;;  %6805 = vst [vmem:[#allocation8 + $0x6c0] sm:$0xff] %v5561_v47  ;;  %v5563_v49 = vadd.f32 %v5562_v8, %v5402_v27  ;;  %v5406_v53 = vadd.f32 %v5405_v28, %v9770_v35 }
 0x449   :  { %6028 = vmatmul.mubr.bf16.gmra.mxu0 %v8909_v24  ;;  %6189 = vmatmul.mubr.bf16.gmra.mxu1 %v8911_v39  ;;  %v1304_v13 = vld [vmem:[#allocation5 + $0xdf8] sm:$0xff]  ;;  %v5407_v42 = vpop.f32.mrf.mxu0  ;;  %v7213_v57 = vcombine.low %v1056_v34, %v1064_v12  ;;  %v7198_v18 = vcombine.high %v9857_v55, %v1048_v20  ;;  %v7197_v12 = vcombine.low %v9857_v55, %v1048_v20 }
 0x44a   :  { %6037 = vmatprep.mubr.bf16.mxu0 %v10716_v46  ;;  %6198 = vmatprep.mubr.bf16.mxu1 %v10717_v2  ;;  %v5568_v31 = vpop.f32.mrf.mxu1  ;;  %6806 = vst [vmem:[#allocation8 + $0x6c8] sm:$0xff] %v5563_v49  ;;  %v5567_v36 = vadd.f32 %v5566_v59, %v5406_v53  ;;  %v5408_v9 = vadd.f32 %v5407_v42, %v9775_v11  ;;  %v1024_v8 = vld [vmem:[#allocation5 + $0x538] sm:$0xff] }
 0x44b   :  { %6288 = vmatpush2.bf16.msra.mxu0 %v7229_v60  ;;  %6449 = vmatpush2.bf16.msra.mxu1 %v7485_v29  ;;  %v7454_v45 = vcombine.high %v1296_v52, %v1304_v13  ;;  %v1032_v47 = vld [vmem:[#allocation5 + $0x578] sm:$0xff]  ;;  %v5409_v27 = vpop.f32.mrf.mxu0  ;;  %v7453_v29 = vcombine.low %v1296_v52, %v1304_v13 }
 0x44c   :  { %6289 = vmatprep.subr.bf16.mxu0 %v7214_v0  ;;  %6450 = vmatprep.subr.bf16.mxu1 %v7470_v32  ;;  %v5570_v28 = vpop.f32.mrf.mxu1  ;;  %v1280_v2 = vld [vmem:[#allocation5 + $0xd38] sm:$0xff]  ;;  %6821 = vst [vmem:[#allocation8 + $0x740] sm:$0xff] %v5567_v36  ;;  %v5569_v60 = vadd.f32 %v5568_v31, %v5408_v9  ;;  %v5410_v34 = vadd.f32 %v5409_v27, %v9770_v35 }
 0x44d   :  { %v1288_v46 = vld [vmem:[#allocation5 + $0xd78] sm:$0xff]  ;;  %v5411_v4 = vpop.f32.mrf.mxu0  ;;  %v7182_v0 = vcombine.high %v1024_v8, %v1032_v47 }
 0x44e   :  { %v5572_v10 = vpop.f32.mrf.mxu1  ;;  %6822 = vst [vmem:[#allocation8 + $0x748] sm:$0xff] %v5569_v60  ;;  %v5571_v32 = vadd.f32 %v5570_v28, %v5410_v34  ;;  %v5412_v59 = vadd.f32 %v5411_v4, %v9775_v11  ;;  %v7438_v49 = vcombine.high %v1280_v2, %v1288_v46  ;;  %v1008_v53 = vld [vmem:[#allocation5 + $0x4b8] sm:$0xff]  ;;  %v7437_v9 = vcombine.low %v1280_v2, %v1288_v46 }
 0x44f   :  { %6290 = vmatpush2.bf16.msra.mxu0 %v7213_v57  ;;  %6451 = vmatpush2.bf16.msra.mxu1 %v7469_v61  ;;  %v1016_v42 = vld [vmem:[#allocation5 + $0x4f8] sm:$0xff]  ;;  %v5415_v31 = vpop.f32.mrf.mxu0 }
 0x450   :  { %6291 = vmatprep.subr.bf16.mxu0 %v7198_v18  ;;  %6452 = vmatprep.subr.bf16.mxu1 %v7454_v45  ;;  %v5576_v36 = vpop.f32.mrf.mxu1  ;;  %v1264_v57 = vld [vmem:[#allocation5 + $0xcb8] sm:$0xff]  ;;  %6837 = vst [vmem:[#allocation8 + $0x7c0] sm:$0xff] %v5571_v32  ;;  %v5573_v55 = vadd.f32 %v5572_v10, %v5412_v59  ;;  %v5416_v20 = vadd.f32 %v5415_v31, %v9770_v35 }
 0x451   :  { %6038 = vmatmul.mubr.bf16.gmra.mxu0 %v8941_v6  ;;  %6199 = vmatmul.mubr.bf16.gmra.mxu1 %v8943_v58  ;;  %v1272_v61 = vld [vmem:[#allocation5 + $0xcf8] sm:$0xff]  ;;  %v5417_v52 = vpop.f32.mrf.mxu0  ;;  %v7181_v18 = vcombine.low %v1024_v8, %v1032_v47  ;;  %v7166_v45 = vcombine.high %v1008_v53, %v1016_v42  ;;  %v7165_v2 = vcombine.low %v1008_v53, %v1016_v42 }
 0x452   :  { %6047 = vmatprep.mubr.bf16.mxu0 %v8951_v56  ;;  %6208 = vmatprep.mubr.bf16.mxu1 %v8953_v41  ;;  %v5578_v13 = vpop.f32.mrf.mxu1  ;;  %6838 = vst [vmem:[#allocation8 + $0x7c8] sm:$0xff] %v5573_v55  ;;  %v5577_v27 = vadd.f32 %v5576_v36, %v5416_v20  ;;  %v5418_v28 = vadd.f32 %v5417_v52, %v9775_v11  ;;  %v992_v34 = vld [vmem:[#allocation5 + $0x438] sm:$0xff] }
 0x453   :  { %6292 = vmatpush2.bf16.msra.mxu0 %v7197_v12  ;;  %6453 = vmatpush2.bf16.msra.mxu1 %v7453_v29  ;;  %v7422_v60 = vcombine.high %v1264_v57, %v1272_v61  ;;  %v1000_v4 = vld [vmem:[#allocation5 + $0x478] sm:$0xff]  ;;  %v5419_v10 = vpop.f32.mrf.mxu0  ;;  %v7421_v47 = vcombine.low %v1264_v57, %v1272_v61 }
 0x454   :  { %6293 = vmatprep.subr.bf16.mxu0 %v7182_v0  ;;  %6454 = vmatprep.subr.bf16.mxu1 %v7438_v49  ;;  %v5580_v32 = vpop.f32.mrf.mxu1  ;;  %v1248_v59 = vld [vmem:[#allocation5 + $0xc38] sm:$0xff]  ;;  %6853 = vst [vmem:[#allocation8 + $0x840] sm:$0xff] %v5577_v27  ;;  %v5579_v41 = vadd.f32 %v5578_v13, %v5418_v28  ;;  %v5420_v12 = vadd.f32 %v5419_v10, %v9770_v35 }
 0x455   :  { %v1256_v31 = vld [vmem:[#allocation5 + $0xc78] sm:$0xff]  ;;  %v5421_v8 = vpop.f32.mrf.mxu0  ;;  %v7150_v29 = vcombine.high %v992_v34, %v1000_v4  ;;  %v7149_v42 = vcombine.low %v992_v34, %v1000_v4 }
 0x456   :  { %v5582_v46 = vpop.f32.mrf.mxu1  ;;  %6854 = vst [vmem:[#allocation8 + $0x848] sm:$0xff] %v5579_v41  ;;  %v5581_v0 = vadd.f32 %v5580_v32, %v5420_v12  ;;  %v5422_v49 = vadd.f32 %v5421_v8, %v9775_v11  ;;  %v7406_v36 = vcombine.high %v1248_v59, %v1256_v31  ;;  %v7405_v57 = vcombine.low %v1248_v59, %v1256_v31 }
 0x457   :  { %6294 = vmatpush2.bf16.msra.mxu0 %v7181_v18  ;;  %6455 = vmatpush2.bf16.msra.mxu1 %v7437_v9  ;;  %v5425_v55 = vpop.f32.mrf.mxu0 }
 0x458   :  { %6295 = vmatprep.subr.bf16.mxu0 %v7166_v45  ;;  %6456 = vmatprep.subr.bf16.mxu1 %v7422_v60  ;;  %v5586_v20 = vpop.f32.mrf.mxu1  ;;  %6869 = vst [vmem:[#allocation8 + $0x8c0] sm:$0xff] %v5581_v0  ;;  %v5583_v52 = vadd.f32 %v5582_v46, %v5422_v49  ;;  %v5426_v13 = vadd.f32 %v5425_v55, %v9770_v35 }
 0x459   :  { %6048 = vmatmul.mubr.bf16.gmra.mxu0 %v8975_v25  ;;  %6209 = vmatmul.mubr.bf16.gmra.mxu1 %v8977_v23  ;;  %v5427_v41 = vpop.f32.mrf.mxu0 }
 0x45a   :  { %6057 = vmatprep.mubr.bf16.mxu0 %v8981_v7  ;;  %6218 = vmatprep.mubr.bf16.mxu1 %v8983_v30  ;;  %v5588_v53 = vpop.f32.mrf.mxu1  ;;  %6870 = vst [vmem:[#allocation8 + $0x8c8] sm:$0xff] %v5583_v52  ;;  %v5587_v61 = vadd.f32 %v5586_v20, %v5426_v13  ;;  %v5428_v18 = vadd.f32 %v5427_v41, %v9775_v11 }
 0x45b   :  { %6296 = vmatpush2.bf16.msra.mxu0 %v7165_v2  ;;  %6457 = vmatpush2.bf16.msra.mxu1 %v7421_v47  ;;  %v5429_v9 = vpop.f32.mrf.mxu0 }
 0x45c   :  { %6297 = vmatprep.subr.bf16.mxu0 %v7150_v29  ;;  %6458 = vmatprep.subr.bf16.mxu1 %v7406_v36  ;;  %v5590_v45 = vpop.f32.mrf.mxu1  ;;  %6885 = vst [vmem:[#allocation8 + $0x940] sm:$0xff] %v5587_v61  ;;  %v5589_v27 = vadd.f32 %v5588_v53, %v5428_v18  ;;  %v5430_v28 = vadd.f32 %v5429_v9, %v9770_v35 }
 0x45d   :  { %v5431_v60 = vpop.f32.mrf.mxu0 }
 0x45e   :  { %v5592_v10 = vpop.f32.mrf.mxu1  ;;  %6886 = vst [vmem:[#allocation8 + $0x948] sm:$0xff] %v5589_v27  ;;  %v5591_v32 = vadd.f32 %v5590_v45, %v5430_v28  ;;  %v5432_v34 = vadd.f32 %v5431_v60, %v9775_v11 }
 0x45f   :  { %6298 = vmatpush2.bf16.msra.mxu0 %v7149_v42  ;;  %6459 = vmatpush2.bf16.msra.mxu1 %v7405_v57  ;;  %v5435_v4 = vpop.f32.mrf.mxu0 }
 0x460   :  { %v5596_v59 = vpop.f32.mrf.mxu1  ;;  %6901 = vst [vmem:[#allocation8 + $0x9c0] sm:$0xff] %v5591_v32  ;;  %v5593_v31 = vadd.f32 %v5592_v10, %v5432_v34  ;;  %v5436_v12 = vadd.f32 %v5435_v4, %v9770_v35 }
 0x461   :  { %6058 = vmatmul.mubr.bf16.gmra.mxu0 %v8999_v51  ;;  %6219 = vmatmul.mubr.bf16.gmra.mxu1 %v9001_v62  ;;  %v5437_v8 = vpop.f32.mrf.mxu0 }
 0x462   :  { %6067 = vmatprep.mubr.bf16.mxu0 %v9005_v54  ;;  %6228 = vmatprep.mubr.bf16.mxu1 %v9007_v44  ;;  %v5598_v46 = vpop.f32.mrf.mxu1  ;;  %6902 = vst [vmem:[#allocation8 + $0x9c8] sm:$0xff] %v5593_v31  ;;  %v5597_v2 = vadd.f32 %v5596_v59, %v5436_v12  ;;  %v5438_v47 = vadd.f32 %v5437_v8, %v9775_v11 }
 0x463   :  { %v5439_v29 = vpop.f32.mrf.mxu0 }
 0x464   :  { %v5600_v0 = vpop.f32.mrf.mxu1  ;;  %6917 = vst [vmem:[#allocation8 + $0xa40] sm:$0xff] %v5597_v2  ;;  %v5599_v49 = vadd.f32 %v5598_v46, %v5438_v47  ;;  %v5440_v36 = vadd.f32 %v5439_v29, %v9770_v35 }
 0x465   :  { %v5441_v55 = vpop.f32.mrf.mxu0 }
 0x466   :  { %v5602_v20 = vpop.f32.mrf.mxu1  ;;  %6918 = vst [vmem:[#allocation8 + $0xa48] sm:$0xff] %v5599_v49  ;;  %v5601_v52 = vadd.f32 %v5600_v0, %v5440_v36  ;;  %v5442_v13 = vadd.f32 %v5441_v55, %v9775_v11 }
 0x467   :  { %v5445_v41 = vpop.f32.mrf.mxu0 }
 0x468   :  { %v5606_v53 = vpop.f32.mrf.mxu1  ;;  %6933 = vst [vmem:[#allocation8 + $0xac0] sm:$0xff] %v5601_v52  ;;  %v5603_v42 = vadd.f32 %v5602_v20, %v5442_v13  ;;  %v5446_v57 = vadd.f32 %v5445_v41, %v9770_v35  ;;  %v10718_v20 = vsub.s32 2, %v10640_v26  ;;  %v10719_v41 = vsub.s32 3, %v10640_v26 }
 0x469   :  { %6068 = vmatmul.mubr.bf16.gmra.mxu0 %v9023_v14  ;;  %6229 = vmatmul.mubr.bf16.gmra.mxu1 %v9025_v19  ;;  %v5447_v61 = vpop.f32.mrf.mxu0 }
 0x46a   :  { %6077 = vmatprep.mubr.bf16.mxu0 %v9027_v17  ;;  %6238 = vmatprep.mubr.bf16.mxu1 %v9029_v5  ;;  %v5608_v18 = vpop.f32.mrf.mxu1  ;;  %6934 = vst [vmem:[#allocation8 + $0xac8] sm:$0xff] %v5603_v42  ;;  %v5607_v9 = vadd.f32 %v5606_v53, %v5446_v57  ;;  %v5448_v45 = vadd.f32 %v5447_v61, %v9775_v11 }
 0x46b   :  { %v5449_v27 = vpop.f32.mrf.mxu0  ;;  %v9910_v52 = vrot.slane %v9764_v48, %v10718_v20  ;;  %v9915_v53 = vrot.slane %v9764_v48, %v10719_v41 }
 0x46c   :  { %v5610_v28 = vpop.f32.mrf.mxu1  ;;  %6949 = vst [vmem:[#allocation8 + $0xb40] sm:$0xff] %v5607_v9  ;;  %v5609_v60 = vadd.f32 %v5608_v18, %v5448_v45  ;;  %v5450_v10 = vadd.f32 %v5449_v27, %v9770_v35 }
 0x46d   :  { %v5451_v32 = vpop.f32.mrf.mxu0 }
 0x46e   :  { %v5612_v34 = vpop.f32.mrf.mxu1  ;;  %6950 = vst [vmem:[#allocation8 + $0xb48] sm:$0xff] %v5609_v60  ;;  %v5611_v4 = vadd.f32 %v5610_v28, %v5450_v10  ;;  %v5452_v59 = vadd.f32 %v5451_v32, %v9775_v11 }
 0x46f   :  { %v5455_v31 = vpop.f32.mrf.mxu0 }
 0x470   :  { %v5616_v12 = vpop.f32.mrf.mxu1  ;;  %6965 = vst [vmem:[#allocation8 + $0xbc0] sm:$0xff] %v5611_v4  ;;  %v5613_v8 = vadd.f32 %v5612_v34, %v5452_v59  ;;  %v5456_v46 = vadd.f32 %v5455_v31, %v9770_v35 }
 0x471   :  { %6078 = vmatmul.mubr.bf16.gmra.mxu0 %v9039_v37  ;;  %6239 = vmatmul.mubr.bf16.gmra.mxu1 %v9041_v40  ;;  %v5457_v2 = vpop.f32.mrf.mxu0 }
 0x472   :  { %6087 = vmatprep.mubr.bf16.mxu0 %v9053_v22  ;;  %6248 = vmatprep.mubr.bf16.mxu1 %v9055_v1  ;;  %v5618_v47 = vpop.f32.mrf.mxu1  ;;  %6966 = vst [vmem:[#allocation8 + $0xbc8] sm:$0xff] %v5613_v8  ;;  %v5617_v29 = vadd.f32 %v5616_v12, %v5456_v46  ;;  %v5458_v0 = vadd.f32 %v5457_v2, %v9775_v11  ;;  %v10720_v46 = vld [vmem:[#allocation56_spill] sm:$0xff] }
 0x473   :  { %v5459_v49 = vpop.f32.mrf.mxu0 }
 0x474   :  { %v5620_v36 = vpop.f32.mrf.mxu1  ;;  %6981 = vst [vmem:[#allocation8 + $0xc40] sm:$0xff] %v5617_v29  ;;  %v5619_v55 = vadd.f32 %v5618_v47, %v5458_v0 }
 0x475   :  { %v5460_v35 = vpop.f32.mrf.mxu0 }
 0x476   :  { %v5621_v13 = vpop.f32.mrf.mxu1  ;;  %6982 = vst [vmem:[#allocation8 + $0xc48] sm:$0xff] %v5619_v55 }
 0x477   :  { %v5657_v42 = vpop.f32.mrf.mxu0 }
 0x478   :  { %v5818_v57 = vpop.f32.mrf.mxu1  ;;  %v5658_v11 = vadd.f32 %v5657_v42, %v9910_v52 }
 0x479   :  { %6088 = vmatmul.mubr.bf16.gmra.mxu0 %v9057_v38  ;;  %6249 = vmatmul.mubr.bf16.gmra.mxu1 %v9059_v15  ;;  %v5659_v61 = vpop.f32.mrf.mxu0 }
 0x47a   :  { %6097 = vmatprep.mubr.bf16.mxu0 %v9067_v63  ;;  %6258 = vmatprep.mubr.bf16.mxu1 %v9069_v50  ;;  %v5820_v18 = vpop.f32.mrf.mxu1  ;;  %v5819_v9 = vadd.f32 %v5818_v57, %v5658_v11  ;;  %v5660_v45 = vadd.f32 %v5659_v61, %v9915_v53  ;;  %v10721_v11 = vld [vmem:[#allocation47_spill] sm:$0xff]  ;;  %v10722_v61 = vld [vmem:[#allocation54_spill] sm:$0xff] }
 0x47b   :  { %v5661_v27 = vpop.f32.mrf.mxu0 }
 0x47c   :  { %v5822_v48 = vpop.f32.mrf.mxu1  ;;  %6599 = vst [vmem:[#allocation8 + $0x50] sm:$0xff] %v5819_v9  ;;  %v5821_v28 = vadd.f32 %v5820_v18, %v5660_v45  ;;  %v5662_v60 = vadd.f32 %v5661_v27, %v9910_v52  ;;  %v10723_v45 = vld [vmem:[#allocation57_spill] sm:$0xff]  ;;  %v10724_v27 = vld [vmem:[#allocation59_spill] sm:$0xff] }
 0x47d   :  { %v5663_v10 = vpop.f32.mrf.mxu0 }
 0x47e   :  { %v5824_v32 = vpop.f32.mrf.mxu1  ;;  %6600 = vst [vmem:[#allocation8 + $0x58] sm:$0xff] %v5821_v28  ;;  %v5823_v34 = vadd.f32 %v5822_v48, %v5662_v60  ;;  %v5664_v4 = vadd.f32 %v5663_v10, %v9915_v53 }
 0x47f   :  { %v5667_v59 = vpop.f32.mrf.mxu0 }
 0x480   :  { %v5828_v31 = vpop.f32.mrf.mxu1  ;;  %6615 = vst [vmem:[#allocation8 + $0xd0] sm:$0xff] %v5823_v34  ;;  %v5825_v12 = vadd.f32 %v5824_v32, %v5664_v4  ;;  %v5668_v8 = vadd.f32 %v5667_v59, %v9910_v52 }
 0x481   :  { %6098 = vmatmul.mubr.bf16.gmra.mxu0 %v9075_v16  ;;  %6259 = vmatmul.mubr.bf16.gmra.mxu1 %v10655_v43  ;;  %v5669_v2 = vpop.f32.mrf.mxu0 }
 0x482   :  { %6299 = vmatprep.mubr.bf16.mxu0 %v10656_v3  ;;  %6460 = vmatprep.mubr.bf16.mxu1 %v10720_v46  ;;  %v5830_v47 = vpop.f32.mrf.mxu1  ;;  %6616 = vst [vmem:[#allocation8 + $0xd8] sm:$0xff] %v5825_v12  ;;  %v5829_v29 = vadd.f32 %v5828_v31, %v5668_v8  ;;  %v5670_v0 = vadd.f32 %v5669_v2, %v9915_v53 }
 0x483   :  { %v5671_v49 = vpop.f32.mrf.mxu0 }
 0x484   :  { %v5832_v36 = vpop.f32.mrf.mxu1  ;;  %6631 = vst [vmem:[#allocation8 + $0x150] sm:$0xff] %v5829_v29  ;;  %v5831_v55 = vadd.f32 %v5830_v47, %v5670_v0  ;;  %v5672_v20 = vadd.f32 %v5671_v49, %v9910_v52  ;;  %v10725_v29 = vld [vmem:[#allocation55_spill] sm:$0xff]  ;;  %v10726_v0 = vld [vmem:[#allocation58_spill] sm:$0xff] }
 0x485   :  { %v5673_v35 = vpop.f32.mrf.mxu0 }
 0x486   :  { %v5834_v13 = vpop.f32.mrf.mxu1  ;;  %6632 = vst [vmem:[#allocation8 + $0x158] sm:$0xff] %v5831_v55  ;;  %v5833_v41 = vadd.f32 %v5832_v36, %v5672_v20  ;;  %v5674_v3 = vadd.f32 %v5673_v35, %v9915_v53  ;;  %v10727_v55 = vld [vmem:[#allocation60_spill] sm:$0xff]  ;;  %v10728_v20 = vld [vmem:[#allocation61_spill] sm:$0xff] }
 0x487   :  { %v5677_v42 = vpop.f32.mrf.mxu0 }
 0x488   :  { %v5838_v57 = vpop.f32.mrf.mxu1  ;;  %6647 = vst [vmem:[#allocation8 + $0x1d0] sm:$0xff] %v5833_v41  ;;  %v5835_v18 = vadd.f32 %v5834_v13, %v5674_v3  ;;  %v5678_v9 = vadd.f32 %v5677_v42, %v9910_v52 }
 0x489   :  { %6300 = vmatmul.mubr.bf16.vlgmr.msra.gmra.mxu0 %v10721_v11  ;;  %6461 = vmatmul.mubr.bf16.vlgmr.msra.gmra.mxu1 %v10722_v61  ;;  %v5679_v48 = vpop.f32.mrf.mxu0 }
 0x48a   :  { %6309 = vmatprep.mubr.bf16.mxu0 %v10723_v45  ;;  %6470 = vmatprep.mubr.bf16.mxu1 %v10724_v27  ;;  %v5840_v28 = vpop.f32.mrf.mxu1  ;;  %6648 = vst [vmem:[#allocation8 + $0x1d8] sm:$0xff] %v5835_v18  ;;  %v5839_v60 = vadd.f32 %v5838_v57, %v5678_v9  ;;  %v5680_v10 = vadd.f32 %v5679_v48, %v9915_v53 }
 0x48b   :  { %v5681_v32 = vpop.f32.mrf.mxu0 }
 0x48c   :  { %v5842_v34 = vpop.f32.mrf.mxu1  ;;  %6663 = vst [vmem:[#allocation8 + $0x250] sm:$0xff] %v5839_v60  ;;  %v5841_v4 = vadd.f32 %v5840_v28, %v5680_v10  ;;  %v5682_v59 = vadd.f32 %v5681_v32, %v9910_v52  ;;  %v10729_v60 = vld [vmem:[#allocation64_spill] sm:$0xff]  ;;  %v10730_v10 = vld [vmem:[#allocation66_spill] sm:$0xff] }
 0x48d   :  { %v5683_v31 = vpop.f32.mrf.mxu0 }
 0x48e   :  { %v5844_v12 = vpop.f32.mrf.mxu1  ;;  %6664 = vst [vmem:[#allocation8 + $0x258] sm:$0xff] %v5841_v4  ;;  %v5843_v8 = vadd.f32 %v5842_v34, %v5682_v59  ;;  %v5684_v46 = vadd.f32 %v5683_v31, %v9915_v53  ;;  %v10731_v4 = vld [vmem:[#allocation62_spill] sm:$0xff]  ;;  %v10732_v59 = vld [vmem:[#allocation63_spill] sm:$0xff] }
 0x48f   :  { %v5687_v2 = vpop.f32.mrf.mxu0 }
 0x490   :  { %v5848_v47 = vpop.f32.mrf.mxu1  ;;  %6679 = vst [vmem:[#allocation8 + $0x2d0] sm:$0xff] %v5843_v8  ;;  %v5845_v49 = vadd.f32 %v5844_v12, %v5684_v46  ;;  %v5688_v36 = vadd.f32 %v5687_v2, %v9910_v52 }
 0x491   :  { %6310 = vmatmul.mubr.bf16.gmra.mxu0 %v10725_v29  ;;  %6471 = vmatmul.mubr.bf16.gmra.mxu1 %v10726_v0  ;;  %v5689_v35 = vpop.f32.mrf.mxu0 }
 0x492   :  { %6319 = vmatprep.mubr.bf16.mxu0 %v10727_v55  ;;  %6480 = vmatprep.mubr.bf16.mxu1 %v10728_v20  ;;  %v5850_v13 = vpop.f32.mrf.mxu1  ;;  %6680 = vst [vmem:[#allocation8 + $0x2d8] sm:$0xff] %v5845_v49  ;;  %v5849_v41 = vadd.f32 %v5848_v47, %v5688_v36  ;;  %v5690_v3 = vadd.f32 %v5689_v35, %v9915_v53 }
 0x493   :  { %v5691_v42 = vpop.f32.mrf.mxu0 }
 0x494   :  { %v5852_v57 = vpop.f32.mrf.mxu1  ;;  %6695 = vst [vmem:[#allocation8 + $0x350] sm:$0xff] %v5849_v41  ;;  %v5851_v11 = vadd.f32 %v5850_v13, %v5690_v3  ;;  %v5692_v61 = vadd.f32 %v5691_v42, %v9910_v52  ;;  %v10733_v41 = vld [vmem:[#allocation65_spill] sm:$0xff]  ;;  %v10734_v3 = vld [vmem:[#allocation67_spill] sm:$0xff] }
 0x495   :  { %v5693_v18 = vpop.f32.mrf.mxu0 }
 0x496   :  { %v5854_v9 = vpop.f32.mrf.mxu1  ;;  %6696 = vst [vmem:[#allocation8 + $0x358] sm:$0xff] %v5851_v11  ;;  %v5853_v45 = vadd.f32 %v5852_v57, %v5692_v61  ;;  %v5694_v27 = vadd.f32 %v5693_v18, %v9915_v53  ;;  %v10735_v11 = vld [vmem:[#allocation69_spill] sm:$0xff]  ;;  %v10736_v61 = vld [vmem:[#allocation71_spill] sm:$0xff] }
 0x497   :  { %v5697_v48 = vpop.f32.mrf.mxu0 }
 0x498   :  { %v5858_v28 = vpop.f32.mrf.mxu1  ;;  %6711 = vst [vmem:[#allocation8 + $0x3d0] sm:$0xff] %v5853_v45  ;;  %v5855_v32 = vadd.f32 %v5854_v9, %v5694_v27  ;;  %v5698_v34 = vadd.f32 %v5697_v48, %v9910_v52 }
 0x499   :  { %6320 = vmatmul.mubr.bf16.gmra.mxu0 %v10729_v60  ;;  %6481 = vmatmul.mubr.bf16.gmra.mxu1 %v10730_v10  ;;  %v5699_v31 = vpop.f32.mrf.mxu0 }
 0x49a   :  { %6329 = vmatprep.mubr.bf16.mxu0 %v10731_v4  ;;  %6490 = vmatprep.mubr.bf16.mxu1 %v10732_v59  ;;  %v5860_v12 = vpop.f32.mrf.mxu1  ;;  %6712 = vst [vmem:[#allocation8 + $0x3d8] sm:$0xff] %v5855_v32  ;;  %v5859_v8 = vadd.f32 %v5858_v28, %v5698_v34  ;;  %v5700_v46 = vadd.f32 %v5699_v31, %v9915_v53 }
 0x49b   :  { %v5701_v2 = vpop.f32.mrf.mxu0 }
 0x49c   :  { %v5862_v47 = vpop.f32.mrf.mxu1  ;;  %6727 = vst [vmem:[#allocation8 + $0x450] sm:$0xff] %v5859_v8  ;;  %v5861_v29 = vadd.f32 %v5860_v12, %v5700_v46  ;;  %v5702_v0 = vadd.f32 %v5701_v2, %v9910_v52  ;;  %v10737_v2 = vld [vmem:[#allocation68_spill] sm:$0xff] }
 0x49d   :  { %v5703_v49 = vpop.f32.mrf.mxu0 }
 0x49e   :  { %v5864_v36 = vpop.f32.mrf.mxu1  ;;  %6728 = vst [vmem:[#allocation8 + $0x458] sm:$0xff] %v5861_v29  ;;  %v5863_v55 = vadd.f32 %v5862_v47, %v5702_v0  ;;  %v5704_v20 = vadd.f32 %v5703_v49, %v9915_v53  ;;  %v10738_v47 = vld [vmem:[#allocation70_spill] sm:$0xff] }
 0x4a0   :  { %v5707_v35 = vpop.f32.mrf.mxu0  ;;  %v5868_v13 = vpop.f32.mrf.mxu1  ;;  %6743 = vst [vmem:[#allocation8 + $0x4d0] sm:$0xff] %v5863_v55  ;;  %v5865_v42 = vadd.f32 %v5864_v36, %v5704_v20 }
 0x4a1   :  { %6330 = vmatmul.mubr.bf16.gmra.mxu0 %v10733_v41  ;;  %6491 = vmatmul.mubr.bf16.gmra.mxu1 %v10734_v3  ;;  %v5708_v57 = vadd.f32 %v5707_v35, %v9910_v52 }
 0x4a2   :  { %6339 = vmatprep.mubr.bf16.mxu0 %v10735_v11  ;;  %6500 = vmatprep.mubr.bf16.mxu1 %v10736_v61  ;;  %v5709_v18 = vpop.f32.mrf.mxu0  ;;  %v5870_v9 = vpop.f32.mrf.mxu1  ;;  %6744 = vst [vmem:[#allocation8 + $0x4d8] sm:$0xff] %v5865_v42 }
 0x4a3   :  { %v5869_v45 = vadd.f32 %v5868_v13, %v5708_v57  ;;  %v5710_v27 = vadd.f32 %v5709_v18, %v9915_v53  ;;  %v10739_v18 = vld [vmem:[#allocation74_spill] sm:$0xff] }
 0x4a4   :  { %v5711_v48 = vpop.f32.mrf.mxu0  ;;  %v5872_v28 = vpop.f32.mrf.mxu1 }
 0x4a5   :  { %6759 = vst [vmem:[#allocation8 + $0x550] sm:$0xff] %v5869_v45  ;;  %v5871_v60 = vadd.f32 %v5870_v9, %v5710_v27  ;;  %v5712_v10 = vadd.f32 %v5711_v48, %v9910_v52  ;;  %v10740_v9 = vld [vmem:[#allocation72_spill] sm:$0xff] }
 0x4a6   :  { %v5713_v32 = vpop.f32.mrf.mxu0  ;;  %v5874_v34 = vpop.f32.mrf.mxu1 }
 0x4a7   :  { %6760 = vst [vmem:[#allocation8 + $0x558] sm:$0xff] %v5871_v60  ;;  %v5873_v4 = vadd.f32 %v5872_v28, %v5712_v10  ;;  %v5714_v59 = vadd.f32 %v5713_v32, %v9915_v53 }
 0x4a8   :  { %v5717_v31 = vpop.f32.mrf.mxu0 }
 0x4a9   :  { %v5878_v12 = vpop.f32.mrf.mxu1  ;;  %6340 = vmatmul.mubr.bf16.gmra.mxu0 %v8871_v33  ;;  %6501 = vmatmul.mubr.bf16.gmra.mxu1 %v8873_v21  ;;  %6775 = vst [vmem:[#allocation8 + $0x5d0] sm:$0xff] %v5873_v4  ;;  %v5875_v8 = vadd.f32 %v5874_v34, %v5714_v59  ;;  %v5718_v46 = vadd.f32 %v5717_v31, %v9910_v52 }
 0x4aa   :  { %6349 = vmatprep.mubr.bf16.mxu0 %v10737_v2  ;;  %6510 = vmatprep.mubr.bf16.mxu1 %v10738_v47  ;;  %v5719_v29 = vpop.f32.mrf.mxu0  ;;  %v10741_v2 = vld [vmem:[#allocation73_spill] sm:$0xff] }
 0x4ab   :  { %v5880_v0 = vpop.f32.mrf.mxu1  ;;  %6776 = vst [vmem:[#allocation8 + $0x5d8] sm:$0xff] %v5875_v8  ;;  %v5879_v49 = vadd.f32 %v5878_v12, %v5718_v46  ;;  %v5720_v36 = vadd.f32 %v5719_v29, %v9915_v53 }
 0x4ac   :  { %v5721_v55 = vpop.f32.mrf.mxu0 }
 0x4ad   :  { %v5882_v20 = vpop.f32.mrf.mxu1  ;;  %6791 = vst [vmem:[#allocation8 + $0x650] sm:$0xff] %v5879_v49  ;;  %v5881_v33 = vadd.f32 %v5880_v0, %v5720_v36  ;;  %v5722_v21 = vadd.f32 %v5721_v55, %v9910_v52 }
 0x4ae   :  { %v5723_v35 = vpop.f32.mrf.mxu0 }
 0x4af   :  { %v5884_v13 = vpop.f32.mrf.mxu1  ;;  %6792 = vst [vmem:[#allocation8 + $0x658] sm:$0xff] %v5881_v33  ;;  %v5883_v41 = vadd.f32 %v5882_v20, %v5722_v21  ;;  %v5724_v3 = vadd.f32 %v5723_v35, %v9915_v53 }
 0x4b0   :  { %v5727_v42 = vpop.f32.mrf.mxu0 }
 0x4b1   :  { %v5888_v57 = vpop.f32.mrf.mxu1  ;;  %6350 = vmatmul.mubr.bf16.gmra.mxu0 %v8909_v24  ;;  %6511 = vmatmul.mubr.bf16.gmra.mxu1 %v8911_v39  ;;  %6807 = vst [vmem:[#allocation8 + $0x6d0] sm:$0xff] %v5883_v41  ;;  %v5885_v11 = vadd.f32 %v5884_v13, %v5724_v3  ;;  %v5728_v61 = vadd.f32 %v5727_v42, %v9910_v52 }
 0x4b2   :  { %6359 = vmatprep.mubr.bf16.mxu0 %v10739_v18  ;;  %6520 = vmatprep.mubr.bf16.mxu1 %v10740_v9  ;;  %v5729_v45 = vpop.f32.mrf.mxu0 }
 0x4b3   :  { %v5890_v27 = vpop.f32.mrf.mxu1  ;;  %6808 = vst [vmem:[#allocation8 + $0x6d8] sm:$0xff] %v5885_v11  ;;  %v5889_v48 = vadd.f32 %v5888_v57, %v5728_v61  ;;  %v5730_v28 = vadd.f32 %v5729_v45, %v9915_v53 }
 0x4b4   :  { %v5731_v60 = vpop.f32.mrf.mxu0 }
 0x4b5   :  { %v5892_v10 = vpop.f32.mrf.mxu1  ;;  %6823 = vst [vmem:[#allocation8 + $0x750] sm:$0xff] %v5889_v48  ;;  %v5891_v24 = vadd.f32 %v5890_v27, %v5730_v28  ;;  %v5732_v39 = vadd.f32 %v5731_v60, %v9910_v52 }
 0x4b6   :  { %v5733_v32 = vpop.f32.mrf.mxu0 }
 0x4b7   :  { %v5894_v34 = vpop.f32.mrf.mxu1  ;;  %6824 = vst [vmem:[#allocation8 + $0x758] sm:$0xff] %v5891_v24  ;;  %v5893_v4 = vadd.f32 %v5892_v10, %v5732_v39  ;;  %v5734_v59 = vadd.f32 %v5733_v32, %v9915_v53 }
 0x4b8   :  { %v5737_v31 = vpop.f32.mrf.mxu0 }
 0x4b9   :  { %v5898_v12 = vpop.f32.mrf.mxu1  ;;  %6360 = vmatmul.mubr.bf16.gmra.mxu0 %v8941_v6  ;;  %6521 = vmatmul.mubr.bf16.gmra.mxu1 %v8943_v58  ;;  %6839 = vst [vmem:[#allocation8 + $0x7d0] sm:$0xff] %v5893_v4  ;;  %v5895_v8 = vadd.f32 %v5894_v34, %v5734_v59  ;;  %v5738_v46 = vadd.f32 %v5737_v31, %v9910_v52 }
 0x4ba   :  { %6369 = vmatprep.mubr.bf16.mxu0 %v8951_v56  ;;  %6530 = vmatprep.mubr.bf16.mxu1 %v10741_v2  ;;  %v5739_v47 = vpop.f32.mrf.mxu0 }
 0x4bb   :  { %v5900_v29 = vpop.f32.mrf.mxu1  ;;  %6840 = vst [vmem:[#allocation8 + $0x7d8] sm:$0xff] %v5895_v8  ;;  %v5899_v0 = vadd.f32 %v5898_v12, %v5738_v46  ;;  %v5740_v49 = vadd.f32 %v5739_v47, %v9915_v53 }
 0x4bc   :  { %v5741_v36 = vpop.f32.mrf.mxu0 }
 0x4bd   :  { %v5902_v55 = vpop.f32.mrf.mxu1  ;;  %6855 = vst [vmem:[#allocation8 + $0x850] sm:$0xff] %v5899_v0  ;;  %v5901_v6 = vadd.f32 %v5900_v29, %v5740_v49  ;;  %v5742_v58 = vadd.f32 %v5741_v36, %v9910_v52 }
 0x4be   :  { %v5743_v20 = vpop.f32.mrf.mxu0 }
 0x4bf   :  { %v5904_v33 = vpop.f32.mrf.mxu1  ;;  %6856 = vst [vmem:[#allocation8 + $0x858] sm:$0xff] %v5901_v6  ;;  %v5903_v21 = vadd.f32 %v5902_v55, %v5742_v58  ;;  %v5744_v56 = vadd.f32 %v5743_v20, %v9915_v53 }
 0x4c0   :  { %v5747_v35 = vpop.f32.mrf.mxu0 }
 0x4c1   :  { %v5908_v13 = vpop.f32.mrf.mxu1  ;;  %6370 = vmatmul.mubr.bf16.gmra.mxu0 %v8975_v25  ;;  %6531 = vmatmul.mubr.bf16.gmra.mxu1 %v8977_v23  ;;  %6871 = vst [vmem:[#allocation8 + $0x8d0] sm:$0xff] %v5903_v21  ;;  %v5905_v41 = vadd.f32 %v5904_v33, %v5744_v56  ;;  %v5748_v3 = vadd.f32 %v5747_v35, %v9910_v52 }
 0x4c2   :  { %6379 = vmatprep.mubr.bf16.mxu0 %v8981_v7  ;;  %6540 = vmatprep.mubr.bf16.mxu1 %v8983_v30  ;;  %v5749_v42 = vpop.f32.mrf.mxu0 }
 0x4c3   :  { %v5910_v57 = vpop.f32.mrf.mxu1  ;;  %6872 = vst [vmem:[#allocation8 + $0x8d8] sm:$0xff] %v5905_v41  ;;  %v5909_v11 = vadd.f32 %v5908_v13, %v5748_v3  ;;  %v5750_v61 = vadd.f32 %v5749_v42, %v9915_v53 }
 0x4c4   :  { %v5751_v18 = vpop.f32.mrf.mxu0 }
 0x4c5   :  { %v5912_v9 = vpop.f32.mrf.mxu1  ;;  %6887 = vst [vmem:[#allocation8 + $0x950] sm:$0xff] %v5909_v11  ;;  %v5911_v25 = vadd.f32 %v5910_v57, %v5750_v61  ;;  %v5752_v23 = vadd.f32 %v5751_v18, %v9910_v52  ;;  %v10019_v61 = vld [vmem:[#allocation7 + $0x8] sm:$0xff] }
 0x4c6   :  { %v5753_v45 = vpop.f32.mrf.mxu0 }
 0x4c7   :  { %v5914_v27 = vpop.f32.mrf.mxu1  ;;  %6888 = vst [vmem:[#allocation8 + $0x958] sm:$0xff] %v5911_v25  ;;  %v5913_v48 = vadd.f32 %v5912_v9, %v5752_v23  ;;  %v5754_v7 = vadd.f32 %v5753_v45, %v9915_v53 }
 0x4c8   :  { %v5757_v28 = vpop.f32.mrf.mxu0 }
 0x4c9   :  { %v5918_v30 = vpop.f32.mrf.mxu1  ;;  %6380 = vmatmul.mubr.bf16.gmra.mxu0 %v8999_v51  ;;  %6541 = vmatmul.mubr.bf16.gmra.mxu1 %v9001_v62  ;;  %6903 = vst [vmem:[#allocation8 + $0x9d0] sm:$0xff] %v5913_v48  ;;  %v5915_v60 = vadd.f32 %v5914_v27, %v5754_v7  ;;  %v5758_v10 = vadd.f32 %v5757_v28, %v9910_v52 }
 0x4ca   :  { %6389 = vmatprep.mubr.bf16.mxu0 %v9005_v54  ;;  %6550 = vmatprep.mubr.bf16.mxu1 %v9007_v44  ;;  %v5759_v24 = vpop.f32.mrf.mxu0 }
 0x4cb   :  { %v5920_v39 = vpop.f32.mrf.mxu1  ;;  %6904 = vst [vmem:[#allocation8 + $0x9d8] sm:$0xff] %v5915_v60  ;;  %v5919_v32 = vadd.f32 %v5918_v30, %v5758_v10  ;;  %v5760_v34 = vadd.f32 %v5759_v24, %v9915_v53 }
 0x4cc   :  { %v5761_v4 = vpop.f32.mrf.mxu0 }
 0x4cd   :  { %v5922_v59 = vpop.f32.mrf.mxu1  ;;  %6919 = vst [vmem:[#allocation8 + $0xa50] sm:$0xff] %v5919_v32  ;;  %v5921_v51 = vadd.f32 %v5920_v39, %v5760_v34  ;;  %v5762_v62 = vadd.f32 %v5761_v4, %v9910_v52 }
 0x4ce   :  { %v5763_v31 = vpop.f32.mrf.mxu0 }
 0x4cf   :  { %v5924_v12 = vpop.f32.mrf.mxu1  ;;  %6920 = vst [vmem:[#allocation8 + $0xa58] sm:$0xff] %v5921_v51  ;;  %v5923_v8 = vadd.f32 %v5922_v59, %v5762_v62  ;;  %v5764_v54 = vadd.f32 %v5763_v31, %v9915_v53 }
 0x4d0   :  { %v5767_v46 = vpop.f32.mrf.mxu0 }
 0x4d1   :  { %v5928_v44 = vpop.f32.mrf.mxu1  ;;  %6390 = vmatmul.mubr.bf16.gmra.mxu0 %v9023_v14  ;;  %6551 = vmatmul.mubr.bf16.gmra.mxu1 %v9025_v19  ;;  %6935 = vst [vmem:[#allocation8 + $0xad0] sm:$0xff] %v5923_v8  ;;  %v5925_v2 = vadd.f32 %v5924_v12, %v5764_v54  ;;  %v5768_v47 = vadd.f32 %v5767_v46, %v9910_v52 }
 0x4d2   :  { %6399 = vmatprep.mubr.bf16.mxu0 %v9027_v17  ;;  %6560 = vmatprep.mubr.bf16.mxu1 %v9029_v5  ;;  %v5769_v29 = vpop.f32.mrf.mxu0 }
 0x4d3   :  { %v5930_v0 = vpop.f32.mrf.mxu1  ;;  %6936 = vst [vmem:[#allocation8 + $0xad8] sm:$0xff] %v5925_v2  ;;  %v5929_v49 = vadd.f32 %v5928_v44, %v5768_v47  ;;  %v5770_v36 = vadd.f32 %v5769_v29, %v9915_v53 }
 0x4d4   :  { %v5771_v55 = vpop.f32.mrf.mxu0 }
 0x4d5   :  { %v5932_v6 = vpop.f32.mrf.mxu1  ;;  %6951 = vst [vmem:[#allocation8 + $0xb50] sm:$0xff] %v5929_v49  ;;  %v5931_v14 = vadd.f32 %v5930_v0, %v5770_v36  ;;  %v5772_v19 = vadd.f32 %v5771_v55, %v9910_v52 }
 0x4d6   :  { %v5773_v58 = vpop.f32.mrf.mxu0 }
 0x4d7   :  { %v5934_v20 = vpop.f32.mrf.mxu1  ;;  %6952 = vst [vmem:[#allocation8 + $0xb58] sm:$0xff] %v5931_v14  ;;  %v5933_v33 = vadd.f32 %v5932_v6, %v5772_v19  ;;  %v5774_v17 = vadd.f32 %v5773_v58, %v9915_v53 }
 0x4d8   :  { %v5777_v21 = vpop.f32.mrf.mxu0 }
 0x4d9   :  { %v5938_v5 = vpop.f32.mrf.mxu1  ;;  %6400 = vmatmul.mubr.bf16.gmra.mxu0 %v9039_v37  ;;  %6561 = vmatmul.mubr.bf16.gmra.mxu1 %v9041_v40  ;;  %6967 = vst [vmem:[#allocation8 + $0xbd0] sm:$0xff] %v5933_v33  ;;  %v5935_v56 = vadd.f32 %v5934_v20, %v5774_v17  ;;  %v5778_v35 = vadd.f32 %v5777_v21, %v9910_v52  ;;  %v10742_v40 = vsub.s32 4, %v10640_v26 }
 0x4da   :  { %6409 = vmatprep.mubr.bf16.mxu0 %v9053_v22  ;;  %6570 = vmatprep.mubr.bf16.mxu1 %v9055_v1  ;;  %v5779_v13 = vpop.f32.mrf.mxu0  ;;  %v10743_v1 = vsub.s32 5, %v10640_v26 }
 0x4db   :  { %v5940_v41 = vpop.f32.mrf.mxu1  ;;  %6968 = vst [vmem:[#allocation8 + $0xbd8] sm:$0xff] %v5935_v56  ;;  %v5939_v3 = vadd.f32 %v5938_v5, %v5778_v35  ;;  %v5780_v42 = vadd.f32 %v5779_v13, %v9915_v53  ;;  %v10024_v52 = vrot.slane %v10019_v61, %v10742_v40 }
 0x4dc   :  { %v5781_v57 = vpop.f32.mrf.mxu0  ;;  %v10029_v9 = vrot.slane %v10019_v61, %v10743_v1 }
 0x4dd   :  { %v5942_v11 = vpop.f32.mrf.mxu1  ;;  %6983 = vst [vmem:[#allocation8 + $0xc50] sm:$0xff] %v5939_v3  ;;  %v5941_v37 = vadd.f32 %v5940_v41, %v5780_v42 }
 0x4de   :  { %v5782_v22 = vpop.f32.mrf.mxu0 }
 0x4df   :  { %v5943_v18 = vpop.f32.mrf.mxu1  ;;  %6984 = vst [vmem:[#allocation8 + $0xc58] sm:$0xff] %v5941_v37 }
 0x4e0   :  { %v5979_v53 = vpop.f32.mrf.mxu0 }
 0x4e1   :  { %v6140_v25 = vpop.f32.mrf.mxu1  ;;  %6410 = vmatmul.mubr.bf16.gmra.mxu0 %v9057_v38  ;;  %6571 = vmatmul.mubr.bf16.gmra.mxu1 %v9059_v15  ;;  %v5980_v23 = vadd.f32 %v5979_v53, %v10024_v52 }
 0x4e2   :  { %6419 = vmatprep.mubr.bf16.mxu0 %v9067_v63  ;;  %6580 = vmatprep.mubr.bf16.mxu1 %v9069_v50  ;;  %v5981_v45 = vpop.f32.mrf.mxu0 }
 0x4e3   :  { %v6142_v27 = vpop.f32.mrf.mxu1  ;;  %v6141_v48 = vadd.f32 %v6140_v25, %v5980_v23  ;;  %v5982_v7 = vadd.f32 %v5981_v45, %v10029_v9 }
 0x4e4   :  { %v5983_v28 = vpop.f32.mrf.mxu0 }
 0x4e5   :  { %v6144_v30 = vpop.f32.mrf.mxu1  ;;  %6601 = vst [vmem:[#allocation8 + $0x60] sm:$0xff] %v6141_v48  ;;  %v6143_v60 = vadd.f32 %v6142_v27, %v5982_v7  ;;  %v5984_v10 = vadd.f32 %v5983_v28, %v10024_v52 }
 0x4e6   :  { %v5985_v38 = vpop.f32.mrf.mxu0 }
 0x4e7   :  { %v6146_v24 = vpop.f32.mrf.mxu1  ;;  %6602 = vst [vmem:[#allocation8 + $0x68] sm:$0xff] %v6143_v60  ;;  %v6145_v15 = vadd.f32 %v6144_v30, %v5984_v10  ;;  %v5986_v39 = vadd.f32 %v5985_v38, %v10029_v9 }
 0x4e8   :  { %v5989_v63 = vpop.f32.mrf.mxu0 }
 0x4e9   :  { %v6150_v32 = vpop.f32.mrf.mxu1  ;;  %6420 = vmatmul.mubr.bf16.gmra.mxu0 %v9075_v16  ;;  %6581 = vmatmul.mubr.bf16.gmra.mxu1 %v10655_v43  ;;  %6617 = vst [vmem:[#allocation8 + $0xe0] sm:$0xff] %v6145_v15  ;;  %v6147_v50 = vadd.f32 %v6146_v24, %v5986_v39  ;;  %v5990_v34 = vadd.f32 %v5989_v63, %v10024_v52 }
 0x4ea   :  { %v5991_v4 = vpop.f32.mrf.mxu0 }
 0x4eb   :  { %v6152_v59 = vpop.f32.mrf.mxu1  ;;  %6618 = vst [vmem:[#allocation8 + $0xe8] sm:$0xff] %v6147_v50  ;;  %v6151_v51 = vadd.f32 %v6150_v32, %v5990_v34  ;;  %v5992_v62 = vadd.f32 %v5991_v4, %v10029_v9 }
 0x4ec   :  { %v5993_v31 = vpop.f32.mrf.mxu0 }
 0x4ed   :  { %v6154_v12 = vpop.f32.mrf.mxu1  ;;  %6633 = vst [vmem:[#allocation8 + $0x160] sm:$0xff] %v6151_v51  ;;  %v6153_v8 = vadd.f32 %v6152_v59, %v5992_v62  ;;  %v5994_v54 = vadd.f32 %v5993_v31, %v10024_v52 }
 0x4ee   :  { %v5995_v46 = vpop.f32.mrf.mxu0 }
 0x4ef   :  { %v6156_v16 = vpop.f32.mrf.mxu1  ;;  %6634 = vst [vmem:[#allocation8 + $0x168] sm:$0xff] %v6153_v8  ;;  %v6155_v43 = vadd.f32 %v6154_v12, %v5994_v54  ;;  %v5996_v44 = vadd.f32 %v5995_v46, %v10029_v9 }
 0x4f0   :  { %v5999_v2 = vpop.f32.mrf.mxu0 }
 0x4f1   :  { %v6160_v47 = vpop.f32.mrf.mxu1  ;;  %6649 = vst [vmem:[#allocation8 + $0x1e0] sm:$0xff] %v6155_v43  ;;  %v6157_v29 = vadd.f32 %v6156_v16, %v5996_v44  ;;  %v6000_v0 = vadd.f32 %v5999_v2, %v10024_v52 }
 0x4f2   :  { %v6001_v49 = vpop.f32.mrf.mxu0 }
 0x4f3   :  { %v6162_v36 = vpop.f32.mrf.mxu1  ;;  %6650 = vst [vmem:[#allocation8 + $0x1e8] sm:$0xff] %v6157_v29  ;;  %v6161_v55 = vadd.f32 %v6160_v47, %v6000_v0  ;;  %v6002_v6 = vadd.f32 %v6001_v49, %v10029_v9 }
 0x4f4   :  { %v6003_v14 = vpop.f32.mrf.mxu0 }
 0x4f5   :  { %v6164_v19 = vpop.f32.mrf.mxu1  ;;  %6665 = vst [vmem:[#allocation8 + $0x260] sm:$0xff] %v6161_v55  ;;  %v6163_v58 = vadd.f32 %v6162_v36, %v6002_v6  ;;  %v6004_v20 = vadd.f32 %v6003_v14, %v10024_v52 }
 0x4f6   :  { %v6005_v33 = vpop.f32.mrf.mxu0 }
 0x4f7   :  { %v6166_v17 = vpop.f32.mrf.mxu1  ;;  %6666 = vst [vmem:[#allocation8 + $0x268] sm:$0xff] %v6163_v58  ;;  %v6165_v21 = vadd.f32 %v6164_v19, %v6004_v20  ;;  %v6006_v5 = vadd.f32 %v6005_v33, %v10029_v9 }
 0x4f8   :  { %v6009_v56 = vpop.f32.mrf.mxu0 }
 0x4f9   :  { %v6170_v35 = vpop.f32.mrf.mxu1  ;;  %6681 = vst [vmem:[#allocation8 + $0x2e0] sm:$0xff] %v6165_v21  ;;  %v6167_v13 = vadd.f32 %v6166_v17, %v6006_v5  ;;  %v6010_v41 = vadd.f32 %v6009_v56, %v10024_v52 }
 0x4fa   :  { %v6011_v3 = vpop.f32.mrf.mxu0 }
 0x4fb   :  { %v6172_v42 = vpop.f32.mrf.mxu1  ;;  %6682 = vst [vmem:[#allocation8 + $0x2e8] sm:$0xff] %v6167_v13  ;;  %v6171_v57 = vadd.f32 %v6170_v35, %v6010_v41  ;;  %v6012_v11 = vadd.f32 %v6011_v3, %v10029_v9 }
 0x4fc   :  { %v6013_v37 = vpop.f32.mrf.mxu0 }
 0x4fd   :  { %v6174_v40 = vpop.f32.mrf.mxu1  ;;  %6697 = vst [vmem:[#allocation8 + $0x360] sm:$0xff] %v6171_v57  ;;  %v6173_v22 = vadd.f32 %v6172_v42, %v6012_v11  ;;  %v6014_v18 = vadd.f32 %v6013_v37, %v10024_v52 }
 0x4fe   :  { %v6015_v1 = vpop.f32.mrf.mxu0 }
 0x4ff   :  { %v6176_v53 = vpop.f32.mrf.mxu1  ;;  %6698 = vst [vmem:[#allocation8 + $0x368] sm:$0xff] %v6173_v22  ;;  %v6175_v25 = vadd.f32 %v6174_v40, %v6014_v18  ;;  %v6016_v23 = vadd.f32 %v6015_v1, %v10029_v9 }
 0x501   :  { %v6019_v45 = vpop.f32.mrf.mxu0  ;;  %v6180_v27 = vpop.f32.mrf.mxu1  ;;  %6713 = vst [vmem:[#allocation8 + $0x3e0] sm:$0xff] %v6175_v25  ;;  %v6177_v48 = vadd.f32 %v6176_v53, %v6016_v23 }
 0x502   :  { %v6020_v7 = vadd.f32 %v6019_v45, %v10024_v52 }
 0x503   :  { %v6021_v28 = vpop.f32.mrf.mxu0  ;;  %v6182_v30 = vpop.f32.mrf.mxu1  ;;  %6714 = vst [vmem:[#allocation8 + $0x3e8] sm:$0xff] %v6177_v48 }
 0x504   :  { %v6181_v60 = vadd.f32 %v6180_v27, %v6020_v7  ;;  %v6022_v10 = vadd.f32 %v6021_v28, %v10029_v9 }
 0x505   :  { %v6023_v38 = vpop.f32.mrf.mxu0  ;;  %v6184_v24 = vpop.f32.mrf.mxu1 }
 0x506   :  { %6729 = vst [vmem:[#allocation8 + $0x460] sm:$0xff] %v6181_v60  ;;  %v6183_v15 = vadd.f32 %v6182_v30, %v6022_v10  ;;  %v6024_v39 = vadd.f32 %v6023_v38, %v10024_v52 }
 0x507   :  { %v6025_v63 = vpop.f32.mrf.mxu0  ;;  %v6186_v32 = vpop.f32.mrf.mxu1 }
 0x508   :  { %6730 = vst [vmem:[#allocation8 + $0x468] sm:$0xff] %v6183_v15  ;;  %v6185_v50 = vadd.f32 %v6184_v24, %v6024_v39  ;;  %v6026_v34 = vadd.f32 %v6025_v63, %v10029_v9 }
 0x509   :  { %v6029_v4 = vpop.f32.mrf.mxu0  ;;  %v6190_v59 = vpop.f32.mrf.mxu1 }
 0x50a   :  { %6745 = vst [vmem:[#allocation8 + $0x4e0] sm:$0xff] %v6185_v50  ;;  %v6187_v51 = vadd.f32 %v6186_v32, %v6026_v34  ;;  %v6030_v62 = vadd.f32 %v6029_v4, %v10024_v52 }
 0x50b   :  { %v6031_v31 = vpop.f32.mrf.mxu0  ;;  %v6192_v12 = vpop.f32.mrf.mxu1 }
 0x50c   :  { %6746 = vst [vmem:[#allocation8 + $0x4e8] sm:$0xff] %v6187_v51  ;;  %v6191_v8 = vadd.f32 %v6190_v59, %v6030_v62  ;;  %v6032_v54 = vadd.f32 %v6031_v31, %v10029_v9 }
 0x50d   :  { %v6033_v46 = vpop.f32.mrf.mxu0  ;;  %v6194_v16 = vpop.f32.mrf.mxu1 }
 0x50e   :  { %6761 = vst [vmem:[#allocation8 + $0x560] sm:$0xff] %v6191_v8  ;;  %v6193_v43 = vadd.f32 %v6192_v12, %v6032_v54  ;;  %v6034_v44 = vadd.f32 %v6033_v46, %v10024_v52 }
 0x50f   :  { %v6035_v2 = vpop.f32.mrf.mxu0  ;;  %v6196_v47 = vpop.f32.mrf.mxu1 }
 0x510   :  { %6762 = vst [vmem:[#allocation8 + $0x568] sm:$0xff] %v6193_v43  ;;  %v6195_v29 = vadd.f32 %v6194_v16, %v6034_v44  ;;  %v6036_v0 = vadd.f32 %v6035_v2, %v10029_v9 }
 0x511   :  { %v6039_v49 = vpop.f32.mrf.mxu0  ;;  %v6200_v36 = vpop.f32.mrf.mxu1 }
 0x512   :  { %6777 = vst [vmem:[#allocation8 + $0x5e0] sm:$0xff] %v6195_v29  ;;  %v6197_v55 = vadd.f32 %v6196_v47, %v6036_v0  ;;  %v6040_v6 = vadd.f32 %v6039_v49, %v10024_v52 }
 0x513   :  { %v6041_v14 = vpop.f32.mrf.mxu0  ;;  %v6202_v19 = vpop.f32.mrf.mxu1 }
 0x514   :  { %6778 = vst [vmem:[#allocation8 + $0x5e8] sm:$0xff] %v6197_v55  ;;  %v6201_v58 = vadd.f32 %v6200_v36, %v6040_v6  ;;  %v6042_v20 = vadd.f32 %v6041_v14, %v10029_v9 }
 0x515   :  { %v6043_v33 = vpop.f32.mrf.mxu0  ;;  %v6204_v17 = vpop.f32.mrf.mxu1 }
 0x516   :  { %6793 = vst [vmem:[#allocation8 + $0x660] sm:$0xff] %v6201_v58  ;;  %v6203_v21 = vadd.f32 %v6202_v19, %v6042_v20  ;;  %v6044_v5 = vadd.f32 %v6043_v33, %v10024_v52 }
 0x517   :  { %v6045_v56 = vpop.f32.mrf.mxu0  ;;  %v6206_v35 = vpop.f32.mrf.mxu1 }
 0x518   :  { %6794 = vst [vmem:[#allocation8 + $0x668] sm:$0xff] %v6203_v21  ;;  %v6205_v13 = vadd.f32 %v6204_v17, %v6044_v5  ;;  %v6046_v41 = vadd.f32 %v6045_v56, %v10029_v9 }
 0x519   :  { %v6049_v3 = vpop.f32.mrf.mxu0  ;;  %v6210_v42 = vpop.f32.mrf.mxu1 }
 0x51a   :  { %6809 = vst [vmem:[#allocation8 + $0x6e0] sm:$0xff] %v6205_v13  ;;  %v6207_v57 = vadd.f32 %v6206_v35, %v6046_v41  ;;  %v6050_v11 = vadd.f32 %v6049_v3, %v10024_v52 }
 0x51b   :  { %v6051_v37 = vpop.f32.mrf.mxu0  ;;  %v6212_v40 = vpop.f32.mrf.mxu1 }
 0x51c   :  { %6810 = vst [vmem:[#allocation8 + $0x6e8] sm:$0xff] %v6207_v57  ;;  %v6211_v22 = vadd.f32 %v6210_v42, %v6050_v11  ;;  %v6052_v18 = vadd.f32 %v6051_v37, %v10029_v9 }
 0x51d   :  { %v6053_v1 = vpop.f32.mrf.mxu0  ;;  %v6214_v53 = vpop.f32.mrf.mxu1 }
 0x51e   :  { %6825 = vst [vmem:[#allocation8 + $0x760] sm:$0xff] %v6211_v22  ;;  %v6213_v25 = vadd.f32 %v6212_v40, %v6052_v18  ;;  %v6054_v23 = vadd.f32 %v6053_v1, %v10024_v52 }
 0x51f   :  { %v6055_v45 = vpop.f32.mrf.mxu0  ;;  %v6216_v27 = vpop.f32.mrf.mxu1 }
 0x520   :  { %6826 = vst [vmem:[#allocation8 + $0x768] sm:$0xff] %v6213_v25  ;;  %v6215_v48 = vadd.f32 %v6214_v53, %v6054_v23  ;;  %v6056_v7 = vadd.f32 %v6055_v45, %v10029_v9 }
 0x521   :  { %v6059_v28 = vpop.f32.mrf.mxu0  ;;  %v6220_v30 = vpop.f32.mrf.mxu1 }
 0x522   :  { %6841 = vst [vmem:[#allocation8 + $0x7e0] sm:$0xff] %v6215_v48  ;;  %v6217_v60 = vadd.f32 %v6216_v27, %v6056_v7  ;;  %v6060_v10 = vadd.f32 %v6059_v28, %v10024_v52 }
 0x523   :  { %v6061_v38 = vpop.f32.mrf.mxu0  ;;  %v6222_v24 = vpop.f32.mrf.mxu1 }
 0x524   :  { %6842 = vst [vmem:[#allocation8 + $0x7e8] sm:$0xff] %v6217_v60  ;;  %v6221_v15 = vadd.f32 %v6220_v30, %v6060_v10  ;;  %v6062_v39 = vadd.f32 %v6061_v38, %v10029_v9 }
 0x525   :  { %v6063_v63 = vpop.f32.mrf.mxu0  ;;  %v6224_v32 = vpop.f32.mrf.mxu1 }
 0x526   :  { %6857 = vst [vmem:[#allocation8 + $0x860] sm:$0xff] %v6221_v15  ;;  %v6223_v50 = vadd.f32 %v6222_v24, %v6062_v39  ;;  %v6064_v34 = vadd.f32 %v6063_v63, %v10024_v52 }
 0x527   :  { %v6065_v4 = vpop.f32.mrf.mxu0  ;;  %v6226_v59 = vpop.f32.mrf.mxu1 }
 0x528   :  { %6858 = vst [vmem:[#allocation8 + $0x868] sm:$0xff] %v6223_v50  ;;  %v6225_v51 = vadd.f32 %v6224_v32, %v6064_v34  ;;  %v6066_v62 = vadd.f32 %v6065_v4, %v10029_v9 }
 0x529   :  { %v6069_v31 = vpop.f32.mrf.mxu0  ;;  %v6230_v12 = vpop.f32.mrf.mxu1 }
 0x52a   :  { %6873 = vst [vmem:[#allocation8 + $0x8e0] sm:$0xff] %v6225_v51  ;;  %v6227_v8 = vadd.f32 %v6226_v59, %v6066_v62  ;;  %v6070_v54 = vadd.f32 %v6069_v31, %v10024_v52  ;;  %v10744_v62 = vsub.s32 6, %v10640_v26 }
 0x52b   :  { %v6071_v46 = vpop.f32.mrf.mxu0  ;;  %v6232_v16 = vpop.f32.mrf.mxu1 }
 0x52c   :  { %6874 = vst [vmem:[#allocation8 + $0x8e8] sm:$0xff] %v6227_v8  ;;  %v6231_v43 = vadd.f32 %v6230_v12, %v6070_v54  ;;  %v6072_v44 = vadd.f32 %v6071_v46, %v10029_v9  ;;  %v10090_v31 = vrot.slane %v10019_v61, %v10744_v62 }
 0x52d   :  { %v6073_v2 = vpop.f32.mrf.mxu0  ;;  %v6234_v47 = vpop.f32.mrf.mxu1 }
 0x52e   :  { %6889 = vst [vmem:[#allocation8 + $0x960] sm:$0xff] %v6231_v43  ;;  %v6233_v29 = vadd.f32 %v6232_v16, %v6072_v44  ;;  %v6074_v0 = vadd.f32 %v6073_v2, %v10024_v52 }
 0x52f   :  { %v6075_v49 = vpop.f32.mrf.mxu0  ;;  %v6236_v36 = vpop.f32.mrf.mxu1 }
 0x530   :  { %6890 = vst [vmem:[#allocation8 + $0x968] sm:$0xff] %v6233_v29  ;;  %v6235_v55 = vadd.f32 %v6234_v47, %v6074_v0  ;;  %v6076_v6 = vadd.f32 %v6075_v49, %v10029_v9 }
 0x531   :  { %v6079_v14 = vpop.f32.mrf.mxu0  ;;  %v6240_v19 = vpop.f32.mrf.mxu1 }
 0x532   :  { %6905 = vst [vmem:[#allocation8 + $0x9e0] sm:$0xff] %v6235_v55  ;;  %v6237_v58 = vadd.f32 %v6236_v36, %v6076_v6  ;;  %v6080_v20 = vadd.f32 %v6079_v14, %v10024_v52 }
 0x533   :  { %v6081_v33 = vpop.f32.mrf.mxu0  ;;  %v6242_v17 = vpop.f32.mrf.mxu1 }
 0x534   :  { %6906 = vst [vmem:[#allocation8 + $0x9e8] sm:$0xff] %v6237_v58  ;;  %v6241_v21 = vadd.f32 %v6240_v19, %v6080_v20  ;;  %v6082_v5 = vadd.f32 %v6081_v33, %v10029_v9 }
 0x535   :  { %v6083_v56 = vpop.f32.mrf.mxu0  ;;  %v6244_v35 = vpop.f32.mrf.mxu1 }
 0x536   :  { %6921 = vst [vmem:[#allocation8 + $0xa60] sm:$0xff] %v6241_v21  ;;  %v6243_v13 = vadd.f32 %v6242_v17, %v6082_v5  ;;  %v6084_v41 = vadd.f32 %v6083_v56, %v10024_v52 }
 0x537   :  { %v6085_v3 = vpop.f32.mrf.mxu0  ;;  %v6246_v42 = vpop.f32.mrf.mxu1 }
 0x538   :  { %6922 = vst [vmem:[#allocation8 + $0xa68] sm:$0xff] %v6243_v13  ;;  %v6245_v57 = vadd.f32 %v6244_v35, %v6084_v41  ;;  %v6086_v11 = vadd.f32 %v6085_v3, %v10029_v9 }
 0x539   :  { %v6089_v37 = vpop.f32.mrf.mxu0  ;;  %v6250_v40 = vpop.f32.mrf.mxu1 }
 0x53a   :  { %6937 = vst [vmem:[#allocation8 + $0xae0] sm:$0xff] %v6245_v57  ;;  %v6247_v22 = vadd.f32 %v6246_v42, %v6086_v11  ;;  %v6090_v18 = vadd.f32 %v6089_v37, %v10024_v52 }
 0x53b   :  { %v6091_v1 = vpop.f32.mrf.mxu0  ;;  %v6252_v53 = vpop.f32.mrf.mxu1 }
 0x53c   :  { %6938 = vst [vmem:[#allocation8 + $0xae8] sm:$0xff] %v6247_v22  ;;  %v6251_v25 = vadd.f32 %v6250_v40, %v6090_v18  ;;  %v6092_v23 = vadd.f32 %v6091_v1, %v10029_v9 }
 0x53d   :  { %v6093_v45 = vpop.f32.mrf.mxu0  ;;  %v6254_v27 = vpop.f32.mrf.mxu1 }
 0x53e   :  { %6953 = vst [vmem:[#allocation8 + $0xb60] sm:$0xff] %v6251_v25  ;;  %v6253_v48 = vadd.f32 %v6252_v53, %v6092_v23  ;;  %v6094_v7 = vadd.f32 %v6093_v45, %v10024_v52 }
 0x53f   :  { %v6095_v28 = vpop.f32.mrf.mxu0  ;;  %v6256_v30 = vpop.f32.mrf.mxu1 }
 0x540   :  { %6954 = vst [vmem:[#allocation8 + $0xb68] sm:$0xff] %v6253_v48  ;;  %v6255_v60 = vadd.f32 %v6254_v27, %v6094_v7  ;;  %v6096_v10 = vadd.f32 %v6095_v28, %v10029_v9 }
 0x541   :  { %v6099_v38 = vpop.f32.mrf.mxu0  ;;  %v6260_v24 = vpop.f32.mrf.mxu1 }
 0x542   :  { %6969 = vst [vmem:[#allocation8 + $0xbe0] sm:$0xff] %v6255_v60  ;;  %v6257_v15 = vadd.f32 %v6256_v30, %v6096_v10  ;;  %v6100_v39 = vadd.f32 %v6099_v38, %v10024_v52  ;;  %v10745_v52 = vsub.s32 7, %v10640_v26 }
 0x543   :  { %v6101_v63 = vpop.f32.mrf.mxu0  ;;  %v6262_v32 = vpop.f32.mrf.mxu1 }
 0x544   :  { %6970 = vst [vmem:[#allocation8 + $0xbe8] sm:$0xff] %v6257_v15  ;;  %v6261_v50 = vadd.f32 %v6260_v24, %v6100_v39  ;;  %v6102_v34 = vadd.f32 %v6101_v63, %v10029_v9  ;;  %v10095_v54 = vrot.slane %v10019_v61, %v10745_v52 }
 0x545   :  { %v6103_v4 = vpop.f32.mrf.mxu0  ;;  %v6264_v59 = vpop.f32.mrf.mxu1 }
 0x546   :  { %6985 = vst [vmem:[#allocation8 + $0xc60] sm:$0xff] %v6261_v50  ;;  %v6263_v51 = vadd.f32 %v6262_v32, %v6102_v34 }
 0x547   :  { %v6104_v12 = vpop.f32.mrf.mxu0  ;;  %v6265_v8 = vpop.f32.mrf.mxu1 }
 0x548   :  { %6986 = vst [vmem:[#allocation8 + $0xc68] sm:$0xff] %v6263_v51 }
 0x549   :  { %v6301_v46 = vpop.f32.mrf.mxu0  ;;  %v6462_v16 = vpop.f32.mrf.mxu1 }
 0x54a   :  { %v6302_v9 = vadd.f32 %v6301_v46, %v10090_v31 }
 0x54b   :  { %v6303_v43 = vpop.f32.mrf.mxu0  ;;  %v6464_v44 = vpop.f32.mrf.mxu1 }
 0x54c   :  { %v6463_v2 = vadd.f32 %v6462_v16, %v6302_v9  ;;  %v6304_v47 = vadd.f32 %v6303_v43, %v10095_v54 }
 0x54d   :  { %v6305_v29 = vpop.f32.mrf.mxu0  ;;  %v6466_v0 = vpop.f32.mrf.mxu1 }
 0x54e   :  { %6603 = vst [vmem:[#allocation8 + $0x70] sm:$0xff] %v6463_v2  ;;  %v6465_v49 = vadd.f32 %v6464_v44, %v6304_v47  ;;  %v6306_v36 = vadd.f32 %v6305_v29, %v10090_v31 }
 0x54f   :  { %v6307_v55 = vpop.f32.mrf.mxu0  ;;  %v6468_v26 = vpop.f32.mrf.mxu1 }
 0x550   :  { %6604 = vst [vmem:[#allocation8 + $0x78] sm:$0xff] %v6465_v49  ;;  %v6467_v61 = vadd.f32 %v6466_v0, %v6306_v36  ;;  %v6308_v6 = vadd.f32 %v6307_v55, %v10095_v54 }
 0x551   :  { %v6311_v14 = vpop.f32.mrf.mxu0  ;;  %v6472_v19 = vpop.f32.mrf.mxu1 }
 0x552   :  { %6619 = vst [vmem:[#allocation8 + $0xf0] sm:$0xff] %v6467_v61  ;;  %v6469_v58 = vadd.f32 %v6468_v26, %v6308_v6  ;;  %v6312_v20 = vadd.f32 %v6311_v14, %v10090_v31 }
 0x553   :  { %v6313_v33 = vpop.f32.mrf.mxu0  ;;  %v6474_v17 = vpop.f32.mrf.mxu1 }
 0x554   :  { %6620 = vst [vmem:[#allocation8 + $0xf8] sm:$0xff] %v6469_v58  ;;  %v6473_v21 = vadd.f32 %v6472_v19, %v6312_v20  ;;  %v6314_v5 = vadd.f32 %v6313_v33, %v10095_v54 }
 0x555   :  { %v6315_v56 = vpop.f32.mrf.mxu0  ;;  %v6476_v35 = vpop.f32.mrf.mxu1 }
 0x556   :  { %6635 = vst [vmem:[#allocation8 + $0x170] sm:$0xff] %v6473_v21  ;;  %v6475_v13 = vadd.f32 %v6474_v17, %v6314_v5  ;;  %v6316_v41 = vadd.f32 %v6315_v56, %v10090_v31 }
 0x557   :  { %v6317_v3 = vpop.f32.mrf.mxu0  ;;  %v6478_v42 = vpop.f32.mrf.mxu1 }
 0x558   :  { %6636 = vst [vmem:[#allocation8 + $0x178] sm:$0xff] %v6475_v13  ;;  %v6477_v57 = vadd.f32 %v6476_v35, %v6316_v41  ;;  %v6318_v11 = vadd.f32 %v6317_v3, %v10095_v54 }
 0x559   :  { %v6321_v37 = vpop.f32.mrf.mxu0  ;;  %v6482_v40 = vpop.f32.mrf.mxu1 }
 0x55a   :  { %6651 = vst [vmem:[#allocation8 + $0x1f0] sm:$0xff] %v6477_v57  ;;  %v6479_v22 = vadd.f32 %v6478_v42, %v6318_v11  ;;  %v6322_v18 = vadd.f32 %v6321_v37, %v10090_v31 }
 0x55b   :  { %v6323_v1 = vpop.f32.mrf.mxu0  ;;  %v6484_v53 = vpop.f32.mrf.mxu1 }
 0x55c   :  { %6652 = vst [vmem:[#allocation8 + $0x1f8] sm:$0xff] %v6479_v22  ;;  %v6483_v25 = vadd.f32 %v6482_v40, %v6322_v18  ;;  %v6324_v23 = vadd.f32 %v6323_v1, %v10095_v54 }
 0x55d   :  { %v6325_v45 = vpop.f32.mrf.mxu0  ;;  %v6486_v27 = vpop.f32.mrf.mxu1 }
 0x55e   :  { %6667 = vst [vmem:[#allocation8 + $0x270] sm:$0xff] %v6483_v25  ;;  %v6485_v48 = vadd.f32 %v6484_v53, %v6324_v23  ;;  %v6326_v7 = vadd.f32 %v6325_v45, %v10090_v31 }
 0x55f   :  { %v6327_v28 = vpop.f32.mrf.mxu0  ;;  %v6488_v30 = vpop.f32.mrf.mxu1 }
 0x560   :  { %6668 = vst [vmem:[#allocation8 + $0x278] sm:$0xff] %v6485_v48  ;;  %v6487_v60 = vadd.f32 %v6486_v27, %v6326_v7  ;;  %v6328_v10 = vadd.f32 %v6327_v28, %v10095_v54 }
 0x561   :  { %v6331_v38 = vpop.f32.mrf.mxu0  ;;  %v6492_v24 = vpop.f32.mrf.mxu1 }
 0x562   :  { %6683 = vst [vmem:[#allocation8 + $0x2f0] sm:$0xff] %v6487_v60  ;;  %v6489_v15 = vadd.f32 %v6488_v30, %v6328_v10  ;;  %v6332_v39 = vadd.f32 %v6331_v38, %v10090_v31 }
 0x563   :  { %v6333_v63 = vpop.f32.mrf.mxu0  ;;  %v6494_v32 = vpop.f32.mrf.mxu1 }
 0x564   :  { %6684 = vst [vmem:[#allocation8 + $0x2f8] sm:$0xff] %v6489_v15  ;;  %v6493_v50 = vadd.f32 %v6492_v24, %v6332_v39  ;;  %v6334_v34 = vadd.f32 %v6333_v63, %v10095_v54 }
 0x565   :  { %v6335_v4 = vpop.f32.mrf.mxu0  ;;  %v6496_v59 = vpop.f32.mrf.mxu1 }
 0x566   :  { %6699 = vst [vmem:[#allocation8 + $0x370] sm:$0xff] %v6493_v50  ;;  %v6495_v51 = vadd.f32 %v6494_v32, %v6334_v34  ;;  %v6336_v62 = vadd.f32 %v6335_v4, %v10090_v31 }
 0x567   :  { %v6337_v12 = vpop.f32.mrf.mxu0  ;;  %v6498_v8 = vpop.f32.mrf.mxu1 }
 0x568   :  { %6700 = vst [vmem:[#allocation8 + $0x378] sm:$0xff] %v6495_v51  ;;  %v6497_v52 = vadd.f32 %v6496_v59, %v6336_v62  ;;  %v6338_v46 = vadd.f32 %v6337_v12, %v10095_v54 }
 0x569   :  { %v6341_v16 = vpop.f32.mrf.mxu0  ;;  %v6502_v9 = vpop.f32.mrf.mxu1 }
 0x56a   :  { %6715 = vst [vmem:[#allocation8 + $0x3f0] sm:$0xff] %v6497_v52  ;;  %v6499_v43 = vadd.f32 %v6498_v8, %v6338_v46  ;;  %v6342_v44 = vadd.f32 %v6341_v16, %v10090_v31 }
 0x56b   :  { %v6343_v2 = vpop.f32.mrf.mxu0  ;;  %v6504_v47 = vpop.f32.mrf.mxu1 }
 0x56c   :  { %6716 = vst [vmem:[#allocation8 + $0x3f8] sm:$0xff] %v6499_v43  ;;  %v6503_v29 = vadd.f32 %v6502_v9, %v6342_v44  ;;  %v6344_v0 = vadd.f32 %v6343_v2, %v10095_v54 }
 0x56d   :  { %v6345_v49 = vpop.f32.mrf.mxu0  ;;  %v6506_v36 = vpop.f32.mrf.mxu1 }
 0x56e   :  { %6731 = vst [vmem:[#allocation8 + $0x470] sm:$0xff] %v6503_v29  ;;  %v6505_v55 = vadd.f32 %v6504_v47, %v6344_v0  ;;  %v6346_v26 = vadd.f32 %v6345_v49, %v10090_v31 }
 0x56f   :  { %v6347_v61 = vpop.f32.mrf.mxu0  ;;  %v6508_v6 = vpop.f32.mrf.mxu1 }
 0x570   :  { %6732 = vst [vmem:[#allocation8 + $0x478] sm:$0xff] %v6505_v55  ;;  %v6507_v14 = vadd.f32 %v6506_v36, %v6346_v26  ;;  %v6348_v19 = vadd.f32 %v6347_v61, %v10095_v54 }
 0x571   :  { %v6351_v58 = vpop.f32.mrf.mxu0  ;;  %v6512_v20 = vpop.f32.mrf.mxu1 }
 0x572   :  { %6747 = vst [vmem:[#allocation8 + $0x4f0] sm:$0xff] %v6507_v14  ;;  %v6509_v33 = vadd.f32 %v6508_v6, %v6348_v19  ;;  %v6352_v17 = vadd.f32 %v6351_v58, %v10090_v31 }
 0x573   :  { %v6353_v21 = vpop.f32.mrf.mxu0  ;;  %v6514_v5 = vpop.f32.mrf.mxu1 }
 0x574   :  { %6748 = vst [vmem:[#allocation8 + $0x4f8] sm:$0xff] %v6509_v33  ;;  %v6513_v56 = vadd.f32 %v6512_v20, %v6352_v17  ;;  %v6354_v35 = vadd.f32 %v6353_v21, %v10095_v54 }
 0x575   :  { %v6355_v13 = vpop.f32.mrf.mxu0  ;;  %v6516_v41 = vpop.f32.mrf.mxu1 }
 0x576   :  { %6763 = vst [vmem:[#allocation8 + $0x570] sm:$0xff] %v6513_v56  ;;  %v6515_v3 = vadd.f32 %v6514_v5, %v6354_v35  ;;  %v6356_v42 = vadd.f32 %v6355_v13, %v10090_v31 }
 0x577   :  { %v6357_v57 = vpop.f32.mrf.mxu0  ;;  %v6518_v11 = vpop.f32.mrf.mxu1 }
 0x578   :  { %6764 = vst [vmem:[#allocation8 + $0x578] sm:$0xff] %v6515_v3  ;;  %v6517_v37 = vadd.f32 %v6516_v41, %v6356_v42  ;;  %v6358_v40 = vadd.f32 %v6357_v57, %v10095_v54 }
 0x579   :  { %v6361_v22 = vpop.f32.mrf.mxu0  ;;  %v6522_v18 = vpop.f32.mrf.mxu1 }
 0x57a   :  { %6779 = vst [vmem:[#allocation8 + $0x5f0] sm:$0xff] %v6517_v37  ;;  %v6519_v1 = vadd.f32 %v6518_v11, %v6358_v40  ;;  %v6362_v53 = vadd.f32 %v6361_v22, %v10090_v31 }
 0x57b   :  { %v6363_v25 = vpop.f32.mrf.mxu0  ;;  %v6524_v23 = vpop.f32.mrf.mxu1 }
 0x57c   :  { %6780 = vst [vmem:[#allocation8 + $0x5f8] sm:$0xff] %v6519_v1  ;;  %v6523_v45 = vadd.f32 %v6522_v18, %v6362_v53  ;;  %v6364_v27 = vadd.f32 %v6363_v25, %v10095_v54 }
 0x57d   :  { %v6365_v48 = vpop.f32.mrf.mxu0  ;;  %v6526_v7 = vpop.f32.mrf.mxu1 }
 0x57e   :  { %6795 = vst [vmem:[#allocation8 + $0x670] sm:$0xff] %v6523_v45  ;;  %v6525_v28 = vadd.f32 %v6524_v23, %v6364_v27  ;;  %v6366_v30 = vadd.f32 %v6365_v48, %v10090_v31 }
 0x57f   :  { %v6367_v60 = vpop.f32.mrf.mxu0  ;;  %v6528_v10 = vpop.f32.mrf.mxu1 }
 0x580   :  { %6796 = vst [vmem:[#allocation8 + $0x678] sm:$0xff] %v6525_v28  ;;  %v6527_v38 = vadd.f32 %v6526_v7, %v6366_v30  ;;  %v6368_v24 = vadd.f32 %v6367_v60, %v10095_v54 }
 0x581   :  { %v6371_v15 = vpop.f32.mrf.mxu0  ;;  %v6532_v39 = vpop.f32.mrf.mxu1 }
 0x582   :  { %6811 = vst [vmem:[#allocation8 + $0x6f0] sm:$0xff] %v6527_v38  ;;  %v6529_v63 = vadd.f32 %v6528_v10, %v6368_v24  ;;  %v6372_v32 = vadd.f32 %v6371_v15, %v10090_v31 }
 0x583   :  { %v6373_v50 = vpop.f32.mrf.mxu0  ;;  %v6534_v34 = vpop.f32.mrf.mxu1 }
 0x584   :  { %6812 = vst [vmem:[#allocation8 + $0x6f8] sm:$0xff] %v6529_v63  ;;  %v6533_v4 = vadd.f32 %v6532_v39, %v6372_v32  ;;  %v6374_v59 = vadd.f32 %v6373_v50, %v10095_v54 }
 0x585   :  { %v6375_v51 = vpop.f32.mrf.mxu0  ;;  %v6536_v62 = vpop.f32.mrf.mxu1 }
 0x586   :  { %6827 = vst [vmem:[#allocation8 + $0x770] sm:$0xff] %v6533_v4  ;;  %v6535_v12 = vadd.f32 %v6534_v34, %v6374_v59  ;;  %v6376_v8 = vadd.f32 %v6375_v51, %v10090_v31 }
 0x587   :  { %v6377_v52 = vpop.f32.mrf.mxu0  ;;  %v6538_v46 = vpop.f32.mrf.mxu1 }
 0x588   :  { %6828 = vst [vmem:[#allocation8 + $0x778] sm:$0xff] %v6535_v12  ;;  %v6537_v16 = vadd.f32 %v6536_v62, %v6376_v8  ;;  %v6378_v9 = vadd.f32 %v6377_v52, %v10095_v54 }
 0x589   :  { %v6381_v43 = vpop.f32.mrf.mxu0  ;;  %v6542_v44 = vpop.f32.mrf.mxu1 }
 0x58a   :  { %6843 = vst [vmem:[#allocation8 + $0x7f0] sm:$0xff] %v6537_v16  ;;  %v6539_v2 = vadd.f32 %v6538_v46, %v6378_v9  ;;  %v6382_v47 = vadd.f32 %v6381_v43, %v10090_v31 }
 0x58b   :  { %v6383_v29 = vpop.f32.mrf.mxu0  ;;  %v6544_v0 = vpop.f32.mrf.mxu1 }
 0x58c   :  { %6844 = vst [vmem:[#allocation8 + $0x7f8] sm:$0xff] %v6539_v2  ;;  %v6543_v49 = vadd.f32 %v6542_v44, %v6382_v47  ;;  %v6384_v36 = vadd.f32 %v6383_v29, %v10095_v54 }
 0x58d   :  { %v6385_v55 = vpop.f32.mrf.mxu0  ;;  %v6546_v26 = vpop.f32.mrf.mxu1 }
 0x58e   :  { %6859 = vst [vmem:[#allocation8 + $0x870] sm:$0xff] %v6543_v49  ;;  %v6545_v61 = vadd.f32 %v6544_v0, %v6384_v36  ;;  %v6386_v6 = vadd.f32 %v6385_v55, %v10090_v31 }
 0x58f   :  { %v6387_v14 = vpop.f32.mrf.mxu0  ;;  %v6548_v19 = vpop.f32.mrf.mxu1 }
 0x590   :  { %6860 = vst [vmem:[#allocation8 + $0x878] sm:$0xff] %v6545_v61  ;;  %v6547_v58 = vadd.f32 %v6546_v26, %v6386_v6  ;;  %v6388_v20 = vadd.f32 %v6387_v14, %v10095_v54 }
 0x591   :  { %v6391_v33 = vpop.f32.mrf.mxu0  ;;  %v6552_v17 = vpop.f32.mrf.mxu1 }
 0x592   :  { %6875 = vst [vmem:[#allocation8 + $0x8f0] sm:$0xff] %v6547_v58  ;;  %v6549_v21 = vadd.f32 %v6548_v19, %v6388_v20  ;;  %v6392_v5 = vadd.f32 %v6391_v33, %v10090_v31 }
 0x593   :  { %v6393_v56 = vpop.f32.mrf.mxu0  ;;  %v6554_v35 = vpop.f32.mrf.mxu1 }
 0x594   :  { %6876 = vst [vmem:[#allocation8 + $0x8f8] sm:$0xff] %v6549_v21  ;;  %v6553_v13 = vadd.f32 %v6552_v17, %v6392_v5  ;;  %v6394_v41 = vadd.f32 %v6393_v56, %v10095_v54 }
 0x595   :  { %v6395_v3 = vpop.f32.mrf.mxu0  ;;  %v6556_v42 = vpop.f32.mrf.mxu1 }
 0x596   :  { %6891 = vst [vmem:[#allocation8 + $0x970] sm:$0xff] %v6553_v13  ;;  %v6555_v57 = vadd.f32 %v6554_v35, %v6394_v41  ;;  %v6396_v11 = vadd.f32 %v6395_v3, %v10090_v31 }
 0x597   :  { %v6397_v37 = vpop.f32.mrf.mxu0  ;;  %v6558_v40 = vpop.f32.mrf.mxu1 }
 0x598   :  { %6892 = vst [vmem:[#allocation8 + $0x978] sm:$0xff] %v6555_v57  ;;  %v6557_v22 = vadd.f32 %v6556_v42, %v6396_v11  ;;  %v6398_v18 = vadd.f32 %v6397_v37, %v10095_v54 }
 0x599   :  { %v6401_v1 = vpop.f32.mrf.mxu0  ;;  %v6562_v53 = vpop.f32.mrf.mxu1 }
 0x59a   :  { %6907 = vst [vmem:[#allocation8 + $0x9f0] sm:$0xff] %v6557_v22  ;;  %v6559_v25 = vadd.f32 %v6558_v40, %v6398_v18  ;;  %v6402_v23 = vadd.f32 %v6401_v1, %v10090_v31 }
 0x59b   :  { %v6403_v45 = vpop.f32.mrf.mxu0  ;;  %v6564_v27 = vpop.f32.mrf.mxu1 }
 0x59c   :  { %6908 = vst [vmem:[#allocation8 + $0x9f8] sm:$0xff] %v6559_v25  ;;  %v6563_v48 = vadd.f32 %v6562_v53, %v6402_v23  ;;  %v6404_v7 = vadd.f32 %v6403_v45, %v10095_v54 }
 0x59d   :  { %v6405_v28 = vpop.f32.mrf.mxu0  ;;  %v6566_v30 = vpop.f32.mrf.mxu1 }
 0x59e   :  { %6923 = vst [vmem:[#allocation8 + $0xa70] sm:$0xff] %v6563_v48  ;;  %v6565_v60 = vadd.f32 %v6564_v27, %v6404_v7  ;;  %v6406_v10 = vadd.f32 %v6405_v28, %v10090_v31 }
 0x59f   :  { %v6407_v38 = vpop.f32.mrf.mxu0  ;;  %v6568_v24 = vpop.f32.mrf.mxu1 }
 0x5a0   :  { %6924 = vst [vmem:[#allocation8 + $0xa78] sm:$0xff] %v6565_v60  ;;  %v6567_v15 = vadd.f32 %v6566_v30, %v6406_v10  ;;  %v6408_v39 = vadd.f32 %v6407_v38, %v10095_v54 }
 0x5a1   :  { %v6411_v63 = vpop.f32.mrf.mxu0  ;;  %v6572_v32 = vpop.f32.mrf.mxu1 }
 0x5a2   :  { %6939 = vst [vmem:[#allocation8 + $0xaf0] sm:$0xff] %v6567_v15  ;;  %v6569_v50 = vadd.f32 %v6568_v24, %v6408_v39  ;;  %v6412_v34 = vadd.f32 %v6411_v63, %v10090_v31 }
 0x5a3   :  { %v6413_v4 = vpop.f32.mrf.mxu0  ;;  %v6574_v59 = vpop.f32.mrf.mxu1 }
 0x5a4   :  { %6940 = vst [vmem:[#allocation8 + $0xaf8] sm:$0xff] %v6569_v50  ;;  %v6573_v51 = vadd.f32 %v6572_v32, %v6412_v34  ;;  %v6414_v62 = vadd.f32 %v6413_v4, %v10095_v54 }
 0x5a5   :  { %v6415_v12 = vpop.f32.mrf.mxu0  ;;  %v6576_v8 = vpop.f32.mrf.mxu1 }
 0x5a6   :  { %6955 = vst [vmem:[#allocation8 + $0xb70] sm:$0xff] %v6573_v51  ;;  %v6575_v52 = vadd.f32 %v6574_v59, %v6414_v62  ;;  %v6416_v46 = vadd.f32 %v6415_v12, %v10090_v31 }
 0x5a7   :  { %v6417_v16 = vpop.f32.mrf.mxu0  ;;  %v6578_v9 = vpop.f32.mrf.mxu1 }
 0x5a8   :  { %6956 = vst [vmem:[#allocation8 + $0xb78] sm:$0xff] %v6575_v52  ;;  %v6577_v43 = vadd.f32 %v6576_v8, %v6416_v46  ;;  %v6418_v44 = vadd.f32 %v6417_v16, %v10095_v54 }
 0x5a9   :  { %v6421_v2 = vpop.f32.mrf.mxu0  ;;  %v6582_v47 = vpop.f32.mrf.mxu1 }
 0x5aa   :  { %6971 = vst [vmem:[#allocation8 + $0xbf0] sm:$0xff] %v6577_v43  ;;  %v6579_v29 = vadd.f32 %v6578_v9, %v6418_v44  ;;  %v6422_v0 = vadd.f32 %v6421_v2, %v10090_v31 }
 0x5ab   :  { %v6423_v49 = vpop.f32.mrf.mxu0  ;;  %v6584_v36 = vpop.f32.mrf.mxu1 }
 0x5ac   :  { %6972 = vst [vmem:[#allocation8 + $0xbf8] sm:$0xff] %v6579_v29  ;;  %v6583_v55 = vadd.f32 %v6582_v47, %v6422_v0  ;;  %v6424_v26 = vadd.f32 %v6423_v49, %v10095_v54 }
 0x5ad   :  { %v6425_v61 = vpop.f32.mrf.mxu0  ;;  %v6586_v6 = vpop.f32.mrf.mxu1 }
 0x5ae   :  { %6987 = vst [vmem:[#allocation8 + $0xc70] sm:$0xff] %v6583_v55  ;;  %v6585_v14 = vadd.f32 %v6584_v36, %v6424_v26 }
 0x5af   :  { %v6426_v19 = vpop.f32.mrf.mxu0  ;;  %v6587_v58 = vpop.f32.mrf.mxu1 }
 0x5b0   :  { %6988 = vst [vmem:[#allocation8 + $0xc78] sm:$0xff] %v6585_v14 }
 0x5b1   :  { %7653 = shalt.err (!%p7650_p5)
}
 0x5b2   :  { %s7676_s4 = smov 2048   ;;  %s7677_s5 = smov 128  }
 0x5b3   :  { %7000 = dma.vmem_to_hbm [thread:$0]  %s6995_s2, 51200, %s10153_s3, [#allocation4], %s7676_s4, %s7676_s4, %s7677_s5  }
 0x5b4   :  { %7666 = dma.done.wait [#allocation4], 51200  }
 0x5b5   :  { %7667 = vsyncadd [#allocation4], 4294916096 }
 0x5b6   :  { %7004 = vsyncpa [#allocation3], 1 }
 0x5b7   :  { %7005 = vsyncpa [#allocation6], 1 }
 0x5b8   :  { %7006 = vsyncpa [#allocation4], 1 }

</bundles_post_ra>
